<compile_context>
chip_gen: v7x
topology: tpu7x:2x2x1
jax: 0.10.0
libtpu: 0.0.40
codegen_flags: <defaults>
</compile_context>

<pallas_src>
import functools
import math

import numpy as np
import jax
import jax.numpy as jnp
from jax import lax
from jax.experimental import pallas as pl
from jax.experimental.pallas import tpu as pltpu


# ------------------------- rope / constant tables ---------------------------

def _rope_tables_full(S, d, H):
    """Full-width (S, H*d) cos/sin tables + rotate_half matrix R (H*d, H*d).

    Reproduces rotary_embedding_torch.RotaryEmbedding(dim=d//2)
    .rotate_queries_or_keys: only the first d//2 features of every head are
    rotated (interleaved pairs), the rest pass through (cos=1, sin=0).
    rotate_half is expressed as the constant matrix R which is folded into the
    QKV projection weights host-side.
    """
    rot = d // 2
    inv_freq = 1.0 / (10000.0 ** (np.arange(0, rot, 2, dtype=np.float64) / rot))
    pos = np.arange(S, dtype=np.float64)
    freqs = pos[:, None] * inv_freq[None, :]              # (S, rot//2)
    freqs = np.repeat(freqs, 2, axis=-1)                  # (S, rot): f0,f0,f1,f1,...
    cos_h = np.concatenate([np.cos(freqs), np.ones((S, d - rot))], axis=-1)
    sin_h = np.concatenate([np.sin(freqs), np.zeros((S, d - rot))], axis=-1)
    cos = np.tile(cos_h, (1, H)).astype(np.float32)       # (S, H*d)
    sin = np.tile(sin_h, (1, H)).astype(np.float32)
    D = H * d
    R = np.zeros((D, D), np.float32)
    for h in range(H):
        o = h * d
        for j in range(0, rot, 2):                        # interleaved pair swap + sign
            R[o + j + 1, o + j] = -1.0
            R[o + j, o + j + 1] = 1.0
    return jnp.asarray(cos), jnp.asarray(sin), jnp.asarray(R)


# ----------------------------- in-kernel helpers ----------------------------

def _gelu(x):
    # exact (erf) GELU, matching torch.nn.GELU() default
    return 0.5 * x * (1.0 + lax.erf(x * 0.7071067811865476))


def _ln(x, g, b, eps=1e-5):
    mu = jnp.mean(x, axis=-1, keepdims=True)
    xc = x - mu
    var = jnp.mean(xc * xc, axis=-1, keepdims=True)
    return (xc * lax.rsqrt(var + eps)) * g + b


def _attention(q, k, v, *, G, S, heads, scale):
    """Softmax attention per (sample, head); all results stay in registers.

    q, k, v: (G*S, D) f32. Returns (G*S, D) f32 via lane/sublane register
    concats (no masked partial stores, no VMEM round-trip).
    """
    D = q.shape[-1]
    dh = D // heads
    qb = q.astype(jnp.bfloat16)
    kb = k.astype(jnp.bfloat16)
    vb = v.astype(jnp.bfloat16)
    sample_outs = []
    for g in range(G):                                    # static unroll over samples
        r0 = g * S
        qg, kg, vg = qb[r0:r0 + S, :], kb[r0:r0 + S, :], vb[r0:r0 + S, :]
        # issue all QK^T pushes for the sample, then softmax + PV dots
        scores = []
        for h in range(heads):
            lo = h * dh
            s = lax.dot_general(qg[:, lo:lo + dh], kg[:, lo:lo + dh],
                                (((1,), (1,)), ((), ())),
                                preferred_element_type=jnp.float32) * scale
            scores.append(s)
        head_outs = []
        for h in range(heads):
            s = scores[h]
            s = s - jnp.max(s, axis=-1, keepdims=True)
            e = jnp.exp(s)
            p = e * pl.reciprocal(jnp.sum(e, axis=-1, keepdims=True), approx=True)
            head_outs.append(
                jnp.dot(p.astype(jnp.bfloat16), vg[:, h * dh:(h + 1) * dh],
                        preferred_element_type=jnp.float32))
        sample_outs.append(jnp.concatenate(head_outs, axis=-1))   # (S, D)
    return jnp.concatenate(sample_outs, axis=0)                    # (G*S, D)


# --------------------------- fused transformer kernel -----------------------

def _fused_kernel(feat_ref, wproj_ref, wslab_ref, vec_ref, o_ref, *,
                  G, HW, S, D, heads, scale_mha, scale_enc, n_enc):
    bf16 = jnp.bfloat16
    f32 = jnp.float32

    # static vector-slab row offsets (must match _pack_constants)
    ROW_CLS = 0
    ROW_BQ, ROW_BK, ROW_BV, ROW_BQR, ROW_BKR = 1, 2, 3, 4, 5
    ROW_BOUT, ROW_LNG, ROW_LNB = 6, 7, 8
    ROW_ENC = 9
    ROW_BHEAD = ROW_ENC + 10 * n_enc
    ROW_COS = ROW_BHEAD + 1
    ROW_SIN = ROW_COS + G * S

    def vrow(r):                                          # (1, D) f32 static view
        return vec_ref[r:r + 1, :]

    def dot_bf(a, w_bf16):                                # bf16 MXU, f32 accumulate
        return jnp.dot(a.astype(bf16), w_bf16, preferred_element_type=f32)

    # ---- cnn_proj: 1x1 conv (eval BatchNorm folded into weight) + GELU
    tok = _gelu(jnp.dot(feat_ref[...], wproj_ref[...],
                        preferred_element_type=f32))      # (G*HW, D) f32

    # ---- prepend cls token per sample: build the (G*S, D) slab in registers
    cls = vrow(ROW_CLS)
    pieces = []
    for g in range(G):
        pieces.append(cls)
        pieces.append(tok[g * HW:(g + 1) * HW, :])
    x = jnp.concatenate(pieces, axis=0)                   # (G*S, D)

    cos = vec_ref[ROW_COS:ROW_COS + G * S, :]             # (G*S, D), tiled host-side
    sin = vec_ref[ROW_SIN:ROW_SIN + G * S, :]

    # ---- MultiHeadRotaryAttention (rotate_half folded into extra QKV columns)
    proj = dot_bf(x, wslab_ref[:, 0:5 * D])               # (G*S, 5D)
    q = proj[:, 0 * D:1 * D] + vrow(ROW_BQ)
    k = proj[:, 1 * D:2 * D] + vrow(ROW_BK)
    v = proj[:, 2 * D:3 * D] + vrow(ROW_BV)
    qr = proj[:, 3 * D:4 * D] + vrow(ROW_BQR)
    kr = proj[:, 4 * D:5 * D] + vrow(ROW_BKR)
    q = q * cos + qr * sin                                # rope, VPU-only f32
    k = k * cos + kr * sin
    a = _attention(q, k, v, G=G, S=S, heads=heads, scale=scale_mha)
    y = dot_bf(a + x, wslab_ref[:, 5 * D:6 * D]) + vrow(ROW_BOUT)
    x = _ln(y, vrow(ROW_LNG), vrow(ROW_LNB))

    # ---- TransformerEncoder layers (post-norm, ReLU FFN, no rope)
    for L in range(n_enc):
        c0 = 6 * D + 6 * D * L
        r0 = ROW_ENC + 10 * L
        qkv = dot_bf(x, wslab_ref[:, c0:c0 + 3 * D])
        q = qkv[:, 0:D] + vrow(r0 + 0)
        k = qkv[:, D:2 * D] + vrow(r0 + 1)
        v = qkv[:, 2 * D:3 * D] + vrow(r0 + 2)
        a = _attention(q, k, v, G=G, S=S, heads=heads, scale=scale_enc)
        a = dot_bf(a, wslab_ref[:, c0 + 3 * D:c0 + 4 * D]) + vrow(r0 + 3)
        x = _ln(x + a, vrow(r0 + 4), vrow(r0 + 5))
        ff = jnp.maximum(
            dot_bf(x, wslab_ref[:, c0 + 4 * D:c0 + 5 * D]) + vrow(r0 + 6), 0.0)
        ff = dot_bf(ff, wslab_ref[:, c0 + 5 * D:c0 + 6 * D]) + vrow(r0 + 7)
        x = _ln(x + ff, vrow(r0 + 8), vrow(r0 + 9))

    # ---- classification head (two chained Linears folded into one matrix,
    #      zero-padded to 128 output lanes -> lane-dense store)
    x_cls = x.reshape(G, S, D)[:, 0, :]                   # (G, D) cls tokens
    c_head = 6 * D + 6 * D * n_enc
    o_ref[...] = dot_bf(x_cls, wslab_ref[:, c_head:c_head + 128]) + vrow(ROW_BHEAD)


# --------------------------- host-side constant packing ---------------------

def _pack_constants(params, cos, sin, R, *, hid_dim, num_classes, G, S):
    D = hid_dim
    f32 = jnp.float32
    mha = params["mha"]
    w_qkv, b_qkv = mha["w_qkv"], mha["b_qkv"]
    wq, wk = w_qkv[:, :D], w_qkv[:, D:2 * D]
    bq, bk, bv = b_qkv[:, :D], b_qkv[:, D:2 * D], b_qkv[:, 2 * D:3 * D]

    # cls head: Dropout -> Linear -> Linear(no bias), no activation -> one affine map
    w_head = params["h1_w"] @ params["h2_w"]              # (D, nc)
    b_head = params["h1_b"] @ params["h2_w"]              # (1, nc)
    w_head_pad = jnp.zeros((D, 128), f32).at[:, :num_classes].set(w_head)
    b_head_pad = jnp.zeros((1, 128), f32).at[:, :num_classes].set(b_head)

    # weight slab: [w_q|w_k|w_v | w_q@R | w_k@R | w_out | enc layers | head]
    w_cols = [w_qkv, wq @ R, wk @ R, mha["w_out"]]
    vec_rows = [params["cls_token"].reshape(1, D),
                bq, bk, bv, bq @ R, bk @ R,
                mha["b_out"], mha["ln_g"], mha["ln_b"]]
    for lp in params["enc"]:
        w_cols += [lp["w_in"], lp["w_o"], lp["w_ff1"], lp["w_ff2"]]
        b_in = lp["b_in"]
        vec_rows += [b_in[:, :D], b_in[:, D:2 * D], b_in[:, 2 * D:3 * D],
                     lp["b_o"], lp["ln1_g"], lp["ln1_b"],
                     lp["b_ff1"], lp["b_ff2"], lp["ln2_g"], lp["ln2_b"]]
    w_cols.append(w_head_pad)
    vec_rows.append(b_head_pad)
    vec_rows.append(jnp.tile(cos, (G, 1)))                # (G*S, D)
    vec_rows.append(jnp.tile(sin, (G, 1)))

    wslab = jnp.concatenate(w_cols, axis=1).astype(jnp.bfloat16)   # (D, 6D+6D*n+128)
    vslab = jnp.concatenate(vec_rows, axis=0).astype(f32)          # (NV, D)
    # cnn_proj 1x1 conv + eval BatchNorm2d (default running stats, eps=1e-5) folded
    wproj = (params["proj_w"] * (1.0 / math.sqrt(1.0 + 1e-5))).astype(jnp.bfloat16)
    return wproj, wslab, vslab


# ------------------------------- fused wrapper ------------------------------

def fused_transformer(feat3, params, cos, sin, R, *, heads, hid_dim, num_classes,
                      scale_mha, scale_enc):
    B, HW, C = feat3.shape
    S = HW + 1
    D = hid_dim
    n_enc = len(params["enc"])

    # per-step batch G: fill the MXU M dim (target ~256 rows); blocks stay legal
    # under the (8,128) rule because either one block covers all rows (NB == 1)
    # or G is a multiple of 8.
    G = max(1, min(B, 256 // S))
    if G < B:
        G = max(8, (G // 8) * 8)
    NB = -(-B // G)
    B_pad = NB * G

    wproj, wslab, vslab = _pack_constants(
        params, cos, sin, R, hid_dim=D, num_classes=num_classes, G=G, S=S)

    feat = feat3
    if B_pad != B:
        feat = jnp.concatenate(
            [feat, jnp.zeros((B_pad - B, HW, C), feat.dtype)], axis=0)
    feat = feat.reshape(B_pad * HW, C).astype(jnp.bfloat16)

    kernel = functools.partial(
        _fused_kernel, G=G, HW=HW, S=S, D=D, heads=heads,
        scale_mha=scale_mha, scale_enc=scale_enc, n_enc=n_enc)

    out = pl.pallas_call(
        kernel,
        out_shape=jax.ShapeDtypeStruct((B_pad, 128), jnp.float32),   # lane-dense
        grid_spec=pltpu.PrefetchScalarGridSpec(
            num_scalar_prefetch=0,
            grid=(NB,),
            in_specs=[
                pl.BlockSpec((G * HW, C), lambda b: (b, 0)),
                pl.BlockSpec(wproj.shape, lambda b: (0, 0)),
                pl.BlockSpec(wslab.shape, lambda b: (0, 0)),
                pl.BlockSpec(vslab.shape, lambda b: (0, 0)),
            ],
            out_specs=pl.BlockSpec((G, 128), lambda b: (b, 0))),
        # TODO(synk): on v7x, if "parallel" does not split the batch axis across
        # the two TensorCores, switch this axis to pltpu.CORE_PARALLEL.
        compiler_params=pltpu.CompilerParams(
            dimension_semantics=("parallel",)),
    )(feat, wproj, wslab, vslab)
    return out[:B, :num_classes]


# --------------------------- backbone (stand-in) ----------------------------

def _conv_bn_silu(x, w, stride, padding, bn_eps=1e-3):
    """Conv2d (no bias) + eval-mode BatchNorm (default stats) + SiLU.  Plain JAX glue."""
    y = lax.conv_general_dilated(
        x, w, window_strides=(stride, stride),
        padding=[(padding, padding), (padding, padding)],
        dimension_numbers=("NCHW", "OIHW", "NCHW"))
    y = y / jnp.sqrt(1.0 + bn_eps)
    return y * jax.nn.sigmoid(y)


# ------------------------------ model forward -------------------------------

def efficient_trans_net(x, params, *, heads=8, hid_dim=128, num_classes=6):
    B = x.shape[0]

    # ---- self.features (EfficientNet-B0 features[:-2] with modified stem conv)
    # The replaced stem conv (in_ch->32, 17x17, s2, p8, no bias) is reproduced.
    # TODO(synk): the pretrained MBConv stack (features[1:7], SE blocks etc.) is
    # not reproduced; a deterministic shape-preserving Conv-BN-SiLU stage per
    # block group stands in (same channel widths / strides / output shape).
    y = _conv_bn_silu(x, params["stem_w"], stride=2, padding=8)
    for w, s in zip(params["stage_w"], (1, 2, 2, 2, 1, 2)):
        y = _conv_bn_silu(y, w, stride=s, padding=1)
    _, C, Hf, Wf = y.shape                                # (B, 192, H/32, W/32)
    HW = Hf * Wf
    S = HW + 1
    d = hid_dim // heads

    # tokens 'b c h w -> b (h w) c'
    feat3 = y.transpose(0, 2, 3, 1).reshape(B, HW, C)

    cos, sin, R = _rope_tables_full(S, d, heads)

    return fused_transformer(
        feat3, params, cos, sin, R,
        heads=heads, hid_dim=hid_dim, num_classes=num_classes,
        scale_mha=float(hid_dim) ** -0.5,   # matches the PyTorch module (h_dim**-0.5)
        scale_enc=float(d) ** -0.5)         # nn.MultiheadAttention head_dim**-0.5


# ------------------------------ parameter init ------------------------------

def init_params(key, in_ch=4, hid_dim=128, heads=8, num_classes=6):
    keys = iter(jax.random.split(key, 64))

    def nrm(shape, fan_in):
        return jax.random.normal(next(keys), shape, jnp.float32) / math.sqrt(fan_in)

    chans = [32, 16, 24, 40, 80, 112, 192]
    p = {
        "stem_w": nrm((32, in_ch, 17, 17), in_ch * 17 * 17),
        "stage_w": [nrm((chans[i + 1], chans[i], 3, 3), chans[i] * 9) for i in range(6)],
        "proj_w": nrm((192, hid_dim), 192),            # (K, N) = conv weight transposed
        "cls_token": jax.random.normal(next(keys), (1, 1, hid_dim), jnp.float32),
        "mha": {
            "w_qkv": nrm((hid_dim, 3 * hid_dim), hid_dim),
            "b_qkv": jnp.zeros((1, 3 * hid_dim), jnp.float32),
            "w_out": nrm((hid_dim, hid_dim), hid_dim),
            "b_out": jnp.zeros((1, hid_dim), jnp.float32),
            "ln_g": jnp.ones((1, hid_dim), jnp.float32),
            "ln_b": jnp.zeros((1, hid_dim), jnp.float32),
        },
        "enc": [],
        "h1_w": nrm((hid_dim, hid_dim // 4), hid_dim),
        "h1_b": jnp.zeros((1, hid_dim // 4), jnp.float32),
        "h2_w": nrm((hid_dim // 4, num_classes), hid_dim // 4),
    }
    for _ in range(2):
        p["enc"].append({
            "w_in": nrm((hid_dim, 3 * hid_dim), hid_dim),
            "b_in": jnp.zeros((1, 3 * hid_dim), jnp.float32),
            "w_o": nrm((hid_dim, hid_dim), hid_dim),
            "b_o": jnp.zeros((1, hid_dim), jnp.float32),
            "ln1_g": jnp.ones((1, hid_dim), jnp.float32),
            "ln1_b": jnp.zeros((1, hid_dim), jnp.float32),
            "w_ff1": nrm((hid_dim, hid_dim), hid_dim),   # dim_feedforward = hid_dim
            "b_ff1": jnp.zeros((1, hid_dim), jnp.float32),
            "w_ff2": nrm((hid_dim, hid_dim), hid_dim),
            "b_ff2": jnp.zeros((1, hid_dim), jnp.float32),
            "ln2_g": jnp.ones((1, hid_dim), jnp.float32),
            "ln2_b": jnp.zeros((1, hid_dim), jnp.float32),
        })
    return p


# ----------------------------------- main ------------------------------------

if __name__ == "__main__":
    key = jax.random.PRNGKey(0)
    kx, kp = jax.random.split(key)

    B, in_ch, H, W = 2, 4, 64, 64                  # small NCHW image input
    x = jax.random.normal(kx, (B, in_ch, H, W), jnp.float32)
    params = init_params(kp, in_ch=in_ch, hid_dim=128, heads=8, num_classes=6)

    forward = jax.jit(efficient_trans_net)
    out = forward(x, params)
    out = jax.block_until_ready(out)

    assert out.shape == (B, 6), out.shape
    assert bool(jnp.all(jnp.isfinite(out)))
    print("KERNEL_OK")
</pallas_src>

<mosaic_0001>
module attributes {stable_mosaic.version = 11 : i64} {
  func.func @_fused_kernel(%arg0: i32, %arg1: memref<8x192xbf16, #tpu.memory_space<vmem>>, %arg2: memref<192x128xbf16, #tpu.memory_space<vmem>>, %arg3: memref<128x2432xbf16, #tpu.memory_space<vmem>>, %arg4: memref<50x128xf32, #tpu.memory_space<vmem>>, %arg5: memref<2x128xf32, #tpu.memory_space<vmem>>) attributes {dimension_semantics = [#tpu.dimension_semantics<parallel>], iteration_bounds = array<i64: 1>, scalar_prefetch = 0 : i64, scratch_operands = 0 : i64, tpu.core_type = #tpu.core_type<tc>, window_params = [{transform_indices = @transform_0, window_bounds = array<i64: 8, 192>}, {pipeline_mode = #tpu.pipeline_mode<synchronous>, transform_indices = @transform_1, window_bounds = array<i64: 192, 128>}, {pipeline_mode = #tpu.pipeline_mode<synchronous>, transform_indices = @transform_2, window_bounds = array<i64: 128, 2432>}, {pipeline_mode = #tpu.pipeline_mode<synchronous>, transform_indices = @transform_3, window_bounds = array<i64: 50, 128>}, {transform_indices = @transform_4, window_bounds = array<i64: 2, 128>}]} {
    %c0 = arith.constant 0 : index
    %c0_0 = arith.constant 0 : index
    %0 = vector.load %arg1[%c0, %c0_0] : memref<8x192xbf16, #tpu.memory_space<vmem>>, vector<8x192xbf16>
    %c0_1 = arith.constant 0 : index
    %c0_2 = arith.constant 0 : index
    %1 = vector.load %arg2[%c0_1, %c0_2] : memref<192x128xbf16, #tpu.memory_space<vmem>>, vector<192x128xbf16>
    %cst = arith.constant dense<0.000000e+00> : vector<8x128xf32>
    %2 = tpu.matmul %0, %1, %cst {dimension_numbers = #tpu.dot_dimension_numbers<[1], [0], [0], [1], [0, 0, 1, 1], [], []>} : vector<8x192xbf16>, vector<192x128xbf16>, vector<8x128xf32> -> vector<8x128xf32>
    %cst_3 = arith.constant 5.000000e-01 : f32
    %3 = vector.broadcast %cst_3 : f32 to vector<8x128xf32>
    %4 = arith.mulf %3, %2 : vector<8x128xf32>
    %cst_4 = arith.constant 0.707106769 : f32
    %5 = vector.broadcast %cst_4 : f32 to vector<8x128xf32>
    %6 = arith.mulf %2, %5 : vector<8x128xf32>
    %7 = math.erf %6 : vector<8x128xf32>
    %cst_5 = arith.constant 1.000000e+00 : f32
    %8 = vector.broadcast %cst_5 : f32 to vector<8x128xf32>
    %9 = arith.addf %8, %7 : vector<8x128xf32>
    %10 = arith.mulf %4, %9 : vector<8x128xf32>
    %c0_6 = arith.constant 0 : index
    %c0_7 = arith.constant 0 : index
    %11 = vector.load %arg4[%c0_6, %c0_7] : memref<50x128xf32, #tpu.memory_space<vmem>>, vector<1x128xf32>
    %12 = vector.extract_strided_slice %10 {offsets = [0, 0], sizes = [4, 128], strides = [1, 1]} : vector<8x128xf32> to vector<4x128xf32>
    %13 = vector.extract_strided_slice %10 {offsets = [4, 0], sizes = [4, 128], strides = [1, 1]} : vector<8x128xf32> to vector<4x128xf32>
    %14 = tpu.concatenate %11, %12, %11, %13 in 0 : vector<1x128xf32>, vector<4x128xf32>, vector<1x128xf32>, vector<4x128xf32> -> vector<10x128xf32>
    %c30 = arith.constant 30 : index
    %c0_8 = arith.constant 0 : index
    %15 = vector.load %arg4[%c30, %c0_8] : memref<50x128xf32, #tpu.memory_space<vmem>>, vector<10x128xf32>
    %c40 = arith.constant 40 : index
    %c0_9 = arith.constant 0 : index
    %16 = vector.load %arg4[%c40, %c0_9] : memref<50x128xf32, #tpu.memory_space<vmem>>, vector<10x128xf32>
    %c0_10 = arith.constant 0 : index
    %c0_11 = arith.constant 0 : index
    %17 = vector.load %arg3[%c0_10, %c0_11] : memref<128x2432xbf16, #tpu.memory_space<vmem>>, vector<128x640xbf16>
    %18 = arith.truncf %14 : vector<10x128xf32> to vector<10x128xbf16>
    %cst_12 = arith.constant dense<0.000000e+00> : vector<10x640xf32>
    %19 = tpu.matmul %18, %17, %cst_12 {dimension_numbers = #tpu.dot_dimension_numbers<[1], [0], [0], [1], [0, 0, 1, 1], [], []>} : vector<10x128xbf16>, vector<128x640xbf16>, vector<10x640xf32> -> vector<10x640xf32>
    %20 = vector.extract_strided_slice %19 {offsets = [0, 0], sizes = [10, 128], strides = [1, 1]} : vector<10x640xf32> to vector<10x128xf32>
    %c1 = arith.constant 1 : index
    %c0_13 = arith.constant 0 : index
    %21 = vector.load %arg4[%c1, %c0_13] : memref<50x128xf32, #tpu.memory_space<vmem>>, vector<1x128xf32>
    %22 = vector.broadcast %21 : vector<1x128xf32> to vector<10x128xf32>
    %23 = arith.addf %20, %22 : vector<10x128xf32>
    %24 = vector.extract_strided_slice %19 {offsets = [0, 128], sizes = [10, 128], strides = [1, 1]} : vector<10x640xf32> to vector<10x128xf32>
    %c2 = arith.constant 2 : index
    %c0_14 = arith.constant 0 : index
    %25 = vector.load %arg4[%c2, %c0_14] : memref<50x128xf32, #tpu.memory_space<vmem>>, vector<1x128xf32>
    %26 = vector.broadcast %25 : vector<1x128xf32> to vector<10x128xf32>
    %27 = arith.addf %24, %26 : vector<10x128xf32>
    %28 = vector.extract_strided_slice %19 {offsets = [0, 256], sizes = [10, 128], strides = [1, 1]} : vector<10x640xf32> to vector<10x128xf32>
    %c3 = arith.constant 3 : index
    %c0_15 = arith.constant 0 : index
    %29 = vector.load %arg4[%c3, %c0_15] : memref<50x128xf32, #tpu.memory_space<vmem>>, vector<1x128xf32>
    %30 = vector.broadcast %29 : vector<1x128xf32> to vector<10x128xf32>
    %31 = arith.addf %28, %30 : vector<10x128xf32>
    %32 = vector.extract_strided_slice %19 {offsets = [0, 384], sizes = [10, 128], strides = [1, 1]} : vector<10x640xf32> to vector<10x128xf32>
    %c4 = arith.constant 4 : index
    %c0_16 = arith.constant 0 : index
    %33 = vector.load %arg4[%c4, %c0_16] : memref<50x128xf32, #tpu.memory_space<vmem>>, vector<1x128xf32>
    %34 = vector.broadcast %33 : vector<1x128xf32> to vector<10x128xf32>
    %35 = arith.addf %32, %34 : vector<10x128xf32>
    %36 = vector.extract_strided_slice %19 {offsets = [0, 512], sizes = [10, 128], strides = [1, 1]} : vector<10x640xf32> to vector<10x128xf32>
    %c5 = arith.constant 5 : index
    %c0_17 = arith.constant 0 : index
    %37 = vector.load %arg4[%c5, %c0_17] : memref<50x128xf32, #tpu.memory_space<vmem>>, vector<1x128xf32>
    %38 = vector.broadcast %37 : vector<1x128xf32> to vector<10x128xf32>
    %39 = arith.addf %36, %38 : vector<10x128xf32>
    %40 = arith.mulf %23, %15 : vector<10x128xf32>
    %41 = arith.mulf %35, %16 : vector<10x128xf32>
    %42 = arith.addf %40, %41 : vector<10x128xf32>
    %43 = arith.mulf %27, %15 : vector<10x128xf32>
    %44 = arith.mulf %39, %16 : vector<10x128xf32>
    %45 = arith.addf %43, %44 : vector<10x128xf32>
    %46 = arith.truncf %42 : vector<10x128xf32> to vector<10x128xbf16>
    %47 = arith.truncf %45 : vector<10x128xf32> to vector<10x128xbf16>
    %48 = arith.truncf %31 : vector<10x128xf32> to vector<10x128xbf16>
    %49 = vector.extract_strided_slice %46 {offsets = [0, 0], sizes = [5, 128], strides = [1, 1]} : vector<10x128xbf16> to vector<5x128xbf16>
    %50 = vector.extract_strided_slice %47 {offsets = [0, 0], sizes = [5, 128], strides = [1, 1]} : vector<10x128xbf16> to vector<5x128xbf16>
    %51 = vector.extract_strided_slice %48 {offsets = [0, 0], sizes = [5, 128], strides = [1, 1]} : vector<10x128xbf16> to vector<5x128xbf16>
    %52 = vector.extract_strided_slice %49 {offsets = [0, 0], sizes = [5, 16], strides = [1, 1]} : vector<5x128xbf16> to vector<5x16xbf16>
    %53 = vector.extract_strided_slice %50 {offsets = [0, 0], sizes = [5, 16], strides = [1, 1]} : vector<5x128xbf16> to vector<5x16xbf16>
    %cst_18 = arith.constant dense<0.000000e+00> : vector<5x5xf32>
    %54 = tpu.matmul %52, %53, %cst_18 {dimension_numbers = #tpu.dot_dimension_numbers<[1], [1], [0], [0], [0, 0, 1, 0], [], []>} : vector<5x16xbf16>, vector<5x16xbf16>, vector<5x5xf32> -> vector<5x5xf32>
    %cst_19 = arith.constant 0.0883883461 : f32
    %55 = vector.broadcast %cst_19 : f32 to vector<5x5xf32>
    %56 = arith.mulf %54, %55 : vector<5x5xf32>
    %57 = vector.extract_strided_slice %49 {offsets = [0, 16], sizes = [5, 16], strides = [1, 1]} : vector<5x128xbf16> to vector<5x16xbf16>
    %58 = vector.extract_strided_slice %50 {offsets = [0, 16], sizes = [5, 16], strides = [1, 1]} : vector<5x128xbf16> to vector<5x16xbf16>
    %cst_20 = arith.constant dense<0.000000e+00> : vector<5x5xf32>
    %59 = tpu.matmul %57, %58, %cst_20 {dimension_numbers = #tpu.dot_dimension_numbers<[1], [1], [0], [0], [0, 0, 1, 0], [], []>} : vector<5x16xbf16>, vector<5x16xbf16>, vector<5x5xf32> -> vector<5x5xf32>
    %cst_21 = arith.constant 0.0883883461 : f32
    %60 = vector.broadcast %cst_21 : f32 to vector<5x5xf32>
    %61 = arith.mulf %59, %60 : vector<5x5xf32>
    %62 = vector.extract_strided_slice %49 {offsets = [0, 32], sizes = [5, 16], strides = [1, 1]} : vector<5x128xbf16> to vector<5x16xbf16>
    %63 = vector.extract_strided_slice %50 {offsets = [0, 32], sizes = [5, 16], strides = [1, 1]} : vector<5x128xbf16> to vector<5x16xbf16>
    %cst_22 = arith.constant dense<0.000000e+00> : vector<5x5xf32>
    %64 = tpu.matmul %62, %63, %cst_22 {dimension_numbers = #tpu.dot_dimension_numbers<[1], [1], [0], [0], [0, 0, 1, 0], [], []>} : vector<5x16xbf16>, vector<5x16xbf16>, vector<5x5xf32> -> vector<5x5xf32>
    %cst_23 = arith.constant 0.0883883461 : f32
    %65 = vector.broadcast %cst_23 : f32 to vector<5x5xf32>
    %66 = arith.mulf %64, %65 : vector<5x5xf32>
    %67 = vector.extract_strided_slice %49 {offsets = [0, 48], sizes = [5, 16], strides = [1, 1]} : vector<5x128xbf16> to vector<5x16xbf16>
    %68 = vector.extract_strided_slice %50 {offsets = [0, 48], sizes = [5, 16], strides = [1, 1]} : vector<5x128xbf16> to vector<5x16xbf16>
    %cst_24 = arith.constant dense<0.000000e+00> : vector<5x5xf32>
    %69 = tpu.matmul %67, %68, %cst_24 {dimension_numbers = #tpu.dot_dimension_numbers<[1], [1], [0], [0], [0, 0, 1, 0], [], []>} : vector<5x16xbf16>, vector<5x16xbf16>, vector<5x5xf32> -> vector<5x5xf32>
    %cst_25 = arith.constant 0.0883883461 : f32
    %70 = vector.broadcast %cst_25 : f32 to vector<5x5xf32>
    %71 = arith.mulf %69, %70 : vector<5x5xf32>
    %72 = vector.extract_strided_slice %49 {offsets = [0, 64], sizes = [5, 16], strides = [1, 1]} : vector<5x128xbf16> to vector<5x16xbf16>
    %73 = vector.extract_strided_slice %50 {offsets = [0, 64], sizes = [5, 16], strides = [1, 1]} : vector<5x128xbf16> to vector<5x16xbf16>
    %cst_26 = arith.constant dense<0.000000e+00> : vector<5x5xf32>
    %74 = tpu.matmul %72, %73, %cst_26 {dimension_numbers = #tpu.dot_dimension_numbers<[1], [1], [0], [0], [0, 0, 1, 0], [], []>} : vector<5x16xbf16>, vector<5x16xbf16>, vector<5x5xf32> -> vector<5x5xf32>
    %cst_27 = arith.constant 0.0883883461 : f32
    %75 = vector.broadcast %cst_27 : f32 to vector<5x5xf32>
    %76 = arith.mulf %74, %75 : vector<5x5xf32>
    %77 = vector.extract_strided_slice %49 {offsets = [0, 80], sizes = [5, 16], strides = [1, 1]} : vector<5x128xbf16> to vector<5x16xbf16>
    %78 = vector.extract_strided_slice %50 {offsets = [0, 80], sizes = [5, 16], strides = [1, 1]} : vector<5x128xbf16> to vector<5x16xbf16>
    %cst_28 = arith.constant dense<0.000000e+00> : vector<5x5xf32>
    %79 = tpu.matmul %77, %78, %cst_28 {dimension_numbers = #tpu.dot_dimension_numbers<[1], [1], [0], [0], [0, 0, 1, 0], [], []>} : vector<5x16xbf16>, vector<5x16xbf16>, vector<5x5xf32> -> vector<5x5xf32>
    %cst_29 = arith.constant 0.0883883461 : f32
    %80 = vector.broadcast %cst_29 : f32 to vector<5x5xf32>
    %81 = arith.mulf %79, %80 : vector<5x5xf32>
    %82 = vector.extract_strided_slice %49 {offsets = [0, 96], sizes = [5, 16], strides = [1, 1]} : vector<5x128xbf16> to vector<5x16xbf16>
    %83 = vector.extract_strided_slice %50 {offsets = [0, 96], sizes = [5, 16], strides = [1, 1]} : vector<5x128xbf16> to vector<5x16xbf16>
    %cst_30 = arith.constant dense<0.000000e+00> : vector<5x5xf32>
    %84 = tpu.matmul %82, %83, %cst_30 {dimension_numbers = #tpu.dot_dimension_numbers<[1], [1], [0], [0], [0, 0, 1, 0], [], []>} : vector<5x16xbf16>, vector<5x16xbf16>, vector<5x5xf32> -> vector<5x5xf32>
    %cst_31 = arith.constant 0.0883883461 : f32
    %85 = vector.broadcast %cst_31 : f32 to vector<5x5xf32>
    %86 = arith.mulf %84, %85 : vector<5x5xf32>
    %87 = vector.extract_strided_slice %49 {offsets = [0, 112], sizes = [5, 16], strides = [1, 1]} : vector<5x128xbf16> to vector<5x16xbf16>
    %88 = vector.extract_strided_slice %50 {offsets = [0, 112], sizes = [5, 16], strides = [1, 1]} : vector<5x128xbf16> to vector<5x16xbf16>
    %cst_32 = arith.constant dense<0.000000e+00> : vector<5x5xf32>
    %89 = tpu.matmul %87, %88, %cst_32 {dimension_numbers = #tpu.dot_dimension_numbers<[1], [1], [0], [0], [0, 0, 1, 0], [], []>} : vector<5x16xbf16>, vector<5x16xbf16>, vector<5x5xf32> -> vector<5x5xf32>
    %cst_33 = arith.constant 0.0883883461 : f32
    %90 = vector.broadcast %cst_33 : f32 to vector<5x5xf32>
    %91 = arith.mulf %89, %90 : vector<5x5xf32>
    %cst_34 = arith.constant dense<0xFF800000> : vector<5xf32>
    %92 = vector.multi_reduction <maximumf>, %56, %cst_34 [1] : vector<5x5xf32> to vector<5xf32>
    %93 = vector.shape_cast %92 : vector<5xf32> to vector<5x1xf32>
    %94 = vector.broadcast %93 : vector<5x1xf32> to vector<5x5xf32>
    %95 = arith.subf %56, %94 : vector<5x5xf32>
    %96 = math.exp %95 : vector<5x5xf32>
    %cst_35 = arith.constant dense<0.000000e+00> : vector<5xf32>
    %97 = vector.multi_reduction <add>, %96, %cst_35 [1] : vector<5x5xf32> to vector<5xf32>
    %98 = vector.shape_cast %97 : vector<5xf32> to vector<5x1xf32>
    %99 = tpu.reciprocal %98 {approx = true} : vector<5x1xf32> -> vector<5x1xf32>
    %100 = vector.broadcast %99 : vector<5x1xf32> to vector<5x5xf32>
    %101 = arith.mulf %96, %100 : vector<5x5xf32>
    %102 = arith.truncf %101 : vector<5x5xf32> to vector<5x5xbf16>
    %103 = vector.extract_strided_slice %51 {offsets = [0, 0], sizes = [5, 16], strides = [1, 1]} : vector<5x128xbf16> to vector<5x16xbf16>
    %cst_36 = arith.constant dense<0.000000e+00> : vector<5x16xf32>
    %104 = tpu.matmul %102, %103, %cst_36 {dimension_numbers = #tpu.dot_dimension_numbers<[1], [0], [0], [1], [0, 0, 1, 1], [], []>} : vector<5x5xbf16>, vector<5x16xbf16>, vector<5x16xf32> -> vector<5x16xf32>
    %cst_37 = arith.constant dense<0xFF800000> : vector<5xf32>
    %105 = vector.multi_reduction <maximumf>, %61, %cst_37 [1] : vector<5x5xf32> to vector<5xf32>
    %106 = vector.shape_cast %105 : vector<5xf32> to vector<5x1xf32>
    %107 = vector.broadcast %106 : vector<5x1xf32> to vector<5x5xf32>
    %108 = arith.subf %61, %107 : vector<5x5xf32>
    %109 = math.exp %108 : vector<5x5xf32>
    %cst_38 = arith.constant dense<0.000000e+00> : vector<5xf32>
    %110 = vector.multi_reduction <add>, %109, %cst_38 [1] : vector<5x5xf32> to vector<5xf32>
    %111 = vector.shape_cast %110 : vector<5xf32> to vector<5x1xf32>
    %112 = tpu.reciprocal %111 {approx = true} : vector<5x1xf32> -> vector<5x1xf32>
    %113 = vector.broadcast %112 : vector<5x1xf32> to vector<5x5xf32>
    %114 = arith.mulf %109, %113 : vector<5x5xf32>
    %115 = arith.truncf %114 : vector<5x5xf32> to vector<5x5xbf16>
    %116 = vector.extract_strided_slice %51 {offsets = [0, 16], sizes = [5, 16], strides = [1, 1]} : vector<5x128xbf16> to vector<5x16xbf16>
    %cst_39 = arith.constant dense<0.000000e+00> : vector<5x16xf32>
    %117 = tpu.matmul %115, %116, %cst_39 {dimension_numbers = #tpu.dot_dimension_numbers<[1], [0], [0], [1], [0, 0, 1, 1], [], []>} : vector<5x5xbf16>, vector<5x16xbf16>, vector<5x16xf32> -> vector<5x16xf32>
    %cst_40 = arith.constant dense<0xFF800000> : vector<5xf32>
    %118 = vector.multi_reduction <maximumf>, %66, %cst_40 [1] : vector<5x5xf32> to vector<5xf32>
    %119 = vector.shape_cast %118 : vector<5xf32> to vector<5x1xf32>
    %120 = vector.broadcast %119 : vector<5x1xf32> to vector<5x5xf32>
    %121 = arith.subf %66, %120 : vector<5x5xf32>
    %122 = math.exp %121 : vector<5x5xf32>
    %cst_41 = arith.constant dense<0.000000e+00> : vector<5xf32>
    %123 = vector.multi_reduction <add>, %122, %cst_41 [1] : vector<5x5xf32> to vector<5xf32>
    %124 = vector.shape_cast %123 : vector<5xf32> to vector<5x1xf32>
    %125 = tpu.reciprocal %124 {approx = true} : vector<5x1xf32> -> vector<5x1xf32>
    %126 = vector.broadcast %125 : vector<5x1xf32> to vector<5x5xf32>
    %127 = arith.mulf %122, %126 : vector<5x5xf32>
    %128 = arith.truncf %127 : vector<5x5xf32> to vector<5x5xbf16>
    %129 = vector.extract_strided_slice %51 {offsets = [0, 32], sizes = [5, 16], strides = [1, 1]} : vector<5x128xbf16> to vector<5x16xbf16>
    %cst_42 = arith.constant dense<0.000000e+00> : vector<5x16xf32>
    %130 = tpu.matmul %128, %129, %cst_42 {dimension_numbers = #tpu.dot_dimension_numbers<[1], [0], [0], [1], [0, 0, 1, 1], [], []>} : vector<5x5xbf16>, vector<5x16xbf16>, vector<5x16xf32> -> vector<5x16xf32>
    %cst_43 = arith.constant dense<0xFF800000> : vector<5xf32>
    %131 = vector.multi_reduction <maximumf>, %71, %cst_43 [1] : vector<5x5xf32> to vector<5xf32>
    %132 = vector.shape_cast %131 : vector<5xf32> to vector<5x1xf32>
    %133 = vector.broadcast %132 : vector<5x1xf32> to vector<5x5xf32>
    %134 = arith.subf %71, %133 : vector<5x5xf32>
    %135 = math.exp %134 : vector<5x5xf32>
    %cst_44 = arith.constant dense<0.000000e+00> : vector<5xf32>
    %136 = vector.multi_reduction <add>, %135, %cst_44 [1] : vector<5x5xf32> to vector<5xf32>
    %137 = vector.shape_cast %136 : vector<5xf32> to vector<5x1xf32>
    %138 = tpu.reciprocal %137 {approx = true} : vector<5x1xf32> -> vector<5x1xf32>
    %139 = vector.broadcast %138 : vector<5x1xf32> to vector<5x5xf32>
    %140 = arith.mulf %135, %139 : vector<5x5xf32>
    %141 = arith.truncf %140 : vector<5x5xf32> to vector<5x5xbf16>
    %142 = vector.extract_strided_slice %51 {offsets = [0, 48], sizes = [5, 16], strides = [1, 1]} : vector<5x128xbf16> to vector<5x16xbf16>
    %cst_45 = arith.constant dense<0.000000e+00> : vector<5x16xf32>
    %143 = tpu.matmul %141, %142, %cst_45 {dimension_numbers = #tpu.dot_dimension_numbers<[1], [0], [0], [1], [0, 0, 1, 1], [], []>} : vector<5x5xbf16>, vector<5x16xbf16>, vector<5x16xf32> -> vector<5x16xf32>
    %cst_46 = arith.constant dense<0xFF800000> : vector<5xf32>
    %144 = vector.multi_reduction <maximumf>, %76, %cst_46 [1] : vector<5x5xf32> to vector<5xf32>
    %145 = vector.shape_cast %144 : vector<5xf32> to vector<5x1xf32>
    %146 = vector.broadcast %145 : vector<5x1xf32> to vector<5x5xf32>
    %147 = arith.subf %76, %146 : vector<5x5xf32>
    %148 = math.exp %147 : vector<5x5xf32>
    %cst_47 = arith.constant dense<0.000000e+00> : vector<5xf32>
    %149 = vector.multi_reduction <add>, %148, %cst_47 [1] : vector<5x5xf32> to vector<5xf32>
    %150 = vector.shape_cast %149 : vector<5xf32> to vector<5x1xf32>
    %151 = tpu.reciprocal %150 {approx = true} : vector<5x1xf32> -> vector<5x1xf32>
    %152 = vector.broadcast %151 : vector<5x1xf32> to vector<5x5xf32>
    %153 = arith.mulf %148, %152 : vector<5x5xf32>
    %154 = arith.truncf %153 : vector<5x5xf32> to vector<5x5xbf16>
    %155 = vector.extract_strided_slice %51 {offsets = [0, 64], sizes = [5, 16], strides = [1, 1]} : vector<5x128xbf16> to vector<5x16xbf16>
    %cst_48 = arith.constant dense<0.000000e+00> : vector<5x16xf32>
    %156 = tpu.matmul %154, %155, %cst_48 {dimension_numbers = #tpu.dot_dimension_numbers<[1], [0], [0], [1], [0, 0, 1, 1], [], []>} : vector<5x5xbf16>, vector<5x16xbf16>, vector<5x16xf32> -> vector<5x16xf32>
    %cst_49 = arith.constant dense<0xFF800000> : vector<5xf32>
    %157 = vector.multi_reduction <maximumf>, %81, %cst_49 [1] : vector<5x5xf32> to vector<5xf32>
    %158 = vector.shape_cast %157 : vector<5xf32> to vector<5x1xf32>
    %159 = vector.broadcast %158 : vector<5x1xf32> to vector<5x5xf32>
    %160 = arith.subf %81, %159 : vector<5x5xf32>
    %161 = math.exp %160 : vector<5x5xf32>
    %cst_50 = arith.constant dense<0.000000e+00> : vector<5xf32>
    %162 = vector.multi_reduction <add>, %161, %cst_50 [1] : vector<5x5xf32> to vector<5xf32>
    %163 = vector.shape_cast %162 : vector<5xf32> to vector<5x1xf32>
    %164 = tpu.reciprocal %163 {approx = true} : vector<5x1xf32> -> vector<5x1xf32>
    %165 = vector.broadcast %164 : vector<5x1xf32> to vector<5x5xf32>
    %166 = arith.mulf %161, %165 : vector<5x5xf32>
    %167 = arith.truncf %166 : vector<5x5xf32> to vector<5x5xbf16>
    %168 = vector.extract_strided_slice %51 {offsets = [0, 80], sizes = [5, 16], strides = [1, 1]} : vector<5x128xbf16> to vector<5x16xbf16>
    %cst_51 = arith.constant dense<0.000000e+00> : vector<5x16xf32>
    %169 = tpu.matmul %167, %168, %cst_51 {dimension_numbers = #tpu.dot_dimension_numbers<[1], [0], [0], [1], [0, 0, 1, 1], [], []>} : vector<5x5xbf16>, vector<5x16xbf16>, vector<5x16xf32> -> vector<5x16xf32>
    %cst_52 = arith.constant dense<0xFF800000> : vector<5xf32>
    %170 = vector.multi_reduction <maximumf>, %86, %cst_52 [1] : vector<5x5xf32> to vector<5xf32>
    %171 = vector.shape_cast %170 : vector<5xf32> to vector<5x1xf32>
    %172 = vector.broadcast %171 : vector<5x1xf32> to vector<5x5xf32>
    %173 = arith.subf %86, %172 : vector<5x5xf32>
    %174 = math.exp %173 : vector<5x5xf32>
    %cst_53 = arith.constant dense<0.000000e+00> : vector<5xf32>
    %175 = vector.multi_reduction <add>, %174, %cst_53 [1] : vector<5x5xf32> to vector<5xf32>
    %176 = vector.shape_cast %175 : vector<5xf32> to vector<5x1xf32>
    %177 = tpu.reciprocal %176 {approx = true} : vector<5x1xf32> -> vector<5x1xf32>
    %178 = vector.broadcast %177 : vector<5x1xf32> to vector<5x5xf32>
    %179 = arith.mulf %174, %178 : vector<5x5xf32>
    %180 = arith.truncf %179 : vector<5x5xf32> to vector<5x5xbf16>
    %181 = vector.extract_strided_slice %51 {offsets = [0, 96], sizes = [5, 16], strides = [1, 1]} : vector<5x128xbf16> to vector<5x16xbf16>
    %cst_54 = arith.constant dense<0.000000e+00> : vector<5x16xf32>
    %182 = tpu.matmul %180, %181, %cst_54 {dimension_numbers = #tpu.dot_dimension_numbers<[1], [0], [0], [1], [0, 0, 1, 1], [], []>} : vector<5x5xbf16>, vector<5x16xbf16>, vector<5x16xf32> -> vector<5x16xf32>
    %cst_55 = arith.constant dense<0xFF800000> : vector<5xf32>
    %183 = vector.multi_reduction <maximumf>, %91, %cst_55 [1] : vector<5x5xf32> to vector<5xf32>
    %184 = vector.shape_cast %183 : vector<5xf32> to vector<5x1xf32>
    %185 = vector.broadcast %184 : vector<5x1xf32> to vector<5x5xf32>
    %186 = arith.subf %91, %185 : vector<5x5xf32>
    %187 = math.exp %186 : vector<5x5xf32>
    %cst_56 = arith.constant dense<0.000000e+00> : vector<5xf32>
    %188 = vector.multi_reduction <add>, %187, %cst_56 [1] : vector<5x5xf32> to vector<5xf32>
    %189 = vector.shape_cast %188 : vector<5xf32> to vector<5x1xf32>
    %190 = tpu.reciprocal %189 {approx = true} : vector<5x1xf32> -> vector<5x1xf32>
    %191 = vector.broadcast %190 : vector<5x1xf32> to vector<5x5xf32>
    %192 = arith.mulf %187, %191 : vector<5x5xf32>
    %193 = arith.truncf %192 : vector<5x5xf32> to vector<5x5xbf16>
    %194 = vector.extract_strided_slice %51 {offsets = [0, 112], sizes = [5, 16], strides = [1, 1]} : vector<5x128xbf16> to vector<5x16xbf16>
    %cst_57 = arith.constant dense<0.000000e+00> : vector<5x16xf32>
    %195 = tpu.matmul %193, %194, %cst_57 {dimension_numbers = #tpu.dot_dimension_numbers<[1], [0], [0], [1], [0, 0, 1, 1], [], []>} : vector<5x5xbf16>, vector<5x16xbf16>, vector<5x16xf32> -> vector<5x16xf32>
    %196 = tpu.concatenate %104, %117, %130, %143, %156, %169, %182, %195 in 1 : vector<5x16xf32>, vector<5x16xf32>, vector<5x16xf32>, vector<5x16xf32>, vector<5x16xf32>, vector<5x16xf32>, vector<5x16xf32>, vector<5x16xf32> -> vector<5x128xf32>
    %197 = vector.extract_strided_slice %46 {offsets = [5, 0], sizes = [5, 128], strides = [1, 1]} : vector<10x128xbf16> to vector<5x128xbf16>
    %198 = vector.extract_strided_slice %47 {offsets = [5, 0], sizes = [5, 128], strides = [1, 1]} : vector<10x128xbf16> to vector<5x128xbf16>
    %199 = vector.extract_strided_slice %48 {offsets = [5, 0], sizes = [5, 128], strides = [1, 1]} : vector<10x128xbf16> to vector<5x128xbf16>
    %200 = vector.extract_strided_slice %197 {offsets = [0, 0], sizes = [5, 16], strides = [1, 1]} : vector<5x128xbf16> to vector<5x16xbf16>
    %201 = vector.extract_strided_slice %198 {offsets = [0, 0], sizes = [5, 16], strides = [1, 1]} : vector<5x128xbf16> to vector<5x16xbf16>
    %cst_58 = arith.constant dense<0.000000e+00> : vector<5x5xf32>
    %202 = tpu.matmul %200, %201, %cst_58 {dimension_numbers = #tpu.dot_dimension_numbers<[1], [1], [0], [0], [0, 0, 1, 0], [], []>} : vector<5x16xbf16>, vector<5x16xbf16>, vector<5x5xf32> -> vector<5x5xf32>
    %cst_59 = arith.constant 0.0883883461 : f32
    %203 = vector.broadcast %cst_59 : f32 to vector<5x5xf32>
    %204 = arith.mulf %202, %203 : vector<5x5xf32>
    %205 = vector.extract_strided_slice %197 {offsets = [0, 16], sizes = [5, 16], strides = [1, 1]} : vector<5x128xbf16> to vector<5x16xbf16>
    %206 = vector.extract_strided_slice %198 {offsets = [0, 16], sizes = [5, 16], strides = [1, 1]} : vector<5x128xbf16> to vector<5x16xbf16>
    %cst_60 = arith.constant dense<0.000000e+00> : vector<5x5xf32>
    %207 = tpu.matmul %205, %206, %cst_60 {dimension_numbers = #tpu.dot_dimension_numbers<[1], [1], [0], [0], [0, 0, 1, 0], [], []>} : vector<5x16xbf16>, vector<5x16xbf16>, vector<5x5xf32> -> vector<5x5xf32>
    %cst_61 = arith.constant 0.0883883461 : f32
    %208 = vector.broadcast %cst_61 : f32 to vector<5x5xf32>
    %209 = arith.mulf %207, %208 : vector<5x5xf32>
    %210 = vector.extract_strided_slice %197 {offsets = [0, 32], sizes = [5, 16], strides = [1, 1]} : vector<5x128xbf16> to vector<5x16xbf16>
    %211 = vector.extract_strided_slice %198 {offsets = [0, 32], sizes = [5, 16], strides = [1, 1]} : vector<5x128xbf16> to vector<5x16xbf16>
    %cst_62 = arith.constant dense<0.000000e+00> : vector<5x5xf32>
    %212 = tpu.matmul %210, %211, %cst_62 {dimension_numbers = #tpu.dot_dimension_numbers<[1], [1], [0], [0], [0, 0, 1, 0], [], []>} : vector<5x16xbf16>, vector<5x16xbf16>, vector<5x5xf32> -> vector<5x5xf32>
    %cst_63 = arith.constant 0.0883883461 : f32
    %213 = vector.broadcast %cst_63 : f32 to vector<5x5xf32>
    %214 = arith.mulf %212, %213 : vector<5x5xf32>
    %215 = vector.extract_strided_slice %197 {offsets = [0, 48], sizes = [5, 16], strides = [1, 1]} : vector<5x128xbf16> to vector<5x16xbf16>
    %216 = vector.extract_strided_slice %198 {offsets = [0, 48], sizes = [5, 16], strides = [1, 1]} : vector<5x128xbf16> to vector<5x16xbf16>
    %cst_64 = arith.constant dense<0.000000e+00> : vector<5x5xf32>
    %217 = tpu.matmul %215, %216, %cst_64 {dimension_numbers = #tpu.dot_dimension_numbers<[1], [1], [0], [0], [0, 0, 1, 0], [], []>} : vector<5x16xbf16>, vector<5x16xbf16>, vector<5x5xf32> -> vector<5x5xf32>
    %cst_65 = arith.constant 0.0883883461 : f32
    %218 = vector.broadcast %cst_65 : f32 to vector<5x5xf32>
    %219 = arith.mulf %217, %218 : vector<5x5xf32>
    %220 = vector.extract_strided_slice %197 {offsets = [0, 64], sizes = [5, 16], strides = [1, 1]} : vector<5x128xbf16> to vector<5x16xbf16>
    %221 = vector.extract_strided_slice %198 {offsets = [0, 64], sizes = [5, 16], strides = [1, 1]} : vector<5x128xbf16> to vector<5x16xbf16>
    %cst_66 = arith.constant dense<0.000000e+00> : vector<5x5xf32>
    %222 = tpu.matmul %220, %221, %cst_66 {dimension_numbers = #tpu.dot_dimension_numbers<[1], [1], [0], [0], [0, 0, 1, 0], [], []>} : vector<5x16xbf16>, vector<5x16xbf16>, vector<5x5xf32> -> vector<5x5xf32>
    %cst_67 = arith.constant 0.0883883461 : f32
    %223 = vector.broadcast %cst_67 : f32 to vector<5x5xf32>
    %224 = arith.mulf %222, %223 : vector<5x5xf32>
    %225 = vector.extract_strided_slice %197 {offsets = [0, 80], sizes = [5, 16], strides = [1, 1]} : vector<5x128xbf16> to vector<5x16xbf16>
    %226 = vector.extract_strided_slice %198 {offsets = [0, 80], sizes = [5, 16], strides = [1, 1]} : vector<5x128xbf16> to vector<5x16xbf16>
    %cst_68 = arith.constant dense<0.000000e+00> : vector<5x5xf32>
    %227 = tpu.matmul %225, %226, %cst_68 {dimension_numbers = #tpu.dot_dimension_numbers<[1], [1], [0], [0], [0, 0, 1, 0], [], []>} : vector<5x16xbf16>, vector<5x16xbf16>, vector<5x5xf32> -> vector<5x5xf32>
    %cst_69 = arith.constant 0.0883883461 : f32
    %228 = vector.broadcast %cst_69 : f32 to vector<5x5xf32>
    %229 = arith.mulf %227, %228 : vector<5x5xf32>
    %230 = vector.extract_strided_slice %197 {offsets = [0, 96], sizes = [5, 16], strides = [1, 1]} : vector<5x128xbf16> to vector<5x16xbf16>
    %231 = vector.extract_strided_slice %198 {offsets = [0, 96], sizes = [5, 16], strides = [1, 1]} : vector<5x128xbf16> to vector<5x16xbf16>
    %cst_70 = arith.constant dense<0.000000e+00> : vector<5x5xf32>
    %232 = tpu.matmul %230, %231, %cst_70 {dimension_numbers = #tpu.dot_dimension_numbers<[1], [1], [0], [0], [0, 0, 1, 0], [], []>} : vector<5x16xbf16>, vector<5x16xbf16>, vector<5x5xf32> -> vector<5x5xf32>
    %cst_71 = arith.constant 0.0883883461 : f32
    %233 = vector.broadcast %cst_71 : f32 to vector<5x5xf32>
    %234 = arith.mulf %232, %233 : vector<5x5xf32>
    %235 = vector.extract_strided_slice %197 {offsets = [0, 112], sizes = [5, 16], strides = [1, 1]} : vector<5x128xbf16> to vector<5x16xbf16>
    %236 = vector.extract_strided_slice %198 {offsets = [0, 112], sizes = [5, 16], strides = [1, 1]} : vector<5x128xbf16> to vector<5x16xbf16>
    %cst_72 = arith.constant dense<0.000000e+00> : vector<5x5xf32>
    %237 = tpu.matmul %235, %236, %cst_72 {dimension_numbers = #tpu.dot_dimension_numbers<[1], [1], [0], [0], [0, 0, 1, 0], [], []>} : vector<5x16xbf16>, vector<5x16xbf16>, vector<5x5xf32> -> vector<5x5xf32>
    %cst_73 = arith.constant 0.0883883461 : f32
    %238 = vector.broadcast %cst_73 : f32 to vector<5x5xf32>
    %239 = arith.mulf %237, %238 : vector<5x5xf32>
    %cst_74 = arith.constant dense<0xFF800000> : vector<5xf32>
    %240 = vector.multi_reduction <maximumf>, %204, %cst_74 [1] : vector<5x5xf32> to vector<5xf32>
    %241 = vector.shape_cast %240 : vector<5xf32> to vector<5x1xf32>
    %242 = vector.broadcast %241 : vector<5x1xf32> to vector<5x5xf32>
    %243 = arith.subf %204, %242 : vector<5x5xf32>
    %244 = math.exp %243 : vector<5x5xf32>
    %cst_75 = arith.constant dense<0.000000e+00> : vector<5xf32>
    %245 = vector.multi_reduction <add>, %244, %cst_75 [1] : vector<5x5xf32> to vector<5xf32>
    %246 = vector.shape_cast %245 : vector<5xf32> to vector<5x1xf32>
    %247 = tpu.reciprocal %246 {approx = true} : vector<5x1xf32> -> vector<5x1xf32>
    %248 = vector.broadcast %247 : vector<5x1xf32> to vector<5x5xf32>
    %249 = arith.mulf %244, %248 : vector<5x5xf32>
    %250 = arith.truncf %249 : vector<5x5xf32> to vector<5x5xbf16>
    %251 = vector.extract_strided_slice %199 {offsets = [0, 0], sizes = [5, 16], strides = [1, 1]} : vector<5x128xbf16> to vector<5x16xbf16>
    %cst_76 = arith.constant dense<0.000000e+00> : vector<5x16xf32>
    %252 = tpu.matmul %250, %251, %cst_76 {dimension_numbers = #tpu.dot_dimension_numbers<[1], [0], [0], [1], [0, 0, 1, 1], [], []>} : vector<5x5xbf16>, vector<5x16xbf16>, vector<5x16xf32> -> vector<5x16xf32>
    %cst_77 = arith.constant dense<0xFF800000> : vector<5xf32>
    %253 = vector.multi_reduction <maximumf>, %209, %cst_77 [1] : vector<5x5xf32> to vector<5xf32>
    %254 = vector.shape_cast %253 : vector<5xf32> to vector<5x1xf32>
    %255 = vector.broadcast %254 : vector<5x1xf32> to vector<5x5xf32>
    %256 = arith.subf %209, %255 : vector<5x5xf32>
    %257 = math.exp %256 : vector<5x5xf32>
    %cst_78 = arith.constant dense<0.000000e+00> : vector<5xf32>
    %258 = vector.multi_reduction <add>, %257, %cst_78 [1] : vector<5x5xf32> to vector<5xf32>
    %259 = vector.shape_cast %258 : vector<5xf32> to vector<5x1xf32>
    %260 = tpu.reciprocal %259 {approx = true} : vector<5x1xf32> -> vector<5x1xf32>
    %261 = vector.broadcast %260 : vector<5x1xf32> to vector<5x5xf32>
    %262 = arith.mulf %257, %261 : vector<5x5xf32>
    %263 = arith.truncf %262 : vector<5x5xf32> to vector<5x5xbf16>
    %264 = vector.extract_strided_slice %199 {offsets = [0, 16], sizes = [5, 16], strides = [1, 1]} : vector<5x128xbf16> to vector<5x16xbf16>
    %cst_79 = arith.constant dense<0.000000e+00> : vector<5x16xf32>
    %265 = tpu.matmul %263, %264, %cst_79 {dimension_numbers = #tpu.dot_dimension_numbers<[1], [0], [0], [1], [0, 0, 1, 1], [], []>} : vector<5x5xbf16>, vector<5x16xbf16>, vector<5x16xf32> -> vector<5x16xf32>
    %cst_80 = arith.constant dense<0xFF800000> : vector<5xf32>
    %266 = vector.multi_reduction <maximumf>, %214, %cst_80 [1] : vector<5x5xf32> to vector<5xf32>
    %267 = vector.shape_cast %266 : vector<5xf32> to vector<5x1xf32>
    %268 = vector.broadcast %267 : vector<5x1xf32> to vector<5x5xf32>
    %269 = arith.subf %214, %268 : vector<5x5xf32>
    %270 = math.exp %269 : vector<5x5xf32>
    %cst_81 = arith.constant dense<0.000000e+00> : vector<5xf32>
    %271 = vector.multi_reduction <add>, %270, %cst_81 [1] : vector<5x5xf32> to vector<5xf32>
    %272 = vector.shape_cast %271 : vector<5xf32> to vector<5x1xf32>
    %273 = tpu.reciprocal %272 {approx = true} : vector<5x1xf32> -> vector<5x1xf32>
    %274 = vector.broadcast %273 : vector<5x1xf32> to vector<5x5xf32>
    %275 = arith.mulf %270, %274 : vector<5x5xf32>
    %276 = arith.truncf %275 : vector<5x5xf32> to vector<5x5xbf16>
    %277 = vector.extract_strided_slice %199 {offsets = [0, 32], sizes = [5, 16], strides = [1, 1]} : vector<5x128xbf16> to vector<5x16xbf16>
    %cst_82 = arith.constant dense<0.000000e+00> : vector<5x16xf32>
    %278 = tpu.matmul %276, %277, %cst_82 {dimension_numbers = #tpu.dot_dimension_numbers<[1], [0], [0], [1], [0, 0, 1, 1], [], []>} : vector<5x5xbf16>, vector<5x16xbf16>, vector<5x16xf32> -> vector<5x16xf32>
    %cst_83 = arith.constant dense<0xFF800000> : vector<5xf32>
    %279 = vector.multi_reduction <maximumf>, %219, %cst_83 [1] : vector<5x5xf32> to vector<5xf32>
    %280 = vector.shape_cast %279 : vector<5xf32> to vector<5x1xf32>
    %281 = vector.broadcast %280 : vector<5x1xf32> to vector<5x5xf32>
    %282 = arith.subf %219, %281 : vector<5x5xf32>
    %283 = math.exp %282 : vector<5x5xf32>
    %cst_84 = arith.constant dense<0.000000e+00> : vector<5xf32>
    %284 = vector.multi_reduction <add>, %283, %cst_84 [1] : vector<5x5xf32> to vector<5xf32>
    %285 = vector.shape_cast %284 : vector<5xf32> to vector<5x1xf32>
    %286 = tpu.reciprocal %285 {approx = true} : vector<5x1xf32> -> vector<5x1xf32>
    %287 = vector.broadcast %286 : vector<5x1xf32> to vector<5x5xf32>
    %288 = arith.mulf %283, %287 : vector<5x5xf32>
    %289 = arith.truncf %288 : vector<5x5xf32> to vector<5x5xbf16>
    %290 = vector.extract_strided_slice %199 {offsets = [0, 48], sizes = [5, 16], strides = [1, 1]} : vector<5x128xbf16> to vector<5x16xbf16>
    %cst_85 = arith.constant dense<0.000000e+00> : vector<5x16xf32>
    %291 = tpu.matmul %289, %290, %cst_85 {dimension_numbers = #tpu.dot_dimension_numbers<[1], [0], [0], [1], [0, 0, 1, 1], [], []>} : vector<5x5xbf16>, vector<5x16xbf16>, vector<5x16xf32> -> vector<5x16xf32>
    %cst_86 = arith.constant dense<0xFF800000> : vector<5xf32>
    %292 = vector.multi_reduction <maximumf>, %224, %cst_86 [1] : vector<5x5xf32> to vector<5xf32>
    %293 = vector.shape_cast %292 : vector<5xf32> to vector<5x1xf32>
    %294 = vector.broadcast %293 : vector<5x1xf32> to vector<5x5xf32>
    %295 = arith.subf %224, %294 : vector<5x5xf32>
    %296 = math.exp %295 : vector<5x5xf32>
    %cst_87 = arith.constant dense<0.000000e+00> : vector<5xf32>
    %297 = vector.multi_reduction <add>, %296, %cst_87 [1] : vector<5x5xf32> to vector<5xf32>
    %298 = vector.shape_cast %297 : vector<5xf32> to vector<5x1xf32>
    %299 = tpu.reciprocal %298 {approx = true} : vector<5x1xf32> -> vector<5x1xf32>
    %300 = vector.broadcast %299 : vector<5x1xf32> to vector<5x5xf32>
    %301 = arith.mulf %296, %300 : vector<5x5xf32>
    %302 = arith.truncf %301 : vector<5x5xf32> to vector<5x5xbf16>
    %303 = vector.extract_strided_slice %199 {offsets = [0, 64], sizes = [5, 16], strides = [1, 1]} : vector<5x128xbf16> to vector<5x16xbf16>
    %cst_88 = arith.constant dense<0.000000e+00> : vector<5x16xf32>
    %304 = tpu.matmul %302, %303, %cst_88 {dimension_numbers = #tpu.dot_dimension_numbers<[1], [0], [0], [1], [0, 0, 1, 1], [], []>} : vector<5x5xbf16>, vector<5x16xbf16>, vector<5x16xf32> -> vector<5x16xf32>
    %cst_89 = arith.constant dense<0xFF800000> : vector<5xf32>
    %305 = vector.multi_reduction <maximumf>, %229, %cst_89 [1] : vector<5x5xf32> to vector<5xf32>
    %306 = vector.shape_cast %305 : vector<5xf32> to vector<5x1xf32>
    %307 = vector.broadcast %306 : vector<5x1xf32> to vector<5x5xf32>
    %308 = arith.subf %229, %307 : vector<5x5xf32>
    %309 = math.exp %308 : vector<5x5xf32>
    %cst_90 = arith.constant dense<0.000000e+00> : vector<5xf32>
    %310 = vector.multi_reduction <add>, %309, %cst_90 [1] : vector<5x5xf32> to vector<5xf32>
    %311 = vector.shape_cast %310 : vector<5xf32> to vector<5x1xf32>
    %312 = tpu.reciprocal %311 {approx = true} : vector<5x1xf32> -> vector<5x1xf32>
    %313 = vector.broadcast %312 : vector<5x1xf32> to vector<5x5xf32>
    %314 = arith.mulf %309, %313 : vector<5x5xf32>
    %315 = arith.truncf %314 : vector<5x5xf32> to vector<5x5xbf16>
    %316 = vector.extract_strided_slice %199 {offsets = [0, 80], sizes = [5, 16], strides = [1, 1]} : vector<5x128xbf16> to vector<5x16xbf16>
    %cst_91 = arith.constant dense<0.000000e+00> : vector<5x16xf32>
    %317 = tpu.matmul %315, %316, %cst_91 {dimension_numbers = #tpu.dot_dimension_numbers<[1], [0], [0], [1], [0, 0, 1, 1], [], []>} : vector<5x5xbf16>, vector<5x16xbf16>, vector<5x16xf32> -> vector<5x16xf32>
    %cst_92 = arith.constant dense<0xFF800000> : vector<5xf32>
    %318 = vector.multi_reduction <maximumf>, %234, %cst_92 [1] : vector<5x5xf32> to vector<5xf32>
    %319 = vector.shape_cast %318 : vector<5xf32> to vector<5x1xf32>
    %320 = vector.broadcast %319 : vector<5x1xf32> to vector<5x5xf32>
    %321 = arith.subf %234, %320 : vector<5x5xf32>
    %322 = math.exp %321 : vector<5x5xf32>
    %cst_93 = arith.constant dense<0.000000e+00> : vector<5xf32>
    %323 = vector.multi_reduction <add>, %322, %cst_93 [1] : vector<5x5xf32> to vector<5xf32>
    %324 = vector.shape_cast %323 : vector<5xf32> to vector<5x1xf32>
    %325 = tpu.reciprocal %324 {approx = true} : vector<5x1xf32> -> vector<5x1xf32>
    %326 = vector.broadcast %325 : vector<5x1xf32> to vector<5x5xf32>
    %327 = arith.mulf %322, %326 : vector<5x5xf32>
    %328 = arith.truncf %327 : vector<5x5xf32> to vector<5x5xbf16>
    %329 = vector.extract_strided_slice %199 {offsets = [0, 96], sizes = [5, 16], strides = [1, 1]} : vector<5x128xbf16> to vector<5x16xbf16>
    %cst_94 = arith.constant dense<0.000000e+00> : vector<5x16xf32>
    %330 = tpu.matmul %328, %329, %cst_94 {dimension_numbers = #tpu.dot_dimension_numbers<[1], [0], [0], [1], [0, 0, 1, 1], [], []>} : vector<5x5xbf16>, vector<5x16xbf16>, vector<5x16xf32> -> vector<5x16xf32>
    %cst_95 = arith.constant dense<0xFF800000> : vector<5xf32>
    %331 = vector.multi_reduction <maximumf>, %239, %cst_95 [1] : vector<5x5xf32> to vector<5xf32>
    %332 = vector.shape_cast %331 : vector<5xf32> to vector<5x1xf32>
    %333 = vector.broadcast %332 : vector<5x1xf32> to vector<5x5xf32>
    %334 = arith.subf %239, %333 : vector<5x5xf32>
    %335 = math.exp %334 : vector<5x5xf32>
    %cst_96 = arith.constant dense<0.000000e+00> : vector<5xf32>
    %336 = vector.multi_reduction <add>, %335, %cst_96 [1] : vector<5x5xf32> to vector<5xf32>
    %337 = vector.shape_cast %336 : vector<5xf32> to vector<5x1xf32>
    %338 = tpu.reciprocal %337 {approx = true} : vector<5x1xf32> -> vector<5x1xf32>
    %339 = vector.broadcast %338 : vector<5x1xf32> to vector<5x5xf32>
    %340 = arith.mulf %335, %339 : vector<5x5xf32>
    %341 = arith.truncf %340 : vector<5x5xf32> to vector<5x5xbf16>
    %342 = vector.extract_strided_slice %199 {offsets = [0, 112], sizes = [5, 16], strides = [1, 1]} : vector<5x128xbf16> to vector<5x16xbf16>
    %cst_97 = arith.constant dense<0.000000e+00> : vector<5x16xf32>
    %343 = tpu.matmul %341, %342, %cst_97 {dimension_numbers = #tpu.dot_dimension_numbers<[1], [0], [0], [1], [0, 0, 1, 1], [], []>} : vector<5x5xbf16>, vector<5x16xbf16>, vector<5x16xf32> -> vector<5x16xf32>
    %344 = tpu.concatenate %252, %265, %278, %291, %304, %317, %330, %343 in 1 : vector<5x16xf32>, vector<5x16xf32>, vector<5x16xf32>, vector<5x16xf32>, vector<5x16xf32>, vector<5x16xf32>, vector<5x16xf32>, vector<5x16xf32> -> vector<5x128xf32>
    %345 = tpu.concatenate %196, %344 in 0 : vector<5x128xf32>, vector<5x128xf32> -> vector<10x128xf32>
    %346 = arith.addf %345, %14 : vector<10x128xf32>
    %c0_98 = arith.constant 0 : index
    %c640 = arith.constant 640 : index
    %347 = vector.load %arg3[%c0_98, %c640] : memref<128x2432xbf16, #tpu.memory_space<vmem>>, vector<128x128xbf16>
    %348 = arith.truncf %346 : vector<10x128xf32> to vector<10x128xbf16>
    %cst_99 = arith.constant dense<0.000000e+00> : vector<10x128xf32>
    %349 = tpu.matmul %348, %347, %cst_99 {dimension_numbers = #tpu.dot_dimension_numbers<[1], [0], [0], [1], [0, 0, 1, 1], [], []>} : vector<10x128xbf16>, vector<128x128xbf16>, vector<10x128xf32> -> vector<10x128xf32>
    %c6 = arith.constant 6 : index
    %c0_100 = arith.constant 0 : index
    %350 = vector.load %arg4[%c6, %c0_100] : memref<50x128xf32, #tpu.memory_space<vmem>>, vector<1x128xf32>
    %351 = vector.broadcast %350 : vector<1x128xf32> to vector<10x128xf32>
    %352 = arith.addf %349, %351 : vector<10x128xf32>
    %c7 = arith.constant 7 : index
    %c0_101 = arith.constant 0 : index
    %353 = vector.load %arg4[%c7, %c0_101] : memref<50x128xf32, #tpu.memory_space<vmem>>, vector<1x128xf32>
    %c8 = arith.constant 8 : index
    %c0_102 = arith.constant 0 : index
    %354 = vector.load %arg4[%c8, %c0_102] : memref<50x128xf32, #tpu.memory_space<vmem>>, vector<1x128xf32>
    %cst_103 = arith.constant dense<0.000000e+00> : vector<10xf32>
    %355 = vector.multi_reduction <add>, %352, %cst_103 [1] : vector<10x128xf32> to vector<10xf32>
    %356 = vector.shape_cast %355 : vector<10xf32> to vector<10x1xf32>
    %cst_104 = arith.constant 1.280000e+02 : f32
    %357 = vector.broadcast %cst_104 : f32 to vector<10x1xf32>
    %358 = arith.divf %356, %357 : vector<10x1xf32>
    %359 = vector.broadcast %358 : vector<10x1xf32> to vector<10x128xf32>
    %360 = arith.subf %352, %359 : vector<10x128xf32>
    %361 = arith.mulf %360, %360 : vector<10x128xf32>
    %cst_105 = arith.constant dense<0.000000e+00> : vector<10xf32>
    %362 = vector.multi_reduction <add>, %361, %cst_105 [1] : vector<10x128xf32> to vector<10xf32>
    %363 = vector.shape_cast %362 : vector<10xf32> to vector<10x1xf32>
    %cst_106 = arith.constant 1.280000e+02 : f32
    %364 = vector.broadcast %cst_106 : f32 to vector<10x1xf32>
    %365 = arith.divf %363, %364 : vector<10x1xf32>
    %cst_107 = arith.constant 9.99999974E-6 : f32
    %366 = vector.broadcast %cst_107 : f32 to vector<10x1xf32>
    %367 = arith.addf %365, %366 : vector<10x1xf32>
    %368 = math.rsqrt %367 : vector<10x1xf32>
    %369 = vector.broadcast %368 : vector<10x1xf32> to vector<10x128xf32>
    %370 = arith.mulf %360, %369 : vector<10x128xf32>
    %371 = vector.broadcast %353 : vector<1x128xf32> to vector<10x128xf32>
    %372 = arith.mulf %370, %371 : vector<10x128xf32>
    %373 = vector.broadcast %354 : vector<1x128xf32> to vector<10x128xf32>
    %374 = arith.addf %372, %373 : vector<10x128xf32>
    %c0_108 = arith.constant 0 : index
    %c768 = arith.constant 768 : index
    %375 = vector.load %arg3[%c0_108, %c768] : memref<128x2432xbf16, #tpu.memory_space<vmem>>, vector<128x384xbf16>
    %376 = arith.truncf %374 : vector<10x128xf32> to vector<10x128xbf16>
    %cst_109 = arith.constant dense<0.000000e+00> : vector<10x384xf32>
    %377 = tpu.matmul %376, %375, %cst_109 {dimension_numbers = #tpu.dot_dimension_numbers<[1], [0], [0], [1], [0, 0, 1, 1], [], []>} : vector<10x128xbf16>, vector<128x384xbf16>, vector<10x384xf32> -> vector<10x384xf32>
    %378 = vector.extract_strided_slice %377 {offsets = [0, 0], sizes = [10, 128], strides = [1, 1]} : vector<10x384xf32> to vector<10x128xf32>
    %c9 = arith.constant 9 : index
    %c0_110 = arith.constant 0 : index
    %379 = vector.load %arg4[%c9, %c0_110] : memref<50x128xf32, #tpu.memory_space<vmem>>, vector<1x128xf32>
    %380 = vector.broadcast %379 : vector<1x128xf32> to vector<10x128xf32>
    %381 = arith.addf %378, %380 : vector<10x128xf32>
    %382 = vector.extract_strided_slice %377 {offsets = [0, 128], sizes = [10, 128], strides = [1, 1]} : vector<10x384xf32> to vector<10x128xf32>
    %c10 = arith.constant 10 : index
    %c0_111 = arith.constant 0 : index
    %383 = vector.load %arg4[%c10, %c0_111] : memref<50x128xf32, #tpu.memory_space<vmem>>, vector<1x128xf32>
    %384 = vector.broadcast %383 : vector<1x128xf32> to vector<10x128xf32>
    %385 = arith.addf %382, %384 : vector<10x128xf32>
    %386 = vector.extract_strided_slice %377 {offsets = [0, 256], sizes = [10, 128], strides = [1, 1]} : vector<10x384xf32> to vector<10x128xf32>
    %c11 = arith.constant 11 : index
    %c0_112 = arith.constant 0 : index
    %387 = vector.load %arg4[%c11, %c0_112] : memref<50x128xf32, #tpu.memory_space<vmem>>, vector<1x128xf32>
    %388 = vector.broadcast %387 : vector<1x128xf32> to vector<10x128xf32>
    %389 = arith.addf %386, %388 : vector<10x128xf32>
    %390 = arith.truncf %381 : vector<10x128xf32> to vector<10x128xbf16>
    %391 = arith.truncf %385 : vector<10x128xf32> to vector<10x128xbf16>
    %392 = arith.truncf %389 : vector<10x128xf32> to vector<10x128xbf16>
    %393 = vector.extract_strided_slice %390 {offsets = [0, 0], sizes = [5, 128], strides = [1, 1]} : vector<10x128xbf16> to vector<5x128xbf16>
    %394 = vector.extract_strided_slice %391 {offsets = [0, 0], sizes = [5, 128], strides = [1, 1]} : vector<10x128xbf16> to vector<5x128xbf16>
    %395 = vector.extract_strided_slice %392 {offsets = [0, 0], sizes = [5, 128], strides = [1, 1]} : vector<10x128xbf16> to vector<5x128xbf16>
    %396 = vector.extract_strided_slice %393 {offsets = [0, 0], sizes = [5, 16], strides = [1, 1]} : vector<5x128xbf16> to vector<5x16xbf16>
    %397 = vector.extract_strided_slice %394 {offsets = [0, 0], sizes = [5, 16], strides = [1, 1]} : vector<5x128xbf16> to vector<5x16xbf16>
    %cst_113 = arith.constant dense<0.000000e+00> : vector<5x5xf32>
    %398 = tpu.matmul %396, %397, %cst_113 {dimension_numbers = #tpu.dot_dimension_numbers<[1], [1], [0], [0], [0, 0, 1, 0], [], []>} : vector<5x16xbf16>, vector<5x16xbf16>, vector<5x5xf32> -> vector<5x5xf32>
    %cst_114 = arith.constant 2.500000e-01 : f32
    %399 = vector.broadcast %cst_114 : f32 to vector<5x5xf32>
    %400 = arith.mulf %398, %399 : vector<5x5xf32>
    %401 = vector.extract_strided_slice %393 {offsets = [0, 16], sizes = [5, 16], strides = [1, 1]} : vector<5x128xbf16> to vector<5x16xbf16>
    %402 = vector.extract_strided_slice %394 {offsets = [0, 16], sizes = [5, 16], strides = [1, 1]} : vector<5x128xbf16> to vector<5x16xbf16>
    %cst_115 = arith.constant dense<0.000000e+00> : vector<5x5xf32>
    %403 = tpu.matmul %401, %402, %cst_115 {dimension_numbers = #tpu.dot_dimension_numbers<[1], [1], [0], [0], [0, 0, 1, 0], [], []>} : vector<5x16xbf16>, vector<5x16xbf16>, vector<5x5xf32> -> vector<5x5xf32>
    %cst_116 = arith.constant 2.500000e-01 : f32
    %404 = vector.broadcast %cst_116 : f32 to vector<5x5xf32>
    %405 = arith.mulf %403, %404 : vector<5x5xf32>
    %406 = vector.extract_strided_slice %393 {offsets = [0, 32], sizes = [5, 16], strides = [1, 1]} : vector<5x128xbf16> to vector<5x16xbf16>
    %407 = vector.extract_strided_slice %394 {offsets = [0, 32], sizes = [5, 16], strides = [1, 1]} : vector<5x128xbf16> to vector<5x16xbf16>
    %cst_117 = arith.constant dense<0.000000e+00> : vector<5x5xf32>
    %408 = tpu.matmul %406, %407, %cst_117 {dimension_numbers = #tpu.dot_dimension_numbers<[1], [1], [0], [0], [0, 0, 1, 0], [], []>} : vector<5x16xbf16>, vector<5x16xbf16>, vector<5x5xf32> -> vector<5x5xf32>
    %cst_118 = arith.constant 2.500000e-01 : f32
    %409 = vector.broadcast %cst_118 : f32 to vector<5x5xf32>
    %410 = arith.mulf %408, %409 : vector<5x5xf32>
    %411 = vector.extract_strided_slice %393 {offsets = [0, 48], sizes = [5, 16], strides = [1, 1]} : vector<5x128xbf16> to vector<5x16xbf16>
    %412 = vector.extract_strided_slice %394 {offsets = [0, 48], sizes = [5, 16], strides = [1, 1]} : vector<5x128xbf16> to vector<5x16xbf16>
    %cst_119 = arith.constant dense<0.000000e+00> : vector<5x5xf32>
    %413 = tpu.matmul %411, %412, %cst_119 {dimension_numbers = #tpu.dot_dimension_numbers<[1], [1], [0], [0], [0, 0, 1, 0], [], []>} : vector<5x16xbf16>, vector<5x16xbf16>, vector<5x5xf32> -> vector<5x5xf32>
    %cst_120 = arith.constant 2.500000e-01 : f32
    %414 = vector.broadcast %cst_120 : f32 to vector<5x5xf32>
    %415 = arith.mulf %413, %414 : vector<5x5xf32>
    %416 = vector.extract_strided_slice %393 {offsets = [0, 64], sizes = [5, 16], strides = [1, 1]} : vector<5x128xbf16> to vector<5x16xbf16>
    %417 = vector.extract_strided_slice %394 {offsets = [0, 64], sizes = [5, 16], strides = [1, 1]} : vector<5x128xbf16> to vector<5x16xbf16>
    %cst_121 = arith.constant dense<0.000000e+00> : vector<5x5xf32>
    %418 = tpu.matmul %416, %417, %cst_121 {dimension_numbers = #tpu.dot_dimension_numbers<[1], [1], [0], [0], [0, 0, 1, 0], [], []>} : vector<5x16xbf16>, vector<5x16xbf16>, vector<5x5xf32> -> vector<5x5xf32>
    %cst_122 = arith.constant 2.500000e-01 : f32
    %419 = vector.broadcast %cst_122 : f32 to vector<5x5xf32>
    %420 = arith.mulf %418, %419 : vector<5x5xf32>
    %421 = vector.extract_strided_slice %393 {offsets = [0, 80], sizes = [5, 16], strides = [1, 1]} : vector<5x128xbf16> to vector<5x16xbf16>
    %422 = vector.extract_strided_slice %394 {offsets = [0, 80], sizes = [5, 16], strides = [1, 1]} : vector<5x128xbf16> to vector<5x16xbf16>
    %cst_123 = arith.constant dense<0.000000e+00> : vector<5x5xf32>
    %423 = tpu.matmul %421, %422, %cst_123 {dimension_numbers = #tpu.dot_dimension_numbers<[1], [1], [0], [0], [0, 0, 1, 0], [], []>} : vector<5x16xbf16>, vector<5x16xbf16>, vector<5x5xf32> -> vector<5x5xf32>
    %cst_124 = arith.constant 2.500000e-01 : f32
    %424 = vector.broadcast %cst_124 : f32 to vector<5x5xf32>
    %425 = arith.mulf %423, %424 : vector<5x5xf32>
    %426 = vector.extract_strided_slice %393 {offsets = [0, 96], sizes = [5, 16], strides = [1, 1]} : vector<5x128xbf16> to vector<5x16xbf16>
    %427 = vector.extract_strided_slice %394 {offsets = [0, 96], sizes = [5, 16], strides = [1, 1]} : vector<5x128xbf16> to vector<5x16xbf16>
    %cst_125 = arith.constant dense<0.000000e+00> : vector<5x5xf32>
    %428 = tpu.matmul %426, %427, %cst_125 {dimension_numbers = #tpu.dot_dimension_numbers<[1], [1], [0], [0], [0, 0, 1, 0], [], []>} : vector<5x16xbf16>, vector<5x16xbf16>, vector<5x5xf32> -> vector<5x5xf32>
    %cst_126 = arith.constant 2.500000e-01 : f32
    %429 = vector.broadcast %cst_126 : f32 to vector<5x5xf32>
    %430 = arith.mulf %428, %429 : vector<5x5xf32>
    %431 = vector.extract_strided_slice %393 {offsets = [0, 112], sizes = [5, 16], strides = [1, 1]} : vector<5x128xbf16> to vector<5x16xbf16>
    %432 = vector.extract_strided_slice %394 {offsets = [0, 112], sizes = [5, 16], strides = [1, 1]} : vector<5x128xbf16> to vector<5x16xbf16>
    %cst_127 = arith.constant dense<0.000000e+00> : vector<5x5xf32>
    %433 = tpu.matmul %431, %432, %cst_127 {dimension_numbers = #tpu.dot_dimension_numbers<[1], [1], [0], [0], [0, 0, 1, 0], [], []>} : vector<5x16xbf16>, vector<5x16xbf16>, vector<5x5xf32> -> vector<5x5xf32>
    %cst_128 = arith.constant 2.500000e-01 : f32
    %434 = vector.broadcast %cst_128 : f32 to vector<5x5xf32>
    %435 = arith.mulf %433, %434 : vector<5x5xf32>
    %cst_129 = arith.constant dense<0xFF800000> : vector<5xf32>
    %436 = vector.multi_reduction <maximumf>, %400, %cst_129 [1] : vector<5x5xf32> to vector<5xf32>
    %437 = vector.shape_cast %436 : vector<5xf32> to vector<5x1xf32>
    %438 = vector.broadcast %437 : vector<5x1xf32> to vector<5x5xf32>
    %439 = arith.subf %400, %438 : vector<5x5xf32>
    %440 = math.exp %439 : vector<5x5xf32>
    %cst_130 = arith.constant dense<0.000000e+00> : vector<5xf32>
    %441 = vector.multi_reduction <add>, %440, %cst_130 [1] : vector<5x5xf32> to vector<5xf32>
    %442 = vector.shape_cast %441 : vector<5xf32> to vector<5x1xf32>
    %443 = tpu.reciprocal %442 {approx = true} : vector<5x1xf32> -> vector<5x1xf32>
    %444 = vector.broadcast %443 : vector<5x1xf32> to vector<5x5xf32>
    %445 = arith.mulf %440, %444 : vector<5x5xf32>
    %446 = arith.truncf %445 : vector<5x5xf32> to vector<5x5xbf16>
    %447 = vector.extract_strided_slice %395 {offsets = [0, 0], sizes = [5, 16], strides = [1, 1]} : vector<5x128xbf16> to vector<5x16xbf16>
    %cst_131 = arith.constant dense<0.000000e+00> : vector<5x16xf32>
    %448 = tpu.matmul %446, %447, %cst_131 {dimension_numbers = #tpu.dot_dimension_numbers<[1], [0], [0], [1], [0, 0, 1, 1], [], []>} : vector<5x5xbf16>, vector<5x16xbf16>, vector<5x16xf32> -> vector<5x16xf32>
    %cst_132 = arith.constant dense<0xFF800000> : vector<5xf32>
    %449 = vector.multi_reduction <maximumf>, %405, %cst_132 [1] : vector<5x5xf32> to vector<5xf32>
    %450 = vector.shape_cast %449 : vector<5xf32> to vector<5x1xf32>
    %451 = vector.broadcast %450 : vector<5x1xf32> to vector<5x5xf32>
    %452 = arith.subf %405, %451 : vector<5x5xf32>
    %453 = math.exp %452 : vector<5x5xf32>
    %cst_133 = arith.constant dense<0.000000e+00> : vector<5xf32>
    %454 = vector.multi_reduction <add>, %453, %cst_133 [1] : vector<5x5xf32> to vector<5xf32>
    %455 = vector.shape_cast %454 : vector<5xf32> to vector<5x1xf32>
    %456 = tpu.reciprocal %455 {approx = true} : vector<5x1xf32> -> vector<5x1xf32>
    %457 = vector.broadcast %456 : vector<5x1xf32> to vector<5x5xf32>
    %458 = arith.mulf %453, %457 : vector<5x5xf32>
    %459 = arith.truncf %458 : vector<5x5xf32> to vector<5x5xbf16>
    %460 = vector.extract_strided_slice %395 {offsets = [0, 16], sizes = [5, 16], strides = [1, 1]} : vector<5x128xbf16> to vector<5x16xbf16>
    %cst_134 = arith.constant dense<0.000000e+00> : vector<5x16xf32>
    %461 = tpu.matmul %459, %460, %cst_134 {dimension_numbers = #tpu.dot_dimension_numbers<[1], [0], [0], [1], [0, 0, 1, 1], [], []>} : vector<5x5xbf16>, vector<5x16xbf16>, vector<5x16xf32> -> vector<5x16xf32>
    %cst_135 = arith.constant dense<0xFF800000> : vector<5xf32>
    %462 = vector.multi_reduction <maximumf>, %410, %cst_135 [1] : vector<5x5xf32> to vector<5xf32>
    %463 = vector.shape_cast %462 : vector<5xf32> to vector<5x1xf32>
    %464 = vector.broadcast %463 : vector<5x1xf32> to vector<5x5xf32>
    %465 = arith.subf %410, %464 : vector<5x5xf32>
    %466 = math.exp %465 : vector<5x5xf32>
    %cst_136 = arith.constant dense<0.000000e+00> : vector<5xf32>
    %467 = vector.multi_reduction <add>, %466, %cst_136 [1] : vector<5x5xf32> to vector<5xf32>
    %468 = vector.shape_cast %467 : vector<5xf32> to vector<5x1xf32>
    %469 = tpu.reciprocal %468 {approx = true} : vector<5x1xf32> -> vector<5x1xf32>
    %470 = vector.broadcast %469 : vector<5x1xf32> to vector<5x5xf32>
    %471 = arith.mulf %466, %470 : vector<5x5xf32>
    %472 = arith.truncf %471 : vector<5x5xf32> to vector<5x5xbf16>
    %473 = vector.extract_strided_slice %395 {offsets = [0, 32], sizes = [5, 16], strides = [1, 1]} : vector<5x128xbf16> to vector<5x16xbf16>
    %cst_137 = arith.constant dense<0.000000e+00> : vector<5x16xf32>
    %474 = tpu.matmul %472, %473, %cst_137 {dimension_numbers = #tpu.dot_dimension_numbers<[1], [0], [0], [1], [0, 0, 1, 1], [], []>} : vector<5x5xbf16>, vector<5x16xbf16>, vector<5x16xf32> -> vector<5x16xf32>
    %cst_138 = arith.constant dense<0xFF800000> : vector<5xf32>
    %475 = vector.multi_reduction <maximumf>, %415, %cst_138 [1] : vector<5x5xf32> to vector<5xf32>
    %476 = vector.shape_cast %475 : vector<5xf32> to vector<5x1xf32>
    %477 = vector.broadcast %476 : vector<5x1xf32> to vector<5x5xf32>
    %478 = arith.subf %415, %477 : vector<5x5xf32>
    %479 = math.exp %478 : vector<5x5xf32>
    %cst_139 = arith.constant dense<0.000000e+00> : vector<5xf32>
    %480 = vector.multi_reduction <add>, %479, %cst_139 [1] : vector<5x5xf32> to vector<5xf32>
    %481 = vector.shape_cast %480 : vector<5xf32> to vector<5x1xf32>
    %482 = tpu.reciprocal %481 {approx = true} : vector<5x1xf32> -> vector<5x1xf32>
    %483 = vector.broadcast %482 : vector<5x1xf32> to vector<5x5xf32>
    %484 = arith.mulf %479, %483 : vector<5x5xf32>
    %485 = arith.truncf %484 : vector<5x5xf32> to vector<5x5xbf16>
    %486 = vector.extract_strided_slice %395 {offsets = [0, 48], sizes = [5, 16], strides = [1, 1]} : vector<5x128xbf16> to vector<5x16xbf16>
    %cst_140 = arith.constant dense<0.000000e+00> : vector<5x16xf32>
    %487 = tpu.matmul %485, %486, %cst_140 {dimension_numbers = #tpu.dot_dimension_numbers<[1], [0], [0], [1], [0, 0, 1, 1], [], []>} : vector<5x5xbf16>, vector<5x16xbf16>, vector<5x16xf32> -> vector<5x16xf32>
    %cst_141 = arith.constant dense<0xFF800000> : vector<5xf32>
    %488 = vector.multi_reduction <maximumf>, %420, %cst_141 [1] : vector<5x5xf32> to vector<5xf32>
    %489 = vector.shape_cast %488 : vector<5xf32> to vector<5x1xf32>
    %490 = vector.broadcast %489 : vector<5x1xf32> to vector<5x5xf32>
    %491 = arith.subf %420, %490 : vector<5x5xf32>
    %492 = math.exp %491 : vector<5x5xf32>
    %cst_142 = arith.constant dense<0.000000e+00> : vector<5xf32>
    %493 = vector.multi_reduction <add>, %492, %cst_142 [1] : vector<5x5xf32> to vector<5xf32>
    %494 = vector.shape_cast %493 : vector<5xf32> to vector<5x1xf32>
    %495 = tpu.reciprocal %494 {approx = true} : vector<5x1xf32> -> vector<5x1xf32>
    %496 = vector.broadcast %495 : vector<5x1xf32> to vector<5x5xf32>
    %497 = arith.mulf %492, %496 : vector<5x5xf32>
    %498 = arith.truncf %497 : vector<5x5xf32> to vector<5x5xbf16>
    %499 = vector.extract_strided_slice %395 {offsets = [0, 64], sizes = [5, 16], strides = [1, 1]} : vector<5x128xbf16> to vector<5x16xbf16>
    %cst_143 = arith.constant dense<0.000000e+00> : vector<5x16xf32>
    %500 = tpu.matmul %498, %499, %cst_143 {dimension_numbers = #tpu.dot_dimension_numbers<[1], [0], [0], [1], [0, 0, 1, 1], [], []>} : vector<5x5xbf16>, vector<5x16xbf16>, vector<5x16xf32> -> vector<5x16xf32>
    %cst_144 = arith.constant dense<0xFF800000> : vector<5xf32>
    %501 = vector.multi_reduction <maximumf>, %425, %cst_144 [1] : vector<5x5xf32> to vector<5xf32>
    %502 = vector.shape_cast %501 : vector<5xf32> to vector<5x1xf32>
    %503 = vector.broadcast %502 : vector<5x1xf32> to vector<5x5xf32>
    %504 = arith.subf %425, %503 : vector<5x5xf32>
    %505 = math.exp %504 : vector<5x5xf32>
    %cst_145 = arith.constant dense<0.000000e+00> : vector<5xf32>
    %506 = vector.multi_reduction <add>, %505, %cst_145 [1] : vector<5x5xf32> to vector<5xf32>
    %507 = vector.shape_cast %506 : vector<5xf32> to vector<5x1xf32>
    %508 = tpu.reciprocal %507 {approx = true} : vector<5x1xf32> -> vector<5x1xf32>
    %509 = vector.broadcast %508 : vector<5x1xf32> to vector<5x5xf32>
    %510 = arith.mulf %505, %509 : vector<5x5xf32>
    %511 = arith.truncf %510 : vector<5x5xf32> to vector<5x5xbf16>
    %512 = vector.extract_strided_slice %395 {offsets = [0, 80], sizes = [5, 16], strides = [1, 1]} : vector<5x128xbf16> to vector<5x16xbf16>
    %cst_146 = arith.constant dense<0.000000e+00> : vector<5x16xf32>
    %513 = tpu.matmul %511, %512, %cst_146 {dimension_numbers = #tpu.dot_dimension_numbers<[1], [0], [0], [1], [0, 0, 1, 1], [], []>} : vector<5x5xbf16>, vector<5x16xbf16>, vector<5x16xf32> -> vector<5x16xf32>
    %cst_147 = arith.constant dense<0xFF800000> : vector<5xf32>
    %514 = vector.multi_reduction <maximumf>, %430, %cst_147 [1] : vector<5x5xf32> to vector<5xf32>
    %515 = vector.shape_cast %514 : vector<5xf32> to vector<5x1xf32>
    %516 = vector.broadcast %515 : vector<5x1xf32> to vector<5x5xf32>
    %517 = arith.subf %430, %516 : vector<5x5xf32>
    %518 = math.exp %517 : vector<5x5xf32>
    %cst_148 = arith.constant dense<0.000000e+00> : vector<5xf32>
    %519 = vector.multi_reduction <add>, %518, %cst_148 [1] : vector<5x5xf32> to vector<5xf32>
    %520 = vector.shape_cast %519 : vector<5xf32> to vector<5x1xf32>
    %521 = tpu.reciprocal %520 {approx = true} : vector<5x1xf32> -> vector<5x1xf32>
    %522 = vector.broadcast %521 : vector<5x1xf32> to vector<5x5xf32>
    %523 = arith.mulf %518, %522 : vector<5x5xf32>
    %524 = arith.truncf %523 : vector<5x5xf32> to vector<5x5xbf16>
    %525 = vector.extract_strided_slice %395 {offsets = [0, 96], sizes = [5, 16], strides = [1, 1]} : vector<5x128xbf16> to vector<5x16xbf16>
    %cst_149 = arith.constant dense<0.000000e+00> : vector<5x16xf32>
    %526 = tpu.matmul %524, %525, %cst_149 {dimension_numbers = #tpu.dot_dimension_numbers<[1], [0], [0], [1], [0, 0, 1, 1], [], []>} : vector<5x5xbf16>, vector<5x16xbf16>, vector<5x16xf32> -> vector<5x16xf32>
    %cst_150 = arith.constant dense<0xFF800000> : vector<5xf32>
    %527 = vector.multi_reduction <maximumf>, %435, %cst_150 [1] : vector<5x5xf32> to vector<5xf32>
    %528 = vector.shape_cast %527 : vector<5xf32> to vector<5x1xf32>
    %529 = vector.broadcast %528 : vector<5x1xf32> to vector<5x5xf32>
    %530 = arith.subf %435, %529 : vector<5x5xf32>
    %531 = math.exp %530 : vector<5x5xf32>
    %cst_151 = arith.constant dense<0.000000e+00> : vector<5xf32>
    %532 = vector.multi_reduction <add>, %531, %cst_151 [1] : vector<5x5xf32> to vector<5xf32>
    %533 = vector.shape_cast %532 : vector<5xf32> to vector<5x1xf32>
    %534 = tpu.reciprocal %533 {approx = true} : vector<5x1xf32> -> vector<5x1xf32>
    %535 = vector.broadcast %534 : vector<5x1xf32> to vector<5x5xf32>
    %536 = arith.mulf %531, %535 : vector<5x5xf32>
    %537 = arith.truncf %536 : vector<5x5xf32> to vector<5x5xbf16>
    %538 = vector.extract_strided_slice %395 {offsets = [0, 112], sizes = [5, 16], strides = [1, 1]} : vector<5x128xbf16> to vector<5x16xbf16>
    %cst_152 = arith.constant dense<0.000000e+00> : vector<5x16xf32>
    %539 = tpu.matmul %537, %538, %cst_152 {dimension_numbers = #tpu.dot_dimension_numbers<[1], [0], [0], [1], [0, 0, 1, 1], [], []>} : vector<5x5xbf16>, vector<5x16xbf16>, vector<5x16xf32> -> vector<5x16xf32>
    %540 = tpu.concatenate %448, %461, %474, %487, %500, %513, %526, %539 in 1 : vector<5x16xf32>, vector<5x16xf32>, vector<5x16xf32>, vector<5x16xf32>, vector<5x16xf32>, vector<5x16xf32>, vector<5x16xf32>, vector<5x16xf32> -> vector<5x128xf32>
    %541 = vector.extract_strided_slice %390 {offsets = [5, 0], sizes = [5, 128], strides = [1, 1]} : vector<10x128xbf16> to vector<5x128xbf16>
    %542 = vector.extract_strided_slice %391 {offsets = [5, 0], sizes = [5, 128], strides = [1, 1]} : vector<10x128xbf16> to vector<5x128xbf16>
    %543 = vector.extract_strided_slice %392 {offsets = [5, 0], sizes = [5, 128], strides = [1, 1]} : vector<10x128xbf16> to vector<5x128xbf16>
    %544 = vector.extract_strided_slice %541 {offsets = [0, 0], sizes = [5, 16], strides = [1, 1]} : vector<5x128xbf16> to vector<5x16xbf16>
    %545 = vector.extract_strided_slice %542 {offsets = [0, 0], sizes = [5, 16], strides = [1, 1]} : vector<5x128xbf16> to vector<5x16xbf16>
    %cst_153 = arith.constant dense<0.000000e+00> : vector<5x5xf32>
    %546 = tpu.matmul %544, %545, %cst_153 {dimension_numbers = #tpu.dot_dimension_numbers<[1], [1], [0], [0], [0, 0, 1, 0], [], []>} : vector<5x16xbf16>, vector<5x16xbf16>, vector<5x5xf32> -> vector<5x5xf32>
    %cst_154 = arith.constant 2.500000e-01 : f32
    %547 = vector.broadcast %cst_154 : f32 to vector<5x5xf32>
    %548 = arith.mulf %546, %547 : vector<5x5xf32>
    %549 = vector.extract_strided_slice %541 {offsets = [0, 16], sizes = [5, 16], strides = [1, 1]} : vector<5x128xbf16> to vector<5x16xbf16>
    %550 = vector.extract_strided_slice %542 {offsets = [0, 16], sizes = [5, 16], strides = [1, 1]} : vector<5x128xbf16> to vector<5x16xbf16>
    %cst_155 = arith.constant dense<0.000000e+00> : vector<5x5xf32>
    %551 = tpu.matmul %549, %550, %cst_155 {dimension_numbers = #tpu.dot_dimension_numbers<[1], [1], [0], [0], [0, 0, 1, 0], [], []>} : vector<5x16xbf16>, vector<5x16xbf16>, vector<5x5xf32> -> vector<5x5xf32>
    %cst_156 = arith.constant 2.500000e-01 : f32
    %552 = vector.broadcast %cst_156 : f32 to vector<5x5xf32>
    %553 = arith.mulf %551, %552 : vector<5x5xf32>
    %554 = vector.extract_strided_slice %541 {offsets = [0, 32], sizes = [5, 16], strides = [1, 1]} : vector<5x128xbf16> to vector<5x16xbf16>
    %555 = vector.extract_strided_slice %542 {offsets = [0, 32], sizes = [5, 16], strides = [1, 1]} : vector<5x128xbf16> to vector<5x16xbf16>
    %cst_157 = arith.constant dense<0.000000e+00> : vector<5x5xf32>
    %556 = tpu.matmul %554, %555, %cst_157 {dimension_numbers = #tpu.dot_dimension_numbers<[1], [1], [0], [0], [0, 0, 1, 0], [], []>} : vector<5x16xbf16>, vector<5x16xbf16>, vector<5x5xf32> -> vector<5x5xf32>
    %cst_158 = arith.constant 2.500000e-01 : f32
    %557 = vector.broadcast %cst_158 : f32 to vector<5x5xf32>
    %558 = arith.mulf %556, %557 : vector<5x5xf32>
    %559 = vector.extract_strided_slice %541 {offsets = [0, 48], sizes = [5, 16], strides = [1, 1]} : vector<5x128xbf16> to vector<5x16xbf16>
    %560 = vector.extract_strided_slice %542 {offsets = [0, 48], sizes = [5, 16], strides = [1, 1]} : vector<5x128xbf16> to vector<5x16xbf16>
    %cst_159 = arith.constant dense<0.000000e+00> : vector<5x5xf32>
    %561 = tpu.matmul %559, %560, %cst_159 {dimension_numbers = #tpu.dot_dimension_numbers<[1], [1], [0], [0], [0, 0, 1, 0], [], []>} : vector<5x16xbf16>, vector<5x16xbf16>, vector<5x5xf32> -> vector<5x5xf32>
    %cst_160 = arith.constant 2.500000e-01 : f32
    %562 = vector.broadcast %cst_160 : f32 to vector<5x5xf32>
    %563 = arith.mulf %561, %562 : vector<5x5xf32>
    %564 = vector.extract_strided_slice %541 {offsets = [0, 64], sizes = [5, 16], strides = [1, 1]} : vector<5x128xbf16> to vector<5x16xbf16>
    %565 = vector.extract_strided_slice %542 {offsets = [0, 64], sizes = [5, 16], strides = [1, 1]} : vector<5x128xbf16> to vector<5x16xbf16>
    %cst_161 = arith.constant dense<0.000000e+00> : vector<5x5xf32>
    %566 = tpu.matmul %564, %565, %cst_161 {dimension_numbers = #tpu.dot_dimension_numbers<[1], [1], [0], [0], [0, 0, 1, 0], [], []>} : vector<5x16xbf16>, vector<5x16xbf16>, vector<5x5xf32> -> vector<5x5xf32>
    %cst_162 = arith.constant 2.500000e-01 : f32
    %567 = vector.broadcast %cst_162 : f32 to vector<5x5xf32>
    %568 = arith.mulf %566, %567 : vector<5x5xf32>
    %569 = vector.extract_strided_slice %541 {offsets = [0, 80], sizes = [5, 16], strides = [1, 1]} : vector<5x128xbf16> to vector<5x16xbf16>
    %570 = vector.extract_strided_slice %542 {offsets = [0, 80], sizes = [5, 16], strides = [1, 1]} : vector<5x128xbf16> to vector<5x16xbf16>
    %cst_163 = arith.constant dense<0.000000e+00> : vector<5x5xf32>
    %571 = tpu.matmul %569, %570, %cst_163 {dimension_numbers = #tpu.dot_dimension_numbers<[1], [1], [0], [0], [0, 0, 1, 0], [], []>} : vector<5x16xbf16>, vector<5x16xbf16>, vector<5x5xf32> -> vector<5x5xf32>
    %cst_164 = arith.constant 2.500000e-01 : f32
    %572 = vector.broadcast %cst_164 : f32 to vector<5x5xf32>
    %573 = arith.mulf %571, %572 : vector<5x5xf32>
    %574 = vector.extract_strided_slice %541 {offsets = [0, 96], sizes = [5, 16], strides = [1, 1]} : vector<5x128xbf16> to vector<5x16xbf16>
    %575 = vector.extract_strided_slice %542 {offsets = [0, 96], sizes = [5, 16], strides = [1, 1]} : vector<5x128xbf16> to vector<5x16xbf16>
    %cst_165 = arith.constant dense<0.000000e+00> : vector<5x5xf32>
    %576 = tpu.matmul %574, %575, %cst_165 {dimension_numbers = #tpu.dot_dimension_numbers<[1], [1], [0], [0], [0, 0, 1, 0], [], []>} : vector<5x16xbf16>, vector<5x16xbf16>, vector<5x5xf32> -> vector<5x5xf32>
    %cst_166 = arith.constant 2.500000e-01 : f32
    %577 = vector.broadcast %cst_166 : f32 to vector<5x5xf32>
    %578 = arith.mulf %576, %577 : vector<5x5xf32>
    %579 = vector.extract_strided_slice %541 {offsets = [0, 112], sizes = [5, 16], strides = [1, 1]} : vector<5x128xbf16> to vector<5x16xbf16>
    %580 = vector.extract_strided_slice %542 {offsets = [0, 112], sizes = [5, 16], strides = [1, 1]} : vector<5x128xbf16> to vector<5x16xbf16>
    %cst_167 = arith.constant dense<0.000000e+00> : vector<5x5xf32>
    %581 = tpu.matmul %579, %580, %cst_167 {dimension_numbers = #tpu.dot_dimension_numbers<[1], [1], [0], [0], [0, 0, 1, 0], [], []>} : vector<5x16xbf16>, vector<5x16xbf16>, vector<5x5xf32> -> vector<5x5xf32>
    %cst_168 = arith.constant 2.500000e-01 : f32
    %582 = vector.broadcast %cst_168 : f32 to vector<5x5xf32>
    %583 = arith.mulf %581, %582 : vector<5x5xf32>
    %cst_169 = arith.constant dense<0xFF800000> : vector<5xf32>
    %584 = vector.multi_reduction <maximumf>, %548, %cst_169 [1] : vector<5x5xf32> to vector<5xf32>
    %585 = vector.shape_cast %584 : vector<5xf32> to vector<5x1xf32>
    %586 = vector.broadcast %585 : vector<5x1xf32> to vector<5x5xf32>
    %587 = arith.subf %548, %586 : vector<5x5xf32>
    %588 = math.exp %587 : vector<5x5xf32>
    %cst_170 = arith.constant dense<0.000000e+00> : vector<5xf32>
    %589 = vector.multi_reduction <add>, %588, %cst_170 [1] : vector<5x5xf32> to vector<5xf32>
    %590 = vector.shape_cast %589 : vector<5xf32> to vector<5x1xf32>
    %591 = tpu.reciprocal %590 {approx = true} : vector<5x1xf32> -> vector<5x1xf32>
    %592 = vector.broadcast %591 : vector<5x1xf32> to vector<5x5xf32>
    %593 = arith.mulf %588, %592 : vector<5x5xf32>
    %594 = arith.truncf %593 : vector<5x5xf32> to vector<5x5xbf16>
    %595 = vector.extract_strided_slice %543 {offsets = [0, 0], sizes = [5, 16], strides = [1, 1]} : vector<5x128xbf16> to vector<5x16xbf16>
    %cst_171 = arith.constant dense<0.000000e+00> : vector<5x16xf32>
    %596 = tpu.matmul %594, %595, %cst_171 {dimension_numbers = #tpu.dot_dimension_numbers<[1], [0], [0], [1], [0, 0, 1, 1], [], []>} : vector<5x5xbf16>, vector<5x16xbf16>, vector<5x16xf32> -> vector<5x16xf32>
    %cst_172 = arith.constant dense<0xFF800000> : vector<5xf32>
    %597 = vector.multi_reduction <maximumf>, %553, %cst_172 [1] : vector<5x5xf32> to vector<5xf32>
    %598 = vector.shape_cast %597 : vector<5xf32> to vector<5x1xf32>
    %599 = vector.broadcast %598 : vector<5x1xf32> to vector<5x5xf32>
    %600 = arith.subf %553, %599 : vector<5x5xf32>
    %601 = math.exp %600 : vector<5x5xf32>
    %cst_173 = arith.constant dense<0.000000e+00> : vector<5xf32>
    %602 = vector.multi_reduction <add>, %601, %cst_173 [1] : vector<5x5xf32> to vector<5xf32>
    %603 = vector.shape_cast %602 : vector<5xf32> to vector<5x1xf32>
    %604 = tpu.reciprocal %603 {approx = true} : vector<5x1xf32> -> vector<5x1xf32>
    %605 = vector.broadcast %604 : vector<5x1xf32> to vector<5x5xf32>
    %606 = arith.mulf %601, %605 : vector<5x5xf32>
    %607 = arith.truncf %606 : vector<5x5xf32> to vector<5x5xbf16>
    %608 = vector.extract_strided_slice %543 {offsets = [0, 16], sizes = [5, 16], strides = [1, 1]} : vector<5x128xbf16> to vector<5x16xbf16>
    %cst_174 = arith.constant dense<0.000000e+00> : vector<5x16xf32>
    %609 = tpu.matmul %607, %608, %cst_174 {dimension_numbers = #tpu.dot_dimension_numbers<[1], [0], [0], [1], [0, 0, 1, 1], [], []>} : vector<5x5xbf16>, vector<5x16xbf16>, vector<5x16xf32> -> vector<5x16xf32>
    %cst_175 = arith.constant dense<0xFF800000> : vector<5xf32>
    %610 = vector.multi_reduction <maximumf>, %558, %cst_175 [1] : vector<5x5xf32> to vector<5xf32>
    %611 = vector.shape_cast %610 : vector<5xf32> to vector<5x1xf32>
    %612 = vector.broadcast %611 : vector<5x1xf32> to vector<5x5xf32>
    %613 = arith.subf %558, %612 : vector<5x5xf32>
    %614 = math.exp %613 : vector<5x5xf32>
    %cst_176 = arith.constant dense<0.000000e+00> : vector<5xf32>
    %615 = vector.multi_reduction <add>, %614, %cst_176 [1] : vector<5x5xf32> to vector<5xf32>
    %616 = vector.shape_cast %615 : vector<5xf32> to vector<5x1xf32>
    %617 = tpu.reciprocal %616 {approx = true} : vector<5x1xf32> -> vector<5x1xf32>
    %618 = vector.broadcast %617 : vector<5x1xf32> to vector<5x5xf32>
    %619 = arith.mulf %614, %618 : vector<5x5xf32>
    %620 = arith.truncf %619 : vector<5x5xf32> to vector<5x5xbf16>
    %621 = vector.extract_strided_slice %543 {offsets = [0, 32], sizes = [5, 16], strides = [1, 1]} : vector<5x128xbf16> to vector<5x16xbf16>
    %cst_177 = arith.constant dense<0.000000e+00> : vector<5x16xf32>
    %622 = tpu.matmul %620, %621, %cst_177 {dimension_numbers = #tpu.dot_dimension_numbers<[1], [0], [0], [1], [0, 0, 1, 1], [], []>} : vector<5x5xbf16>, vector<5x16xbf16>, vector<5x16xf32> -> vector<5x16xf32>
    %cst_178 = arith.constant dense<0xFF800000> : vector<5xf32>
    %623 = vector.multi_reduction <maximumf>, %563, %cst_178 [1] : vector<5x5xf32> to vector<5xf32>
    %624 = vector.shape_cast %623 : vector<5xf32> to vector<5x1xf32>
    %625 = vector.broadcast %624 : vector<5x1xf32> to vector<5x5xf32>
    %626 = arith.subf %563, %625 : vector<5x5xf32>
    %627 = math.exp %626 : vector<5x5xf32>
    %cst_179 = arith.constant dense<0.000000e+00> : vector<5xf32>
    %628 = vector.multi_reduction <add>, %627, %cst_179 [1] : vector<5x5xf32> to vector<5xf32>
    %629 = vector.shape_cast %628 : vector<5xf32> to vector<5x1xf32>
    %630 = tpu.reciprocal %629 {approx = true} : vector<5x1xf32> -> vector<5x1xf32>
    %631 = vector.broadcast %630 : vector<5x1xf32> to vector<5x5xf32>
    %632 = arith.mulf %627, %631 : vector<5x5xf32>
    %633 = arith.truncf %632 : vector<5x5xf32> to vector<5x5xbf16>
    %634 = vector.extract_strided_slice %543 {offsets = [0, 48], sizes = [5, 16], strides = [1, 1]} : vector<5x128xbf16> to vector<5x16xbf16>
    %cst_180 = arith.constant dense<0.000000e+00> : vector<5x16xf32>
    %635 = tpu.matmul %633, %634, %cst_180 {dimension_numbers = #tpu.dot_dimension_numbers<[1], [0], [0], [1], [0, 0, 1, 1], [], []>} : vector<5x5xbf16>, vector<5x16xbf16>, vector<5x16xf32> -> vector<5x16xf32>
    %cst_181 = arith.constant dense<0xFF800000> : vector<5xf32>
    %636 = vector.multi_reduction <maximumf>, %568, %cst_181 [1] : vector<5x5xf32> to vector<5xf32>
    %637 = vector.shape_cast %636 : vector<5xf32> to vector<5x1xf32>
    %638 = vector.broadcast %637 : vector<5x1xf32> to vector<5x5xf32>
    %639 = arith.subf %568, %638 : vector<5x5xf32>
    %640 = math.exp %639 : vector<5x5xf32>
    %cst_182 = arith.constant dense<0.000000e+00> : vector<5xf32>
    %641 = vector.multi_reduction <add>, %640, %cst_182 [1] : vector<5x5xf32> to vector<5xf32>
    %642 = vector.shape_cast %641 : vector<5xf32> to vector<5x1xf32>
    %643 = tpu.reciprocal %642 {approx = true} : vector<5x1xf32> -> vector<5x1xf32>
    %644 = vector.broadcast %643 : vector<5x1xf32> to vector<5x5xf32>
    %645 = arith.mulf %640, %644 : vector<5x5xf32>
    %646 = arith.truncf %645 : vector<5x5xf32> to vector<5x5xbf16>
    %647 = vector.extract_strided_slice %543 {offsets = [0, 64], sizes = [5, 16], strides = [1, 1]} : vector<5x128xbf16> to vector<5x16xbf16>
    %cst_183 = arith.constant dense<0.000000e+00> : vector<5x16xf32>
    %648 = tpu.matmul %646, %647, %cst_183 {dimension_numbers = #tpu.dot_dimension_numbers<[1], [0], [0], [1], [0, 0, 1, 1], [], []>} : vector<5x5xbf16>, vector<5x16xbf16>, vector<5x16xf32> -> vector<5x16xf32>
    %cst_184 = arith.constant dense<0xFF800000> : vector<5xf32>
    %649 = vector.multi_reduction <maximumf>, %573, %cst_184 [1] : vector<5x5xf32> to vector<5xf32>
    %650 = vector.shape_cast %649 : vector<5xf32> to vector<5x1xf32>
    %651 = vector.broadcast %650 : vector<5x1xf32> to vector<5x5xf32>
    %652 = arith.subf %573, %651 : vector<5x5xf32>
    %653 = math.exp %652 : vector<5x5xf32>
    %cst_185 = arith.constant dense<0.000000e+00> : vector<5xf32>
    %654 = vector.multi_reduction <add>, %653, %cst_185 [1] : vector<5x5xf32> to vector<5xf32>
    %655 = vector.shape_cast %654 : vector<5xf32> to vector<5x1xf32>
    %656 = tpu.reciprocal %655 {approx = true} : vector<5x1xf32> -> vector<5x1xf32>
    %657 = vector.broadcast %656 : vector<5x1xf32> to vector<5x5xf32>
    %658 = arith.mulf %653, %657 : vector<5x5xf32>
    %659 = arith.truncf %658 : vector<5x5xf32> to vector<5x5xbf16>
    %660 = vector.extract_strided_slice %543 {offsets = [0, 80], sizes = [5, 16], strides = [1, 1]} : vector<5x128xbf16> to vector<5x16xbf16>
    %cst_186 = arith.constant dense<0.000000e+00> : vector<5x16xf32>
    %661 = tpu.matmul %659, %660, %cst_186 {dimension_numbers = #tpu.dot_dimension_numbers<[1], [0], [0], [1], [0, 0, 1, 1], [], []>} : vector<5x5xbf16>, vector<5x16xbf16>, vector<5x16xf32> -> vector<5x16xf32>
    %cst_187 = arith.constant dense<0xFF800000> : vector<5xf32>
    %662 = vector.multi_reduction <maximumf>, %578, %cst_187 [1] : vector<5x5xf32> to vector<5xf32>
    %663 = vector.shape_cast %662 : vector<5xf32> to vector<5x1xf32>
    %664 = vector.broadcast %663 : vector<5x1xf32> to vector<5x5xf32>
    %665 = arith.subf %578, %664 : vector<5x5xf32>
    %666 = math.exp %665 : vector<5x5xf32>
    %cst_188 = arith.constant dense<0.000000e+00> : vector<5xf32>
    %667 = vector.multi_reduction <add>, %666, %cst_188 [1] : vector<5x5xf32> to vector<5xf32>
    %668 = vector.shape_cast %667 : vector<5xf32> to vector<5x1xf32>
    %669 = tpu.reciprocal %668 {approx = true} : vector<5x1xf32> -> vector<5x1xf32>
    %670 = vector.broadcast %669 : vector<5x1xf32> to vector<5x5xf32>
    %671 = arith.mulf %666, %670 : vector<5x5xf32>
    %672 = arith.truncf %671 : vector<5x5xf32> to vector<5x5xbf16>
    %673 = vector.extract_strided_slice %543 {offsets = [0, 96], sizes = [5, 16], strides = [1, 1]} : vector<5x128xbf16> to vector<5x16xbf16>
    %cst_189 = arith.constant dense<0.000000e+00> : vector<5x16xf32>
    %674 = tpu.matmul %672, %673, %cst_189 {dimension_numbers = #tpu.dot_dimension_numbers<[1], [0], [0], [1], [0, 0, 1, 1], [], []>} : vector<5x5xbf16>, vector<5x16xbf16>, vector<5x16xf32> -> vector<5x16xf32>
    %cst_190 = arith.constant dense<0xFF800000> : vector<5xf32>
    %675 = vector.multi_reduction <maximumf>, %583, %cst_190 [1] : vector<5x5xf32> to vector<5xf32>
    %676 = vector.shape_cast %675 : vector<5xf32> to vector<5x1xf32>
    %677 = vector.broadcast %676 : vector<5x1xf32> to vector<5x5xf32>
    %678 = arith.subf %583, %677 : vector<5x5xf32>
    %679 = math.exp %678 : vector<5x5xf32>
    %cst_191 = arith.constant dense<0.000000e+00> : vector<5xf32>
    %680 = vector.multi_reduction <add>, %679, %cst_191 [1] : vector<5x5xf32> to vector<5xf32>
    %681 = vector.shape_cast %680 : vector<5xf32> to vector<5x1xf32>
    %682 = tpu.reciprocal %681 {approx = true} : vector<5x1xf32> -> vector<5x1xf32>
    %683 = vector.broadcast %682 : vector<5x1xf32> to vector<5x5xf32>
    %684 = arith.mulf %679, %683 : vector<5x5xf32>
    %685 = arith.truncf %684 : vector<5x5xf32> to vector<5x5xbf16>
    %686 = vector.extract_strided_slice %543 {offsets = [0, 112], sizes = [5, 16], strides = [1, 1]} : vector<5x128xbf16> to vector<5x16xbf16>
    %cst_192 = arith.constant dense<0.000000e+00> : vector<5x16xf32>
    %687 = tpu.matmul %685, %686, %cst_192 {dimension_numbers = #tpu.dot_dimension_numbers<[1], [0], [0], [1], [0, 0, 1, 1], [], []>} : vector<5x5xbf16>, vector<5x16xbf16>, vector<5x16xf32> -> vector<5x16xf32>
    %688 = tpu.concatenate %596, %609, %622, %635, %648, %661, %674, %687 in 1 : vector<5x16xf32>, vector<5x16xf32>, vector<5x16xf32>, vector<5x16xf32>, vector<5x16xf32>, vector<5x16xf32>, vector<5x16xf32>, vector<5x16xf32> -> vector<5x128xf32>
    %689 = tpu.concatenate %540, %688 in 0 : vector<5x128xf32>, vector<5x128xf32> -> vector<10x128xf32>
    %c0_193 = arith.constant 0 : index
    %c1152 = arith.constant 1152 : index
    %690 = vector.load %arg3[%c0_193, %c1152] : memref<128x2432xbf16, #tpu.memory_space<vmem>>, vector<128x128xbf16>
    %691 = arith.truncf %689 : vector<10x128xf32> to vector<10x128xbf16>
    %cst_194 = arith.constant dense<0.000000e+00> : vector<10x128xf32>
    %692 = tpu.matmul %691, %690, %cst_194 {dimension_numbers = #tpu.dot_dimension_numbers<[1], [0], [0], [1], [0, 0, 1, 1], [], []>} : vector<10x128xbf16>, vector<128x128xbf16>, vector<10x128xf32> -> vector<10x128xf32>
    %c12 = arith.constant 12 : index
    %c0_195 = arith.constant 0 : index
    %693 = vector.load %arg4[%c12, %c0_195] : memref<50x128xf32, #tpu.memory_space<vmem>>, vector<1x128xf32>
    %694 = vector.broadcast %693 : vector<1x128xf32> to vector<10x128xf32>
    %695 = arith.addf %692, %694 : vector<10x128xf32>
    %696 = arith.addf %374, %695 : vector<10x128xf32>
    %c13 = arith.constant 13 : index
    %c0_196 = arith.constant 0 : index
    %697 = vector.load %arg4[%c13, %c0_196] : memref<50x128xf32, #tpu.memory_space<vmem>>, vector<1x128xf32>
    %c14 = arith.constant 14 : index
    %c0_197 = arith.constant 0 : index
    %698 = vector.load %arg4[%c14, %c0_197] : memref<50x128xf32, #tpu.memory_space<vmem>>, vector<1x128xf32>
    %cst_198 = arith.constant dense<0.000000e+00> : vector<10xf32>
    %699 = vector.multi_reduction <add>, %696, %cst_198 [1] : vector<10x128xf32> to vector<10xf32>
    %700 = vector.shape_cast %699 : vector<10xf32> to vector<10x1xf32>
    %cst_199 = arith.constant 1.280000e+02 : f32
    %701 = vector.broadcast %cst_199 : f32 to vector<10x1xf32>
    %702 = arith.divf %700, %701 : vector<10x1xf32>
    %703 = vector.broadcast %702 : vector<10x1xf32> to vector<10x128xf32>
    %704 = arith.subf %696, %703 : vector<10x128xf32>
    %705 = arith.mulf %704, %704 : vector<10x128xf32>
    %cst_200 = arith.constant dense<0.000000e+00> : vector<10xf32>
    %706 = vector.multi_reduction <add>, %705, %cst_200 [1] : vector<10x128xf32> to vector<10xf32>
    %707 = vector.shape_cast %706 : vector<10xf32> to vector<10x1xf32>
    %cst_201 = arith.constant 1.280000e+02 : f32
    %708 = vector.broadcast %cst_201 : f32 to vector<10x1xf32>
    %709 = arith.divf %707, %708 : vector<10x1xf32>
    %cst_202 = arith.constant 9.99999974E-6 : f32
    %710 = vector.broadcast %cst_202 : f32 to vector<10x1xf32>
    %711 = arith.addf %709, %710 : vector<10x1xf32>
    %712 = math.rsqrt %711 : vector<10x1xf32>
    %713 = vector.broadcast %712 : vector<10x1xf32> to vector<10x128xf32>
    %714 = arith.mulf %704, %713 : vector<10x128xf32>
    %715 = vector.broadcast %697 : vector<1x128xf32> to vector<10x128xf32>
    %716 = arith.mulf %714, %715 : vector<10x128xf32>
    %717 = vector.broadcast %698 : vector<1x128xf32> to vector<10x128xf32>
    %718 = arith.addf %716, %717 : vector<10x128xf32>
    %c0_203 = arith.constant 0 : index
    %c1280 = arith.constant 1280 : index
    %719 = vector.load %arg3[%c0_203, %c1280] : memref<128x2432xbf16, #tpu.memory_space<vmem>>, vector<128x128xbf16>
    %720 = arith.truncf %718 : vector<10x128xf32> to vector<10x128xbf16>
    %cst_204 = arith.constant dense<0.000000e+00> : vector<10x128xf32>
    %721 = tpu.matmul %720, %719, %cst_204 {dimension_numbers = #tpu.dot_dimension_numbers<[1], [0], [0], [1], [0, 0, 1, 1], [], []>} : vector<10x128xbf16>, vector<128x128xbf16>, vector<10x128xf32> -> vector<10x128xf32>
    %c15 = arith.constant 15 : index
    %c0_205 = arith.constant 0 : index
    %722 = vector.load %arg4[%c15, %c0_205] : memref<50x128xf32, #tpu.memory_space<vmem>>, vector<1x128xf32>
    %723 = vector.broadcast %722 : vector<1x128xf32> to vector<10x128xf32>
    %724 = arith.addf %721, %723 : vector<10x128xf32>
    %cst_206 = arith.constant 0.000000e+00 : f32
    %725 = vector.broadcast %cst_206 : f32 to vector<10x128xf32>
    %726 = arith.maximumf %724, %725 : vector<10x128xf32>
    %c0_207 = arith.constant 0 : index
    %c1408 = arith.constant 1408 : index
    %727 = vector.load %arg3[%c0_207, %c1408] : memref<128x2432xbf16, #tpu.memory_space<vmem>>, vector<128x128xbf16>
    %728 = arith.truncf %726 : vector<10x128xf32> to vector<10x128xbf16>
    %cst_208 = arith.constant dense<0.000000e+00> : vector<10x128xf32>
    %729 = tpu.matmul %728, %727, %cst_208 {dimension_numbers = #tpu.dot_dimension_numbers<[1], [0], [0], [1], [0, 0, 1, 1], [], []>} : vector<10x128xbf16>, vector<128x128xbf16>, vector<10x128xf32> -> vector<10x128xf32>
    %c16 = arith.constant 16 : index
    %c0_209 = arith.constant 0 : index
    %730 = vector.load %arg4[%c16, %c0_209] : memref<50x128xf32, #tpu.memory_space<vmem>>, vector<1x128xf32>
    %731 = vector.broadcast %730 : vector<1x128xf32> to vector<10x128xf32>
    %732 = arith.addf %729, %731 : vector<10x128xf32>
    %733 = arith.addf %718, %732 : vector<10x128xf32>
    %c17 = arith.constant 17 : index
    %c0_210 = arith.constant 0 : index
    %734 = vector.load %arg4[%c17, %c0_210] : memref<50x128xf32, #tpu.memory_space<vmem>>, vector<1x128xf32>
    %c18 = arith.constant 18 : index
    %c0_211 = arith.constant 0 : index
    %735 = vector.load %arg4[%c18, %c0_211] : memref<50x128xf32, #tpu.memory_space<vmem>>, vector<1x128xf32>
    %cst_212 = arith.constant dense<0.000000e+00> : vector<10xf32>
    %736 = vector.multi_reduction <add>, %733, %cst_212 [1] : vector<10x128xf32> to vector<10xf32>
    %737 = vector.shape_cast %736 : vector<10xf32> to vector<10x1xf32>
    %cst_213 = arith.constant 1.280000e+02 : f32
    %738 = vector.broadcast %cst_213 : f32 to vector<10x1xf32>
    %739 = arith.divf %737, %738 : vector<10x1xf32>
    %740 = vector.broadcast %739 : vector<10x1xf32> to vector<10x128xf32>
    %741 = arith.subf %733, %740 : vector<10x128xf32>
    %742 = arith.mulf %741, %741 : vector<10x128xf32>
    %cst_214 = arith.constant dense<0.000000e+00> : vector<10xf32>
    %743 = vector.multi_reduction <add>, %742, %cst_214 [1] : vector<10x128xf32> to vector<10xf32>
    %744 = vector.shape_cast %743 : vector<10xf32> to vector<10x1xf32>
    %cst_215 = arith.constant 1.280000e+02 : f32
    %745 = vector.broadcast %cst_215 : f32 to vector<10x1xf32>
    %746 = arith.divf %744, %745 : vector<10x1xf32>
    %cst_216 = arith.constant 9.99999974E-6 : f32
    %747 = vector.broadcast %cst_216 : f32 to vector<10x1xf32>
    %748 = arith.addf %746, %747 : vector<10x1xf32>
    %749 = math.rsqrt %748 : vector<10x1xf32>
    %750 = vector.broadcast %749 : vector<10x1xf32> to vector<10x128xf32>
    %751 = arith.mulf %741, %750 : vector<10x128xf32>
    %752 = vector.broadcast %734 : vector<1x128xf32> to vector<10x128xf32>
    %753 = arith.mulf %751, %752 : vector<10x128xf32>
    %754 = vector.broadcast %735 : vector<1x128xf32> to vector<10x128xf32>
    %755 = arith.addf %753, %754 : vector<10x128xf32>
    %c0_217 = arith.constant 0 : index
    %c1536 = arith.constant 1536 : index
    %756 = vector.load %arg3[%c0_217, %c1536] : memref<128x2432xbf16, #tpu.memory_space<vmem>>, vector<128x384xbf16>
    %757 = arith.truncf %755 : vector<10x128xf32> to vector<10x128xbf16>
    %cst_218 = arith.constant dense<0.000000e+00> : vector<10x384xf32>
    %758 = tpu.matmul %757, %756, %cst_218 {dimension_numbers = #tpu.dot_dimension_numbers<[1], [0], [0], [1], [0, 0, 1, 1], [], []>} : vector<10x128xbf16>, vector<128x384xbf16>, vector<10x384xf32> -> vector<10x384xf32>
    %759 = vector.extract_strided_slice %758 {offsets = [0, 0], sizes = [10, 128], strides = [1, 1]} : vector<10x384xf32> to vector<10x128xf32>
    %c19 = arith.constant 19 : index
    %c0_219 = arith.constant 0 : index
    %760 = vector.load %arg4[%c19, %c0_219] : memref<50x128xf32, #tpu.memory_space<vmem>>, vector<1x128xf32>
    %761 = vector.broadcast %760 : vector<1x128xf32> to vector<10x128xf32>
    %762 = arith.addf %759, %761 : vector<10x128xf32>
    %763 = vector.extract_strided_slice %758 {offsets = [0, 128], sizes = [10, 128], strides = [1, 1]} : vector<10x384xf32> to vector<10x128xf32>
    %c20 = arith.constant 20 : index
    %c0_220 = arith.constant 0 : index
    %764 = vector.load %arg4[%c20, %c0_220] : memref<50x128xf32, #tpu.memory_space<vmem>>, vector<1x128xf32>
    %765 = vector.broadcast %764 : vector<1x128xf32> to vector<10x128xf32>
    %766 = arith.addf %763, %765 : vector<10x128xf32>
    %767 = vector.extract_strided_slice %758 {offsets = [0, 256], sizes = [10, 128], strides = [1, 1]} : vector<10x384xf32> to vector<10x128xf32>
    %c21 = arith.constant 21 : index
    %c0_221 = arith.constant 0 : index
    %768 = vector.load %arg4[%c21, %c0_221] : memref<50x128xf32, #tpu.memory_space<vmem>>, vector<1x128xf32>
    %769 = vector.broadcast %768 : vector<1x128xf32> to vector<10x128xf32>
    %770 = arith.addf %767, %769 : vector<10x128xf32>
    %771 = arith.truncf %762 : vector<10x128xf32> to vector<10x128xbf16>
    %772 = arith.truncf %766 : vector<10x128xf32> to vector<10x128xbf16>
    %773 = arith.truncf %770 : vector<10x128xf32> to vector<10x128xbf16>
    %774 = vector.extract_strided_slice %771 {offsets = [0, 0], sizes = [5, 128], strides = [1, 1]} : vector<10x128xbf16> to vector<5x128xbf16>
    %775 = vector.extract_strided_slice %772 {offsets = [0, 0], sizes = [5, 128], strides = [1, 1]} : vector<10x128xbf16> to vector<5x128xbf16>
    %776 = vector.extract_strided_slice %773 {offsets = [0, 0], sizes = [5, 128], strides = [1, 1]} : vector<10x128xbf16> to vector<5x128xbf16>
    %777 = vector.extract_strided_slice %774 {offsets = [0, 0], sizes = [5, 16], strides = [1, 1]} : vector<5x128xbf16> to vector<5x16xbf16>
    %778 = vector.extract_strided_slice %775 {offsets = [0, 0], sizes = [5, 16], strides = [1, 1]} : vector<5x128xbf16> to vector<5x16xbf16>
    %cst_222 = arith.constant dense<0.000000e+00> : vector<5x5xf32>
    %779 = tpu.matmul %777, %778, %cst_222 {dimension_numbers = #tpu.dot_dimension_numbers<[1], [1], [0], [0], [0, 0, 1, 0], [], []>} : vector<5x16xbf16>, vector<5x16xbf16>, vector<5x5xf32> -> vector<5x5xf32>
    %cst_223 = arith.constant 2.500000e-01 : f32
    %780 = vector.broadcast %cst_223 : f32 to vector<5x5xf32>
    %781 = arith.mulf %779, %780 : vector<5x5xf32>
    %782 = vector.extract_strided_slice %774 {offsets = [0, 16], sizes = [5, 16], strides = [1, 1]} : vector<5x128xbf16> to vector<5x16xbf16>
    %783 = vector.extract_strided_slice %775 {offsets = [0, 16], sizes = [5, 16], strides = [1, 1]} : vector<5x128xbf16> to vector<5x16xbf16>
    %cst_224 = arith.constant dense<0.000000e+00> : vector<5x5xf32>
    %784 = tpu.matmul %782, %783, %cst_224 {dimension_numbers = #tpu.dot_dimension_numbers<[1], [1], [0], [0], [0, 0, 1, 0], [], []>} : vector<5x16xbf16>, vector<5x16xbf16>, vector<5x5xf32> -> vector<5x5xf32>
    %cst_225 = arith.constant 2.500000e-01 : f32
    %785 = vector.broadcast %cst_225 : f32 to vector<5x5xf32>
    %786 = arith.mulf %784, %785 : vector<5x5xf32>
    %787 = vector.extract_strided_slice %774 {offsets = [0, 32], sizes = [5, 16], strides = [1, 1]} : vector<5x128xbf16> to vector<5x16xbf16>
    %788 = vector.extract_strided_slice %775 {offsets = [0, 32], sizes = [5, 16], strides = [1, 1]} : vector<5x128xbf16> to vector<5x16xbf16>
    %cst_226 = arith.constant dense<0.000000e+00> : vector<5x5xf32>
    %789 = tpu.matmul %787, %788, %cst_226 {dimension_numbers = #tpu.dot_dimension_numbers<[1], [1], [0], [0], [0, 0, 1, 0], [], []>} : vector<5x16xbf16>, vector<5x16xbf16>, vector<5x5xf32> -> vector<5x5xf32>
    %cst_227 = arith.constant 2.500000e-01 : f32
    %790 = vector.broadcast %cst_227 : f32 to vector<5x5xf32>
    %791 = arith.mulf %789, %790 : vector<5x5xf32>
    %792 = vector.extract_strided_slice %774 {offsets = [0, 48], sizes = [5, 16], strides = [1, 1]} : vector<5x128xbf16> to vector<5x16xbf16>
    %793 = vector.extract_strided_slice %775 {offsets = [0, 48], sizes = [5, 16], strides = [1, 1]} : vector<5x128xbf16> to vector<5x16xbf16>
    %cst_228 = arith.constant dense<0.000000e+00> : vector<5x5xf32>
    %794 = tpu.matmul %792, %793, %cst_228 {dimension_numbers = #tpu.dot_dimension_numbers<[1], [1], [0], [0], [0, 0, 1, 0], [], []>} : vector<5x16xbf16>, vector<5x16xbf16>, vector<5x5xf32> -> vector<5x5xf32>
    %cst_229 = arith.constant 2.500000e-01 : f32
    %795 = vector.broadcast %cst_229 : f32 to vector<5x5xf32>
    %796 = arith.mulf %794, %795 : vector<5x5xf32>
    %797 = vector.extract_strided_slice %774 {offsets = [0, 64], sizes = [5, 16], strides = [1, 1]} : vector<5x128xbf16> to vector<5x16xbf16>
    %798 = vector.extract_strided_slice %775 {offsets = [0, 64], sizes = [5, 16], strides = [1, 1]} : vector<5x128xbf16> to vector<5x16xbf16>
    %cst_230 = arith.constant dense<0.000000e+00> : vector<5x5xf32>
    %799 = tpu.matmul %797, %798, %cst_230 {dimension_numbers = #tpu.dot_dimension_numbers<[1], [1], [0], [0], [0, 0, 1, 0], [], []>} : vector<5x16xbf16>, vector<5x16xbf16>, vector<5x5xf32> -> vector<5x5xf32>
    %cst_231 = arith.constant 2.500000e-01 : f32
    %800 = vector.broadcast %cst_231 : f32 to vector<5x5xf32>
    %801 = arith.mulf %799, %800 : vector<5x5xf32>
    %802 = vector.extract_strided_slice %774 {offsets = [0, 80], sizes = [5, 16], strides = [1, 1]} : vector<5x128xbf16> to vector<5x16xbf16>
    %803 = vector.extract_strided_slice %775 {offsets = [0, 80], sizes = [5, 16], strides = [1, 1]} : vector<5x128xbf16> to vector<5x16xbf16>
    %cst_232 = arith.constant dense<0.000000e+00> : vector<5x5xf32>
    %804 = tpu.matmul %802, %803, %cst_232 {dimension_numbers = #tpu.dot_dimension_numbers<[1], [1], [0], [0], [0, 0, 1, 0], [], []>} : vector<5x16xbf16>, vector<5x16xbf16>, vector<5x5xf32> -> vector<5x5xf32>
    %cst_233 = arith.constant 2.500000e-01 : f32
    %805 = vector.broadcast %cst_233 : f32 to vector<5x5xf32>
    %806 = arith.mulf %804, %805 : vector<5x5xf32>
    %807 = vector.extract_strided_slice %774 {offsets = [0, 96], sizes = [5, 16], strides = [1, 1]} : vector<5x128xbf16> to vector<5x16xbf16>
    %808 = vector.extract_strided_slice %775 {offsets = [0, 96], sizes = [5, 16], strides = [1, 1]} : vector<5x128xbf16> to vector<5x16xbf16>
    %cst_234 = arith.constant dense<0.000000e+00> : vector<5x5xf32>
    %809 = tpu.matmul %807, %808, %cst_234 {dimension_numbers = #tpu.dot_dimension_numbers<[1], [1], [0], [0], [0, 0, 1, 0], [], []>} : vector<5x16xbf16>, vector<5x16xbf16>, vector<5x5xf32> -> vector<5x5xf32>
    %cst_235 = arith.constant 2.500000e-01 : f32
    %810 = vector.broadcast %cst_235 : f32 to vector<5x5xf32>
    %811 = arith.mulf %809, %810 : vector<5x5xf32>
    %812 = vector.extract_strided_slice %774 {offsets = [0, 112], sizes = [5, 16], strides = [1, 1]} : vector<5x128xbf16> to vector<5x16xbf16>
    %813 = vector.extract_strided_slice %775 {offsets = [0, 112], sizes = [5, 16], strides = [1, 1]} : vector<5x128xbf16> to vector<5x16xbf16>
    %cst_236 = arith.constant dense<0.000000e+00> : vector<5x5xf32>
    %814 = tpu.matmul %812, %813, %cst_236 {dimension_numbers = #tpu.dot_dimension_numbers<[1], [1], [0], [0], [0, 0, 1, 0], [], []>} : vector<5x16xbf16>, vector<5x16xbf16>, vector<5x5xf32> -> vector<5x5xf32>
    %cst_237 = arith.constant 2.500000e-01 : f32
    %815 = vector.broadcast %cst_237 : f32 to vector<5x5xf32>
    %816 = arith.mulf %814, %815 : vector<5x5xf32>
    %cst_238 = arith.constant dense<0xFF800000> : vector<5xf32>
    %817 = vector.multi_reduction <maximumf>, %781, %cst_238 [1] : vector<5x5xf32> to vector<5xf32>
    %818 = vector.shape_cast %817 : vector<5xf32> to vector<5x1xf32>
    %819 = vector.broadcast %818 : vector<5x1xf32> to vector<5x5xf32>
    %820 = arith.subf %781, %819 : vector<5x5xf32>
    %821 = math.exp %820 : vector<5x5xf32>
    %cst_239 = arith.constant dense<0.000000e+00> : vector<5xf32>
    %822 = vector.multi_reduction <add>, %821, %cst_239 [1] : vector<5x5xf32> to vector<5xf32>
    %823 = vector.shape_cast %822 : vector<5xf32> to vector<5x1xf32>
    %824 = tpu.reciprocal %823 {approx = true} : vector<5x1xf32> -> vector<5x1xf32>
    %825 = vector.broadcast %824 : vector<5x1xf32> to vector<5x5xf32>
    %826 = arith.mulf %821, %825 : vector<5x5xf32>
    %827 = arith.truncf %826 : vector<5x5xf32> to vector<5x5xbf16>
    %828 = vector.extract_strided_slice %776 {offsets = [0, 0], sizes = [5, 16], strides = [1, 1]} : vector<5x128xbf16> to vector<5x16xbf16>
    %cst_240 = arith.constant dense<0.000000e+00> : vector<5x16xf32>
    %829 = tpu.matmul %827, %828, %cst_240 {dimension_numbers = #tpu.dot_dimension_numbers<[1], [0], [0], [1], [0, 0, 1, 1], [], []>} : vector<5x5xbf16>, vector<5x16xbf16>, vector<5x16xf32> -> vector<5x16xf32>
    %cst_241 = arith.constant dense<0xFF800000> : vector<5xf32>
    %830 = vector.multi_reduction <maximumf>, %786, %cst_241 [1] : vector<5x5xf32> to vector<5xf32>
    %831 = vector.shape_cast %830 : vector<5xf32> to vector<5x1xf32>
    %832 = vector.broadcast %831 : vector<5x1xf32> to vector<5x5xf32>
    %833 = arith.subf %786, %832 : vector<5x5xf32>
    %834 = math.exp %833 : vector<5x5xf32>
    %cst_242 = arith.constant dense<0.000000e+00> : vector<5xf32>
    %835 = vector.multi_reduction <add>, %834, %cst_242 [1] : vector<5x5xf32> to vector<5xf32>
    %836 = vector.shape_cast %835 : vector<5xf32> to vector<5x1xf32>
    %837 = tpu.reciprocal %836 {approx = true} : vector<5x1xf32> -> vector<5x1xf32>
    %838 = vector.broadcast %837 : vector<5x1xf32> to vector<5x5xf32>
    %839 = arith.mulf %834, %838 : vector<5x5xf32>
    %840 = arith.truncf %839 : vector<5x5xf32> to vector<5x5xbf16>
    %841 = vector.extract_strided_slice %776 {offsets = [0, 16], sizes = [5, 16], strides = [1, 1]} : vector<5x128xbf16> to vector<5x16xbf16>
    %cst_243 = arith.constant dense<0.000000e+00> : vector<5x16xf32>
    %842 = tpu.matmul %840, %841, %cst_243 {dimension_numbers = #tpu.dot_dimension_numbers<[1], [0], [0], [1], [0, 0, 1, 1], [], []>} : vector<5x5xbf16>, vector<5x16xbf16>, vector<5x16xf32> -> vector<5x16xf32>
    %cst_244 = arith.constant dense<0xFF800000> : vector<5xf32>
    %843 = vector.multi_reduction <maximumf>, %791, %cst_244 [1] : vector<5x5xf32> to vector<5xf32>
    %844 = vector.shape_cast %843 : vector<5xf32> to vector<5x1xf32>
    %845 = vector.broadcast %844 : vector<5x1xf32> to vector<5x5xf32>
    %846 = arith.subf %791, %845 : vector<5x5xf32>
    %847 = math.exp %846 : vector<5x5xf32>
    %cst_245 = arith.constant dense<0.000000e+00> : vector<5xf32>
    %848 = vector.multi_reduction <add>, %847, %cst_245 [1] : vector<5x5xf32> to vector<5xf32>
    %849 = vector.shape_cast %848 : vector<5xf32> to vector<5x1xf32>
    %850 = tpu.reciprocal %849 {approx = true} : vector<5x1xf32> -> vector<5x1xf32>
    %851 = vector.broadcast %850 : vector<5x1xf32> to vector<5x5xf32>
    %852 = arith.mulf %847, %851 : vector<5x5xf32>
    %853 = arith.truncf %852 : vector<5x5xf32> to vector<5x5xbf16>
    %854 = vector.extract_strided_slice %776 {offsets = [0, 32], sizes = [5, 16], strides = [1, 1]} : vector<5x128xbf16> to vector<5x16xbf16>
    %cst_246 = arith.constant dense<0.000000e+00> : vector<5x16xf32>
    %855 = tpu.matmul %853, %854, %cst_246 {dimension_numbers = #tpu.dot_dimension_numbers<[1], [0], [0], [1], [0, 0, 1, 1], [], []>} : vector<5x5xbf16>, vector<5x16xbf16>, vector<5x16xf32> -> vector<5x16xf32>
    %cst_247 = arith.constant dense<0xFF800000> : vector<5xf32>
    %856 = vector.multi_reduction <maximumf>, %796, %cst_247 [1] : vector<5x5xf32> to vector<5xf32>
    %857 = vector.shape_cast %856 : vector<5xf32> to vector<5x1xf32>
    %858 = vector.broadcast %857 : vector<5x1xf32> to vector<5x5xf32>
    %859 = arith.subf %796, %858 : vector<5x5xf32>
    %860 = math.exp %859 : vector<5x5xf32>
    %cst_248 = arith.constant dense<0.000000e+00> : vector<5xf32>
    %861 = vector.multi_reduction <add>, %860, %cst_248 [1] : vector<5x5xf32> to vector<5xf32>
    %862 = vector.shape_cast %861 : vector<5xf32> to vector<5x1xf32>
    %863 = tpu.reciprocal %862 {approx = true} : vector<5x1xf32> -> vector<5x1xf32>
    %864 = vector.broadcast %863 : vector<5x1xf32> to vector<5x5xf32>
    %865 = arith.mulf %860, %864 : vector<5x5xf32>
    %866 = arith.truncf %865 : vector<5x5xf32> to vector<5x5xbf16>
    %867 = vector.extract_strided_slice %776 {offsets = [0, 48], sizes = [5, 16], strides = [1, 1]} : vector<5x128xbf16> to vector<5x16xbf16>
    %cst_249 = arith.constant dense<0.000000e+00> : vector<5x16xf32>
    %868 = tpu.matmul %866, %867, %cst_249 {dimension_numbers = #tpu.dot_dimension_numbers<[1], [0], [0], [1], [0, 0, 1, 1], [], []>} : vector<5x5xbf16>, vector<5x16xbf16>, vector<5x16xf32> -> vector<5x16xf32>
    %cst_250 = arith.constant dense<0xFF800000> : vector<5xf32>
    %869 = vector.multi_reduction <maximumf>, %801, %cst_250 [1] : vector<5x5xf32> to vector<5xf32>
    %870 = vector.shape_cast %869 : vector<5xf32> to vector<5x1xf32>
    %871 = vector.broadcast %870 : vector<5x1xf32> to vector<5x5xf32>
    %872 = arith.subf %801, %871 : vector<5x5xf32>
    %873 = math.exp %872 : vector<5x5xf32>
    %cst_251 = arith.constant dense<0.000000e+00> : vector<5xf32>
    %874 = vector.multi_reduction <add>, %873, %cst_251 [1] : vector<5x5xf32> to vector<5xf32>
    %875 = vector.shape_cast %874 : vector<5xf32> to vector<5x1xf32>
    %876 = tpu.reciprocal %875 {approx = true} : vector<5x1xf32> -> vector<5x1xf32>
    %877 = vector.broadcast %876 : vector<5x1xf32> to vector<5x5xf32>
    %878 = arith.mulf %873, %877 : vector<5x5xf32>
    %879 = arith.truncf %878 : vector<5x5xf32> to vector<5x5xbf16>
    %880 = vector.extract_strided_slice %776 {offsets = [0, 64], sizes = [5, 16], strides = [1, 1]} : vector<5x128xbf16> to vector<5x16xbf16>
    %cst_252 = arith.constant dense<0.000000e+00> : vector<5x16xf32>
    %881 = tpu.matmul %879, %880, %cst_252 {dimension_numbers = #tpu.dot_dimension_numbers<[1], [0], [0], [1], [0, 0, 1, 1], [], []>} : vector<5x5xbf16>, vector<5x16xbf16>, vector<5x16xf32> -> vector<5x16xf32>
    %cst_253 = arith.constant dense<0xFF800000> : vector<5xf32>
    %882 = vector.multi_reduction <maximumf>, %806, %cst_253 [1] : vector<5x5xf32> to vector<5xf32>
    %883 = vector.shape_cast %882 : vector<5xf32> to vector<5x1xf32>
    %884 = vector.broadcast %883 : vector<5x1xf32> to vector<5x5xf32>
    %885 = arith.subf %806, %884 : vector<5x5xf32>
    %886 = math.exp %885 : vector<5x5xf32>
    %cst_254 = arith.constant dense<0.000000e+00> : vector<5xf32>
    %887 = vector.multi_reduction <add>, %886, %cst_254 [1] : vector<5x5xf32> to vector<5xf32>
    %888 = vector.shape_cast %887 : vector<5xf32> to vector<5x1xf32>
    %889 = tpu.reciprocal %888 {approx = true} : vector<5x1xf32> -> vector<5x1xf32>
    %890 = vector.broadcast %889 : vector<5x1xf32> to vector<5x5xf32>
    %891 = arith.mulf %886, %890 : vector<5x5xf32>
    %892 = arith.truncf %891 : vector<5x5xf32> to vector<5x5xbf16>
    %893 = vector.extract_strided_slice %776 {offsets = [0, 80], sizes = [5, 16], strides = [1, 1]} : vector<5x128xbf16> to vector<5x16xbf16>
    %cst_255 = arith.constant dense<0.000000e+00> : vector<5x16xf32>
    %894 = tpu.matmul %892, %893, %cst_255 {dimension_numbers = #tpu.dot_dimension_numbers<[1], [0], [0], [1], [0, 0, 1, 1], [], []>} : vector<5x5xbf16>, vector<5x16xbf16>, vector<5x16xf32> -> vector<5x16xf32>
    %cst_256 = arith.constant dense<0xFF800000> : vector<5xf32>
    %895 = vector.multi_reduction <maximumf>, %811, %cst_256 [1] : vector<5x5xf32> to vector<5xf32>
    %896 = vector.shape_cast %895 : vector<5xf32> to vector<5x1xf32>
    %897 = vector.broadcast %896 : vector<5x1xf32> to vector<5x5xf32>
    %898 = arith.subf %811, %897 : vector<5x5xf32>
    %899 = math.exp %898 : vector<5x5xf32>
    %cst_257 = arith.constant dense<0.000000e+00> : vector<5xf32>
    %900 = vector.multi_reduction <add>, %899, %cst_257 [1] : vector<5x5xf32> to vector<5xf32>
    %901 = vector.shape_cast %900 : vector<5xf32> to vector<5x1xf32>
    %902 = tpu.reciprocal %901 {approx = true} : vector<5x1xf32> -> vector<5x1xf32>
    %903 = vector.broadcast %902 : vector<5x1xf32> to vector<5x5xf32>
    %904 = arith.mulf %899, %903 : vector<5x5xf32>
    %905 = arith.truncf %904 : vector<5x5xf32> to vector<5x5xbf16>
    %906 = vector.extract_strided_slice %776 {offsets = [0, 96], sizes = [5, 16], strides = [1, 1]} : vector<5x128xbf16> to vector<5x16xbf16>
    %cst_258 = arith.constant dense<0.000000e+00> : vector<5x16xf32>
    %907 = tpu.matmul %905, %906, %cst_258 {dimension_numbers = #tpu.dot_dimension_numbers<[1], [0], [0], [1], [0, 0, 1, 1], [], []>} : vector<5x5xbf16>, vector<5x16xbf16>, vector<5x16xf32> -> vector<5x16xf32>
    %cst_259 = arith.constant dense<0xFF800000> : vector<5xf32>
    %908 = vector.multi_reduction <maximumf>, %816, %cst_259 [1] : vector<5x5xf32> to vector<5xf32>
    %909 = vector.shape_cast %908 : vector<5xf32> to vector<5x1xf32>
    %910 = vector.broadcast %909 : vector<5x1xf32> to vector<5x5xf32>
    %911 = arith.subf %816, %910 : vector<5x5xf32>
    %912 = math.exp %911 : vector<5x5xf32>
    %cst_260 = arith.constant dense<0.000000e+00> : vector<5xf32>
    %913 = vector.multi_reduction <add>, %912, %cst_260 [1] : vector<5x5xf32> to vector<5xf32>
    %914 = vector.shape_cast %913 : vector<5xf32> to vector<5x1xf32>
    %915 = tpu.reciprocal %914 {approx = true} : vector<5x1xf32> -> vector<5x1xf32>
    %916 = vector.broadcast %915 : vector<5x1xf32> to vector<5x5xf32>
    %917 = arith.mulf %912, %916 : vector<5x5xf32>
    %918 = arith.truncf %917 : vector<5x5xf32> to vector<5x5xbf16>
    %919 = vector.extract_strided_slice %776 {offsets = [0, 112], sizes = [5, 16], strides = [1, 1]} : vector<5x128xbf16> to vector<5x16xbf16>
    %cst_261 = arith.constant dense<0.000000e+00> : vector<5x16xf32>
    %920 = tpu.matmul %918, %919, %cst_261 {dimension_numbers = #tpu.dot_dimension_numbers<[1], [0], [0], [1], [0, 0, 1, 1], [], []>} : vector<5x5xbf16>, vector<5x16xbf16>, vector<5x16xf32> -> vector<5x16xf32>
    %921 = tpu.concatenate %829, %842, %855, %868, %881, %894, %907, %920 in 1 : vector<5x16xf32>, vector<5x16xf32>, vector<5x16xf32>, vector<5x16xf32>, vector<5x16xf32>, vector<5x16xf32>, vector<5x16xf32>, vector<5x16xf32> -> vector<5x128xf32>
    %922 = vector.extract_strided_slice %771 {offsets = [5, 0], sizes = [5, 128], strides = [1, 1]} : vector<10x128xbf16> to vector<5x128xbf16>
    %923 = vector.extract_strided_slice %772 {offsets = [5, 0], sizes = [5, 128], strides = [1, 1]} : vector<10x128xbf16> to vector<5x128xbf16>
    %924 = vector.extract_strided_slice %773 {offsets = [5, 0], sizes = [5, 128], strides = [1, 1]} : vector<10x128xbf16> to vector<5x128xbf16>
    %925 = vector.extract_strided_slice %922 {offsets = [0, 0], sizes = [5, 16], strides = [1, 1]} : vector<5x128xbf16> to vector<5x16xbf16>
    %926 = vector.extract_strided_slice %923 {offsets = [0, 0], sizes = [5, 16], strides = [1, 1]} : vector<5x128xbf16> to vector<5x16xbf16>
    %cst_262 = arith.constant dense<0.000000e+00> : vector<5x5xf32>
    %927 = tpu.matmul %925, %926, %cst_262 {dimension_numbers = #tpu.dot_dimension_numbers<[1], [1], [0], [0], [0, 0, 1, 0], [], []>} : vector<5x16xbf16>, vector<5x16xbf16>, vector<5x5xf32> -> vector<5x5xf32>
    %cst_263 = arith.constant 2.500000e-01 : f32
    %928 = vector.broadcast %cst_263 : f32 to vector<5x5xf32>
    %929 = arith.mulf %927, %928 : vector<5x5xf32>
    %930 = vector.extract_strided_slice %922 {offsets = [0, 16], sizes = [5, 16], strides = [1, 1]} : vector<5x128xbf16> to vector<5x16xbf16>
    %931 = vector.extract_strided_slice %923 {offsets = [0, 16], sizes = [5, 16], strides = [1, 1]} : vector<5x128xbf16> to vector<5x16xbf16>
    %cst_264 = arith.constant dense<0.000000e+00> : vector<5x5xf32>
    %932 = tpu.matmul %930, %931, %cst_264 {dimension_numbers = #tpu.dot_dimension_numbers<[1], [1], [0], [0], [0, 0, 1, 0], [], []>} : vector<5x16xbf16>, vector<5x16xbf16>, vector<5x5xf32> -> vector<5x5xf32>
    %cst_265 = arith.constant 2.500000e-01 : f32
    %933 = vector.broadcast %cst_265 : f32 to vector<5x5xf32>
    %934 = arith.mulf %932, %933 : vector<5x5xf32>
    %935 = vector.extract_strided_slice %922 {offsets = [0, 32], sizes = [5, 16], strides = [1, 1]} : vector<5x128xbf16> to vector<5x16xbf16>
    %936 = vector.extract_strided_slice %923 {offsets = [0, 32], sizes = [5, 16], strides = [1, 1]} : vector<5x128xbf16> to vector<5x16xbf16>
    %cst_266 = arith.constant dense<0.000000e+00> : vector<5x5xf32>
    %937 = tpu.matmul %935, %936, %cst_266 {dimension_numbers = #tpu.dot_dimension_numbers<[1], [1], [0], [0], [0, 0, 1, 0], [], []>} : vector<5x16xbf16>, vector<5x16xbf16>, vector<5x5xf32> -> vector<5x5xf32>
    %cst_267 = arith.constant 2.500000e-01 : f32
    %938 = vector.broadcast %cst_267 : f32 to vector<5x5xf32>
    %939 = arith.mulf %937, %938 : vector<5x5xf32>
    %940 = vector.extract_strided_slice %922 {offsets = [0, 48], sizes = [5, 16], strides = [1, 1]} : vector<5x128xbf16> to vector<5x16xbf16>
    %941 = vector.extract_strided_slice %923 {offsets = [0, 48], sizes = [5, 16], strides = [1, 1]} : vector<5x128xbf16> to vector<5x16xbf16>
    %cst_268 = arith.constant dense<0.000000e+00> : vector<5x5xf32>
    %942 = tpu.matmul %940, %941, %cst_268 {dimension_numbers = #tpu.dot_dimension_numbers<[1], [1], [0], [0], [0, 0, 1, 0], [], []>} : vector<5x16xbf16>, vector<5x16xbf16>, vector<5x5xf32> -> vector<5x5xf32>
    %cst_269 = arith.constant 2.500000e-01 : f32
    %943 = vector.broadcast %cst_269 : f32 to vector<5x5xf32>
    %944 = arith.mulf %942, %943 : vector<5x5xf32>
    %945 = vector.extract_strided_slice %922 {offsets = [0, 64], sizes = [5, 16], strides = [1, 1]} : vector<5x128xbf16> to vector<5x16xbf16>
    %946 = vector.extract_strided_slice %923 {offsets = [0, 64], sizes = [5, 16], strides = [1, 1]} : vector<5x128xbf16> to vector<5x16xbf16>
    %cst_270 = arith.constant dense<0.000000e+00> : vector<5x5xf32>
    %947 = tpu.matmul %945, %946, %cst_270 {dimension_numbers = #tpu.dot_dimension_numbers<[1], [1], [0], [0], [0, 0, 1, 0], [], []>} : vector<5x16xbf16>, vector<5x16xbf16>, vector<5x5xf32> -> vector<5x5xf32>
    %cst_271 = arith.constant 2.500000e-01 : f32
    %948 = vector.broadcast %cst_271 : f32 to vector<5x5xf32>
    %949 = arith.mulf %947, %948 : vector<5x5xf32>
    %950 = vector.extract_strided_slice %922 {offsets = [0, 80], sizes = [5, 16], strides = [1, 1]} : vector<5x128xbf16> to vector<5x16xbf16>
    %951 = vector.extract_strided_slice %923 {offsets = [0, 80], sizes = [5, 16], strides = [1, 1]} : vector<5x128xbf16> to vector<5x16xbf16>
    %cst_272 = arith.constant dense<0.000000e+00> : vector<5x5xf32>
    %952 = tpu.matmul %950, %951, %cst_272 {dimension_numbers = #tpu.dot_dimension_numbers<[1], [1], [0], [0], [0, 0, 1, 0], [], []>} : vector<5x16xbf16>, vector<5x16xbf16>, vector<5x5xf32> -> vector<5x5xf32>
    %cst_273 = arith.constant 2.500000e-01 : f32
    %953 = vector.broadcast %cst_273 : f32 to vector<5x5xf32>
    %954 = arith.mulf %952, %953 : vector<5x5xf32>
    %955 = vector.extract_strided_slice %922 {offsets = [0, 96], sizes = [5, 16], strides = [1, 1]} : vector<5x128xbf16> to vector<5x16xbf16>
    %956 = vector.extract_strided_slice %923 {offsets = [0, 96], sizes = [5, 16], strides = [1, 1]} : vector<5x128xbf16> to vector<5x16xbf16>
    %cst_274 = arith.constant dense<0.000000e+00> : vector<5x5xf32>
    %957 = tpu.matmul %955, %956, %cst_274 {dimension_numbers = #tpu.dot_dimension_numbers<[1], [1], [0], [0], [0, 0, 1, 0], [], []>} : vector<5x16xbf16>, vector<5x16xbf16>, vector<5x5xf32> -> vector<5x5xf32>
    %cst_275 = arith.constant 2.500000e-01 : f32
    %958 = vector.broadcast %cst_275 : f32 to vector<5x5xf32>
    %959 = arith.mulf %957, %958 : vector<5x5xf32>
    %960 = vector.extract_strided_slice %922 {offsets = [0, 112], sizes = [5, 16], strides = [1, 1]} : vector<5x128xbf16> to vector<5x16xbf16>
    %961 = vector.extract_strided_slice %923 {offsets = [0, 112], sizes = [5, 16], strides = [1, 1]} : vector<5x128xbf16> to vector<5x16xbf16>
    %cst_276 = arith.constant dense<0.000000e+00> : vector<5x5xf32>
    %962 = tpu.matmul %960, %961, %cst_276 {dimension_numbers = #tpu.dot_dimension_numbers<[1], [1], [0], [0], [0, 0, 1, 0], [], []>} : vector<5x16xbf16>, vector<5x16xbf16>, vector<5x5xf32> -> vector<5x5xf32>
    %cst_277 = arith.constant 2.500000e-01 : f32
    %963 = vector.broadcast %cst_277 : f32 to vector<5x5xf32>
    %964 = arith.mulf %962, %963 : vector<5x5xf32>
    %cst_278 = arith.constant dense<0xFF800000> : vector<5xf32>
    %965 = vector.multi_reduction <maximumf>, %929, %cst_278 [1] : vector<5x5xf32> to vector<5xf32>
    %966 = vector.shape_cast %965 : vector<5xf32> to vector<5x1xf32>
    %967 = vector.broadcast %966 : vector<5x1xf32> to vector<5x5xf32>
    %968 = arith.subf %929, %967 : vector<5x5xf32>
    %969 = math.exp %968 : vector<5x5xf32>
    %cst_279 = arith.constant dense<0.000000e+00> : vector<5xf32>
    %970 = vector.multi_reduction <add>, %969, %cst_279 [1] : vector<5x5xf32> to vector<5xf32>
    %971 = vector.shape_cast %970 : vector<5xf32> to vector<5x1xf32>
    %972 = tpu.reciprocal %971 {approx = true} : vector<5x1xf32> -> vector<5x1xf32>
    %973 = vector.broadcast %972 : vector<5x1xf32> to vector<5x5xf32>
    %974 = arith.mulf %969, %973 : vector<5x5xf32>
    %975 = arith.truncf %974 : vector<5x5xf32> to vector<5x5xbf16>
    %976 = vector.extract_strided_slice %924 {offsets = [0, 0], sizes = [5, 16], strides = [1, 1]} : vector<5x128xbf16> to vector<5x16xbf16>
    %cst_280 = arith.constant dense<0.000000e+00> : vector<5x16xf32>
    %977 = tpu.matmul %975, %976, %cst_280 {dimension_numbers = #tpu.dot_dimension_numbers<[1], [0], [0], [1], [0, 0, 1, 1], [], []>} : vector<5x5xbf16>, vector<5x16xbf16>, vector<5x16xf32> -> vector<5x16xf32>
    %cst_281 = arith.constant dense<0xFF800000> : vector<5xf32>
    %978 = vector.multi_reduction <maximumf>, %934, %cst_281 [1] : vector<5x5xf32> to vector<5xf32>
    %979 = vector.shape_cast %978 : vector<5xf32> to vector<5x1xf32>
    %980 = vector.broadcast %979 : vector<5x1xf32> to vector<5x5xf32>
    %981 = arith.subf %934, %980 : vector<5x5xf32>
    %982 = math.exp %981 : vector<5x5xf32>
    %cst_282 = arith.constant dense<0.000000e+00> : vector<5xf32>
    %983 = vector.multi_reduction <add>, %982, %cst_282 [1] : vector<5x5xf32> to vector<5xf32>
    %984 = vector.shape_cast %983 : vector<5xf32> to vector<5x1xf32>
    %985 = tpu.reciprocal %984 {approx = true} : vector<5x1xf32> -> vector<5x1xf32>
    %986 = vector.broadcast %985 : vector<5x1xf32> to vector<5x5xf32>
    %987 = arith.mulf %982, %986 : vector<5x5xf32>
    %988 = arith.truncf %987 : vector<5x5xf32> to vector<5x5xbf16>
    %989 = vector.extract_strided_slice %924 {offsets = [0, 16], sizes = [5, 16], strides = [1, 1]} : vector<5x128xbf16> to vector<5x16xbf16>
    %cst_283 = arith.constant dense<0.000000e+00> : vector<5x16xf32>
    %990 = tpu.matmul %988, %989, %cst_283 {dimension_numbers = #tpu.dot_dimension_numbers<[1], [0], [0], [1], [0, 0, 1, 1], [], []>} : vector<5x5xbf16>, vector<5x16xbf16>, vector<5x16xf32> -> vector<5x16xf32>
    %cst_284 = arith.constant dense<0xFF800000> : vector<5xf32>
    %991 = vector.multi_reduction <maximumf>, %939, %cst_284 [1] : vector<5x5xf32> to vector<5xf32>
    %992 = vector.shape_cast %991 : vector<5xf32> to vector<5x1xf32>
    %993 = vector.broadcast %992 : vector<5x1xf32> to vector<5x5xf32>
    %994 = arith.subf %939, %993 : vector<5x5xf32>
    %995 = math.exp %994 : vector<5x5xf32>
    %cst_285 = arith.constant dense<0.000000e+00> : vector<5xf32>
    %996 = vector.multi_reduction <add>, %995, %cst_285 [1] : vector<5x5xf32> to vector<5xf32>
    %997 = vector.shape_cast %996 : vector<5xf32> to vector<5x1xf32>
    %998 = tpu.reciprocal %997 {approx = true} : vector<5x1xf32> -> vector<5x1xf32>
    %999 = vector.broadcast %998 : vector<5x1xf32> to vector<5x5xf32>
    %1000 = arith.mulf %995, %999 : vector<5x5xf32>
    %1001 = arith.truncf %1000 : vector<5x5xf32> to vector<5x5xbf16>
    %1002 = vector.extract_strided_slice %924 {offsets = [0, 32], sizes = [5, 16], strides = [1, 1]} : vector<5x128xbf16> to vector<5x16xbf16>
    %cst_286 = arith.constant dense<0.000000e+00> : vector<5x16xf32>
    %1003 = tpu.matmul %1001, %1002, %cst_286 {dimension_numbers = #tpu.dot_dimension_numbers<[1], [0], [0], [1], [0, 0, 1, 1], [], []>} : vector<5x5xbf16>, vector<5x16xbf16>, vector<5x16xf32> -> vector<5x16xf32>
    %cst_287 = arith.constant dense<0xFF800000> : vector<5xf32>
    %1004 = vector.multi_reduction <maximumf>, %944, %cst_287 [1] : vector<5x5xf32> to vector<5xf32>
    %1005 = vector.shape_cast %1004 : vector<5xf32> to vector<5x1xf32>
    %1006 = vector.broadcast %1005 : vector<5x1xf32> to vector<5x5xf32>
    %1007 = arith.subf %944, %1006 : vector<5x5xf32>
    %1008 = math.exp %1007 : vector<5x5xf32>
    %cst_288 = arith.constant dense<0.000000e+00> : vector<5xf32>
    %1009 = vector.multi_reduction <add>, %1008, %cst_288 [1] : vector<5x5xf32> to vector<5xf32>
    %1010 = vector.shape_cast %1009 : vector<5xf32> to vector<5x1xf32>
    %1011 = tpu.reciprocal %1010 {approx = true} : vector<5x1xf32> -> vector<5x1xf32>
    %1012 = vector.broadcast %1011 : vector<5x1xf32> to vector<5x5xf32>
    %1013 = arith.mulf %1008, %1012 : vector<5x5xf32>
    %1014 = arith.truncf %1013 : vector<5x5xf32> to vector<5x5xbf16>
    %1015 = vector.extract_strided_slice %924 {offsets = [0, 48], sizes = [5, 16], strides = [1, 1]} : vector<5x128xbf16> to vector<5x16xbf16>
    %cst_289 = arith.constant dense<0.000000e+00> : vector<5x16xf32>
    %1016 = tpu.matmul %1014, %1015, %cst_289 {dimension_numbers = #tpu.dot_dimension_numbers<[1], [0], [0], [1], [0, 0, 1, 1], [], []>} : vector<5x5xbf16>, vector<5x16xbf16>, vector<5x16xf32> -> vector<5x16xf32>
    %cst_290 = arith.constant dense<0xFF800000> : vector<5xf32>
    %1017 = vector.multi_reduction <maximumf>, %949, %cst_290 [1] : vector<5x5xf32> to vector<5xf32>
    %1018 = vector.shape_cast %1017 : vector<5xf32> to vector<5x1xf32>
    %1019 = vector.broadcast %1018 : vector<5x1xf32> to vector<5x5xf32>
    %1020 = arith.subf %949, %1019 : vector<5x5xf32>
    %1021 = math.exp %1020 : vector<5x5xf32>
    %cst_291 = arith.constant dense<0.000000e+00> : vector<5xf32>
    %1022 = vector.multi_reduction <add>, %1021, %cst_291 [1] : vector<5x5xf32> to vector<5xf32>
    %1023 = vector.shape_cast %1022 : vector<5xf32> to vector<5x1xf32>
    %1024 = tpu.reciprocal %1023 {approx = true} : vector<5x1xf32> -> vector<5x1xf32>
    %1025 = vector.broadcast %1024 : vector<5x1xf32> to vector<5x5xf32>
    %1026 = arith.mulf %1021, %1025 : vector<5x5xf32>
    %1027 = arith.truncf %1026 : vector<5x5xf32> to vector<5x5xbf16>
    %1028 = vector.extract_strided_slice %924 {offsets = [0, 64], sizes = [5, 16], strides = [1, 1]} : vector<5x128xbf16> to vector<5x16xbf16>
    %cst_292 = arith.constant dense<0.000000e+00> : vector<5x16xf32>
    %1029 = tpu.matmul %1027, %1028, %cst_292 {dimension_numbers = #tpu.dot_dimension_numbers<[1], [0], [0], [1], [0, 0, 1, 1], [], []>} : vector<5x5xbf16>, vector<5x16xbf16>, vector<5x16xf32> -> vector<5x16xf32>
    %cst_293 = arith.constant dense<0xFF800000> : vector<5xf32>
    %1030 = vector.multi_reduction <maximumf>, %954, %cst_293 [1] : vector<5x5xf32> to vector<5xf32>
    %1031 = vector.shape_cast %1030 : vector<5xf32> to vector<5x1xf32>
    %1032 = vector.broadcast %1031 : vector<5x1xf32> to vector<5x5xf32>
    %1033 = arith.subf %954, %1032 : vector<5x5xf32>
    %1034 = math.exp %1033 : vector<5x5xf32>
    %cst_294 = arith.constant dense<0.000000e+00> : vector<5xf32>
    %1035 = vector.multi_reduction <add>, %1034, %cst_294 [1] : vector<5x5xf32> to vector<5xf32>
    %1036 = vector.shape_cast %1035 : vector<5xf32> to vector<5x1xf32>
    %1037 = tpu.reciprocal %1036 {approx = true} : vector<5x1xf32> -> vector<5x1xf32>
    %1038 = vector.broadcast %1037 : vector<5x1xf32> to vector<5x5xf32>
    %1039 = arith.mulf %1034, %1038 : vector<5x5xf32>
    %1040 = arith.truncf %1039 : vector<5x5xf32> to vector<5x5xbf16>
    %1041 = vector.extract_strided_slice %924 {offsets = [0, 80], sizes = [5, 16], strides = [1, 1]} : vector<5x128xbf16> to vector<5x16xbf16>
    %cst_295 = arith.constant dense<0.000000e+00> : vector<5x16xf32>
    %1042 = tpu.matmul %1040, %1041, %cst_295 {dimension_numbers = #tpu.dot_dimension_numbers<[1], [0], [0], [1], [0, 0, 1, 1], [], []>} : vector<5x5xbf16>, vector<5x16xbf16>, vector<5x16xf32> -> vector<5x16xf32>
    %cst_296 = arith.constant dense<0xFF800000> : vector<5xf32>
    %1043 = vector.multi_reduction <maximumf>, %959, %cst_296 [1] : vector<5x5xf32> to vector<5xf32>
    %1044 = vector.shape_cast %1043 : vector<5xf32> to vector<5x1xf32>
    %1045 = vector.broadcast %1044 : vector<5x1xf32> to vector<5x5xf32>
    %1046 = arith.subf %959, %1045 : vector<5x5xf32>
    %1047 = math.exp %1046 : vector<5x5xf32>
    %cst_297 = arith.constant dense<0.000000e+00> : vector<5xf32>
    %1048 = vector.multi_reduction <add>, %1047, %cst_297 [1] : vector<5x5xf32> to vector<5xf32>
    %1049 = vector.shape_cast %1048 : vector<5xf32> to vector<5x1xf32>
    %1050 = tpu.reciprocal %1049 {approx = true} : vector<5x1xf32> -> vector<5x1xf32>
    %1051 = vector.broadcast %1050 : vector<5x1xf32> to vector<5x5xf32>
    %1052 = arith.mulf %1047, %1051 : vector<5x5xf32>
    %1053 = arith.truncf %1052 : vector<5x5xf32> to vector<5x5xbf16>
    %1054 = vector.extract_strided_slice %924 {offsets = [0, 96], sizes = [5, 16], strides = [1, 1]} : vector<5x128xbf16> to vector<5x16xbf16>
    %cst_298 = arith.constant dense<0.000000e+00> : vector<5x16xf32>
    %1055 = tpu.matmul %1053, %1054, %cst_298 {dimension_numbers = #tpu.dot_dimension_numbers<[1], [0], [0], [1], [0, 0, 1, 1], [], []>} : vector<5x5xbf16>, vector<5x16xbf16>, vector<5x16xf32> -> vector<5x16xf32>
    %cst_299 = arith.constant dense<0xFF800000> : vector<5xf32>
    %1056 = vector.multi_reduction <maximumf>, %964, %cst_299 [1] : vector<5x5xf32> to vector<5xf32>
    %1057 = vector.shape_cast %1056 : vector<5xf32> to vector<5x1xf32>
    %1058 = vector.broadcast %1057 : vector<5x1xf32> to vector<5x5xf32>
    %1059 = arith.subf %964, %1058 : vector<5x5xf32>
    %1060 = math.exp %1059 : vector<5x5xf32>
    %cst_300 = arith.constant dense<0.000000e+00> : vector<5xf32>
    %1061 = vector.multi_reduction <add>, %1060, %cst_300 [1] : vector<5x5xf32> to vector<5xf32>
    %1062 = vector.shape_cast %1061 : vector<5xf32> to vector<5x1xf32>
    %1063 = tpu.reciprocal %1062 {approx = true} : vector<5x1xf32> -> vector<5x1xf32>
    %1064 = vector.broadcast %1063 : vector<5x1xf32> to vector<5x5xf32>
    %1065 = arith.mulf %1060, %1064 : vector<5x5xf32>
    %1066 = arith.truncf %1065 : vector<5x5xf32> to vector<5x5xbf16>
    %1067 = vector.extract_strided_slice %924 {offsets = [0, 112], sizes = [5, 16], strides = [1, 1]} : vector<5x128xbf16> to vector<5x16xbf16>
    %cst_301 = arith.constant dense<0.000000e+00> : vector<5x16xf32>
    %1068 = tpu.matmul %1066, %1067, %cst_301 {dimension_numbers = #tpu.dot_dimension_numbers<[1], [0], [0], [1], [0, 0, 1, 1], [], []>} : vector<5x5xbf16>, vector<5x16xbf16>, vector<5x16xf32> -> vector<5x16xf32>
    %1069 = tpu.concatenate %977, %990, %1003, %1016, %1029, %1042, %1055, %1068 in 1 : vector<5x16xf32>, vector<5x16xf32>, vector<5x16xf32>, vector<5x16xf32>, vector<5x16xf32>, vector<5x16xf32>, vector<5x16xf32>, vector<5x16xf32> -> vector<5x128xf32>
    %1070 = tpu.concatenate %921, %1069 in 0 : vector<5x128xf32>, vector<5x128xf32> -> vector<10x128xf32>
    %c0_302 = arith.constant 0 : index
    %c1920 = arith.constant 1920 : index
    %1071 = vector.load %arg3[%c0_302, %c1920] : memref<128x2432xbf16, #tpu.memory_space<vmem>>, vector<128x128xbf16>
    %1072 = arith.truncf %1070 : vector<10x128xf32> to vector<10x128xbf16>
    %cst_303 = arith.constant dense<0.000000e+00> : vector<10x128xf32>
    %1073 = tpu.matmul %1072, %1071, %cst_303 {dimension_numbers = #tpu.dot_dimension_numbers<[1], [0], [0], [1], [0, 0, 1, 1], [], []>} : vector<10x128xbf16>, vector<128x128xbf16>, vector<10x128xf32> -> vector<10x128xf32>
    %c22 = arith.constant 22 : index
    %c0_304 = arith.constant 0 : index
    %1074 = vector.load %arg4[%c22, %c0_304] : memref<50x128xf32, #tpu.memory_space<vmem>>, vector<1x128xf32>
    %1075 = vector.broadcast %1074 : vector<1x128xf32> to vector<10x128xf32>
    %1076 = arith.addf %1073, %1075 : vector<10x128xf32>
    %1077 = arith.addf %755, %1076 : vector<10x128xf32>
    %c23 = arith.constant 23 : index
    %c0_305 = arith.constant 0 : index
    %1078 = vector.load %arg4[%c23, %c0_305] : memref<50x128xf32, #tpu.memory_space<vmem>>, vector<1x128xf32>
    %c24 = arith.constant 24 : index
    %c0_306 = arith.constant 0 : index
    %1079 = vector.load %arg4[%c24, %c0_306] : memref<50x128xf32, #tpu.memory_space<vmem>>, vector<1x128xf32>
    %cst_307 = arith.constant dense<0.000000e+00> : vector<10xf32>
    %1080 = vector.multi_reduction <add>, %1077, %cst_307 [1] : vector<10x128xf32> to vector<10xf32>
    %1081 = vector.shape_cast %1080 : vector<10xf32> to vector<10x1xf32>
    %cst_308 = arith.constant 1.280000e+02 : f32
    %1082 = vector.broadcast %cst_308 : f32 to vector<10x1xf32>
    %1083 = arith.divf %1081, %1082 : vector<10x1xf32>
    %1084 = vector.broadcast %1083 : vector<10x1xf32> to vector<10x128xf32>
    %1085 = arith.subf %1077, %1084 : vector<10x128xf32>
    %1086 = arith.mulf %1085, %1085 : vector<10x128xf32>
    %cst_309 = arith.constant dense<0.000000e+00> : vector<10xf32>
    %1087 = vector.multi_reduction <add>, %1086, %cst_309 [1] : vector<10x128xf32> to vector<10xf32>
    %1088 = vector.shape_cast %1087 : vector<10xf32> to vector<10x1xf32>
    %cst_310 = arith.constant 1.280000e+02 : f32
    %1089 = vector.broadcast %cst_310 : f32 to vector<10x1xf32>
    %1090 = arith.divf %1088, %1089 : vector<10x1xf32>
    %cst_311 = arith.constant 9.99999974E-6 : f32
    %1091 = vector.broadcast %cst_311 : f32 to vector<10x1xf32>
    %1092 = arith.addf %1090, %1091 : vector<10x1xf32>
    %1093 = math.rsqrt %1092 : vector<10x1xf32>
    %1094 = vector.broadcast %1093 : vector<10x1xf32> to vector<10x128xf32>
    %1095 = arith.mulf %1085, %1094 : vector<10x128xf32>
    %1096 = vector.broadcast %1078 : vector<1x128xf32> to vector<10x128xf32>
    %1097 = arith.mulf %1095, %1096 : vector<10x128xf32>
    %1098 = vector.broadcast %1079 : vector<1x128xf32> to vector<10x128xf32>
    %1099 = arith.addf %1097, %1098 : vector<10x128xf32>
    %c0_312 = arith.constant 0 : index
    %c2048 = arith.constant 2048 : index
    %1100 = vector.load %arg3[%c0_312, %c2048] : memref<128x2432xbf16, #tpu.memory_space<vmem>>, vector<128x128xbf16>
    %1101 = arith.truncf %1099 : vector<10x128xf32> to vector<10x128xbf16>
    %cst_313 = arith.constant dense<0.000000e+00> : vector<10x128xf32>
    %1102 = tpu.matmul %1101, %1100, %cst_313 {dimension_numbers = #tpu.dot_dimension_numbers<[1], [0], [0], [1], [0, 0, 1, 1], [], []>} : vector<10x128xbf16>, vector<128x128xbf16>, vector<10x128xf32> -> vector<10x128xf32>
    %c25 = arith.constant 25 : index
    %c0_314 = arith.constant 0 : index
    %1103 = vector.load %arg4[%c25, %c0_314] : memref<50x128xf32, #tpu.memory_space<vmem>>, vector<1x128xf32>
    %1104 = vector.broadcast %1103 : vector<1x128xf32> to vector<10x128xf32>
    %1105 = arith.addf %1102, %1104 : vector<10x128xf32>
    %cst_315 = arith.constant 0.000000e+00 : f32
    %1106 = vector.broadcast %cst_315 : f32 to vector<10x128xf32>
    %1107 = arith.maximumf %1105, %1106 : vector<10x128xf32>
    %c0_316 = arith.constant 0 : index
    %c2176 = arith.constant 2176 : index
    %1108 = vector.load %arg3[%c0_316, %c2176] : memref<128x2432xbf16, #tpu.memory_space<vmem>>, vector<128x128xbf16>
    %1109 = arith.truncf %1107 : vector<10x128xf32> to vector<10x128xbf16>
    %cst_317 = arith.constant dense<0.000000e+00> : vector<10x128xf32>
    %1110 = tpu.matmul %1109, %1108, %cst_317 {dimension_numbers = #tpu.dot_dimension_numbers<[1], [0], [0], [1], [0, 0, 1, 1], [], []>} : vector<10x128xbf16>, vector<128x128xbf16>, vector<10x128xf32> -> vector<10x128xf32>
    %c26 = arith.constant 26 : index
    %c0_318 = arith.constant 0 : index
    %1111 = vector.load %arg4[%c26, %c0_318] : memref<50x128xf32, #tpu.memory_space<vmem>>, vector<1x128xf32>
    %1112 = vector.broadcast %1111 : vector<1x128xf32> to vector<10x128xf32>
    %1113 = arith.addf %1110, %1112 : vector<10x128xf32>
    %1114 = arith.addf %1099, %1113 : vector<10x128xf32>
    %c27 = arith.constant 27 : index
    %c0_319 = arith.constant 0 : index
    %1115 = vector.load %arg4[%c27, %c0_319] : memref<50x128xf32, #tpu.memory_space<vmem>>, vector<1x128xf32>
    %c28 = arith.constant 28 : index
    %c0_320 = arith.constant 0 : index
    %1116 = vector.load %arg4[%c28, %c0_320] : memref<50x128xf32, #tpu.memory_space<vmem>>, vector<1x128xf32>
    %cst_321 = arith.constant dense<0.000000e+00> : vector<10xf32>
    %1117 = vector.multi_reduction <add>, %1114, %cst_321 [1] : vector<10x128xf32> to vector<10xf32>
    %1118 = vector.shape_cast %1117 : vector<10xf32> to vector<10x1xf32>
    %cst_322 = arith.constant 1.280000e+02 : f32
    %1119 = vector.broadcast %cst_322 : f32 to vector<10x1xf32>
    %1120 = arith.divf %1118, %1119 : vector<10x1xf32>
    %1121 = vector.broadcast %1120 : vector<10x1xf32> to vector<10x128xf32>
    %1122 = arith.subf %1114, %1121 : vector<10x128xf32>
    %1123 = arith.mulf %1122, %1122 : vector<10x128xf32>
    %cst_323 = arith.constant dense<0.000000e+00> : vector<10xf32>
    %1124 = vector.multi_reduction <add>, %1123, %cst_323 [1] : vector<10x128xf32> to vector<10xf32>
    %1125 = vector.shape_cast %1124 : vector<10xf32> to vector<10x1xf32>
    %cst_324 = arith.constant 1.280000e+02 : f32
    %1126 = vector.broadcast %cst_324 : f32 to vector<10x1xf32>
    %1127 = arith.divf %1125, %1126 : vector<10x1xf32>
    %cst_325 = arith.constant 9.99999974E-6 : f32
    %1128 = vector.broadcast %cst_325 : f32 to vector<10x1xf32>
    %1129 = arith.addf %1127, %1128 : vector<10x1xf32>
    %1130 = math.rsqrt %1129 : vector<10x1xf32>
    %1131 = vector.broadcast %1130 : vector<10x1xf32> to vector<10x128xf32>
    %1132 = arith.mulf %1122, %1131 : vector<10x128xf32>
    %1133 = vector.broadcast %1115 : vector<1x128xf32> to vector<10x128xf32>
    %1134 = arith.mulf %1132, %1133 : vector<10x128xf32>
    %1135 = vector.broadcast %1116 : vector<1x128xf32> to vector<10x128xf32>
    %1136 = arith.addf %1134, %1135 : vector<10x128xf32>
    %1137 = vector.shape_cast %1136 : vector<10x128xf32> to vector<2x5x128xf32>
    %1138 = vector.extract_strided_slice %1137 {offsets = [0, 0, 0], sizes = [2, 1, 128], strides = [1, 1, 1]} : vector<2x5x128xf32> to vector<2x1x128xf32>
    %1139 = vector.shape_cast %1138 : vector<2x1x128xf32> to vector<2x128xf32>
    %c0_326 = arith.constant 0 : index
    %c2304 = arith.constant 2304 : index
    %1140 = vector.load %arg3[%c0_326, %c2304] : memref<128x2432xbf16, #tpu.memory_space<vmem>>, vector<128x128xbf16>
    %1141 = arith.truncf %1139 : vector<2x128xf32> to vector<2x128xbf16>
    %cst_327 = arith.constant dense<0.000000e+00> : vector<2x128xf32>
    %1142 = tpu.matmul %1141, %1140, %cst_327 {dimension_numbers = #tpu.dot_dimension_numbers<[1], [0], [0], [1], [0, 0, 1, 1], [], []>} : vector<2x128xbf16>, vector<128x128xbf16>, vector<2x128xf32> -> vector<2x128xf32>
    %c29 = arith.constant 29 : index
    %c0_328 = arith.constant 0 : index
    %1143 = vector.load %arg4[%c29, %c0_328] : memref<50x128xf32, #tpu.memory_space<vmem>>, vector<1x128xf32>
    %1144 = vector.broadcast %1143 : vector<1x128xf32> to vector<2x128xf32>
    %1145 = arith.addf %1142, %1144 : vector<2x128xf32>
    %c0_329 = arith.constant 0 : index
    %c0_330 = arith.constant 0 : index
    %1146 = vector.load %arg5[%c0_329, %c0_330] : memref<2x128xf32, #tpu.memory_space<vmem>>, vector<2x128xf32>
    tpu.vector_store %arg5[%c0_329, %c0_330], %1145 {strides = array<i32>} : memref<2x128xf32, #tpu.memory_space<vmem>>, vector<2x128xf32>,
    return
  }
  func.func @transform_0(%arg0: i32) -> (i32, i32) {
    %c0_i32 = arith.constant 0 : i32
    %c0_i32_0 = arith.constant 0 : i32
    return %arg0, %c0_i32 : i32, i32
  }
  func.func @transform_1(%arg0: i32) -> (i32, i32) {
    %c0_i32 = arith.constant 0 : i32
    %c0_i32_0 = arith.constant 0 : i32
    %c0_i32_1 = arith.constant 0 : i32
    return %c0_i32, %c0_i32_0 : i32, i32
  }
  func.func @transform_2(%arg0: i32) -> (i32, i32) {
    %c0_i32 = arith.constant 0 : i32
    %c0_i32_0 = arith.constant 0 : i32
    %c0_i32_1 = arith.constant 0 : i32
    return %c0_i32, %c0_i32_0 : i32, i32
  }
  func.func @transform_3(%arg0: i32) -> (i32, i32) {
    %c0_i32 = arith.constant 0 : i32
    %c0_i32_0 = arith.constant 0 : i32
    %c0_i32_1 = arith.constant 0 : i32
    return %c0_i32, %c0_i32_0 : i32, i32
  }
  func.func @transform_4(%arg0: i32) -> (i32, i32) {
    %c0_i32 = arith.constant 0 : i32
    %c0_i32_0 = arith.constant 0 : i32
    return %arg0, %c0_i32 : i32, i32
  }
}

</mosaic_0001>

<bundles_post_ra>
// kernel: tile.11
= control target key start
LH: loop header
LB: loop body
LE: loop exit
PB: predicated region body
PF: predicated region fallthrough
CT: control target
= control target key end

     0   :  { %s32_s0 = inlined_call_operand.vmem [shape: f32[2,5,128], index: 0, kind: input, shape index: {}]   ;;  %s33_s1 = inlined_call_operand.vmem [shape: f32[10,128], index: 1, kind: output, shape index: {}]  }
   0x1   :  { %v2_v0 = vld [vmem:[%s32_s0] sm:$0x1f]   ;;  %v8_v1 = vld [vmem:[%s32_s0 + $0x8] sm:$0x1f]  }
   0x2   :  { %3 = vst [vmem:[%s33_s1] sm:$0x1f] %v2_v0   ;;  %9 = vst [vmem:[%s33_s1 + $0x5] sm:$0x1f] %v8_v1  }

// kernel: efficient_trans_net.1
= control target key start
LH: loop header
LB: loop body
LE: loop exit
PB: predicated region body
PF: predicated region fallthrough
CT: control target
= control target key end

     0   :  { %v9779_v1 = vmov 0   ;;  %vm122_vm0 = vcmask 523264   ;;  %v9780_v21 = vmov 0.0   ;;  %s11903_s0 = inlined_call_operand.vmem [shape: bf16[8,192], index: 0, kind: input, shape index: {}]   ;;  %s11904_s1 = inlined_call_operand.vmem [shape: bf16[192,128], index: 1, kind: input, shape index: {}]   ;;  %s11905_s2 = inlined_call_operand.vmem [shape: bf16[128,2432], index: 2, kind: input, shape index: {}]   ;;  %s11906_s3 = inlined_call_operand.vmem [shape: f32[50,128], index: 3, kind: input, shape index: {}]   ;;  %s11907_s4 = inlined_call_operand.hbm [shape: f32[2,128], index: 4, kind: output, shape index: {}]  }
   0x1   :  { %v9345_v0 = vld [vmem:[%s11904_s1] sm:$0xff]   ;;  %126 = vmatprep.subr.bf16.mxu0 %v9779_v1  ;;  %479 = vmatprep.mubr.bf16.mxu1 %v9779_v1  ;;  %v9346_v2 = vld [vmem:[%s11904_s1 + $0x8] sm:$0xff]   ;;  %v9347_v3 = vld [vmem:[%s11904_s1 + $0x10] sm:$0xff]  }
   0x2   :  { %127 = vmatpush1.bf16.msra.mxu0 %v9345_v0  ;;  %v9348_v4 = vld [vmem:[%s11904_s1 + $0x18] sm:$0xff]   ;;  %v19_v5 = vld [vmem:[%s11903_s0] sm:$0xff]  ;;  %v9350_v11 = vld [vmem:[%s11904_s1 + $0x28] sm:$0xff]  }
   0x3   :  { %128 = vmatprep.subr.bf16.mxu0 %v9779_v1  ;;  %v7894_v6 = vcombine.high %v19_v5, %v19_v5  ;;  %v9359_v7 = vld [vmem:[%s11905_s2 + $0x4] ss:$76 sps:$4 sm:$0xff]   ;;  %v9361_v8 = vld [vmem:[%s11905_s2] ss:$76 sps:$4 sm:$0xff]   ;;  %v9363_v10 = vld [vmem:[%s11905_s2 + $0x9c] ss:$76 sps:$4 sm:$0xff]   ;;  %v7893_v20 = vcombine.low %v19_v5, %v19_v5 }
   0x4   :  { %v9349_v9 = vld [vmem:[%s11904_s1 + $0x20] sm:$0xff]   ;;  %447 = vmatprep.subr.bf16.mxu1 %v9359_v7  ;;  %v9351_v13 = vld [vmem:[%s11904_s1 + $0x30] sm:$0xff]   ;;  %v9352_v14 = vld [vmem:[%s11904_s1 + $0x38] sm:$0xff]  }
   0x5   :  { %7907 = vmatprep.mubr.msk.bf16.mxu0 %vm122_vm0, %v7894_v6  ;;  %v9365_v12 = vld [vmem:[%s11905_s2 + $0x98] ss:$76 sps:$4 sm:$0xff]   ;;  %448 = vmatpush1.bf16.msra.mxu1 %v9361_v8  ;;  %v9354_v16 = vld [vmem:[%s11904_s1 + $0x48] sm:$0xff]   ;;  %v9355_v17 = vld [vmem:[%s11904_s1 + $0x50] sm:$0xff]  }
   0x6   :  { %129 = vmatpush1.bf16.msra.mxu0 %v9346_v2  ;;  %449 = vmatprep.subr.bf16.mxu1 %v9363_v10  ;;  %v9353_v15 = vld [vmem:[%s11904_s1 + $0x40] sm:$0xff]   ;;  %v9356_v18 = vld [vmem:[%s11904_s1 + $0x58] sm:$0xff]   ;;  %v9366_v22 = vld [vmem:[%s11905_s2 + $0xa8] ss:$76 sps:$4 sm:$0xff]  }
   0x7   :  { %130 = vmatprep.subr.bf16.mxu0 %v9779_v1  ;;  %v9362_v19 = vld [vmem:[%s11905_s2 + $0x10] ss:$76 sps:$4 sm:$0xff]  }
   0x9   :  { %450 = vmatpush1.bf16.msra.mxu1 %v9365_v12 }
   0xa   :  { %131 = vmatpush1.bf16.msra.mxu0 %v9347_v3 }
   0xb   :  { %132 = vmatprep.subr.bf16.mxu0 %v9779_v1 }
   0xe   :  { %133 = vmatpush1.bf16.msra.mxu0 %v9348_v4 }
   0xf   :  { %134 = vmatprep.subr.bf16.mxu0 %v9779_v1 }
  0x12   :  { %135 = vmatpush1.bf16.msra.mxu0 %v9349_v9 }
  0x13   :  { %136 = vmatprep.subr.bf16.mxu0 %v9779_v1 }
  0x16   :  { %137 = vmatpush1.bf16.msra.mxu0 %v9350_v11 }
  0x17   :  { %138 = vmatprep.subr.bf16.mxu0 %v9779_v1 }
  0x1a   :  { %139 = vmatpush1.bf16.msra.mxu0 %v9351_v13 }
  0x1b   :  { %140 = vmatprep.subr.bf16.mxu0 %v9779_v1 }
  0x1e   :  { %141 = vmatpush1.bf16.msra.mxu0 %v9352_v14 }
  0x1f   :  { %142 = vmatprep.subr.bf16.mxu0 %v9779_v1 }
  0x22   :  { %143 = vmatpush1.bf16.msra.mxu0 %v9353_v15 }
  0x23   :  { %144 = vmatprep.subr.bf16.mxu0 %v9779_v1 }
  0x26   :  { %145 = vmatpush1.bf16.msra.mxu0 %v9354_v16 }
  0x27   :  { %146 = vmatprep.subr.bf16.mxu0 %v9779_v1 }
  0x2a   :  { %147 = vmatpush1.bf16.msra.mxu0 %v9355_v17 }
  0x2b   :  { %148 = vmatprep.subr.bf16.mxu0 %v9779_v1 }
  0x2e   :  { %149 = vmatpush1.bf16.msra.mxu0 %v9356_v18 }
  0x2f   :  { %8476 = vmatprep.subr.bf16.mxu0 %v9780_v21 }
  0x31   :  { %159 = vmatmul.mubr.bf16.vlgmr.msra.gmra.mrb[0].mxu0 %v7893_v20 }
  0x32   :  { %8477 = vmatpush3.bf16.msra.mxu0 %v9362_v19 }
  0x33   :  { %8478 = vmatprep.subr.bf16.mxu0 %v9780_v21 }
  0x36   :  { %8479 = vmatpush3.bf16.msra.mxu0 %v9366_v22 }
  0x37   :  { %8480 = vmatprep.subr.bf16.mxu0 %v9780_v21 }
  0x38   :  { %9 = vsyncpa [#allocation3], 0  ;;  %v9367_v23 = vld [vmem:[%s11905_s2 + $0x134] ss:$76 sps:$4 sm:$0xff]   ;;  %v9369_v24 = vld [vmem:[%s11905_s2 + $0x130] ss:$76 sps:$4 sm:$0xff]  }
  0x39   :  { %451 = vmatprep.subr.bf16.mxu1 %v9367_v23  ;;  %v9370_v25 = vld [vmem:[%s11905_s2 + $0x140] ss:$76 sps:$4 sm:$0xff]   ;;  %v9373_v27 = vld [vmem:[%s11905_s2 + $0x1c8] ss:$76 sps:$4 sm:$0xff]   ;;  %v9374_v28 = vld [vmem:[%s11905_s2 + $0x1d8] ss:$76 sps:$4 sm:$0xff]  }
  0x3a   :  { %452 = vmatpush1.bf16.msra.mxu1 %v9369_v24  ;;  %8481 = vmatpush3.bf16.msra.mxu0 %v9370_v25  ;;  %v9371_v26 = vld [vmem:[%s11905_s2 + $0x1cc] ss:$76 sps:$4 sm:$0xff]   ;;  %v9375_v29 = vld [vmem:[%s11905_s2 + $0x264] ss:$76 sps:$4 sm:$0xff]   ;;  %v9379_v32 = vld [vmem:[%s11905_s2 + $0x2fc] ss:$76 sps:$4 sm:$0xff]  }
  0x3b   :  { %8482 = vmatprep.subr.bf16.mxu0 %v9780_v21  ;;  %453 = vmatprep.subr.bf16.mxu1 %v9371_v26  ;;  %v9377_v30 = vld [vmem:[%s11905_s2 + $0x260] ss:$76 sps:$4 sm:$0xff]   ;;  %v9378_v31 = vld [vmem:[%s11905_s2 + $0x270] ss:$76 sps:$4 sm:$0xff]   ;;  %v9381_v33 = vld [vmem:[%s11905_s2 + $0x2f8] ss:$76 sps:$4 sm:$0xff]  }
  0x3c   :  { %v9382_v34 = vld [vmem:[%s11905_s2 + $0x308] ss:$76 sps:$4 sm:$0xff]   ;;  %v9385_v36 = vld [vmem:[%s11905_s2 + $0x390] ss:$76 sps:$4 sm:$0xff]   ;;  %v9386_v37 = vld [vmem:[%s11905_s2 + $0x3a0] ss:$76 sps:$4 sm:$0xff]  }
  0x3d   :  { %v9383_v35 = vld [vmem:[%s11905_s2 + $0x394] ss:$76 sps:$4 sm:$0xff]   ;;  %v9387_v38 = vld [vmem:[%s11905_s2 + $0x42c] ss:$76 sps:$4 sm:$0xff]   ;;  %vm9781_vm1 = vmmov 0   ;;  %vm180_vm2 = vcmask 1040384  }
  0x3e   :  { %454 = vmatpush1.bf16.msra.mxu1 %v9373_v27  ;;  %8483 = vmatpush3.bf16.msra.mxu0 %v9374_v28  ;;  %v9389_v39 = vld [vmem:[%s11905_s2 + $0x428] ss:$76 sps:$4 sm:$0xff]   ;;  %v9390_v40 = vld [vmem:[%s11905_s2 + $0x438] ss:$76 sps:$4 sm:$0xff]   ;;  %v171_v50 = vld [vmem:[%s11906_s3] sm:$0x1] }
  0x3f   :  { %8484 = vmatprep.subr.bf16.mxu0 %v9780_v21  ;;  %455 = vmatprep.subr.bf16.mxu1 %v9375_v29  ;;  %v9393_v41 = vld [vmem:[%s11905_s2 + $0xc] ss:$76 sps:$4 sm:$0xff]   ;;  %v176_v52 = vrot.slane %v171_v50, 3  ;;  %vm182_vm3 = vcmask 1044480   ;;  %vm184_vm4 = vcmask 1045504   ;;  %v186_v16 = vld [vmem:[%s11906_s3 + $0x1e] sm:$0xff] }
  0x40   :  { %8492 = vmatprep.mubr.msk.bf16.mxu0 %vm9781_vm1, %v9780_v21  ;;  %v9391_v57 = vld [vmem:[%s11905_s2 + $0x8] ss:$76 sps:$4 sm:$0xff]   ;;  %v9396_v60 = vld [vmem:[%s11905_s2 + $0xa4] ss:$76 sps:$4 sm:$0xff]   ;;  %v9394_v61 = vld [vmem:[%s11905_s2 + $0xa0] ss:$76 sps:$4 sm:$0xff]  }
  0x41   :  { %v9399_v62 = vld [vmem:[%s11905_s2 + $0x13c] ss:$76 sps:$4 sm:$0xff]   ;;  %v9397_v63 = vld [vmem:[%s11905_s2 + $0x138] ss:$76 sps:$4 sm:$0xff]   ;;  %v9402_v0 = vld [vmem:[%s11905_s2 + $0x1d4] ss:$76 sps:$4 sm:$0xff]  }
  0x42   :  { %456 = vmatpush1.bf16.msra.mxu1 %v9377_v30  ;;  %8485 = vmatpush3.bf16.msra.mxu0 %v9378_v31  ;;  %v9400_v2 = vld [vmem:[%s11905_s2 + $0x1d0] ss:$76 sps:$4 sm:$0xff]   ;;  %v9405_v3 = vld [vmem:[%s11905_s2 + $0x26c] ss:$76 sps:$4 sm:$0xff]   ;;  %v9403_v4 = vld [vmem:[%s11905_s2 + $0x268] ss:$76 sps:$4 sm:$0xff]  }
  0x43   :  { %8486 = vmatprep.subr.bf16.mxu0 %v9780_v21  ;;  %457 = vmatprep.subr.bf16.mxu1 %v9379_v32  ;;  %v9408_v5 = vld [vmem:[%s11905_s2 + $0x304] ss:$76 sps:$4 sm:$0xff]   ;;  %v9406_v6 = vld [vmem:[%s11905_s2 + $0x300] ss:$76 sps:$4 sm:$0xff]   ;;  %v9411_v7 = vld [vmem:[%s11905_s2 + $0x39c] ss:$76 sps:$4 sm:$0xff]  }
  0x44   :  { %v9409_v8 = vld [vmem:[%s11905_s2 + $0x398] ss:$76 sps:$4 sm:$0xff]   ;;  %v9414_v9 = vld [vmem:[%s11905_s2 + $0x434] ss:$76 sps:$4 sm:$0xff]   ;;  %v9412_v10 = vld [vmem:[%s11905_s2 + $0x430] ss:$76 sps:$4 sm:$0xff]  }
  0x45   :  { %v7952_v11 = vld [vmem:[%s11906_s3 + $0x5] ss:$0 sm:$0xff]  ;;  %v7949_v12 = vld [vmem:[%s11906_s3 + $0x2] ss:$0 sm:$0xff]  ;;  %v188_v14 = vld [vmem:[%s11906_s3 + $0x28] sm:$0xff]  ;;  %vm624_vm5 = vcmask 130048  }
  0x46   :  { %458 = vmatpush1.bf16.msra.mxu1 %v9381_v33  ;;  %8487 = vmatpush3.bf16.msra.mxu0 %v9382_v34  ;;  %v189_v23 = vld [vmem:[%s11906_s3 + $0x30] sm:$0x3]  ;;  %v187_v26 = vld [vmem:[%s11906_s3 + $0x26] sm:$0x3]  ;;  %s9782_s24 = smov 80   ;;  %s9783_s25 = smov 112  }
  0x47   :  { %8488 = vmatprep.subr.bf16.mxu0 %v9780_v21  ;;  %459 = vmatprep.subr.bf16.mxu1 %v9383_v35  ;;  %s9784_s1 = smov 96   ;;  %s9785_s5 = smov 64   ;;  %vm1048_vm6 = vcmask 1041408   ;;  %vm1049_vm7 = vcmask 1042432   ;;  %vm1031_vm8 = vcmask 36864   ;;  %vm1044_vm9 = vcmask 39936  }
  0x48   :  { %s9786_s6 = smov 48   ;;  %s9787_s7 = smov 32   ;;  %vm1545_vm10 = vcmask 261120   ;;  %vm1547_vm11 = vcmask 392192   ;;  %vm1550_vm12 = vcmask 654336   ;;  %vm1554_vm13 = vcmask 916480  }
  0x49   :  { %s9788_s8 = smov 16   ;;  %vm1552_vm14 = vcmask 785408   ;;  %vm7786_vm15 = vcmask 1041409   ;;  %s9791_s30 = smov [#allocation2]  }
  0x4a   :  { %460 = vmatpush1.bf16.msra.mxu1 %v9385_v36  ;;  %8489 = vmatpush3.bf16.msra.mxu0 %v9386_v37  ;;  %s7885_s0 = sshll.u32 %s9791_s30, 4  ;;  %s7886_s0 = int_to_ptr.vmem [resolvable:$true] %s7885_s0 }
  0x4b   :  { %8490 = vmatprep.subr.bf16.mxu0 %v9780_v21  ;;  %461 = vmatprep.subr.bf16.mxu1 %v9387_v38  ;;  %v7948_v38 = vld [vmem:[%s11906_s3 + $0x1] ss:$0 sm:$0xff]  ;;  %s9755_s9 = scalar_lea.vmem %s7886_s0, 32  ;;  %p9760_p1 = scmp.lt.s32.totalorder %s7886_s0, %s7886_s0 }
  0x4c   :  { %p9756_p0 = scmp.ne.s32.totalorder %s7886_s0, %s9755_s9  ;;  %p9761_p2 = scmp.lt.s32.totalorder %s9755_s9, %s9755_s9 }
  0x4e   :  { %462 = vmatpush1.bf16.msra.mxu1 %v9389_v39  ;;  %8491 = vmatpush3.bf16.msra.mxu0 %v9390_v40  ;;  %v7951_v39 = vld [vmem:[%s11906_s3 + $0x4] ss:$0 sm:$0xff]  ;;  %p9762_p3 = por %p9761_p2, %p9760_p1 }
  0x4f   :  { %490 = vmatprep.subr.bf16.mxu1 %v9393_v41  ;;  %8508 = vmatprep.subr.bf16.mxu0 %v9780_v21 }
  0x50   :  { %p9763_p4 = pnand %p9762_p3, %p9756_p0 }
 0x104   :  { %v160_v42 = vpop.f32.mrb[0].mxu0 }
 0x105   :  { %v167_v43 = vmul.f32 0.70710677, %v160_v42  ;;  %v162_v44 = vpop.f32.mrb[1].mxu0  ;;  %v166_v48 = vmul.f32 0.5, %v160_v42  ;;  %v7950_v42 = vld [vmem:[%s11906_s3 + $0x3] ss:$0 sm:$0xff] }
 0x106   :  { %v163_v45 = vpop.f32.mrb[2].mxu0 }
 0x107   :  { %9543 = verf.f32 %v167_v43  ;;  %v164_v46 = vpop.f32.mrb[3].mxu0 }
 0x111   :  { %v9544_v47 = vpop.eup %9543 }
 0x112   :  { %v169_v49 = vadd.f32 1.0, %v9544_v47 }
 0x114   :  { %v170_v51 = vmul.f32 %v169_v49, %v166_v48 }
 0x116   :  { %v173_v53 = vrot.slane %v170_v51, 7  ;;  %v9959_v54 = vrot.slane %v170_v51, 6 }
 0x118   :  { %v181_v55 = vsel %vm180_vm2, %v171_v50, %v173_v53 }
 0x119   :  { %v183_v56 = vsel %vm182_vm3, %v181_v55, %v176_v52 }
 0x11a   :  { %v9966_v58 = vsel %vm184_vm4, %v183_v56, %v9959_v54 }
 0x11b   :  { %v238_v59 = vpack.c.bf16 %v9959_v54, %v9966_v58 }
 0x11d   :  { %480 = vmatmul.mubr.bf16.vlgmr.msra.gmra.mrb[0].mxu1 %v238_v59  ;;  %8493 = vmatmul.mubr.bf16.vlgmr.msra.gmra.mrb[4].mxu0 %v238_v59 }
 0x11e   :  { %491 = vmatpush1.bf16.msra.mxu1 %v9391_v57  ;;  %522 = vmatprep.mubr.bf16.mxu1 %v9779_v1 }
 0x11f   :  { %492 = vmatprep.subr.bf16.mxu1 %v9396_v60  ;;  %8510 = vmatprep.mubr.msk.bf16.mxu0 %vm9781_vm1, %v9780_v21 }
 0x122   :  { %493 = vmatpush1.bf16.msra.mxu1 %v9394_v61 }
 0x123   :  { %494 = vmatprep.subr.bf16.mxu1 %v9399_v62 }
 0x126   :  { %495 = vmatpush1.bf16.msra.mxu1 %v9397_v63 }
 0x127   :  { %496 = vmatprep.subr.bf16.mxu1 %v9402_v0 }
 0x12a   :  { %497 = vmatpush1.bf16.msra.mxu1 %v9400_v2 }
 0x12b   :  { %498 = vmatprep.subr.bf16.mxu1 %v9405_v3 }
 0x12e   :  { %499 = vmatpush1.bf16.msra.mxu1 %v9403_v4 }
 0x12f   :  { %500 = vmatprep.subr.bf16.mxu1 %v9408_v5 }
 0x132   :  { %501 = vmatpush1.bf16.msra.mxu1 %v9406_v6 }
 0x133   :  { %502 = vmatprep.subr.bf16.mxu1 %v9411_v7 }
 0x136   :  { %503 = vmatpush1.bf16.msra.mxu1 %v9409_v8 }
 0x137   :  { %504 = vmatprep.subr.bf16.mxu1 %v9414_v9 }
 0x13a   :  { %505 = vmatpush1.bf16.msra.mxu1 %v9412_v10 }
 0x13b   :  { %8496 = vmatprep.subr.bf16.mxu1 %v9780_v21 }
 0x13d   :  { %523 = vmatmul.mubr.bf16.vlgmr.msra.gmra.mrb[4].mxu1 %v238_v59 }
 0x13e   :  { %8498 = vmatprep.mubr.msk.bf16.mxu1 %vm9781_vm1, %v9780_v21 }
 0x1f0   :  { %v481_v13 = vpop.f32.mrb[0].mxu1  ;;  %v567_v15 = vpop.f32.mrb[4].mxu0 }
 0x1f1   :  { %v607_v17 = vadd.f32 %v7952_v11, %v567_v15  ;;  %v483_v18 = vpop.f32.mrb[1].mxu1  ;;  %v8494_v19 = vpop.f32.mrb[5].mxu0  ;;  %v579_v40 = vadd.f32 %v7948_v38, %v481_v13  ;;  %v9789_v15 = vmov 65535  }
 0x1f2   :  { %v586_v20 = vadd.f32 %v7949_v12, %v483_v18  ;;  %v485_v22 = vpop.f32.mrb[2].mxu1  ;;  %v570_v24 = vpop.f32.mrb[6].mxu0 }
 0x1f3   :  { %v617_v25 = vmul.f32 %v607_v17, %v188_v14  ;;  %v608_v27 = vadd.f32 %v7952_v11, %v570_v24  ;;  %v487_v28 = vpop.f32.mrb[3].mxu1  ;;  %v8495_v29 = vpop.f32.mrb[7].mxu0  ;;  %v580_v44 = vadd.f32 %v7948_v38, %v485_v22  ;;  %v609_v50 = vmul.f32 %v579_v40, %v186_v16 }
 0x1f4   :  { %v615_v30 = vmul.f32 %v586_v20, %v186_v16  ;;  %v587_v31 = vadd.f32 %v7949_v12, %v487_v28  ;;  %v1050_v16 = vsel %vm1048_vm6, 4294967295, %v9789_v15 }
 0x1f5   :  { %v618_v32 = vmul.f32 %v608_v27, %v189_v23  ;;  %v610_v55 = vmul.f32 %v580_v44, %v187_v26  ;;  %v10117_v20 = vsel %vm1049_vm7, %v1050_v16, 0 }
 0x1f6   :  { %v619_v33 = vadd.f32 %v617_v25, %v615_v30  ;;  %v616_v34 = vmul.f32 %v587_v31, %v187_v26 }
 0x1f8   :  { %v620_v35 = vadd.f32 %v618_v32, %v616_v34 }
 0x1fa   :  { %v10036_v36 = vpack.c.bf16 %v620_v35, %v619_v33 }
 0x1fc   :  { %778 = vrot.lane.b32.xlu1 %v10036_v36, %s9782_s24  ;;  %676 = vrot.lane.b32.xlu0 %v10036_v36, %s9783_s25  ;;  %v629_v37 = vsel %vm624_vm5, %v10036_v36, 0 }
 0x1fd   :  { %8497 = vmatpush3.bf16.xpose.msra.mxu1 %v629_v37 }
 0x1fe   :  { %8502 = vmatprep.subr.bf16.mxu1 %v9780_v21 }
 0x200   :  { %727 = vrot.lane.b32.xlu0 %v10036_v36, %s9784_s1 }
 0x210   :  { %v524_v41 = vpop.f32.mrb[4].mxu1 }
 0x211   :  { %v526_v43 = vpop.f32.mrb[5].mxu1  ;;  %v593_v47 = vadd.f32 %v7950_v42, %v524_v41 }
 0x212   :  { %v600_v45 = vadd.f32 %v7951_v39, %v526_v43  ;;  %v528_v46 = vpop.f32.mrb[6].mxu1 }
 0x213   :  { %v594_v48 = vadd.f32 %v7950_v42, %v528_v46  ;;  %v530_v49 = vpop.f32.mrb[7].mxu1 }
 0x214   :  { %v611_v51 = vmul.f32 %v600_v45, %v188_v14  ;;  %v601_v52 = vadd.f32 %v7951_v39, %v530_v49 }
 0x215   :  { %v10056_v53 = vpack.c.bf16 %v594_v48, %v593_v47 }
 0x216   :  { %v613_v56 = vadd.f32 %v611_v51, %v609_v50  ;;  %v612_v57 = vmul.f32 %v601_v52, %v189_v23 }
 0x217   :  { %v1053_v22 = vand.u32 %v10117_v20, %v10056_v53 }
 0x218   :  { %v614_v59 = vadd.f32 %v612_v57, %v610_v55 }
 0x21a   :  { %v10058_v60 = vpack.c.bf16 %v614_v59, %v613_v56 }
 0x21c   :  { %673 = vrot.lane.b32.xlu1 %v10058_v60, %s9783_s25  ;;  %725 = vrot.lane.b32.xlu0 %v10058_v60, %s9784_s1 }
 0x21d   :  { %8499 = vmatmul.mubr.msk.bf16.vlgmr.msra.gmra.mrb[8].mxu1 %vm624_vm5, %v10058_v60 }
 0x21e   :  { %8504 = vmatprep.mubr.msk.bf16.mxu1 %vm9781_vm1, %v9780_v21 }
 0x220   :  { %829 = vrot.lane.b32.xlu1 %v10036_v36, %s9785_s5  ;;  %776 = vrot.lane.b32.xlu0 %v10058_v60, %s9782_s24 }
 0x224   :  { %880 = vrot.lane.b32.xlu1 %v10036_v36, %s9786_s6  ;;  %827 = vrot.lane.b32.xlu0 %v10058_v60, %s9785_s5 }
 0x228   :  { %931 = vrot.lane.b32.xlu1 %v10036_v36, %s9787_s7  ;;  %878 = vrot.lane.b32.xlu0 %v10058_v60, %s9786_s6 }
 0x22c   :  { %982 = vrot.lane.b32.xlu1 %v10036_v36, %s9788_s8  ;;  %929 = vrot.lane.b32.xlu0 %v10058_v60, %s9787_s7 }
 0x230   :  { %980 = vrot.lane.b32.xlu1 %v10058_v60, %s9788_s8  ;;  %1108 = vrot.lane.b32.xlu0 %v10056_v53, %s9783_s25 }
 0x234   :  { %1168 = vrot.lane.b32.xlu1 %v10056_v53, %s9784_s1 }
 0x26e   :  { %v677_v61 = vpop.permute.xlu0 %676  ;;  %v779_v2 = vpop.permute.xlu1 %778 }
 0x26f   :  { %v682_v62 = vsel %vm624_vm5, %v677_v61, 0  ;;  %v784_v5 = vsel %vm624_vm5, %v779_v2, 0 }
 0x270   :  { %8503 = vmatpush3.bf16.xpose.msra.mxu1 %v682_v62 }
 0x271   :  { %8514 = vmatprep.subr.bf16.mxu1 %v9780_v21 }
 0x272   :  { %v728_v63 = vpop.permute.xlu0 %727 }
 0x273   :  { %v733_v0 = vsel %vm624_vm5, %v728_v63, 0 }
 0x274   :  { %8509 = vmatpush3.bf16.xpose.msra.mxu0 %v733_v0 }
 0x275   :  { %8520 = vmatprep.subr.bf16.mxu0 %v9780_v21 }
 0x28e   :  { %v674_v3 = vpop.permute.xlu1 %673  ;;  %v726_v4 = vpop.permute.xlu0 %725 }
 0x28f   :  { %8505 = vmatmul.mubr.msk.bf16.vlgmr.msra.gmra.mrb[12].mxu1 %vm624_vm5, %v674_v3  ;;  %8511 = vmatmul.mubr.msk.bf16.vlgmr.msra.gmra.mrb[8].mxu0 %vm624_vm5, %v726_v4 }
 0x290   :  { %8515 = vmatpush3.bf16.xpose.msra.mxu1 %v784_v5  ;;  %8516 = vmatprep.mubr.msk.bf16.mxu1 %vm9781_vm1, %v9780_v21 }
 0x291   :  { %8526 = vmatprep.subr.bf16.mxu1 %v9780_v21  ;;  %8522 = vmatprep.mubr.msk.bf16.mxu0 %vm9781_vm1, %v9780_v21 }
 0x292   :  { %v830_v6 = vpop.permute.xlu1 %829  ;;  %v777_v7 = vpop.permute.xlu0 %776 }
 0x293   :  { %v835_v8 = vsel %vm624_vm5, %v830_v6, 0 }
 0x294   :  { %8521 = vmatpush3.bf16.xpose.msra.mxu0 %v835_v8 }
 0x295   :  { %8532 = vmatprep.subr.bf16.mxu0 %v9780_v21 }
 0x296   :  { %v881_v9 = vpop.permute.xlu1 %880  ;;  %v828_v10 = vpop.permute.xlu0 %827 }
 0x297   :  { %v886_v11 = vsel %vm624_vm5, %v881_v9, 0  ;;  %8517 = vmatmul.mubr.msk.bf16.vlgmr.msra.gmra.mrb[16].mxu1 %vm624_vm5, %v777_v7 }
 0x298   :  { %8527 = vmatpush3.bf16.xpose.msra.mxu1 %v886_v11  ;;  %8528 = vmatprep.mubr.msk.bf16.mxu1 %vm9781_vm1, %v9780_v21 }
 0x299   :  { %8538 = vmatprep.subr.bf16.mxu1 %v9780_v21 }
 0x29a   :  { %v932_v12 = vpop.permute.xlu1 %931  ;;  %v879_v13 = vpop.permute.xlu0 %878 }
 0x29b   :  { %v937_v14 = vsel %vm624_vm5, %v932_v12, 0  ;;  %8523 = vmatmul.mubr.msk.bf16.vlgmr.msra.gmra.mrb[12].mxu0 %vm624_vm5, %v828_v10 }
 0x29c   :  { %8533 = vmatpush3.bf16.xpose.msra.mxu0 %v937_v14  ;;  %8534 = vmatprep.mubr.msk.bf16.mxu0 %vm9781_vm1, %v9780_v21 }
 0x29d   :  { %8544 = vmatprep.subr.bf16.mxu0 %v9780_v21 }
 0x29e   :  { %v983_v17 = vpop.permute.xlu1 %982  ;;  %v930_v18 = vpop.permute.xlu0 %929 }
 0x29f   :  { %v988_v19 = vsel %vm624_vm5, %v983_v17, 0  ;;  %8529 = vmatmul.mubr.msk.bf16.vlgmr.msra.gmra.mrb[20].mxu1 %vm624_vm5, %v879_v13 }
 0x2a0   :  { %8539 = vmatpush3.bf16.xpose.msra.mxu1 %v988_v19  ;;  %8540 = vmatprep.mubr.msk.bf16.mxu1 %vm9781_vm1, %v9780_v21 }
 0x2a1   :  { %8550 = vmatprep.subr.bf16.mxu1 %v9780_v21 }
 0x2a2   :  { %v1109_v23 = vpop.permute.xlu0 %1108  ;;  %v981_v24 = vpop.permute.xlu1 %980 }
 0x2a3   :  { %8535 = vmatmul.mubr.msk.bf16.vlgmr.msra.gmra.mrb[16].mxu0 %vm624_vm5, %v930_v18  ;;  %v1114_v25 = vand.u32 %v1109_v23, %v10117_v20 }
 0x2a4   :  { %8545 = vmatpush3.bf16.msra.mxu0 %v1053_v22  ;;  %8546 = vmatprep.mubr.msk.bf16.mxu0 %vm9781_vm1, %v9780_v21 }
 0x2a5   :  { %8556 = vmatprep.subr.bf16.mxu0 %v9780_v21 }
 0x2a6   :  { %v10157_v23 = vpop.permute.xlu1 %1168 }
 0x2a7   :  { %8541 = vmatmul.mubr.msk.bf16.vlgmr.msra.gmra.mrb[24].mxu1 %vm624_vm5, %v981_v24 }
 0x2a8   :  { %8551 = vmatpush3.bf16.msra.mxu1 %v1114_v25  ;;  %8552 = vmatprep.mubr.msk.bf16.mxu1 %vm9781_vm1, %v9780_v21 }
 0x2a9   :  { %8562 = vmatprep.subr.bf16.mxu1 %v9780_v21 }
 0x2f0   :  { %v665_v26 = vpop.f32.mrb[8].mxu1 }
 0x2f1   :  { %v671_v27 = vmul.f32 0.088388346, %v665_v26  ;;  %v8500_v28 = vpop.f32.mrb[9].mxu1 }
 0x2f2   :  { %v668_v29 = vpop.f32.mrb[10].mxu1 }
 0x2f3   :  { %v8501_v30 = vpop.f32.mrb[11].mxu1  ;;  %v1032_v31 = vsel %vm1031_vm8, %v671_v27, -inf }
 0x2f4   :  { %1033 = vmax.xlane.f32.xlu0 %v1032_v31 }
 0x362   :  { %v718_v32 = vpop.f32.mrb[12].mxu1  ;;  %v769_v33 = vpop.f32.mrb[8].mxu0 }
 0x363   :  { %v724_v34 = vmul.f32 0.088388346, %v718_v32  ;;  %v775_v35 = vmul.f32 0.088388346, %v769_v33  ;;  %v8506_v37 = vpop.f32.mrb[13].mxu1  ;;  %v8512_v38 = vpop.f32.mrb[9].mxu0 }
 0x364   :  { %v721_v39 = vpop.f32.mrb[14].mxu1  ;;  %v772_v40 = vpop.f32.mrb[10].mxu0 }
 0x365   :  { %v8507_v41 = vpop.f32.mrb[15].mxu1  ;;  %v8513_v42 = vpop.f32.mrb[11].mxu0  ;;  %v1095_v43 = vsel %vm1031_vm8, %v724_v34, -inf  ;;  %v1156_v44 = vsel %vm1031_vm8, %v775_v35, -inf }
 0x366   :  { %1096 = vmax.xlane.f32.xlu1 %v1095_v43  ;;  %1157 = vmax.xlane.f32.xlu0 %v1156_v44 }
 0x36a   :  { %v820_v45 = vpop.f32.mrb[16].mxu1 }
 0x36b   :  { %v10136_v46 = vmul.f32 0.088388346, %v820_v45  ;;  %v8518_v47 = vpop.f32.mrb[17].mxu1 }
 0x36c   :  { %v823_v48 = vpop.f32.mrb[18].mxu1 }
 0x36d   :  { %v8519_v49 = vpop.f32.mrb[19].mxu1  ;;  %v1216_v50 = vsel %vm1031_vm8, %v10136_v46, -inf }
 0x36e   :  { %1217 = vmax.xlane.f32.xlu0 %v1216_v50  ;;  %v871_v51 = vpop.f32.mrb[12].mxu0 }
 0x36f   :  { %v877_v52 = vmul.f32 0.088388346, %v871_v51  ;;  %v8524_v55 = vpop.f32.mrb[13].mxu0 }
 0x370   :  { %v874_v56 = vpop.f32.mrb[14].mxu0  ;;  %v1563_v55 = vshrl.u32 %v10036_v36, 16 }
 0x371   :  { %v8525_v57 = vpop.f32.mrb[15].mxu0  ;;  %v1276_v59 = vsel %vm1031_vm8, %v877_v52, -inf  ;;  %v1566_v56 = vshll.u32 %v10036_v36, 16 }
 0x372   :  { %v922_v61 = vpop.f32.mrb[20].mxu1  ;;  %1277 = vmax.xlane.f32.xlu1 %v1276_v59  ;;  %v1565_v59 = vrot.slane %v1563_v55, 2 }
 0x373   :  { %v10141_v62 = vmul.f32 0.088388346, %v922_v61  ;;  %v8530_v63 = vpop.f32.mrb[21].mxu1  ;;  %v1568_v61 = vrot.slane %v1566_v56, 3 }
 0x374   :  { %v925_v0 = vpop.f32.mrb[22].mxu1 }
 0x375   :  { %v8531_v2 = vpop.f32.mrb[23].mxu1  ;;  %v1336_v3 = vsel %vm1031_vm8, %v10141_v62, -inf }
 0x376   :  { %1337 = vmax.xlane.f32.xlu0 %v1336_v3  ;;  %v973_v4 = vpop.f32.mrb[16].mxu0  ;;  %v1556_v2 = vshrl.u32 %v10058_v60, 16  ;;  %v1559_v3 = vshll.u32 %v10058_v60, 16 }
 0x377   :  { %v979_v5 = vmul.f32 0.088388346, %v973_v4  ;;  %v8536_v6 = vpop.f32.mrb[17].mxu0  ;;  %v10187_v4 = vor.u32 %v1568_v61, %v1565_v59 }
 0x378   :  { %v976_v7 = vpop.f32.mrb[18].mxu0  ;;  %v1558_v6 = vrot.slane %v1556_v2, 2 }
 0x379   :  { %v8537_v8 = vpop.f32.mrb[19].mxu0  ;;  %v1396_v9 = vsel %vm1031_vm8, %v979_v5, -inf  ;;  %v1561_v7 = vrot.slane %v1559_v3, 3 }
 0x37a   :  { %v1024_v10 = vpop.f32.mrb[24].mxu1  ;;  %1397 = vmax.xlane.f32.xlu1 %v1396_v9 }
 0x37b   :  { %v1030_v11 = vmul.f32 0.088388346, %v1024_v10  ;;  %v8542_v12 = vpop.f32.mrb[25].mxu1  ;;  %v10191_v36 = vor.u32 %v1561_v7, %v1558_v6 }
 0x37c   :  { %v1027_v13 = vpop.f32.mrb[26].mxu1 }
 0x37d   :  { %v8543_v14 = vpop.f32.mrb[27].mxu1  ;;  %v1456_v15 = vsel %vm1031_vm8, %v1030_v11, -inf }
 0x37e   :  { %1457 = vmax.xlane.f32.xlu0 %v1456_v15  ;;  %v1174_v14 = vand.u32 %v10157_v23, %v10117_v20 }
 0x381   :  { %v1034_v16 = vpop.xlane.xlu0 %1033 }
 0x382   :  { %v1035_v17 = vsub.f32 %v671_v27, %v1034_v16 }
 0x384   :  { %v1036_v18 = vmul.f32 1.442695, %v1035_v17 }
 0x386   :  { %9545 = vpow2.f32 %v1036_v18 }
 0x38b   :  { %1288 = vrot.lane.b32.xlu1 %v10056_v53, %s9785_s5 }
 0x390   :  { %v10151_v19 = vpop.eup %9545 }
 0x391   :  { %v1038_v22 = vsel %vm1031_vm8, %v10151_v19, 0.0 }
 0x394   :  { %1228 = vrot.lane.b32.xlu0 %v10056_v53, %s9782_s24 }
 0x3af   :  { %1039 = vadd.xlane.f32.xlu1 %v1038_v22 }
 0x3c0   :  { %1408 = vrot.lane.b32.xlu1 %v10056_v53, %s9787_s7 }
 0x3f3   :  { %v1097_v24 = vpop.xlane.xlu1 %1096  ;;  %v1158_v25 = vpop.xlane.xlu0 %1157 }
 0x3f4   :  { %v1098_v26 = vsub.f32 %v724_v34, %v1097_v24  ;;  %v1159_v28 = vsub.f32 %v775_v35, %v1158_v25 }
 0x3f6   :  { %v1099_v29 = vmul.f32 1.442695, %v1098_v26  ;;  %v1160_v30 = vmul.f32 1.442695, %v1159_v28 }
 0x3f8   :  { %9547 = vpow2.f32 %v1099_v29 }
 0x3f9   :  { %9549 = vpow2.f32 %v1160_v30 }
 0x3fb   :  { %v1218_v38 = vpop.xlane.xlu0 %1217 }
 0x3fc   :  { %v1219_v57 = vsub.f32 %v10136_v46, %v1218_v38 }
 0x3fe   :  { %v1220_v63 = vmul.f32 1.442695, %v1219_v57 }
 0x3ff   :  { %v1278_v27 = vpop.xlane.xlu1 %1277 }
 0x400   :  { %v1279_v31 = vsub.f32 %v877_v52, %v1278_v27 }
 0x402   :  { %v10159_v32 = vpop.eup %9547  ;;  %v1280_v33 = vmul.f32 1.442695, %v1279_v31 }
 0x403   :  { %v10161_v37 = vpop.eup %9549  ;;  %v1101_v39 = vsel %vm1031_vm8, %v10159_v32, 0.0  ;;  %v1338_v35 = vpop.xlane.xlu0 %1337 }
 0x404   :  { %9551 = vpow2.f32 %v1280_v33  ;;  %1102 = vadd.xlane.f32.xlu0 %v1101_v39  ;;  %v1162_v34 = vsel %vm1031_vm8, %v10161_v37, 0.0  ;;  %v1339_v0 = vsub.f32 %v10141_v62, %v1338_v35  ;;  %v1574_v35 = vsel %vm624_vm5, %v10187_v4, 0 }
 0x405   :  { %1163 = vadd.xlane.f32.xlu1 %v1162_v34 }
 0x407   :  { %v1398_v40 = vpop.xlane.xlu1 %1397 }
 0x408   :  { %v1399_v41 = vsub.f32 %v979_v5, %v1398_v40  ;;  %v1340_v5 = vmul.f32 1.442695, %v1339_v0 }
 0x40a   :  { %v1400_v42 = vmul.f32 1.442695, %v1399_v41 }
 0x40b   :  { %v1458_v43 = vpop.xlane.xlu0 %1457  ;;  %v1289_v60 = vpop.permute.xlu1 %1288 }
 0x40c   :  { %9553 = vpow2.f32 %v1400_v42  ;;  %v1459_v44 = vsub.f32 %v1030_v11, %v1458_v43  ;;  %v1294_v30 = vand.u32 %v1289_v60, %v10117_v20  ;;  %v1989_v60 = vshll.u32 %v10056_v53, 16 }
 0x40e   :  { %v10167_v45 = vpop.eup %9551  ;;  %v1460_v47 = vmul.f32 1.442695, %v1459_v44 }
 0x40f   :  { %v1282_v48 = vsel %vm1031_vm8, %v10167_v45, 0.0  ;;  %v1229_v15 = vpop.permute.xlu0 %1228 }
 0x410   :  { %9555 = vpow2.f32 %v1460_v47  ;;  %1283 = vadd.xlane.f32.xlu1 %v1282_v48  ;;  %v1234_v28 = vand.u32 %v1229_v15, %v10117_v20 }
 0x411   :  { %9557 = vpow2.f32 %v1220_v63 }
 0x412   :  { %9559 = vpow2.f32 %v1340_v5 }
 0x416   :  { %v10171_v49 = vpop.eup %9553 }
 0x417   :  { %v1402_v50 = vsel %vm1031_vm8, %v10171_v49, 0.0 }
 0x418   :  { %1403 = vadd.xlane.f32.xlu1 %v1402_v50 }
 0x41a   :  { %v10175_v51 = vpop.eup %9555  ;;  %1348 = vrot.lane.b32.xlu0 %v10056_v53, %s9786_s6 }
 0x41b   :  { %v1462_v52 = vsel %vm1031_vm8, %v10175_v51, 0.0  ;;  %v10195_v46 = vpop.eup %9557 }
 0x41c   :  { %1463 = vadd.xlane.f32.xlu1 %v1462_v52  ;;  %v1222_v62 = vsel %vm1031_vm8, %v10195_v46, 0.0  ;;  %v10201_v8 = vpop.eup %9559 }
 0x41d   :  { %v1342_v10 = vsel %vm1031_vm8, %v10201_v8, 0.0 }
 0x42d   :  { %1619 = vrot.lane.b32.xlu1 %v10187_v4, %s9783_s25 }
 0x431   :  { %1617 = vrot.lane.b32.xlu1 %v10191_v36, %s9783_s25 }
 0x435   :  { %1668 = vrot.lane.b32.xlu1 %v10191_v36, %s9784_s1 }
 0x439   :  { %1223 = vadd.xlane.f32.xlu0 %v1222_v62  ;;  %1719 = vrot.lane.b32.xlu1 %v10191_v36, %s9782_s24 }
 0x43c   :  { %v1040_v9 = vpop.xlane.xlu1 %1039 }
 0x43d   :  { %9561 = vrcp.f32 %v1040_v9  ;;  %1343 = vadd.xlane.f32.xlu0 %v1342_v10  ;;  %1770 = vrot.lane.b32.xlu1 %v10191_v36, %s9785_s5  ;;  %v1991_v10 = vrot.slane %v1989_v60, 3 }
 0x440   :  { %v1409_v16 = vpop.permute.xlu1 %1408 }
 0x441   :  { %1821 = vrot.lane.b32.xlu1 %v10191_v36, %s9786_s6 }
 0x445   :  { %1872 = vrot.lane.b32.xlu1 %v10191_v36, %s9787_s7 }
 0x447   :  { %v9562_v11 = vpop.eup %9561 }
 0x448   :  { %v1042_v12 = vmul.f32 %v9562_v11, %v10151_v19 }
 0x44a   :  { %v1043_v13 = vpack.c.bf16 %v1042_v12, %v1042_v12 }
 0x44c   :  { %8547 = vmatmul.mubr.msk.bf16.vlgmr.msra.gmra.mrb[20].mxu0 %vm1044_vm9, %v1043_v13 }
 0x44d   :  { %8557 = vmatpush3.bf16.msra.mxu0 %v1174_v14  ;;  %8558 = vmatprep.mubr.msk.bf16.mxu0 %vm9781_vm1, %v9780_v21 }
 0x44e   :  { %8568 = vmatprep.subr.bf16.mxu0 %v9780_v21 }
 0x453   :  { %1468 = vrot.lane.b32.xlu0 %v10056_v53, %s9788_s8 }
 0x457   :  { %1670 = vrot.lane.b32.xlu0 %v10187_v4, %s9784_s1 }
 0x45b   :  { %1721 = vrot.lane.b32.xlu0 %v10187_v4, %s9782_s24 }
 0x45f   :  { %1772 = vrot.lane.b32.xlu0 %v10187_v4, %s9785_s5 }
 0x463   :  { %1823 = vrot.lane.b32.xlu0 %v10187_v4, %s9786_s6 }
 0x467   :  { %1874 = vrot.lane.b32.xlu0 %v10187_v4, %s9787_s7 }
 0x46b   :  { %1925 = vrot.lane.b32.xlu0 %v10187_v4, %s9788_s8 }
 0x46f   :  { %1923 = vrot.lane.b32.xlu0 %v10191_v36, %s9788_s8 }
 0x491   :  { %v1103_v17 = vpop.xlane.xlu0 %1102 }
 0x492   :  { %9563 = vrcp.f32 %v1103_v17  ;;  %v1164_v18 = vpop.xlane.xlu1 %1163 }
 0x493   :  { %9565 = vrcp.f32 %v1164_v18 }
 0x495   :  { %v1349_v41 = vpop.permute.xlu0 %1348 }
 0x496   :  { %v1354_v59 = vand.u32 %v1349_v41, %v10117_v20 }
 0x49c   :  { %v9564_v19 = vpop.eup %9563 }
 0x49d   :  { %v9566_v22 = vpop.eup %9565  ;;  %v1284_v23 = vpop.xlane.xlu1 %1283  ;;  %v1105_v24 = vmul.f32 %v9564_v19, %v10159_v32 }
 0x49e   :  { %9567 = vrcp.f32 %v1284_v23  ;;  %v1166_v25 = vmul.f32 %v9566_v22, %v10161_v37  ;;  %v1414_v37 = vand.u32 %v1409_v16, %v10117_v20 }
 0x49f   :  { %v1106_v26 = vpack.c.bf16 %v1105_v24, %v1105_v24 }
 0x4a0   :  { %v1167_v29 = vpack.c.bf16 %v1166_v25, %v1166_v25 }
 0x4a1   :  { %8553 = vmatmul.mubr.msk.bf16.vlgmr.msra.gmra.mrb[28].mxu1 %vm1044_vm9, %v1106_v26 }
 0x4a2   :  { %8559 = vmatmul.mubr.msk.bf16.vlgmr.msra.gmra.mrb[24].mxu0 %vm1044_vm9, %v1167_v29  ;;  %8563 = vmatpush3.bf16.msra.mxu1 %v1234_v28 }
 0x4a3   :  { %8569 = vmatpush3.bf16.msra.mxu0 %v1294_v30  ;;  %8570 = vmatprep.mubr.msk.bf16.mxu0 %vm9781_vm1, %v9780_v21 }
 0x4a4   :  { %8580 = vmatprep.subr.bf16.mxu0 %v9780_v21  ;;  %8564 = vmatprep.mubr.msk.bf16.mxu1 %vm9781_vm1, %v9780_v21 }
 0x4a5   :  { %v1404_v27 = vpop.xlane.xlu1 %1403  ;;  %8574 = vmatprep.subr.bf16.mxu1 %v9780_v21 }
 0x4a6   :  { %9569 = vrcp.f32 %v1404_v27 }
 0x4a8   :  { %v9568_v31 = vpop.eup %9567 }
 0x4a9   :  { %v1286_v32 = vmul.f32 %v9568_v31, %v10167_v45  ;;  %v1464_v40 = vpop.xlane.xlu1 %1463 }
 0x4ab   :  { %v1287_v33 = vpack.c.bf16 %v1286_v32, %v1286_v32 }
 0x4ad   :  { %8571 = vmatmul.mubr.msk.bf16.vlgmr.msra.gmra.mrb[28].mxu0 %vm1044_vm9, %v1287_v33  ;;  %v1620_v42 = vpop.permute.xlu1 %1619 }
 0x4ae   :  { %8581 = vmatpush3.bf16.msra.mxu0 %v1414_v37  ;;  %8582 = vmatprep.mubr.msk.bf16.mxu0 %vm9781_vm1, %v9780_v21 }
 0x4af   :  { %8592 = vmatprep.subr.bf16.mxu0 %v9780_v21 }
 0x4b0   :  { %v9570_v38 = vpop.eup %9569 }
 0x4b1   :  { %v1406_v39 = vmul.f32 %v9570_v38, %v10171_v49  ;;  %v1618_v45 = vpop.permute.xlu1 %1617 }
 0x4b3   :  { %v1407_v34 = vpack.c.bf16 %v1406_v39, %v1406_v39 }
 0x4b5   :  { %8583 = vmatmul.mubr.msk.bf16.vlgmr.msra.gmra.mrb[32].mxu0 %vm1044_vm9, %v1407_v34  ;;  %v1669_v49 = vpop.permute.xlu1 %1668 }
 0x4b6   :  { %8594 = vmatprep.mubr.msk.bf16.mxu0 %vm9781_vm1, %v9780_v21 }
 0x4b7   :  { %8593 = vmatpush3.bf16.xpose.msra.mxu0 %v1574_v35 }
 0x4b8   :  { %8604 = vmatprep.subr.bf16.mxu0 %v9780_v21 }
 0x4b9   :  { %v1720_v63 = vpop.permute.xlu1 %1719 }
 0x4bd   :  { %v1771_v7 = vpop.permute.xlu1 %1770 }
 0x4be   :  { %8595 = vmatmul.mubr.msk.bf16.vlgmr.msra.gmra.mrb[36].mxu0 %vm624_vm5, %v10191_v36 }
 0x4bf   :  { %8606 = vmatprep.mubr.msk.bf16.mxu0 %vm9781_vm1, %v9780_v21 }
 0x4c1   :  { %v1822_v12 = vpop.permute.xlu1 %1821 }
 0x4c5   :  { %v1873_v14 = vpop.permute.xlu1 %1872 }
 0x4c6   :  { %v1224_v43 = vpop.xlane.xlu0 %1223 }
 0x4c7   :  { %9571 = vrcp.f32 %v1224_v43 }
 0x4ca   :  { %v1344_v44 = vpop.xlane.xlu0 %1343 }
 0x4cb   :  { %9573 = vrcp.f32 %v1344_v44 }
 0x4cc   :  { %9575 = vrcp.f32 %v1464_v40 }
 0x4ce   :  { %v1469_v47 = vpop.permute.xlu0 %1468 }
 0x4cf   :  { %v1474_v6 = vand.u32 %v1469_v47, %v10117_v20 }
 0x4d1   :  { %v9572_v48 = vpop.eup %9571 }
 0x4d2   :  { %v1671_v50 = vpop.permute.xlu0 %1670  ;;  %v1226_v52 = vmul.f32 %v9572_v48, %v10195_v46  ;;  %v1986_v46 = vshrl.u32 %v10056_v53, 16 }
 0x4d3   :  { %v1676_v55 = vsel %vm624_vm5, %v1671_v50, 0 }
 0x4d4   :  { %8605 = vmatpush3.bf16.xpose.msra.mxu0 %v1676_v55  ;;  %v1227_v56 = vpack.c.bf16 %v1226_v52, %v1226_v52  ;;  %v1988_v9 = vrot.slane %v1986_v46, 2 }
 0x4d5   :  { %v9574_v57 = vpop.eup %9573  ;;  %8616 = vmatprep.subr.bf16.mxu0 %v9780_v21 }
 0x4d6   :  { %8565 = vmatmul.mubr.msk.bf16.vlgmr.msra.gmra.mrb[32].mxu1 %vm1044_vm9, %v1227_v56  ;;  %v1722_v61 = vpop.permute.xlu0 %1721  ;;  %v1346_v0 = vmul.f32 %v9574_v57, %v10201_v8  ;;  %v9576_v5 = vpop.eup %9575  ;;  %v10293_v53 = vor.u32 %v1991_v10, %v1988_v9 }
 0x4d7   :  { %8575 = vmatpush3.bf16.msra.mxu1 %v1354_v59  ;;  %8576 = vmatprep.mubr.msk.bf16.mxu1 %vm9781_vm1, %v9780_v21  ;;  %v1466_v62 = vmul.f32 %v9576_v5, %v10175_v51  ;;  %v1625_v51 = vsel %vm624_vm5, %v1620_v42, 0  ;;  %v1727_v16 = vsel %vm624_vm5, %v1722_v61, 0 }
 0x4d8   :  { %8586 = vmatprep.subr.bf16.mxu1 %v9780_v21  ;;  %v1347_v4 = vpack.c.bf16 %v1346_v0, %v1346_v0  ;;  %v1997_v15 = vand.u32 %v10293_v53, %v10117_v20 }
 0x4d9   :  { %v1467_v13 = vpack.c.bf16 %v1466_v62, %v1466_v62 }
 0x4da   :  { %v1773_v2 = vpop.permute.xlu0 %1772 }
 0x4db   :  { %v1778_v3 = vsel %vm624_vm5, %v1773_v2, 0  ;;  %8607 = vmatmul.mubr.msk.bf16.vlgmr.msra.gmra.mrb[40].mxu0 %vm624_vm5, %v1669_v49 }
 0x4dc   :  { %8617 = vmatpush3.bf16.xpose.msra.mxu0 %v1778_v3  ;;  %8618 = vmatprep.mubr.msk.bf16.mxu0 %vm9781_vm1, %v9780_v21 }
 0x4dd   :  { %8628 = vmatprep.subr.bf16.mxu0 %v9780_v21 }
 0x4de   :  { %8577 = vmatmul.mubr.msk.bf16.vlgmr.msra.gmra.mrb[36].mxu1 %vm1044_vm9, %v1347_v4  ;;  %v1824_v36 = vpop.permute.xlu0 %1823 }
 0x4df   :  { %8587 = vmatpush3.bf16.msra.mxu1 %v1474_v6  ;;  %8588 = vmatprep.mubr.msk.bf16.mxu1 %vm9781_vm1, %v9780_v21  ;;  %v1829_v17 = vsel %vm624_vm5, %v1824_v36, 0 }
 0x4e0   :  { %8598 = vmatprep.subr.bf16.mxu1 %v9780_v21 }
 0x4e2   :  { %v1875_v8 = vpop.permute.xlu0 %1874 }
 0x4e3   :  { %v1880_v11 = vsel %vm624_vm5, %v1875_v8, 0  ;;  %8619 = vmatmul.mubr.msk.bf16.vlgmr.msra.gmra.mrb[44].mxu0 %vm624_vm5, %v1771_v7 }
 0x4e4   :  { %8629 = vmatpush3.bf16.xpose.msra.mxu0 %v1880_v11  ;;  %8630 = vmatprep.mubr.msk.bf16.mxu0 %vm9781_vm1, %v9780_v21 }
 0x4e5   :  { %8640 = vmatprep.subr.bf16.mxu0 %v9780_v21 }
 0x4e6   :  { %8589 = vmatmul.mubr.msk.bf16.vlgmr.msra.gmra.mrb[40].mxu1 %vm1044_vm9, %v1467_v13  ;;  %v1926_v18 = vpop.permute.xlu0 %1925 }
 0x4e7   :  { %8600 = vmatprep.mubr.msk.bf16.mxu1 %vm9781_vm1, %v9780_v21  ;;  %v1931_v19 = vsel %vm624_vm5, %v1926_v18, 0 }
 0x4e8   :  { %8599 = vmatpush3.bf16.xpose.msra.mxu1 %v1625_v51 }
 0x4e9   :  { %8610 = vmatprep.subr.bf16.mxu1 %v9780_v21 }
 0x4ea   :  { %v1924_v22 = vpop.permute.xlu0 %1923 }
 0x4eb   :  { %8631 = vmatmul.mubr.msk.bf16.vlgmr.msra.gmra.mrb[48].mxu0 %vm624_vm5, %v1873_v14 }
 0x4ec   :  { %8641 = vmatpush3.bf16.msra.mxu0 %v1997_v15  ;;  %8642 = vmatprep.mubr.msk.bf16.mxu0 %vm9781_vm1, %v9780_v21 }
 0x4ed   :  { %8652 = vmatprep.subr.bf16.mxu0 %v9780_v21 }
 0x4ef   :  { %8601 = vmatmul.mubr.msk.bf16.vlgmr.msra.gmra.mrb[44].mxu1 %vm624_vm5, %v1618_v45 }
 0x4f0   :  { %8611 = vmatpush3.bf16.xpose.msra.mxu1 %v1727_v16  ;;  %8612 = vmatprep.mubr.msk.bf16.mxu1 %vm9781_vm1, %v9780_v21 }
 0x4f1   :  { %8622 = vmatprep.subr.bf16.mxu1 %v9780_v21 }
 0x4f7   :  { %8613 = vmatmul.mubr.msk.bf16.vlgmr.msra.gmra.mrb[48].mxu1 %vm624_vm5, %v1720_v63 }
 0x4f8   :  { %8623 = vmatpush3.bf16.xpose.msra.mxu1 %v1829_v17  ;;  %8624 = vmatprep.mubr.msk.bf16.mxu1 %vm9781_vm1, %v9780_v21 }
 0x4f9   :  { %8634 = vmatprep.subr.bf16.mxu1 %v9780_v21 }
 0x4ff   :  { %8625 = vmatmul.mubr.msk.bf16.vlgmr.msra.gmra.mrb[52].mxu1 %vm624_vm5, %v1822_v12 }
 0x500   :  { %8635 = vmatpush3.bf16.xpose.msra.mxu1 %v1931_v19  ;;  %8636 = vmatprep.mubr.msk.bf16.mxu1 %vm9781_vm1, %v9780_v21 }
 0x501   :  { %8646 = vmatprep.subr.bf16.mxu1 %v9780_v21 }
 0x507   :  { %8637 = vmatmul.mubr.msk.bf16.vlgmr.msra.gmra.mrb[56].mxu1 %vm624_vm5, %v1924_v22 }
 0x508   :  { %8648 = vmatprep.mubr.msk.bf16.mxu1 %vm9781_vm1, %v9780_v21 }
 0x51f   :  { %v10323_v23 = vpop.f32.mrb[20].mxu0 }
 0x520   :  { %v8548_v24 = vpop.f32.mrb[21].mxu0 }
 0x521   :  { %v1092_v25 = vpop.f32.mrb[22].mxu0 }
 0x522   :  { %v8549_v26 = vpop.f32.mrb[23].mxu0 }
 0x574   :  { %v10325_v28 = vpop.f32.mrb[28].mxu1 }
 0x575   :  { %v10327_v29 = vpop.f32.mrb[24].mxu0  ;;  %v8554_v30 = vpop.f32.mrb[29].mxu1 }
 0x576   :  { %v8560_v27 = vpop.f32.mrb[25].mxu0  ;;  %v1153_v31 = vpop.f32.mrb[30].mxu1 }
 0x577   :  { %v1213_v32 = vpop.f32.mrb[26].mxu0  ;;  %v8555_v33 = vpop.f32.mrb[31].mxu1 }
 0x578   :  { %v8561_v37 = vpop.f32.mrb[27].mxu0 }
 0x580   :  { %v10329_v38 = vpop.f32.mrb[28].mxu0 }
 0x581   :  { %v8572_v39 = vpop.f32.mrb[29].mxu0 }
 0x582   :  { %v1333_v34 = vpop.f32.mrb[30].mxu0 }
 0x583   :  { %v8573_v35 = vpop.f32.mrb[31].mxu0 }
 0x588   :  { %v10331_v40 = vpop.f32.mrb[32].mxu0 }
 0x589   :  { %v8584_v41 = vpop.f32.mrb[33].mxu0 }
 0x58a   :  { %v1453_v42 = vpop.f32.mrb[34].mxu0 }
 0x58b   :  { %v8585_v43 = vpop.f32.mrb[35].mxu0 }
 0x591   :  { %v1610_v44 = vpop.f32.mrb[36].mxu0 }
 0x592   :  { %v10333_v45 = vmul.f32 0.088388346, %v1610_v44  ;;  %v8596_v47 = vpop.f32.mrb[37].mxu0 }
 0x593   :  { %v1613_v48 = vpop.f32.mrb[38].mxu0 }
 0x594   :  { %v8597_v49 = vpop.f32.mrb[39].mxu0  ;;  %v1974_v50 = vsel %vm1031_vm8, %v10333_v45, -inf }
 0x595   :  { %1975 = vmax.xlane.f32.xlu1 %v1974_v50 }
 0x5a9   :  { %v10337_v52 = vpop.f32.mrb[32].mxu1 }
 0x5aa   :  { %v8566_v55 = vpop.f32.mrb[33].mxu1 }
 0x5ab   :  { %v1273_v56 = vpop.f32.mrb[34].mxu1 }
 0x5ac   :  { %v8567_v57 = vpop.f32.mrb[35].mxu1 }
 0x5ae   :  { %v1712_v59 = vpop.f32.mrb[40].mxu0 }
 0x5af   :  { %v8608_v61 = vpop.f32.mrb[41].mxu0  ;;  %v1718_v17 = vmul.f32 0.088388346, %v1712_v59 }
 0x5b0   :  { %v1715_v63 = vpop.f32.mrb[42].mxu0 }
 0x5b1   :  { %v10339_v0 = vpop.f32.mrb[36].mxu1  ;;  %v8609_v2 = vpop.f32.mrb[43].mxu0  ;;  %v2099_v24 = vsel %vm1031_vm8, %v1718_v17, -inf }
 0x5b2   :  { %v8578_v3 = vpop.f32.mrb[37].mxu1 }
 0x5b3   :  { %v1393_v4 = vpop.f32.mrb[38].mxu1 }
 0x5b4   :  { %v8579_v5 = vpop.f32.mrb[39].mxu1 }
 0x5b6   :  { %v1814_v6 = vpop.f32.mrb[44].mxu0 }
 0x5b7   :  { %v8620_v7 = vpop.f32.mrb[45].mxu0  ;;  %v1820_v22 = vmul.f32 0.088388346, %v1814_v6 }
 0x5b8   :  { %v1817_v36 = vpop.f32.mrb[46].mxu0 }
 0x5b9   :  { %v10341_v46 = vpop.f32.mrb[40].mxu1  ;;  %v8621_v60 = vpop.f32.mrb[47].mxu0  ;;  %v2219_v37 = vsel %vm1031_vm8, %v1820_v22, -inf }
 0x5ba   :  { %v8590_v62 = vpop.f32.mrb[41].mxu1 }
 0x5bb   :  { %v1513_v8 = vpop.f32.mrb[42].mxu1 }
 0x5bc   :  { %v8591_v9 = vpop.f32.mrb[43].mxu1 }
 0x5be   :  { %v1916_v10 = vpop.f32.mrb[48].mxu0 }
 0x5bf   :  { %v8632_v11 = vpop.f32.mrb[49].mxu0  ;;  %v1922_v31 = vmul.f32 0.088388346, %v1916_v10 }
 0x5c0   :  { %v1919_v12 = vpop.f32.mrb[50].mxu0 }
 0x5c1   :  { %v8633_v13 = vpop.f32.mrb[51].mxu0  ;;  %v2339_v39 = vsel %vm1031_vm8, %v1922_v31, -inf }
 0x5c2   :  { %v1661_v51 = vpop.f32.mrb[44].mxu1 }
 0x5c3   :  { %v1667_v14 = vmul.f32 0.088388346, %v1661_v51  ;;  %v8602_v15 = vpop.f32.mrb[45].mxu1 }
 0x5c4   :  { %v1664_v16 = vpop.f32.mrb[46].mxu1 }
 0x5c5   :  { %v8603_v18 = vpop.f32.mrb[47].mxu1  ;;  %v2039_v19 = vsel %vm1031_vm8, %v1667_v14, -inf }
 0x5c6   :  { %2040 = vmax.xlane.f32.xlu0 %v2039_v19 }
 0x5ca   :  { %v1763_v25 = vpop.f32.mrb[48].mxu1  ;;  %2100 = vmax.xlane.f32.xlu0 %v2099_v24 }
 0x5cb   :  { %v10345_v26 = vmul.f32 0.088388346, %v1763_v25  ;;  %v8614_v30 = vpop.f32.mrb[49].mxu1 }
 0x5cc   :  { %v1766_v27 = vpop.f32.mrb[50].mxu1 }
 0x5cd   :  { %v8615_v32 = vpop.f32.mrb[51].mxu1  ;;  %v2159_v33 = vsel %vm1031_vm8, %v10345_v26, -inf }
 0x5ce   :  { %2160 = vmax.xlane.f32.xlu1 %v2159_v33  ;;  %2220 = vmax.xlane.f32.xlu0 %v2219_v37 }
 0x5d2   :  { %v1865_v34 = vpop.f32.mrb[52].mxu1  ;;  %2340 = vmax.xlane.f32.xlu0 %v2339_v39 }
 0x5d3   :  { %v10351_v35 = vmul.f32 0.088388346, %v1865_v34  ;;  %v8626_v41 = vpop.f32.mrb[53].mxu1 }
 0x5d4   :  { %v1868_v42 = vpop.f32.mrb[54].mxu1 }
 0x5d5   :  { %v8627_v43 = vpop.f32.mrb[55].mxu1  ;;  %v2279_v44 = vsel %vm1031_vm8, %v10351_v35, -inf }
 0x5d6   :  { %2280 = vmax.xlane.f32.xlu1 %v2279_v44 }
 0x5da   :  { %v1967_v47 = vpop.f32.mrb[56].mxu1 }
 0x5db   :  { %v8638_v48 = vpop.f32.mrb[57].mxu1  ;;  %v1973_v55 = vmul.f32 0.088388346, %v1967_v47 }
 0x5dc   :  { %v1970_v49 = vpop.f32.mrb[58].mxu1 }
 0x5dd   :  { %v8639_v50 = vpop.f32.mrb[59].mxu1  ;;  %v2399_v56 = vsel %vm1031_vm8, %v1973_v55, -inf }
 0x5e7   :  { %2051 = vrot.lane.b32.xlu1 %v10293_v53, %s9783_s25 }
 0x60b   :  { %2400 = vmax.xlane.f32.xlu1 %v2399_v56 }
 0x61c   :  { %2171 = vrot.lane.b32.xlu1 %v10293_v53, %s9782_s24 }
 0x620   :  { %2231 = vrot.lane.b32.xlu1 %v10293_v53, %s9785_s5 }
 0x622   :  { %v1976_v57 = vpop.xlane.xlu1 %1975 }
 0x623   :  { %v1977_v59 = vsub.f32 %v10333_v45, %v1976_v57 }
 0x625   :  { %v1978_v61 = vmul.f32 1.442695, %v1977_v59 }
 0x627   :  { %9577 = vpow2.f32 %v1978_v61 }
 0x631   :  { %v10363_v63 = vpop.eup %9577 }
 0x632   :  { %v1980_v2 = vsel %vm1031_vm8, %v10363_v63, 0.0 }
 0x633   :  { %1981 = vadd.xlane.f32.xlu0 %v1980_v2 }
 0x649   :  { %2111 = vrot.lane.b32.xlu0 %v10293_v53, %s9784_s1 }
 0x653   :  { %v2041_v3 = vpop.xlane.xlu0 %2040 }
 0x654   :  { %v2042_v4 = vsub.f32 %v1667_v14, %v2041_v3 }
 0x656   :  { %v2043_v5 = vmul.f32 1.442695, %v2042_v4 }
 0x657   :  { %v2101_v6 = vpop.xlane.xlu0 %2100 }
 0x658   :  { %9579 = vpow2.f32 %v2043_v5  ;;  %v2102_v7 = vsub.f32 %v1718_v17, %v2101_v6 }
 0x65a   :  { %v2103_v36 = vmul.f32 1.442695, %v2102_v7 }
 0x65b   :  { %v2221_v60 = vpop.xlane.xlu0 %2220  ;;  %v2161_v8 = vpop.xlane.xlu1 %2160 }
 0x65c   :  { %9581 = vpow2.f32 %v2103_v36  ;;  %v2222_v45 = vsub.f32 %v1820_v22, %v2221_v60  ;;  %v2162_v25 = vsub.f32 %v10345_v26, %v2161_v8 }
 0x65e   :  { %v2223_v62 = vmul.f32 1.442695, %v2222_v45  ;;  %v2163_v30 = vmul.f32 1.442695, %v2162_v25 }
 0x65f   :  { %v2341_v9 = vpop.xlane.xlu0 %2340 }
 0x660   :  { %v2342_v10 = vsub.f32 %v1922_v31, %v2341_v9  ;;  %9583 = vpow2.f32 %v2223_v62 }
 0x662   :  { %v10369_v11 = vpop.eup %9579  ;;  %v2343_v12 = vmul.f32 1.442695, %v2342_v10 }
 0x663   :  { %v2281_v13 = vpop.xlane.xlu1 %2280  ;;  %v2045_v51 = vsel %vm1031_vm8, %v10369_v11, 0.0 }
 0x664   :  { %9585 = vpow2.f32 %v2343_v12  ;;  %2046 = vadd.xlane.f32.xlu1 %v2045_v51  ;;  %v2282_v27 = vsub.f32 %v10351_v35, %v2281_v13 }
 0x665   :  { %9587 = vpow2.f32 %v2163_v30 }
 0x666   :  { %v10373_v14 = vpop.eup %9581  ;;  %v2283_v31 = vmul.f32 1.442695, %v2282_v27 }
 0x667   :  { %v2052_v15 = vpop.permute.xlu1 %2051  ;;  %v2105_v16 = vsel %vm1031_vm8, %v10373_v14, 0.0 }
 0x668   :  { %v2057_v17 = vand.u32 %v2052_v15, %v10117_v20  ;;  %2106 = vadd.xlane.f32.xlu0 %v2105_v16  ;;  %9589 = vpow2.f32 %v2283_v31 }
 0x66a   :  { %8647 = vmatpush3.bf16.msra.mxu1 %v2057_v17  ;;  %v10378_v18 = vpop.eup %9583 }
 0x66b   :  { %8658 = vmatprep.subr.bf16.mxu1 %v9780_v21  ;;  %v2225_v19 = vsel %vm1031_vm8, %v10378_v18, 0.0 }
 0x66c   :  { %2226 = vadd.xlane.f32.xlu0 %v2225_v19 }
 0x66e   :  { %v10383_v22 = vpop.eup %9585 }
 0x66f   :  { %v2345_v24 = vsel %vm1031_vm8, %v10383_v22, 0.0  ;;  %v10391_v32 = vpop.eup %9587 }
 0x670   :  { %2346 = vadd.xlane.f32.xlu0 %v2345_v24  ;;  %v2165_v37 = vsel %vm1031_vm8, %v10391_v32, 0.0 }
 0x672   :  { %v10395_v39 = vpop.eup %9589 }
 0x673   :  { %v2285_v26 = vsel %vm1031_vm8, %v10395_v39, 0.0 }
 0x675   :  { %2291 = vrot.lane.b32.xlu1 %v10293_v53, %s9786_s6 }
 0x698   :  { %v2401_v33 = vpop.xlane.xlu1 %2400 }
 0x699   :  { %v2402_v34 = vsub.f32 %v1973_v55, %v2401_v33  ;;  %2166 = vadd.xlane.f32.xlu1 %v2165_v37  ;;  %v9415_v37 = vld [vmem:[%s11905_s2 + $0x14] ss:$76 sps:$4 sm:$0xff]  }
 0x69b   :  { %v2403_v41 = vmul.f32 1.442695, %v2402_v34 }
 0x69d   :  { %9591 = vpow2.f32 %v2403_v41  ;;  %2286 = vadd.xlane.f32.xlu1 %v2285_v26 }
 0x6a7   :  { %v10399_v35 = vpop.eup %9591 }
 0x6a8   :  { %v2405_v42 = vsel %vm1031_vm8, %v10399_v35, 0.0 }
 0x6a9   :  { %2406 = vadd.xlane.f32.xlu0 %v2405_v42 }
 0x6ae   :  { %2411 = vrot.lane.b32.xlu1 %v10293_v53, %s9788_s8 }
 0x6bf   :  { %2351 = vrot.lane.b32.xlu0 %v10293_v53, %s9787_s7  ;;  %v2172_v53 = vpop.permute.xlu1 %2171 }
 0x6c0   :  { %v1982_v43 = vpop.xlane.xlu0 %1981  ;;  %v2177_v61 = vand.u32 %v2172_v53, %v10117_v20 }
 0x6c1   :  { %9593 = vrcp.f32 %v1982_v43 }
 0x6c3   :  { %1517 = vrot.lane.b32.xlu0 %v10325_v28, %s9788_s8  ;;  %v2232_v28 = vpop.permute.xlu1 %2231 }
 0x6c4   :  { %v2112_v47 = vpop.permute.xlu0 %2111  ;;  %v2237_v3 = vand.u32 %v2232_v28, %v10117_v20  ;;  %v9417_v28 = vld [vmem:[%s11905_s2 + $0x144] ss:$76 sps:$4 sm:$0xff]  }
 0x6c5   :  { %v2117_v50 = vand.u32 %v2112_v47, %v10117_v20 }
 0x6c7   :  { %1521 = vrot.lane.b32.xlu0 %v10327_v29, %s9787_s7 }
 0x6cb   :  { %v9594_v44 = vpop.eup %9593  ;;  %1525 = vrot.lane.b32.xlu0 %v10337_v52, %s9786_s6 }
 0x6cc   :  { %v1984_v48 = vmul.f32 %v9594_v44, %v10363_v63 }
 0x6ce   :  { %v1985_v49 = vpack.c.bf16 %v1984_v48, %v1984_v48 }
 0x6cf   :  { %1529 = vrot.lane.b32.xlu0 %v10329_v38, %s9785_s5 }
 0x6d0   :  { %8643 = vmatmul.mubr.msk.bf16.vlgmr.msra.gmra.mrb[52].mxu0 %vm1044_vm9, %v1985_v49 }
 0x6d1   :  { %8653 = vmatpush3.bf16.msra.mxu0 %v2117_v50  ;;  %8654 = vmatprep.mubr.msk.bf16.mxu0 %vm9781_vm1, %v9780_v21 }
 0x6d2   :  { %8664 = vmatprep.subr.bf16.mxu0 %v9780_v21 }
 0x6f1   :  { %v2047_v29 = vpop.xlane.xlu1 %2046 }
 0x6f2   :  { %9595 = vrcp.f32 %v2047_v29 }
 0x6f5   :  { %v2107_v52 = vpop.xlane.xlu0 %2106  ;;  %v2292_v7 = vpop.permute.xlu1 %2291 }
 0x6f6   :  { %9597 = vrcp.f32 %v2107_v52  ;;  %v9420_v52 = vld [vmem:[%s11905_s2 + $0x30c] ss:$76 sps:$4 sm:$0xff]  }
 0x6f9   :  { %v2227_v55 = vpop.xlane.xlu0 %2226 }
 0x6fa   :  { %9599 = vrcp.f32 %v2227_v55 }
 0x6fc   :  { %v9596_v56 = vpop.eup %9595 }
 0x6fd   :  { %v2049_v57 = vmul.f32 %v9596_v56, %v10369_v11  ;;  %v2347_v60 = vpop.xlane.xlu0 %2346  ;;  %v2297_v11 = vand.u32 %v2292_v7, %v10117_v20 }
 0x6ff   :  { %v2050_v38 = vpack.c.bf16 %v2049_v57, %v2049_v57 }
 0x700   :  { %v9598_v59 = vpop.eup %9597 }
 0x701   :  { %8649 = vmatmul.mubr.msk.bf16.vlgmr.msra.gmra.mrb[60].mxu1 %vm1044_vm9, %v2050_v38  ;;  %v2109_v63 = vmul.f32 %v9598_v59, %v10373_v14  ;;  %v9421_v38 = vld [vmem:[%s11905_s2 + $0x3a4] ss:$76 sps:$4 sm:$0xff]  }
 0x702   :  { %8659 = vmatpush3.bf16.msra.mxu1 %v2177_v61  ;;  %8660 = vmatprep.mubr.msk.bf16.mxu1 %vm9781_vm1, %v9780_v21 }
 0x703   :  { %v2110_v2 = vpack.c.bf16 %v2109_v63, %v2109_v63  ;;  %8670 = vmatprep.subr.bf16.mxu1 %v9780_v21 }
 0x704   :  { %v9600_v4 = vpop.eup %9599 }
 0x705   :  { %8655 = vmatmul.mubr.msk.bf16.vlgmr.msra.gmra.mrb[56].mxu0 %vm1044_vm9, %v2110_v2  ;;  %v2229_v5 = vmul.f32 %v9600_v4, %v10378_v18 }
 0x706   :  { %8665 = vmatpush3.bf16.msra.mxu0 %v2237_v3  ;;  %8666 = vmatprep.mubr.msk.bf16.mxu0 %vm9781_vm1, %v9780_v21  ;;  %v9422_v3 = vld [vmem:[%s11905_s2 + $0x43c] ss:$76 sps:$4 sm:$0xff]  }
 0x707   :  { %8676 = vmatprep.subr.bf16.mxu0 %v9780_v21  ;;  %v2230_v6 = vpack.c.bf16 %v2229_v5, %v2229_v5 }
 0x70d   :  { %8667 = vmatmul.mubr.msk.bf16.vlgmr.msra.gmra.mrb[60].mxu0 %vm1044_vm9, %v2230_v6 }
 0x70e   :  { %8678 = vmatprep.mubr.msk.bf16.mxu0 %vm9781_vm1, %v9780_v21 }
 0x726   :  { %v2167_v36 = vpop.xlane.xlu1 %2166 }
 0x727   :  { %9601 = vrcp.f32 %v2167_v36 }
 0x72a   :  { %v2287_v45 = vpop.xlane.xlu1 %2286 }
 0x72b   :  { %9603 = vrcp.f32 %v2287_v45 }
 0x72c   :  { %9605 = vrcp.f32 %v2347_v60 }
 0x72e   :  { %v2412_v14 = vpop.permute.xlu1 %2411 }
 0x72f   :  { %v2417_v19 = vand.u32 %v2412_v14, %v10117_v20 }
 0x731   :  { %v9602_v62 = vpop.eup %9601 }
 0x732   :  { %v2169_v8 = vmul.f32 %v9602_v62, %v10391_v32 }
 0x734   :  { %v2170_v9 = vpack.c.bf16 %v2169_v8, %v2169_v8 }
 0x735   :  { %v9604_v10 = vpop.eup %9603 }
 0x736   :  { %8661 = vmatmul.mubr.msk.bf16.vlgmr.msra.gmra.mrb[64].mxu1 %vm1044_vm9, %v2170_v9  ;;  %v2407_v12 = vpop.xlane.xlu0 %2406  ;;  %v9606_v13 = vpop.eup %9605  ;;  %v2289_v51 = vmul.f32 %v9604_v10, %v10395_v39  ;;  %v9416_v39 = vld [vmem:[%s11905_s2 + $0xac] ss:$76 sps:$4 sm:$0xff]  }
 0x737   :  { %8671 = vmatpush3.bf16.msra.mxu1 %v2297_v11  ;;  %9607 = vrcp.f32 %v2407_v12  ;;  %8672 = vmatprep.mubr.msk.bf16.mxu1 %vm9781_vm1, %v9780_v21  ;;  %v2349_v16 = vmul.f32 %v9606_v13, %v10383_v22 }
 0x738   :  { %8682 = vmatprep.subr.bf16.mxu1 %v9780_v21  ;;  %v2290_v18 = vpack.c.bf16 %v2289_v51, %v2289_v51 }
 0x739   :  { %v2350_v24 = vpack.c.bf16 %v2349_v16, %v2349_v16 }
 0x73a   :  { %v2352_v15 = vpop.permute.xlu0 %2351 }
 0x73b   :  { %v2357_v17 = vand.u32 %v2352_v15, %v10117_v20 }
 0x73d   :  { %8677 = vmatpush3.bf16.msra.mxu0 %v2357_v17 }
 0x73e   :  { %8673 = vmatmul.mubr.msk.bf16.vlgmr.msra.gmra.mrb[68].mxu1 %vm1044_vm9, %v2290_v18  ;;  %8688 = vmatprep.subr.bf16.mxu0 %v9780_v21  ;;  %v1518_v8 = vpop.permute.xlu0 %1517 }
 0x73f   :  { %8683 = vmatpush3.bf16.msra.mxu1 %v2417_v19  ;;  %8684 = vmatprep.mubr.msk.bf16.mxu1 %vm9781_vm1, %v9780_v21 }
 0x740   :  { %8679 = vmatmul.mubr.msk.bf16.vlgmr.msra.gmra.mrb[64].mxu0 %vm1044_vm9, %v2350_v24 }
 0x741   :  { %v9608_v25 = vpop.eup %9607  ;;  %8704 = vmatprep.mubr.msk.bf16.mxu0 %vm9781_vm1, %v9780_v21  ;;  %8689 = vmatpush3.bf16.msra.mxu0 %v9415_v37 }
 0x742   :  { %v2409_v22 = vmul.f32 %v9608_v25, %v10399_v35  ;;  %8690 = vmatprep.subr.bf16.mxu0 %v9780_v21  ;;  %v1522_v9 = vpop.permute.xlu0 %1521  ;;  %v1544_v25 = vsel %vm624_vm5, %v10323_v23, %v1518_v8  ;;  %v9438_v8 = vld [vmem:[%s11905_s2 + $0x1e8] ss:$76 sps:$4 sm:$0xff]  }
 0x744   :  { %v2410_v30 = vpack.c.bf16 %v2409_v22, %v2409_v22 }
 0x745   :  { %8691 = vmatpush3.bf16.msra.mxu0 %v9416_v39 }
 0x746   :  { %8685 = vmatmul.mubr.msk.bf16.vlgmr.msra.gmra.mrb[72].mxu1 %vm1044_vm9, %v2410_v30  ;;  %8692 = vmatprep.subr.bf16.mxu0 %v9780_v21  ;;  %v1526_v10 = vpop.permute.xlu0 %1525  ;;  %v1546_v30 = vsel %vm1545_vm10, %v1544_v25, %v1522_v9  ;;  %v9441_v9 = vld [vmem:[%s11905_s2 + $0x27c] ss:$76 sps:$4 sm:$0xff]  }
 0x747   :  { %2843 = vmatprep.mubr.bf16.mxu1 %v9779_v1 }
 0x749   :  { %8693 = vmatpush3.bf16.msra.mxu0 %v9417_v28 }
 0x74a   :  { %8694 = vmatprep.subr.bf16.mxu0 %v9780_v21  ;;  %v1530_v13 = vpop.permute.xlu0 %1529 }
 0x7a3   :  { %v10457_v27 = vpop.f32.mrb[52].mxu0 }
 0x7a4   :  { %v8644_v31 = vpop.f32.mrb[53].mxu0 }
 0x7a5   :  { %v2036_v32 = vpop.f32.mrb[54].mxu0 }
 0x7a6   :  { %v8645_v33 = vpop.f32.mrb[55].mxu0  ;;  %v1548_v32 = vsel %vm1547_vm11, %v1546_v30, %v1526_v10  ;;  %v9439_v10 = vld [vmem:[%s11905_s2 + $0x278] ss:$76 sps:$4 sm:$0xff]  }
 0x7a7   :  { %v1549_v39 = vsel %vm122_vm0, %v1548_v32, %v1530_v13  ;;  %v9443_v13 = vld [vmem:[%s11905_s2 + $0x310] ss:$76 sps:$4 sm:$0xff]  }
 0x7d4   :  { %v2093_v34 = vpop.f32.mrb[60].mxu1 }
 0x7d5   :  { %v8650_v41 = vpop.f32.mrb[61].mxu1  ;;  %2460 = vrot.lane.b32.xlu0 %v2093_v34, %s9788_s8 }
 0x7d6   :  { %v2096_v26 = vpop.f32.mrb[62].mxu1 }
 0x7d7   :  { %v8651_v35 = vpop.f32.mrb[63].mxu1 }
 0x7d8   :  { %v2153_v42 = vpop.f32.mrb[56].mxu0 }
 0x7d9   :  { %1533 = vrot.lane.b32.xlu0 %v10339_v0, %s9782_s24  ;;  %2464 = vrot.lane.b32.xlu1 %v2153_v42, %s9787_s7  ;;  %v8656_v43 = vpop.f32.mrb[57].mxu0  ;;  %v9418_v0 = vld [vmem:[%s11905_s2 + $0x1dc] ss:$76 sps:$4 sm:$0xff]  }
 0x7da   :  { %v2156_v44 = vpop.f32.mrb[58].mxu0  ;;  %8695 = vmatpush3.bf16.msra.mxu0 %v9418_v0 }
 0x7db   :  { %v8657_v47 = vpop.f32.mrb[59].mxu0  ;;  %8696 = vmatprep.subr.bf16.mxu0 %v9780_v21 }
 0x7dd   :  { %1537 = vrot.lane.b32.xlu0 %v10331_v40, %s9784_s1  ;;  %v9419_v40 = vld [vmem:[%s11905_s2 + $0x274] ss:$76 sps:$4 sm:$0xff]  }
 0x7de   :  { %8697 = vmatpush3.bf16.msra.mxu0 %v9419_v40 }
 0x7df   :  { %8698 = vmatprep.subr.bf16.mxu0 %v9780_v21 }
 0x7e0   :  { %v2273_v48 = vpop.f32.mrb[60].mxu0 }
 0x7e1   :  { %v8668_v49 = vpop.f32.mrb[61].mxu0 }
 0x7e2   :  { %v2276_v50 = vpop.f32.mrb[62].mxu0  ;;  %8699 = vmatpush3.bf16.msra.mxu0 %v9420_v52  ;;  %v9426_v52 = vld [vmem:[%s11905_s2 + $0x20] ss:$76 sps:$4 sm:$0xff]  }
 0x7e3   :  { %v8669_v53 = vpop.f32.mrb[63].mxu0  ;;  %8700 = vmatprep.subr.bf16.mxu0 %v9780_v21 }
 0x7e6   :  { %8701 = vmatpush3.bf16.msra.mxu0 %v9421_v38 }
 0x7e7   :  { %8702 = vmatprep.subr.bf16.mxu0 %v9780_v21 }
 0x7ea   :  { %8703 = vmatpush3.bf16.msra.mxu0 %v9422_v3 }
 0x7eb   :  { %8708 = vmatprep.subr.bf16.mxu0 %v9780_v21 }
 0x809   :  { %v2213_v29 = vpop.f32.mrb[64].mxu1 }
 0x80a   :  { %v8662_v55 = vpop.f32.mrb[65].mxu1  ;;  %2468 = vrot.lane.b32.xlu1 %v2213_v29, %s9786_s6  ;;  %v9425_v29 = vld [vmem:[%s11905_s2 + $0x1c] ss:$76 sps:$4 sm:$0xff]  }
 0x80b   :  { %v2216_v56 = vpop.f32.mrb[66].mxu1  ;;  %v9429_v55 = vld [vmem:[%s11905_s2 + $0xb4] ss:$76 sps:$4 sm:$0xff]   ;;  %2811 = vmatprep.subr.bf16.mxu1 %v9425_v29 }
 0x80c   :  { %v8663_v57 = vpop.f32.mrb[67].mxu1  ;;  %v9427_v56 = vld [vmem:[%s11905_s2 + $0xb0] ss:$76 sps:$4 sm:$0xff]  }
 0x80e   :  { %2472 = vrot.lane.b32.xlu1 %v2273_v48, %s9785_s5  ;;  %v7985_v48 = vld [vmem:[%s11906_s3 + $0x6] ss:$0 sm:$0xff] }
 0x811   :  { %v2333_v59 = vpop.f32.mrb[68].mxu1 }
 0x812   :  { %v8674_v61 = vpop.f32.mrb[69].mxu1  ;;  %2476 = vrot.lane.b32.xlu1 %v2333_v59, %s9782_s24 }
 0x813   :  { %v2336_v63 = vpop.f32.mrb[70].mxu1  ;;  %v2393_v2 = vpop.f32.mrb[64].mxu0 }
 0x814   :  { %v8675_v4 = vpop.f32.mrb[71].mxu1  ;;  %v8680_v5 = vpop.f32.mrb[65].mxu0 }
 0x815   :  { %v2396_v6 = vpop.f32.mrb[66].mxu0 }
 0x816   :  { %2480 = vrot.lane.b32.xlu1 %v2393_v2, %s9784_s1  ;;  %v8681_v7 = vpop.f32.mrb[67].mxu0  ;;  %v9430_v6 = vld [vmem:[%s11905_s2 + $0xb8] ss:$76 sps:$4 sm:$0xff]  }
 0x817   :  { %v9433_v7 = vld [vmem:[%s11905_s2 + $0x14c] ss:$76 sps:$4 sm:$0xff]  }
 0x819   :  { %v2453_v36 = vpop.f32.mrb[72].mxu1 }
 0x81a   :  { %v8686_v60 = vpop.f32.mrb[73].mxu1  ;;  %2484 = vrot.lane.b32.xlu1 %v2453_v36, %s9783_s25  ;;  %v9431_v36 = vld [vmem:[%s11905_s2 + $0x148] ss:$76 sps:$4 sm:$0xff]  }
 0x81b   :  { %v2456_v45 = vpop.f32.mrb[74].mxu1  ;;  %v9434_v60 = vld [vmem:[%s11905_s2 + $0x150] ss:$76 sps:$4 sm:$0xff]  }
 0x81c   :  { %v8687_v62 = vpop.f32.mrb[75].mxu1  ;;  %v9437_v45 = vld [vmem:[%s11905_s2 + $0x1e4] ss:$76 sps:$4 sm:$0xff]  }
 0x81d   :  { %v9435_v62 = vld [vmem:[%s11905_s2 + $0x1e0] ss:$76 sps:$4 sm:$0xff]  }
 0x81e   :  { %1541 = vrot.lane.b32.xlu1 %v10341_v46, %s9783_s25 }
 0x847   :  { %v2461_v14 = vpop.permute.xlu0 %2460 }
 0x848   :  { %v2487_v16 = vsel %vm624_vm5, %v10457_v27, %v2461_v14  ;;  %v9449_v14 = vld [vmem:[%s11905_s2 + $0x3ac] ss:$76 sps:$4 sm:$0xff]  }
 0x84b   :  { %v2465_v11 = vpop.permute.xlu1 %2464  ;;  %v1534_v17 = vpop.permute.xlu0 %1533 }
 0x84c   :  { %v2488_v18 = vsel %vm1545_vm10, %v2487_v16, %v2465_v11  ;;  %v1551_v34 = vsel %vm1550_vm12, %v1549_v39, %v1534_v17  ;;  %v9442_v11 = vld [vmem:[%s11905_s2 + $0x280] ss:$76 sps:$4 sm:$0xff]   ;;  %v9450_v16 = vld [vmem:[%s11905_s2 + $0x3b0] ss:$76 sps:$4 sm:$0xff]  }
 0x84d   :  { %v9453_v17 = vld [vmem:[%s11905_s2 + $0x444] ss:$76 sps:$4 sm:$0xff]  }
 0x84f   :  { %v1538_v33 = vpop.permute.xlu0 %1537 }
 0x850   :  { %v1553_v23 = vsel %vm1552_vm14, %v1551_v34, %v1538_v33  ;;  %v7994_v33 = vld [vmem:[%s11906_s3 + $0x7] ss:$0 sm:$0xff] }
 0x87c   :  { %v2469_v12 = vpop.permute.xlu1 %2468 }
 0x87d   :  { %v2489_v46 = vsel %vm1547_vm11, %v2488_v18, %v2469_v12  ;;  %v9445_v12 = vld [vmem:[%s11905_s2 + $0x314] ss:$76 sps:$4 sm:$0xff]  }
 0x87e   :  { %v9451_v18 = vld [vmem:[%s11905_s2 + $0x440] ss:$76 sps:$4 sm:$0xff]  }
 0x880   :  { %v2473_v51 = vpop.permute.xlu1 %2472 }
 0x881   :  { %v2490_v24 = vsel %vm122_vm0, %v2489_v46, %v2473_v51  ;;  %v9446_v51 = vld [vmem:[%s11905_s2 + $0x318] ss:$76 sps:$4 sm:$0xff]  }
 0x884   :  { %v2477_v15 = vpop.permute.xlu1 %2476 }
 0x885   :  { %v2491_v22 = vsel %vm1550_vm12, %v2490_v24, %v2477_v15  ;;  %v9447_v15 = vld [vmem:[%s11905_s2 + $0x3a8] ss:$76 sps:$4 sm:$0xff]  }
 0x888   :  { %v2481_v19 = vpop.permute.xlu1 %2480 }
 0x889   :  { %v2492_v27 = vsel %vm1552_vm14, %v2491_v22, %v2481_v19  ;;  %v9454_v19 = vld [vmem:[%s11905_s2 + $0x448] ss:$76 sps:$4 sm:$0xff]  }
 0x88c   :  { %v2485_v31 = vpop.permute.xlu1 %2484 }
 0x88d   :  { %v2493_v37 = vsel %vm1554_vm13, %v2492_v27, %v2485_v31 }
 0x88e   :  { %v2495_v41 = vrot.slane %v2493_v37, 3 }
 0x890   :  { %v1542_v26 = vpop.permute.xlu1 %1541  ;;  %v2499_v43 = vadd.f32 %v2495_v41, %v9959_v54 }
 0x891   :  { %v1555_v35 = vsel %vm1554_vm13, %v1553_v23, %v1542_v26 }
 0x892   :  { %v2497_v42 = vsel %vm182_vm3, %v1555_v35, %v2495_v41  ;;  %v7995_v41 = vld [vmem:[%s11906_s3 + $0x8] ss:$0 sm:$0xff] }
 0x893   :  { %v2498_v44 = vadd.f32 %v2497_v42, %v9966_v58  ;;  %v9423_v58 = vld [vmem:[%s11905_s2 + $0x18] ss:$76 sps:$4 sm:$0xff]  }
 0x894   :  { %2812 = vmatpush1.bf16.msra.mxu1 %v9423_v58 }
 0x895   :  { %v2516_v47 = vpack.c.bf16 %v2499_v43, %v2498_v44  ;;  %2813 = vmatprep.subr.bf16.mxu1 %v9429_v55  ;;  %v8020_v44 = vld [vmem:[%s11906_s3 + $0x9] ss:$0 sm:$0xff] }
 0x897   :  { %8705 = vmatmul.mubr.bf16.vlgmr.msra.gmra.mrb[68].mxu0 %v2516_v47 }
 0x898   :  { %8724 = vmatprep.mubr.msk.bf16.mxu0 %vm9781_vm1, %v9780_v21  ;;  %8709 = vmatpush3.bf16.msra.mxu0 %v9426_v52 }
 0x899   :  { %8710 = vmatprep.subr.bf16.mxu0 %v9780_v21  ;;  %2814 = vmatpush1.bf16.msra.mxu1 %v9427_v56 }
 0x89a   :  { %2815 = vmatprep.subr.bf16.mxu1 %v9433_v7 }
 0x89c   :  { %8711 = vmatpush3.bf16.msra.mxu0 %v9430_v6 }
 0x89d   :  { %8712 = vmatprep.subr.bf16.mxu0 %v9780_v21  ;;  %2816 = vmatpush1.bf16.msra.mxu1 %v9431_v36 }
 0x89e   :  { %2817 = vmatprep.subr.bf16.mxu1 %v9437_v45 }
 0x8a0   :  { %8713 = vmatpush3.bf16.msra.mxu0 %v9434_v60 }
 0x8a1   :  { %8714 = vmatprep.subr.bf16.mxu0 %v9780_v21  ;;  %2818 = vmatpush1.bf16.msra.mxu1 %v9435_v62 }
 0x8a2   :  { %2819 = vmatprep.subr.bf16.mxu1 %v9441_v9 }
 0x8a4   :  { %8715 = vmatpush3.bf16.msra.mxu0 %v9438_v8 }
 0x8a5   :  { %8716 = vmatprep.subr.bf16.mxu0 %v9780_v21  ;;  %2820 = vmatpush1.bf16.msra.mxu1 %v9439_v10 }
 0x8a6   :  { %2821 = vmatprep.subr.bf16.mxu1 %v9445_v12 }
 0x8a8   :  { %8717 = vmatpush3.bf16.msra.mxu0 %v9442_v11 }
 0x8a9   :  { %8718 = vmatprep.subr.bf16.mxu0 %v9780_v21  ;;  %2822 = vmatpush1.bf16.msra.mxu1 %v9443_v13 }
 0x8aa   :  { %2823 = vmatprep.subr.bf16.mxu1 %v9449_v14 }
 0x8ac   :  { %8719 = vmatpush3.bf16.msra.mxu0 %v9446_v51 }
 0x8ad   :  { %8720 = vmatprep.subr.bf16.mxu0 %v9780_v21  ;;  %2824 = vmatpush1.bf16.msra.mxu1 %v9447_v15 }
 0x8ae   :  { %2825 = vmatprep.subr.bf16.mxu1 %v9453_v17 }
 0x8b0   :  { %8721 = vmatpush3.bf16.msra.mxu0 %v9450_v16 }
 0x8b1   :  { %8722 = vmatprep.subr.bf16.mxu0 %v9780_v21  ;;  %2826 = vmatpush1.bf16.msra.mxu1 %v9451_v18 }
 0x8b2   :  { %8728 = vmatprep.subr.bf16.mxu1 %v9780_v21 }
 0x8b4   :  { %8723 = vmatpush3.bf16.msra.mxu0 %v9454_v19 }
 0x8b5   :  { %8752 = vmatprep.subr.bf16.mxu0 %v9780_v21 }
 0x96a   :  { %v2604_v49 = vpop.f32.mrb[68].mxu0 }
 0x96b   :  { %v2605_v50 = vadd.f32 %v7985_v48, %v2604_v49  ;;  %v8706_v53 = vpop.f32.mrb[69].mxu0 }
 0x96c   :  { %v2607_v28 = vpop.f32.mrb[70].mxu0 }
 0x96d   :  { %v2608_v0 = vadd.f32 %v7985_v48, %v2607_v28  ;;  %2613 = vadd.xlane.f32.xlu1 %v2605_v50  ;;  %v8707_v40 = vpop.f32.mrb[71].mxu0  ;;  %v8022_v48 = vld [vmem:[%s11906_s3 + $0xb] ss:$0 sm:$0xff] }
 0x96f   :  { %v2615_v54 = vsel %vm1048_vm6, %v2608_v0, 0.0 }
 0x970   :  { %2616 = vadd.xlane.f32.xlu0 %v2615_v54 }
 0x9fa   :  { %v2614_v57 = vpop.xlane.xlu1 %2613 }
 0x9fb   :  { %v2619_v38 = vmul.f32 0.0078125, %v2614_v57 }
 0x9fd   :  { %v2617_v59 = vpop.xlane.xlu0 %2616  ;;  %v10545_v61 = vsub.f32 %v2605_v50, %v2619_v38  ;;  %v8021_v50 = vld [vmem:[%s11906_s3 + $0xa] ss:$0 sm:$0xff] }
 0x9fe   :  { %v2620_v63 = vmul.f32 0.0078125, %v2617_v59 }
 0x9ff   :  { %v2623_v2 = vmul.f32 %v10545_v61, %v10545_v61 }
 0xa00   :  { %v10549_v3 = vsub.f32 %v2608_v0, %v2620_v63 }
 0xa01   :  { %2625 = vadd.xlane.f32.xlu0 %v2623_v2 }
 0xa02   :  { %v2624_v4 = vmul.f32 %v10549_v3, %v10549_v3 }
 0xa04   :  { %v2627_v5 = vsel %vm1048_vm6, %v2624_v4, 0.0 }
 0xa05   :  { %2628 = vadd.xlane.f32.xlu0 %v2627_v5 }
 0xa8e   :  { %v2626_v46 = vpop.xlane.xlu0 %2625 }
 0xa8f   :  { %v2630_v24 = vmul.f32 0.0078125, %v2626_v46 }
 0xa91   :  { %v2632_v25 = vadd.f32 1e-05, %v2630_v24 }
 0xa92   :  { %v2629_v22 = vpop.xlane.xlu0 %2628 }
 0xa93   :  { %9609 = vrsqrt.f32 %v2632_v25  ;;  %v2631_v30 = vmul.f32 0.0078125, %v2629_v22 }
 0xa95   :  { %v2633_v27 = vadd.f32 1e-05, %v2631_v30 }
 0xa97   :  { %9611 = vrsqrt.f32 %v2633_v27 }
 0xa9d   :  { %v9610_v31 = vpop.eup %9609 }
 0xa9e   :  { %v2636_v32 = vmul.f32 %v9610_v31, %v10545_v61 }
 0xaa0   :  { %v2642_v34 = vmul.f32 %v7994_v33, %v2636_v32 }
 0xaa1   :  { %v9612_v37 = vpop.eup %9611 }
 0xaa2   :  { %v2637_v39 = vmul.f32 %v9612_v37, %v10549_v3  ;;  %v10627_v26 = vadd.f32 %v7995_v41, %v2642_v34 }
 0xaa4   :  { %v2643_v23 = vmul.f32 %v7994_v33, %v2637_v39 }
 0xaa6   :  { %v10629_v35 = vadd.f32 %v7995_v41, %v2643_v23 }
 0xaa8   :  { %v2682_v42 = vpack.c.bf16 %v10629_v35, %v10627_v26 }
 0xaaa   :  { %2844 = vmatmul.mubr.bf16.vlgmr.msra.gmra.mrb[76].mxu1 %v2682_v42  ;;  %8725 = vmatmul.mubr.bf16.vlgmr.msra.gmra.mrb[72].mxu0 %v2682_v42 }
 0xaab   :  { %8730 = vmatprep.mubr.msk.bf16.mxu1 %vm9781_vm1, %v9780_v21  ;;  %8754 = vmatprep.mubr.msk.bf16.mxu0 %vm9781_vm1, %v9780_v21 }
 0xb7d   :  { %v2845_v43 = vpop.f32.mrb[76].mxu1  ;;  %v2888_v47 = vpop.f32.mrb[72].mxu0 }
 0xb7e   :  { %v2847_v49 = vpop.f32.mrb[77].mxu1  ;;  %v8726_v53 = vpop.f32.mrb[73].mxu0  ;;  %v2900_v40 = vadd.f32 %v8020_v44, %v2845_v43  ;;  %v2914_v54 = vadd.f32 %v8022_v48, %v2888_v47 }
 0xb7f   :  { %v2849_v28 = vpop.f32.mrb[78].mxu1  ;;  %v2891_v0 = vpop.f32.mrb[74].mxu0  ;;  %v2907_v56 = vadd.f32 %v8021_v50, %v2847_v49 }
 0xb80   :  { %v2901_v58 = vadd.f32 %v8020_v44, %v2849_v28  ;;  %v2915_v29 = vadd.f32 %v8022_v48, %v2891_v0  ;;  %v2851_v52 = vpop.f32.mrb[79].mxu1  ;;  %v8727_v55 = vpop.f32.mrb[75].mxu0 }
 0xb81   :  { %v2908_v57 = vadd.f32 %v8021_v50, %v2851_v52 }
 0xb82   :  { %v10646_v38 = vpack.c.bf16 %v2901_v58, %v2900_v40  ;;  %v10648_v59 = vpack.c.bf16 %v2915_v29, %v2914_v54 }
 0xb83   :  { %v10650_v61 = vpack.c.bf16 %v2908_v57, %v2907_v56 }
 0xb84   :  { %2967 = vrot.lane.b32.xlu0 %v10646_v38, %s9783_s25  ;;  %v3341_v15 = vand.u32 %v10648_v59, %v10117_v20 }
 0xb85   :  { %2970 = vrot.lane.b32.xlu1 %v10650_v61, %s9783_s25  ;;  %v2923_v63 = vsel %vm624_vm5, %v10650_v61, 0 }
 0xb86   :  { %8729 = vmatpush3.bf16.xpose.msra.mxu1 %v2923_v63 }
 0xb87   :  { %8734 = vmatprep.subr.bf16.mxu1 %v9780_v21 }
 0xb88   :  { %3072 = vrot.lane.b32.xlu0 %v10650_v61, %s9782_s24 }
 0xb89   :  { %3021 = vrot.lane.b32.xlu1 %v10650_v61, %s9784_s1 }
 0xb8c   :  { %3070 = vrot.lane.b32.xlu0 %v10646_v38, %s9782_s24 }
 0xb8d   :  { %3019 = vrot.lane.b32.xlu1 %v10646_v38, %s9784_s1  ;;  %8731 = vmatmul.mubr.msk.bf16.vlgmr.msra.gmra.mrb[80].mxu1 %vm624_vm5, %v10646_v38 }
 0xb8e   :  { %8736 = vmatprep.mubr.msk.bf16.mxu1 %vm9781_vm1, %v9780_v21 }
 0xb90   :  { %3121 = vrot.lane.b32.xlu0 %v10646_v38, %s9785_s5 }
 0xb91   :  { %3123 = vrot.lane.b32.xlu1 %v10650_v61, %s9785_s5 }
 0xb94   :  { %3172 = vrot.lane.b32.xlu0 %v10646_v38, %s9786_s6 }
 0xb95   :  { %3174 = vrot.lane.b32.xlu1 %v10650_v61, %s9786_s6 }
 0xb98   :  { %3223 = vrot.lane.b32.xlu0 %v10646_v38, %s9787_s7 }
 0xb99   :  { %3225 = vrot.lane.b32.xlu1 %v10650_v61, %s9787_s7 }
 0xb9c   :  { %3396 = vrot.lane.b32.xlu0 %v10648_v59, %s9783_s25 }
 0xb9d   :  { %3276 = vrot.lane.b32.xlu1 %v10650_v61, %s9788_s8 }
 0xba1   :  { %3274 = vrot.lane.b32.xlu1 %v10646_v38, %s9788_s8 }
 0xba5   :  { %3456 = vrot.lane.b32.xlu1 %v10648_v59, %s9784_s1 }
 0xbf6   :  { %v2968_v2 = vpop.permute.xlu0 %2967 }
 0xbf7   :  { %v2971_v3 = vpop.permute.xlu1 %2970 }
 0xbf8   :  { %v2976_v4 = vsel %vm624_vm5, %v2971_v3, 0 }
 0xbf9   :  { %8735 = vmatpush3.bf16.xpose.msra.mxu1 %v2976_v4 }
 0xbfa   :  { %8740 = vmatprep.subr.bf16.mxu1 %v9780_v21  ;;  %v3073_v5 = vpop.permute.xlu0 %3072 }
 0xbfb   :  { %v3022_v6 = vpop.permute.xlu1 %3021  ;;  %v3078_v10 = vsel %vm624_vm5, %v3073_v5, 0 }
 0xbfc   :  { %v3027_v36 = vsel %vm624_vm5, %v3022_v6, 0 }
 0xbfe   :  { %v3071_v60 = vpop.permute.xlu0 %3070 }
 0xbff   :  { %v3020_v7 = vpop.permute.xlu1 %3019 }
 0xc00   :  { %8737 = vmatmul.mubr.msk.bf16.vlgmr.msra.gmra.mrb[84].mxu1 %vm624_vm5, %v2968_v2 }
 0xc01   :  { %8741 = vmatpush3.bf16.xpose.msra.mxu1 %v3027_v36  ;;  %8742 = vmatprep.mubr.msk.bf16.mxu1 %vm9781_vm1, %v9780_v21 }
 0xc02   :  { %8746 = vmatprep.subr.bf16.mxu1 %v9780_v21  ;;  %v3122_v8 = vpop.permute.xlu0 %3121 }
 0xc03   :  { %v3124_v45 = vpop.permute.xlu1 %3123 }
 0xc04   :  { %v3129_v62 = vsel %vm624_vm5, %v3124_v45, 0 }
 0xc05   :  { %8753 = vmatpush3.bf16.xpose.msra.mxu0 %v3129_v62 }
 0xc06   :  { %8764 = vmatprep.subr.bf16.mxu0 %v9780_v21  ;;  %v3173_v13 = vpop.permute.xlu0 %3172 }
 0xc07   :  { %v3175_v9 = vpop.permute.xlu1 %3174 }
 0xc08   :  { %8743 = vmatmul.mubr.msk.bf16.vlgmr.msra.gmra.mrb[88].mxu1 %vm624_vm5, %v3020_v7  ;;  %v3180_v51 = vsel %vm624_vm5, %v3175_v9, 0 }
 0xc09   :  { %8747 = vmatpush3.bf16.xpose.msra.mxu1 %v3078_v10  ;;  %8748 = vmatprep.mubr.msk.bf16.mxu1 %vm9781_vm1, %v9780_v21 }
 0xc0a   :  { %8758 = vmatprep.subr.bf16.mxu1 %v9780_v21  ;;  %v3224_v14 = vpop.permute.xlu0 %3223 }
 0xc0b   :  { %v3226_v11 = vpop.permute.xlu1 %3225 }
 0xc0c   :  { %v3231_v12 = vsel %vm624_vm5, %v3226_v11, 0  ;;  %8755 = vmatmul.mubr.msk.bf16.vlgmr.msra.gmra.mrb[76].mxu0 %vm624_vm5, %v3122_v8 }
 0xc0d   :  { %8765 = vmatpush3.bf16.xpose.msra.mxu0 %v3231_v12  ;;  %8766 = vmatprep.mubr.msk.bf16.mxu0 %vm9781_vm1, %v9780_v21 }
 0xc0e   :  { %8776 = vmatprep.subr.bf16.mxu0 %v9780_v21  ;;  %v3397_v18 = vpop.permute.xlu0 %3396 }
 0xc0f   :  { %v3277_v16 = vpop.permute.xlu1 %3276  ;;  %v3402_v19 = vand.u32 %v3397_v18, %v10117_v20 }
 0xc10   :  { %8749 = vmatmul.mubr.msk.bf16.vlgmr.msra.gmra.mrb[92].mxu1 %vm624_vm5, %v3071_v60  ;;  %v3282_v17 = vsel %vm624_vm5, %v3277_v16, 0 }
 0xc11   :  { %8759 = vmatpush3.bf16.xpose.msra.mxu1 %v3180_v51  ;;  %8760 = vmatprep.mubr.msk.bf16.mxu1 %vm9781_vm1, %v9780_v21 }
 0xc12   :  { %8770 = vmatprep.subr.bf16.mxu1 %v9780_v21 }
 0xc13   :  { %v3275_v46 = vpop.permute.xlu1 %3274 }
 0xc14   :  { %8767 = vmatmul.mubr.msk.bf16.vlgmr.msra.gmra.mrb[80].mxu0 %vm624_vm5, %v3224_v14 }
 0xc15   :  { %8777 = vmatpush3.bf16.msra.mxu0 %v3341_v15  ;;  %8778 = vmatprep.mubr.msk.bf16.mxu0 %vm9781_vm1, %v9780_v21 }
 0xc16   :  { %8788 = vmatprep.subr.bf16.mxu0 %v9780_v21 }
 0xc17   :  { %v3457_v18 = vpop.permute.xlu1 %3456 }
 0xc18   :  { %8761 = vmatmul.mubr.msk.bf16.vlgmr.msra.gmra.mrb[96].mxu1 %vm624_vm5, %v3173_v13 }
 0xc19   :  { %8771 = vmatpush3.bf16.xpose.msra.mxu1 %v3282_v17  ;;  %8772 = vmatprep.mubr.msk.bf16.mxu1 %vm9781_vm1, %v9780_v21 }
 0xc1a   :  { %8782 = vmatprep.subr.bf16.mxu1 %v9780_v21 }
 0xc20   :  { %8773 = vmatmul.mubr.msk.bf16.vlgmr.msra.gmra.mrb[100].mxu1 %vm624_vm5, %v3275_v46 }
 0xc21   :  { %8783 = vmatpush3.bf16.msra.mxu1 %v3402_v19  ;;  %8784 = vmatprep.mubr.msk.bf16.mxu1 %vm9781_vm1, %v9780_v21 }
 0xc22   :  { %8794 = vmatprep.subr.bf16.mxu1 %v9780_v21 }
 0xc60   :  { %v2959_v24 = vpop.f32.mrb[80].mxu1 }
 0xc61   :  { %v2965_v25 = vmul.f32 0.25, %v2959_v24  ;;  %v8732_v22 = vpop.f32.mrb[81].mxu1 }
 0xc62   :  { %v2962_v30 = vpop.f32.mrb[82].mxu1 }
 0xc63   :  { %v8733_v27 = vpop.f32.mrb[83].mxu1  ;;  %v3325_v31 = vsel %vm1031_vm8, %v2965_v25, -inf }
 0xc64   :  { %3326 = vmax.xlane.f32.xlu0 %v3325_v31 }
 0xcd3   :  { %v3012_v32 = vpop.f32.mrb[84].mxu1 }
 0xcd4   :  { %v3018_v33 = vmul.f32 0.25, %v3012_v32  ;;  %v8738_v37 = vpop.f32.mrb[85].mxu1 }
 0xcd5   :  { %v3015_v39 = vpop.f32.mrb[86].mxu1 }
 0xcd6   :  { %v8739_v34 = vpop.f32.mrb[87].mxu1  ;;  %v3383_v41 = vsel %vm1031_vm8, %v3018_v33, -inf }
 0xcd7   :  { %3384 = vmax.xlane.f32.xlu1 %v3383_v41 }
 0xcdb   :  { %v3063_v23 = vpop.f32.mrb[88].mxu1 }
 0xcdc   :  { %v3069_v42 = vmul.f32 0.25, %v3063_v23  ;;  %v8744_v43 = vpop.f32.mrb[89].mxu1 }
 0xcdd   :  { %v3066_v44 = vpop.f32.mrb[90].mxu1 }
 0xcde   :  { %v8745_v47 = vpop.f32.mrb[91].mxu1  ;;  %v3444_v48 = vsel %vm1031_vm8, %v3069_v42, -inf }
 0xcdf   :  { %3445 = vmax.xlane.f32.xlu0 %v3444_v48  ;;  %v3165_v49 = vpop.f32.mrb[76].mxu0 }
 0xce0   :  { %v3171_v50 = vmul.f32 0.25, %v3165_v49  ;;  %v8756_v53 = vpop.f32.mrb[77].mxu0 }
 0xce1   :  { %v3168_v28 = vpop.f32.mrb[78].mxu0 }
 0xce2   :  { %v8757_v0 = vpop.f32.mrb[79].mxu0  ;;  %v3564_v40 = vsel %vm1031_vm8, %v3171_v50, -inf }
 0xce3   :  { %v3114_v54 = vpop.f32.mrb[92].mxu1  ;;  %3565 = vmax.xlane.f32.xlu1 %v3564_v40 }
 0xce4   :  { %v10735_v58 = vmul.f32 0.25, %v3114_v54  ;;  %v8750_v29 = vpop.f32.mrb[93].mxu1 }
 0xce5   :  { %v3117_v52 = vpop.f32.mrb[94].mxu1 }
 0xce6   :  { %v8751_v55 = vpop.f32.mrb[95].mxu1  ;;  %v3504_v56 = vsel %vm1031_vm8, %v10735_v58, -inf }
 0xce7   :  { %3505 = vmax.xlane.f32.xlu0 %v3504_v56  ;;  %v3267_v57 = vpop.f32.mrb[80].mxu0 }
 0xce8   :  { %v10739_v63 = vmul.f32 0.25, %v3267_v57  ;;  %v8768_v2 = vpop.f32.mrb[81].mxu0 }
 0xce9   :  { %v3270_v3 = vpop.f32.mrb[82].mxu0 }
 0xcea   :  { %v8769_v4 = vpop.f32.mrb[83].mxu0  ;;  %v3684_v5 = vsel %vm1031_vm8, %v10739_v63, -inf }
 0xceb   :  { %v3216_v6 = vpop.f32.mrb[96].mxu1  ;;  %3685 = vmax.xlane.f32.xlu1 %v3684_v5 }
 0xcec   :  { %v3222_v7 = vmul.f32 0.25, %v3216_v6  ;;  %v8762_v36 = vpop.f32.mrb[97].mxu1 }
 0xced   :  { %v3219_v60 = vpop.f32.mrb[98].mxu1 }
 0xcee   :  { %v8763_v45 = vpop.f32.mrb[99].mxu1  ;;  %v3624_v62 = vsel %vm1031_vm8, %v3222_v7, -inf  ;;  %v3846_v60 = vshrl.u32 %v10650_v61, 16 }
 0xcef   :  { %3625 = vmax.xlane.f32.xlu0 %v3624_v62  ;;  %v3849_v45 = vshll.u32 %v10650_v61, 16 }
 0xcf0   :  { %v3848_v62 = vrot.slane %v3846_v60, 2 }
 0xcf1   :  { %v3327_v51 = vpop.xlane.xlu0 %3326 }
 0xcf2   :  { %v3328_v14 = vsub.f32 %v2965_v25, %v3327_v51 }
 0xcf3   :  { %v3318_v8 = vpop.f32.mrb[100].mxu1 }
 0xcf4   :  { %v3324_v9 = vmul.f32 0.25, %v3318_v8  ;;  %v8774_v10 = vpop.f32.mrb[101].mxu1  ;;  %v3329_v15 = vmul.f32 1.442695, %v3328_v14  ;;  %v3851_v8 = vrot.slane %v3849_v45, 3 }
 0xcf5   :  { %v3321_v11 = vpop.f32.mrb[102].mxu1  ;;  %v3839_v10 = vshrl.u32 %v10646_v38, 16 }
 0xcf6   :  { %v8775_v12 = vpop.f32.mrb[103].mxu1  ;;  %v3744_v13 = vsel %vm1031_vm8, %v3324_v9, -inf  ;;  %9613 = vpow2.f32 %v3329_v15  ;;  %v3842_v11 = vshll.u32 %v10646_v38, 16 }
 0xcf7   :  { %3745 = vmax.xlane.f32.xlu0 %v3744_v13  ;;  %v3841_v61 = vrot.slane %v3839_v10, 2  ;;  %v4272_v10 = vshll.u32 %v10648_v59, 16 }
 0xcf8   :  { %v3844_v12 = vrot.slane %v3842_v11, 3 }
 0xcfa   :  { %v10807_v13 = vor.u32 %v3844_v12, %v3841_v61  ;;  %v4274_v12 = vrot.slane %v4272_v10, 3 }
 0xcfc   :  { %3576 = vrot.lane.b32.xlu1 %v10648_v59, %s9785_s5 }
 0xd00   :  { %v9614_v16 = vpop.eup %9613 }
 0xd01   :  { %v3331_v17 = vsel %vm1031_vm8, %v9614_v16, 0.0 }
 0xd0d   :  { %3516 = vrot.lane.b32.xlu0 %v10648_v59, %s9782_s24 }
 0xd20   :  { %3332 = vadd.xlane.f32.xlu1 %v3331_v17 }
 0xd64   :  { %v3385_v19 = vpop.xlane.xlu1 %3384 }
 0xd65   :  { %v3386_v46 = vsub.f32 %v3018_v33, %v3385_v19 }
 0xd67   :  { %v3387_v24 = vmul.f32 1.442695, %v3386_v46 }
 0xd69   :  { %9615 = vpow2.f32 %v3387_v24 }
 0xd6c   :  { %v3446_v22 = vpop.xlane.xlu0 %3445 }
 0xd6d   :  { %v3447_v30 = vsub.f32 %v3069_v42, %v3446_v22 }
 0xd6f   :  { %v3448_v25 = vmul.f32 1.442695, %v3447_v30 }
 0xd70   :  { %v3566_v27 = vpop.xlane.xlu1 %3565 }
 0xd71   :  { %v3567_v31 = vsub.f32 %v3171_v50, %v3566_v27 }
 0xd73   :  { %v10750_v32 = vpop.eup %9615  ;;  %v3568_v37 = vmul.f32 1.442695, %v3567_v31 }
 0xd74   :  { %v3389_v39 = vsel %vm1031_vm8, %v10750_v32, 0.0  ;;  %v3506_v42 = vpop.xlane.xlu0 %3505 }
 0xd75   :  { %9617 = vpow2.f32 %v3568_v37  ;;  %3390 = vadd.xlane.f32.xlu0 %v3389_v39  ;;  %v3507_v43 = vsub.f32 %v10735_v58, %v3506_v42 }
 0xd76   :  { %9619 = vpow2.f32 %v3448_v25 }
 0xd77   :  { %v3508_v47 = vmul.f32 1.442695, %v3507_v43 }
 0xd78   :  { %v3686_v50 = vpop.xlane.xlu1 %3685 }
 0xd79   :  { %9621 = vpow2.f32 %v3508_v47  ;;  %v3687_v53 = vsub.f32 %v10739_v63, %v3686_v50 }
 0xd7b   :  { %v3688_v40 = vmul.f32 1.442695, %v3687_v53 }
 0xd7c   :  { %v3626_v44 = vpop.xlane.xlu0 %3625  ;;  %v10770_v29 = vpop.permute.xlu1 %3576 }
 0xd7d   :  { %v3627_v48 = vsub.f32 %v3222_v7, %v3626_v44  ;;  %v3462_v7 = vand.u32 %v3457_v18, %v10117_v20  ;;  %v3582_v27 = vand.u32 %v10770_v29, %v10117_v20 }
 0xd7f   :  { %v10754_v34 = vpop.eup %9617  ;;  %v3628_v49 = vmul.f32 1.442695, %v3627_v48 }
 0xd80   :  { %v3570_v33 = vsel %vm1031_vm8, %v10754_v34, 0.0  ;;  %v10758_v41 = vpop.eup %9619 }
 0xd81   :  { %3571 = vadd.xlane.f32.xlu1 %v3570_v33  ;;  %v3450_v23 = vsel %vm1031_vm8, %v10758_v41, 0.0  ;;  %9623 = vpow2.f32 %v3628_v49 }
 0xd82   :  { %9625 = vpow2.f32 %v3688_v40 }
 0xd83   :  { %v10768_v0 = vpop.eup %9621 }
 0xd84   :  { %v3746_v28 = vpop.xlane.xlu0 %3745  ;;  %v3510_v58 = vsel %vm1031_vm8, %v10768_v0, 0.0 }
 0xd85   :  { %3451 = vadd.xlane.f32.xlu1 %v3450_v23  ;;  %v3747_v54 = vsub.f32 %v3324_v9, %v3746_v28  ;;  %v10795_v9 = vor.u32 %v3851_v8, %v3848_v62 }
 0xd87   :  { %v3748_v55 = vmul.f32 1.442695, %v3747_v54 }
 0xd88   :  { %v3517_v38 = vpop.permute.xlu0 %3516 }
 0xd89   :  { %v3522_v18 = vand.u32 %v3517_v38, %v10117_v20 }
 0xd8b   :  { %3636 = vrot.lane.b32.xlu0 %v10648_v59, %s9786_s6  ;;  %v10774_v52 = vpop.eup %9623 }
 0xd8c   :  { %v3630_v57 = vsel %vm1031_vm8, %v10774_v52, 0.0  ;;  %v10778_v63 = vpop.eup %9625 }
 0xd8d   :  { %v3690_v3 = vsel %vm1031_vm8, %v10778_v63, 0.0 }
 0xd96   :  { %3696 = vrot.lane.b32.xlu1 %v10648_v59, %s9787_s7 }
 0xdaa   :  { %3511 = vadd.xlane.f32.xlu0 %v3510_v58 }
 0xdad   :  { %v3333_v56 = vpop.xlane.xlu1 %3332 }
 0xdae   :  { %9627 = vrcp.f32 %v3333_v56  ;;  %3631 = vadd.xlane.f32.xlu0 %v3630_v57 }
 0xdaf   :  { %9629 = vpow2.f32 %v3748_v55  ;;  %v3857_v55 = vsel %vm624_vm5, %v10795_v9, 0 }
 0xdb8   :  { %v9628_v2 = vpop.eup %9627 }
 0xdb9   :  { %v3335_v4 = vmul.f32 %v9628_v2, %v9614_v16  ;;  %v10782_v5 = vpop.eup %9629 }
 0xdba   :  { %3691 = vadd.xlane.f32.xlu1 %v3690_v3  ;;  %v3750_v36 = vsel %vm1031_vm8, %v10782_v5, 0.0 }
 0xdbb   :  { %v3336_v6 = vpack.c.bf16 %v3335_v4, %v3335_v4 }
 0xdbd   :  { %8779 = vmatmul.mubr.msk.bf16.vlgmr.msra.gmra.mrb[84].mxu0 %vm1044_vm9, %v3336_v6 }
 0xdbe   :  { %8789 = vmatpush3.bf16.msra.mxu0 %v3462_v7  ;;  %3751 = vadd.xlane.f32.xlu1 %v3750_v36 }
 0xdbf   :  { %8790 = vmatprep.mubr.msk.bf16.mxu0 %vm9781_vm1, %v9780_v21  ;;  %8800 = vmatprep.subr.bf16.mxu0 %v9780_v21 }
 0xdc4   :  { %3756 = vrot.lane.b32.xlu0 %v10648_v59, %s9788_s8 }
 0xdc8   :  { %3953 = vrot.lane.b32.xlu0 %v10795_v9, %s9784_s1 }
 0xdcc   :  { %4004 = vrot.lane.b32.xlu0 %v10795_v9, %s9782_s24 }
 0xdcf   :  { %3902 = vrot.lane.b32.xlu1 %v10795_v9, %s9783_s25 }
 0xdd0   :  { %4055 = vrot.lane.b32.xlu0 %v10795_v9, %s9785_s5 }
 0xdd3   :  { %3900 = vrot.lane.b32.xlu1 %v10807_v13, %s9783_s25 }
 0xdd4   :  { %4106 = vrot.lane.b32.xlu0 %v10795_v9, %s9786_s6 }
 0xdd7   :  { %3951 = vrot.lane.b32.xlu1 %v10807_v13, %s9784_s1 }
 0xdd8   :  { %4157 = vrot.lane.b32.xlu0 %v10795_v9, %s9787_s7 }
 0xddb   :  { %4002 = vrot.lane.b32.xlu1 %v10807_v13, %s9782_s24 }
 0xddc   :  { %4208 = vrot.lane.b32.xlu0 %v10795_v9, %s9788_s8  ;;  %v4269_v9 = vshrl.u32 %v10648_v59, 16 }
 0xdde   :  { %v4271_v61 = vrot.slane %v4269_v9, 2 }
 0xddf   :  { %4053 = vrot.lane.b32.xlu1 %v10807_v13, %s9785_s5 }
 0xde0   :  { %4206 = vrot.lane.b32.xlu0 %v10807_v13, %s9788_s8  ;;  %v10901_v59 = vor.u32 %v4274_v12, %v4271_v61 }
 0xde3   :  { %4104 = vrot.lane.b32.xlu1 %v10807_v13, %s9786_s6 }
 0xde7   :  { %4155 = vrot.lane.b32.xlu1 %v10807_v13, %s9787_s7 }
 0xe02   :  { %v3391_v51 = vpop.xlane.xlu0 %3390 }
 0xe03   :  { %9631 = vrcp.f32 %v3391_v51 }
 0xe06   :  { %v3637_v39 = vpop.permute.xlu0 %3636 }
 0xe07   :  { %v3642_v44 = vand.u32 %v3637_v39, %v10117_v20 }
 0xe0d   :  { %v9632_v14 = vpop.eup %9631 }
 0xe0e   :  { %v3572_v15 = vpop.xlane.xlu1 %3571  ;;  %v3393_v16 = vmul.f32 %v9632_v14, %v10750_v32 }
 0xe10   :  { %v3394_v17 = vpack.c.bf16 %v3393_v16, %v3393_v16  ;;  %v4280_v16 = vand.u32 %v10901_v59, %v10117_v20 }
 0xe12   :  { %8785 = vmatmul.mubr.msk.bf16.vlgmr.msra.gmra.mrb[104].mxu1 %vm1044_vm9, %v3394_v17  ;;  %v3452_v19 = vpop.xlane.xlu1 %3451 }
 0xe13   :  { %8795 = vmatpush3.bf16.msra.mxu1 %v3522_v18  ;;  %9633 = vrcp.f32 %v3452_v19  ;;  %8796 = vmatprep.mubr.msk.bf16.mxu1 %vm9781_vm1, %v9780_v21 }
 0xe14   :  { %8806 = vmatprep.subr.bf16.mxu1 %v9780_v21  ;;  %9635 = vrcp.f32 %v3572_v15 }
 0xe16   :  { %v3697_v32 = vpop.permute.xlu1 %3696 }
 0xe17   :  { %v3702_v37 = vand.u32 %v3697_v32, %v10117_v20 }
 0xe1d   :  { %v9634_v46 = vpop.eup %9633 }
 0xe1e   :  { %v3454_v24 = vmul.f32 %v9634_v46, %v10758_v41  ;;  %v9636_v30 = vpop.eup %9635 }
 0xe1f   :  { %v3574_v31 = vmul.f32 %v9636_v30, %v10754_v34 }
 0xe20   :  { %v3455_v22 = vpack.c.bf16 %v3454_v24, %v3454_v24 }
 0xe21   :  { %v3575_v25 = vpack.c.bf16 %v3574_v31, %v3574_v31 }
 0xe22   :  { %8791 = vmatmul.mubr.msk.bf16.vlgmr.msra.gmra.mrb[88].mxu0 %vm1044_vm9, %v3455_v22 }
 0xe23   :  { %8801 = vmatpush3.bf16.msra.mxu0 %v3582_v27  ;;  %8802 = vmatprep.mubr.msk.bf16.mxu0 %vm9781_vm1, %v9780_v21 }
 0xe24   :  { %8812 = vmatprep.subr.bf16.mxu0 %v9780_v21 }
 0xe2a   :  { %8803 = vmatmul.mubr.msk.bf16.vlgmr.msra.gmra.mrb[92].mxu0 %vm1044_vm9, %v3575_v25 }
 0xe2b   :  { %8813 = vmatpush3.bf16.msra.mxu0 %v3702_v37  ;;  %8814 = vmatprep.mubr.msk.bf16.mxu0 %vm9781_vm1, %v9780_v21 }
 0xe2c   :  { %8824 = vmatprep.subr.bf16.mxu0 %v9780_v21 }
 0xe37   :  { %v3512_v33 = vpop.xlane.xlu0 %3511 }
 0xe38   :  { %9637 = vrcp.f32 %v3512_v33 }
 0xe3b   :  { %v3632_v41 = vpop.xlane.xlu0 %3631 }
 0xe3c   :  { %9639 = vrcp.f32 %v3632_v41 }
 0xe3f   :  { %v3757_v49 = vpop.permute.xlu0 %3756 }
 0xe40   :  { %v3762_v28 = vand.u32 %v3757_v49, %v10117_v20 }
 0xe42   :  { %v9638_v23 = vpop.eup %9637 }
 0xe43   :  { %v3514_v34 = vmul.f32 %v9638_v23, %v10768_v0  ;;  %v3954_v40 = vpop.permute.xlu0 %3953 }
 0xe44   :  { %v3959_v6 = vsel %vm624_vm5, %v3954_v40, 0 }
 0xe45   :  { %v3515_v42 = vpack.c.bf16 %v3514_v34, %v3514_v34 }
 0xe46   :  { %v9640_v43 = vpop.eup %9639 }
 0xe47   :  { %8797 = vmatmul.mubr.msk.bf16.vlgmr.msra.gmra.mrb[108].mxu1 %vm1044_vm9, %v3515_v42  ;;  %v3692_v47 = vpop.xlane.xlu1 %3691  ;;  %v3634_v48 = vmul.f32 %v9640_v43, %v10774_v52  ;;  %v4005_v57 = vpop.permute.xlu0 %4004 }
 0xe48   :  { %8807 = vmatpush3.bf16.msra.mxu1 %v3642_v44  ;;  %9641 = vrcp.f32 %v3692_v47  ;;  %8808 = vmatprep.mubr.msk.bf16.mxu1 %vm9781_vm1, %v9780_v21  ;;  %v4010_v7 = vsel %vm624_vm5, %v4005_v57, 0 }
 0xe49   :  { %8818 = vmatprep.subr.bf16.mxu1 %v9780_v21  ;;  %v3635_v53 = vpack.c.bf16 %v3634_v48, %v3634_v48 }
 0xe4b   :  { %v3752_v50 = vpop.xlane.xlu1 %3751  ;;  %v4056_v4 = vpop.permute.xlu0 %4055 }
 0xe4c   :  { %9643 = vrcp.f32 %v3752_v50  ;;  %v4061_v45 = vsel %vm624_vm5, %v4056_v4, 0 }
 0xe4f   :  { %8809 = vmatmul.mubr.msk.bf16.vlgmr.msra.gmra.mrb[112].mxu1 %vm1044_vm9, %v3635_v53  ;;  %v3903_v54 = vpop.permute.xlu1 %3902  ;;  %v4107_v36 = vpop.permute.xlu0 %4106 }
 0xe50   :  { %8819 = vmatpush3.bf16.msra.mxu1 %v3762_v28  ;;  %8820 = vmatprep.mubr.msk.bf16.mxu1 %vm9781_vm1, %v9780_v21  ;;  %v4112_v11 = vsel %vm624_vm5, %v4107_v36, 0 }
 0xe51   :  { %8830 = vmatprep.subr.bf16.mxu1 %v9780_v21 }
 0xe52   :  { %v9642_v0 = vpop.eup %9641 }
 0xe53   :  { %v3694_v29 = vmul.f32 %v9642_v0, %v10778_v63  ;;  %v3901_v2 = vpop.permute.xlu1 %3900  ;;  %v3908_v63 = vsel %vm624_vm5, %v3903_v54, 0  ;;  %v4158_v62 = vpop.permute.xlu0 %4157 }
 0xe55   :  { %v3695_v58 = vpack.c.bf16 %v3694_v29, %v3694_v29 }
 0xe56   :  { %v9644_v52 = vpop.eup %9643 }
 0xe57   :  { %8815 = vmatmul.mubr.msk.bf16.vlgmr.msra.gmra.mrb[96].mxu0 %vm1044_vm9, %v3695_v58  ;;  %v3754_v56 = vmul.f32 %v9644_v52, %v10782_v5  ;;  %v3952_v5 = vpop.permute.xlu1 %3951  ;;  %v4209_v38 = vpop.permute.xlu0 %4208 }
 0xe58   :  { %8825 = vmatpush3.bf16.xpose.msra.mxu0 %v3857_v55  ;;  %8826 = vmatprep.mubr.msk.bf16.mxu0 %vm9781_vm1, %v9780_v21  ;;  %v4214_v14 = vsel %vm624_vm5, %v4209_v38, 0 }
 0xe59   :  { %v3755_v3 = vpack.c.bf16 %v3754_v56, %v3754_v56  ;;  %8836 = vmatprep.subr.bf16.mxu0 %v9780_v21 }
 0xe5b   :  { %8821 = vmatmul.mubr.msk.bf16.vlgmr.msra.gmra.mrb[116].mxu1 %vm1044_vm9, %v3755_v3  ;;  %v4003_v60 = vpop.permute.xlu1 %4002  ;;  %v4207_v17 = vpop.permute.xlu0 %4206 }
 0xe5c   :  { %8831 = vmatpush3.bf16.xpose.msra.mxu1 %v3908_v63  ;;  %8832 = vmatprep.mubr.msk.bf16.mxu1 %vm9781_vm1, %v9780_v21 }
 0xe5d   :  { %8842 = vmatprep.subr.bf16.mxu1 %v9780_v21 }
 0xe5f   :  { %8827 = vmatmul.mubr.msk.bf16.vlgmr.msra.gmra.mrb[100].mxu0 %vm624_vm5, %v10807_v13  ;;  %v4054_v8 = vpop.permute.xlu1 %4053  ;;  %v4163_v13 = vsel %vm624_vm5, %v4158_v62, 0 }
 0xe60   :  { %8837 = vmatpush3.bf16.xpose.msra.mxu0 %v3959_v6  ;;  %8838 = vmatprep.mubr.msk.bf16.mxu0 %vm9781_vm1, %v9780_v21 }
 0xe61   :  { %8848 = vmatprep.subr.bf16.mxu0 %v9780_v21 }
 0xe63   :  { %8833 = vmatmul.mubr.msk.bf16.vlgmr.msra.gmra.mrb[120].mxu1 %vm624_vm5, %v3901_v2  ;;  %v4105_v51 = vpop.permute.xlu1 %4104 }
 0xe64   :  { %8843 = vmatpush3.bf16.xpose.msra.mxu1 %v4010_v7  ;;  %8844 = vmatprep.mubr.msk.bf16.mxu1 %vm9781_vm1, %v9780_v21 }
 0xe65   :  { %8854 = vmatprep.subr.bf16.mxu1 %v9780_v21 }
 0xe67   :  { %8839 = vmatmul.mubr.msk.bf16.vlgmr.msra.gmra.mrb[104].mxu0 %vm624_vm5, %v3952_v5  ;;  %v4156_v15 = vpop.permute.xlu1 %4155 }
 0xe68   :  { %8849 = vmatpush3.bf16.xpose.msra.mxu0 %v4061_v45  ;;  %8850 = vmatprep.mubr.msk.bf16.mxu0 %vm9781_vm1, %v9780_v21 }
 0xe69   :  { %8860 = vmatprep.subr.bf16.mxu0 %v9780_v21 }
 0xe6b   :  { %8845 = vmatmul.mubr.msk.bf16.vlgmr.msra.gmra.mrb[124].mxu1 %vm624_vm5, %v4003_v60 }
 0xe6c   :  { %8855 = vmatpush3.bf16.xpose.msra.mxu1 %v4112_v11  ;;  %8856 = vmatprep.mubr.msk.bf16.mxu1 %vm9781_vm1, %v9780_v21 }
 0xe6d   :  { %8866 = vmatprep.subr.bf16.mxu1 %v9780_v21 }
 0xe6f   :  { %8851 = vmatmul.mubr.msk.bf16.vlgmr.msra.gmra.mrb[108].mxu0 %vm624_vm5, %v4054_v8 }
 0xe70   :  { %8861 = vmatpush3.bf16.xpose.msra.mxu0 %v4163_v13  ;;  %8862 = vmatprep.mubr.msk.bf16.mxu0 %vm9781_vm1, %v9780_v21 }
 0xe71   :  { %8872 = vmatprep.subr.bf16.mxu0 %v9780_v21 }
 0xe73   :  { %8857 = vmatmul.mubr.msk.bf16.vlgmr.msra.gmra.mrb[128].mxu1 %vm624_vm5, %v4105_v51 }
 0xe74   :  { %8867 = vmatpush3.bf16.xpose.msra.mxu1 %v4214_v14  ;;  %8868 = vmatprep.mubr.msk.bf16.mxu1 %vm9781_vm1, %v9780_v21 }
 0xe75   :  { %8878 = vmatprep.subr.bf16.mxu1 %v9780_v21 }
 0xe77   :  { %8863 = vmatmul.mubr.msk.bf16.vlgmr.msra.gmra.mrb[112].mxu0 %vm624_vm5, %v4156_v15 }
 0xe78   :  { %8873 = vmatpush3.bf16.msra.mxu0 %v4280_v16  ;;  %8874 = vmatprep.mubr.msk.bf16.mxu0 %vm9781_vm1, %v9780_v21 }
 0xe79   :  { %8884 = vmatprep.subr.bf16.mxu0 %v9780_v21 }
 0xe7b   :  { %8869 = vmatmul.mubr.msk.bf16.vlgmr.msra.gmra.mrb[132].mxu1 %vm624_vm5, %v4207_v17 }
 0xe7c   :  { %8880 = vmatprep.mubr.msk.bf16.mxu1 %vm9781_vm1, %v9780_v21 }
 0xe90   :  { %v10917_v18 = vpop.f32.mrb[84].mxu0 }
 0xe91   :  { %v8780_v19 = vpop.f32.mrb[85].mxu0 }
 0xe92   :  { %v3380_v46 = vpop.f32.mrb[86].mxu0 }
 0xe93   :  { %v8781_v24 = vpop.f32.mrb[87].mxu0 }
 0xee5   :  { %v10919_v22 = vpop.f32.mrb[104].mxu1 }
 0xee6   :  { %v8786_v30 = vpop.f32.mrb[105].mxu1 }
 0xee7   :  { %v3441_v27 = vpop.f32.mrb[106].mxu1 }
 0xee8   :  { %v8787_v31 = vpop.f32.mrb[107].mxu1 }
 0xef5   :  { %v10921_v32 = vpop.f32.mrb[88].mxu0 }
 0xef6   :  { %v8792_v25 = vpop.f32.mrb[89].mxu0 }
 0xef7   :  { %v3501_v37 = vpop.f32.mrb[90].mxu0 }
 0xef8   :  { %v8793_v39 = vpop.f32.mrb[91].mxu0 }
 0xefd   :  { %v10923_v33 = vpop.f32.mrb[92].mxu0 }
 0xefe   :  { %v8804_v41 = vpop.f32.mrb[93].mxu0 }
 0xeff   :  { %v3621_v23 = vpop.f32.mrb[94].mxu0 }
 0xf00   :  { %v8805_v34 = vpop.f32.mrb[95].mxu0 }
 0xf1a   :  { %v10925_v42 = vpop.f32.mrb[108].mxu1 }
 0xf1b   :  { %v8798_v43 = vpop.f32.mrb[109].mxu1 }
 0xf1c   :  { %v3561_v44 = vpop.f32.mrb[110].mxu1 }
 0xf1d   :  { %v8799_v47 = vpop.f32.mrb[111].mxu1 }
 0xf22   :  { %v10927_v48 = vpop.f32.mrb[112].mxu1 }
 0xf23   :  { %v8810_v49 = vpop.f32.mrb[113].mxu1 }
 0xf24   :  { %v3681_v50 = vpop.f32.mrb[114].mxu1 }
 0xf25   :  { %v8811_v53 = vpop.f32.mrb[115].mxu1 }
 0xf2a   :  { %v10929_v28 = vpop.f32.mrb[96].mxu0 }
 0xf2b   :  { %v8816_v0 = vpop.f32.mrb[97].mxu0 }
 0xf2c   :  { %v3741_v40 = vpop.f32.mrb[98].mxu0 }
 0xf2d   :  { %v8817_v54 = vpop.f32.mrb[99].mxu0 }
 0xf2e   :  { %v10931_v29 = vpop.f32.mrb[116].mxu1 }
 0xf2f   :  { %v8822_v58 = vpop.f32.mrb[117].mxu1 }
 0xf30   :  { %v3801_v52 = vpop.f32.mrb[118].mxu1 }
 0xf31   :  { %v8823_v55 = vpop.f32.mrb[119].mxu1 }
 0xf32   :  { %v3893_v56 = vpop.f32.mrb[100].mxu0 }
 0xf33   :  { %v3899_v57 = vmul.f32 0.25, %v3893_v56  ;;  %v8828_v2 = vpop.f32.mrb[101].mxu0 }
 0xf34   :  { %v3896_v3 = vpop.f32.mrb[102].mxu0 }
 0xf35   :  { %v8829_v63 = vpop.f32.mrb[103].mxu0  ;;  %v4257_v4 = vsel %vm1031_vm8, %v3899_v57, -inf }
 0xf36   :  { %v3944_v5 = vpop.f32.mrb[120].mxu1  ;;  %4258 = vmax.xlane.f32.xlu1 %v4257_v4 }
 0xf37   :  { %v3950_v6 = vmul.f32 0.25, %v3944_v5  ;;  %v8834_v7 = vpop.f32.mrb[121].mxu1 }
 0xf38   :  { %v3947_v36 = vpop.f32.mrb[122].mxu1 }
 0xf39   :  { %v8835_v60 = vpop.f32.mrb[123].mxu1  ;;  %v4322_v45 = vsel %vm1031_vm8, %v3950_v6, -inf }
 0xf3a   :  { %4323 = vmax.xlane.f32.xlu0 %v4322_v45  ;;  %v3995_v62 = vpop.f32.mrb[104].mxu0 }
 0xf3b   :  { %v10935_v8 = vmul.f32 0.25, %v3995_v62  ;;  %v8840_v9 = vpop.f32.mrb[105].mxu0 }
 0xf3c   :  { %v3998_v10 = vpop.f32.mrb[106].mxu0 }
 0xf3d   :  { %v8841_v11 = vpop.f32.mrb[107].mxu0  ;;  %v4382_v61 = vsel %vm1031_vm8, %v10935_v8, -inf }
 0xf3e   :  { %v4046_v12 = vpop.f32.mrb[124].mxu1  ;;  %4383 = vmax.xlane.f32.xlu0 %v4382_v61 }
 0xf3f   :  { %v10939_v13 = vmul.f32 0.25, %v4046_v12  ;;  %v8846_v38 = vpop.f32.mrb[125].mxu1 }
 0xf40   :  { %v4049_v51 = vpop.f32.mrb[126].mxu1 }
 0xf41   :  { %v8847_v14 = vpop.f32.mrb[127].mxu1  ;;  %v4442_v15 = vsel %vm1031_vm8, %v10939_v13, -inf }
 0xf42   :  { %4443 = vmax.xlane.f32.xlu1 %v4442_v15  ;;  %v4097_v16 = vpop.f32.mrb[108].mxu0 }
 0xf43   :  { %v4103_v17 = vmul.f32 0.25, %v4097_v16  ;;  %v8852_v19 = vpop.f32.mrb[109].mxu0 }
 0xf44   :  { %v4100_v46 = vpop.f32.mrb[110].mxu0 }
 0xf45   :  { %v8853_v24 = vpop.f32.mrb[111].mxu0  ;;  %v4502_v30 = vsel %vm1031_vm8, %v4103_v17, -inf }
 0xf46   :  { %v4148_v27 = vpop.f32.mrb[128].mxu1  ;;  %4503 = vmax.xlane.f32.xlu0 %v4502_v30 }
 0xf47   :  { %v4154_v31 = vmul.f32 0.25, %v4148_v27  ;;  %v8858_v25 = vpop.f32.mrb[129].mxu1 }
 0xf48   :  { %v4151_v37 = vpop.f32.mrb[130].mxu1 }
 0xf49   :  { %v8859_v39 = vpop.f32.mrb[131].mxu1  ;;  %v4562_v41 = vsel %vm1031_vm8, %v4154_v31, -inf }
 0xf4a   :  { %4563 = vmax.xlane.f32.xlu1 %v4562_v41  ;;  %v4199_v23 = vpop.f32.mrb[112].mxu0 }
 0xf4b   :  { %v4205_v34 = vmul.f32 0.25, %v4199_v23  ;;  %v8864_v43 = vpop.f32.mrb[113].mxu0 }
 0xf4c   :  { %v4202_v44 = vpop.f32.mrb[114].mxu0 }
 0xf4d   :  { %v8865_v47 = vpop.f32.mrb[115].mxu0  ;;  %v4622_v49 = vsel %vm1031_vm8, %v4205_v34, -inf }
 0xf4e   :  { %v4250_v50 = vpop.f32.mrb[132].mxu1  ;;  %4623 = vmax.xlane.f32.xlu0 %v4622_v49 }
 0xf4f   :  { %v8870_v53 = vpop.f32.mrb[133].mxu1  ;;  %v4256_v54 = vmul.f32 0.25, %v4250_v50 }
 0xf50   :  { %v4253_v0 = vpop.f32.mrb[134].mxu1 }
 0xf51   :  { %v8871_v40 = vpop.f32.mrb[135].mxu1  ;;  %v4682_v58 = vsel %vm1031_vm8, %v4256_v54, -inf }
 0xf5b   :  { %4334 = vrot.lane.b32.xlu1 %v10901_v59, %s9783_s25 }
 0xf7f   :  { %4683 = vmax.xlane.f32.xlu1 %v4682_v58 }
 0xf90   :  { %4454 = vrot.lane.b32.xlu1 %v10901_v59, %s9782_s24 }
 0xf94   :  { %4514 = vrot.lane.b32.xlu1 %v10901_v59, %s9785_s5 }
 0xfc3   :  { %v4259_v52 = vpop.xlane.xlu1 %4258 }
 0xfc4   :  { %v4260_v55 = vsub.f32 %v3899_v57, %v4259_v52 }
 0xfc6   :  { %v4261_v56 = vmul.f32 1.442695, %v4260_v55 }
 0xfc7   :  { %v4324_v2 = vpop.xlane.xlu0 %4323 }
 0xfc8   :  { %9645 = vpow2.f32 %v4261_v56  ;;  %v4325_v3 = vsub.f32 %v3950_v6, %v4324_v2 }
 0xfca   :  { %v4326_v63 = vmul.f32 1.442695, %v4325_v3 }
 0xfcb   :  { %v4384_v6 = vpop.xlane.xlu0 %4383 }
 0xfcc   :  { %9647 = vpow2.f32 %v4326_v63  ;;  %v4385_v9 = vsub.f32 %v10935_v8, %v4384_v6 }
 0xfce   :  { %v4386_v61 = vmul.f32 1.442695, %v4385_v9 }
 0xfcf   :  { %v4444_v5 = vpop.xlane.xlu1 %4443 }
 0xfd0   :  { %v4445_v11 = vsub.f32 %v10939_v13, %v4444_v5  ;;  %9649 = vpow2.f32 %v4386_v61 }
 0xfd2   :  { %v10953_v4 = vpop.eup %9645  ;;  %v4446_v51 = vmul.f32 1.442695, %v4445_v11 }
 0xfd3   :  { %v4263_v7 = vsel %vm1031_vm8, %v10953_v4, 0.0  ;;  %v4504_v10 = vpop.xlane.xlu0 %4503 }
 0xfd4   :  { %4264 = vadd.xlane.f32.xlu0 %v4263_v7  ;;  %v4505_v12 = vsub.f32 %v4103_v17, %v4504_v10  ;;  %9651 = vpow2.f32 %v4446_v51 }
 0xfd6   :  { %v10957_v36 = vpop.eup %9647  ;;  %v4506_v15 = vmul.f32 1.442695, %v4505_v12 }
 0xfd7   :  { %v4564_v60 = vpop.xlane.xlu1 %4563  ;;  %v4328_v45 = vsel %vm1031_vm8, %v10957_v36, 0.0 }
 0xfd8   :  { %4329 = vadd.xlane.f32.xlu1 %v4328_v45  ;;  %v4565_v14 = vsub.f32 %v4154_v31, %v4564_v60  ;;  %9653 = vpow2.f32 %v4506_v15 }
 0xfda   :  { %v4566_v19 = vmul.f32 1.442695, %v4565_v14  ;;  %v9650_v24 = vpop.eup %9649 }
 0xfdb   :  { %v4335_v57 = vpop.permute.xlu1 %4334  ;;  %v4624_v38 = vpop.xlane.xlu0 %4623  ;;  %v4388_v8 = vsel %vm1031_vm8, %v9650_v24, 0.0 }
 0xfdc   :  { %v4340_v62 = vand.u32 %v4335_v57, %v10117_v20  ;;  %v4625_v16 = vsub.f32 %v4205_v34, %v4624_v38  ;;  %9655 = vpow2.f32 %v4566_v19 }
 0xfde   :  { %8879 = vmatpush3.bf16.msra.mxu1 %v4340_v62  ;;  %v4626_v46 = vmul.f32 1.442695, %v4625_v16  ;;  %v10969_v30 = vpop.eup %9651 }
 0xfdf   :  { %8890 = vmatprep.subr.bf16.mxu1 %v9780_v21  ;;  %v4448_v31 = vsel %vm1031_vm8, %v10969_v30, 0.0 }
 0xfe0   :  { %9657 = vpow2.f32 %v4626_v46 }
 0xfe2   :  { %v10972_v13 = vpop.eup %9653 }
 0xfe3   :  { %v4508_v25 = vsel %vm1031_vm8, %v10972_v13, 0.0 }
 0xfe6   :  { %v10974_v17 = vpop.eup %9655 }
 0xfe7   :  { %v4568_v23 = vsel %vm1031_vm8, %v10974_v17, 0.0 }
 0xfe9   :  { %4574 = vrot.lane.b32.xlu1 %v10901_v59, %s9786_s6 }
 0xfea   :  { %4394 = vrot.lane.b32.xlu0 %v10901_v59, %s9784_s1  ;;  %v10980_v37 = vpop.eup %9657 }
 0xfeb   :  { %v4628_v34 = vsel %vm1031_vm8, %v10980_v37, 0.0 }
0x1009   :  { %4389 = vadd.xlane.f32.xlu0 %v4388_v8 }
0x100c   :  { %v4684_v27 = vpop.xlane.xlu1 %4683 }
0x100d   :  { %v4685_v39 = vsub.f32 %v4256_v54, %v4684_v27  ;;  %4449 = vadd.xlane.f32.xlu1 %v4448_v31  ;;  %4509 = vadd.xlane.f32.xlu0 %v4508_v25 }
0x100f   :  { %v4686_v41 = vmul.f32 1.442695, %v4685_v39  ;;  %v9456_v39 = vld [vmem:[%s11905_s2 + $0xbc] ss:$76 sps:$4 sm:$0xff]  }
0x1010   :  { %v4455_v47 = vpop.permute.xlu1 %4454 }
0x1011   :  { %9659 = vpow2.f32 %v4686_v41  ;;  %4569 = vadd.xlane.f32.xlu1 %v4568_v23  ;;  %4629 = vadd.xlane.f32.xlu0 %v4628_v34  ;;  %v4460_v2 = vand.u32 %v4455_v47, %v10117_v20 }
0x1014   :  { %v4515_v49 = vpop.permute.xlu1 %4514 }
0x1015   :  { %v4520_v6 = vand.u32 %v4515_v49, %v10117_v20 }
0x101b   :  { %v10986_v43 = vpop.eup %9659 }
0x101c   :  { %v4688_v44 = vsel %vm1031_vm8, %v10986_v43, 0.0 }
0x101d   :  { %4689 = vadd.xlane.f32.xlu0 %v4688_v44 }
0x1022   :  { %4694 = vrot.lane.b32.xlu1 %v10901_v59, %s9788_s8 }
0x1033   :  { %4634 = vrot.lane.b32.xlu0 %v10901_v59, %s9787_s7 }
0x1061   :  { %v4265_v50 = vpop.xlane.xlu0 %4264 }
0x1062   :  { %9661 = vrcp.f32 %v4265_v50 }
0x1065   :  { %v4330_v53 = vpop.xlane.xlu1 %4329  ;;  %v4395_v40 = vpop.permute.xlu0 %4394 }
0x1066   :  { %9663 = vrcp.f32 %v4330_v53  ;;  %v4400_v55 = vand.u32 %v4395_v40, %v10117_v20  ;;  %v9458_v40 = vld [vmem:[%s11905_s2 + $0x1ec] ss:$76 sps:$4 sm:$0xff]  }
0x1069   :  { %v4575_v3 = vpop.permute.xlu1 %4574 }
0x106a   :  { %v4580_v38 = vand.u32 %v4575_v3, %v10117_v20 }
0x106c   :  { %v9662_v0 = vpop.eup %9661 }
0x106d   :  { %v4267_v54 = vmul.f32 %v9662_v0, %v10953_v4  ;;  %v9457_v0 = vld [vmem:[%s11905_s2 + $0x154] ss:$76 sps:$4 sm:$0xff]  }
0x106f   :  { %v4268_v58 = vpack.c.bf16 %v4267_v54, %v4267_v54 }
0x1070   :  { %v9664_v52 = vpop.eup %9663 }
0x1071   :  { %8875 = vmatmul.mubr.msk.bf16.vlgmr.msra.gmra.mrb[116].mxu0 %vm1044_vm9, %v4268_v58  ;;  %v4332_v56 = vmul.f32 %v9664_v52, %v10957_v36 }
0x1072   :  { %8885 = vmatpush3.bf16.msra.mxu0 %v4400_v55  ;;  %8886 = vmatprep.mubr.msk.bf16.mxu0 %vm9781_vm1, %v9780_v21 }
0x1073   :  { %v4333_v59 = vpack.c.bf16 %v4332_v56, %v4332_v56  ;;  %8896 = vmatprep.subr.bf16.mxu0 %v9780_v21  ;;  %v9460_v56 = vld [vmem:[%s11905_s2 + $0x31c] ss:$76 sps:$4 sm:$0xff]  }
0x1075   :  { %8881 = vmatmul.mubr.msk.bf16.vlgmr.msra.gmra.mrb[136].mxu1 %vm1044_vm9, %v4333_v59 }
0x1076   :  { %8891 = vmatpush3.bf16.msra.mxu1 %v4460_v2  ;;  %8892 = vmatprep.mubr.msk.bf16.mxu1 %vm9781_vm1, %v9780_v21 }
0x1077   :  { %8902 = vmatprep.subr.bf16.mxu1 %v9780_v21 }
0x1096   :  { %v4390_v63 = vpop.xlane.xlu0 %4389 }
0x1097   :  { %9665 = vrcp.f32 %v4390_v63 }
0x109a   :  { %v4450_v4 = vpop.xlane.xlu1 %4449  ;;  %v4510_v5 = vpop.xlane.xlu0 %4509 }
0x109b   :  { %9667 = vrcp.f32 %v4450_v4 }
0x109c   :  { %9669 = vrcp.f32 %v4510_v5  ;;  %v9461_v5 = vld [vmem:[%s11905_s2 + $0x3b4] ss:$76 sps:$4 sm:$0xff]  }
0x109e   :  { %v4570_v7 = vpop.xlane.xlu1 %4569  ;;  %v4630_v36 = vpop.xlane.xlu0 %4629 }
0x109f   :  { %9671 = vrcp.f32 %v4570_v7 }
0x10a0   :  { %9673 = vrcp.f32 %v4630_v36 }
0x10a1   :  { %v9666_v60 = vpop.eup %9665 }
0x10a2   :  { %v4392_v45 = vmul.f32 %v9666_v60, %v9650_v24  ;;  %v4695_v19 = vpop.permute.xlu1 %4694 }
0x10a4   :  { %v4393_v57 = vpack.c.bf16 %v4392_v45, %v4392_v45 }
0x10a5   :  { %v9668_v62 = vpop.eup %9667 }
0x10a6   :  { %v9670_v9 = vpop.eup %9669  ;;  %8887 = vmatmul.mubr.msk.bf16.vlgmr.msra.gmra.mrb[120].mxu0 %vm1044_vm9, %v4393_v57  ;;  %v4452_v10 = vmul.f32 %v9668_v62, %v10969_v30  ;;  %v9462_v57 = vld [vmem:[%s11905_s2 + $0x44c] ss:$76 sps:$4 sm:$0xff]  }
0x10a7   :  { %8897 = vmatpush3.bf16.msra.mxu0 %v4520_v6  ;;  %8898 = vmatprep.mubr.msk.bf16.mxu0 %vm9781_vm1, %v9780_v21  ;;  %v4512_v61 = vmul.f32 %v9670_v9, %v10972_v13  ;;  %v4700_v13 = vand.u32 %v4695_v19, %v10117_v20 }
0x10a8   :  { %v4453_v11 = vpack.c.bf16 %v4452_v10, %v4452_v10  ;;  %8908 = vmatprep.subr.bf16.mxu0 %v9780_v21 }
0x10a9   :  { %v9672_v12 = vpop.eup %9671  ;;  %v4513_v14 = vpack.c.bf16 %v4512_v61, %v4512_v61 }
0x10aa   :  { %8893 = vmatmul.mubr.msk.bf16.vlgmr.msra.gmra.mrb[140].mxu1 %vm1044_vm9, %v4453_v11  ;;  %v4690_v51 = vpop.xlane.xlu0 %4689  ;;  %v4572_v15 = vmul.f32 %v9672_v12, %v10974_v17  ;;  %v9674_v16 = vpop.eup %9673 }
0x10ab   :  { %8903 = vmatpush3.bf16.msra.mxu1 %v4580_v38  ;;  %9675 = vrcp.f32 %v4690_v51  ;;  %8904 = vmatprep.mubr.msk.bf16.mxu1 %vm9781_vm1, %v9780_v21  ;;  %v4632_v8 = vmul.f32 %v9674_v16, %v10980_v37  ;;  %v9455_v37 = vld [vmem:[%s11905_s2 + $0x24] ss:$76 sps:$4 sm:$0xff]  }
0x10ac   :  { %8914 = vmatprep.subr.bf16.mxu1 %v9780_v21  ;;  %v4573_v30 = vpack.c.bf16 %v4572_v15, %v4572_v15 }
0x10ad   :  { %v4633_v17 = vpack.c.bf16 %v4632_v8, %v4632_v8 }
0x10ae   :  { %8899 = vmatmul.mubr.msk.bf16.vlgmr.msra.gmra.mrb[124].mxu0 %vm1044_vm9, %v4513_v14  ;;  %v4635_v46 = vpop.permute.xlu0 %4634 }
0x10af   :  { %v4640_v24 = vand.u32 %v4635_v46, %v10117_v20  ;;  %8910 = vmatprep.mubr.msk.bf16.mxu0 %vm9781_vm1, %v9780_v21 }
0x10b1   :  { %8909 = vmatpush3.bf16.msra.mxu0 %v4640_v24 }
0x10b2   :  { %8905 = vmatmul.mubr.msk.bf16.vlgmr.msra.gmra.mrb[144].mxu1 %vm1044_vm9, %v4573_v30  ;;  %8920 = vmatprep.subr.bf16.mxu0 %v9780_v21 }
0x10b3   :  { %8915 = vmatpush3.bf16.msra.mxu1 %v4700_v13  ;;  %8916 = vmatprep.mubr.msk.bf16.mxu1 %vm9781_vm1, %v9780_v21 }
0x10b4   :  { %8940 = vmatprep.subr.bf16.mxu1 %v9780_v21 }
0x10b5   :  { %v9676_v27 = vpop.eup %9675 }
0x10b6   :  { %8911 = vmatmul.mubr.msk.bf16.vlgmr.msra.gmra.mrb[128].mxu0 %vm1044_vm9, %v4633_v17  ;;  %v4692_v31 = vmul.f32 %v9676_v27, %v10986_v43 }
0x10b7   :  { %8936 = vmatprep.mubr.msk.bf16.mxu0 %vm9781_vm1, %v9780_v21  ;;  %8921 = vmatpush3.bf16.msra.mxu0 %v9455_v37 }
0x10b8   :  { %v4693_v25 = vpack.c.bf16 %v4692_v31, %v4692_v31  ;;  %8922 = vmatprep.subr.bf16.mxu0 %v9780_v21 }
0x10ba   :  { %8917 = vmatmul.mubr.msk.bf16.vlgmr.msra.gmra.mrb[148].mxu1 %vm1044_vm9, %v4693_v25 }
0x10bb   :  { %8956 = vmatprep.mubr.msk.bf16.mxu1 %vm9781_vm1, %v9780_v21  ;;  %8923 = vmatpush3.bf16.msra.mxu0 %v9456_v39 }
0x10bc   :  { %8924 = vmatprep.subr.bf16.mxu0 %v9780_v21 }
0x10bf   :  { %8925 = vmatpush3.bf16.msra.mxu0 %v9457_v0 }
0x10c0   :  { %8926 = vmatprep.subr.bf16.mxu0 %v9780_v21 }
0x10c3   :  { %8927 = vmatpush3.bf16.msra.mxu0 %v9458_v40 }
0x10c4   :  { %8928 = vmatprep.subr.bf16.mxu0 %v9780_v21 }
0x1144   :  { %v11044_v41 = vpop.f32.mrb[116].mxu0 }
0x1145   :  { %v8876_v23 = vpop.f32.mrb[117].mxu0 }
0x1146   :  { %v4319_v34 = vpop.f32.mrb[118].mxu0 }
0x1147   :  { %v8877_v43 = vpop.f32.mrb[119].mxu0 }
0x1148   :  { %v4376_v44 = vpop.f32.mrb[136].mxu1 }
0x1149   :  { %v9285_v47 = vpack.i.bf16 %v10919_v22, %v4376_v44  ;;  %v8882_v49 = vpop.f32.mrb[137].mxu1  ;;  %v9459_v22 = vld [vmem:[%s11905_s2 + $0x284] ss:$76 sps:$4 sm:$0xff]  }
0x114a   :  { %v4379_v50 = vpop.f32.mrb[138].mxu1  ;;  %8929 = vmatpush3.bf16.msra.mxu0 %v9459_v22 }
0x114b   :  { %v8883_v53 = vpop.f32.mrb[139].mxu1  ;;  %9286 = vrot.lane.b32.xlu0 %v9285_v47, %s9788_s8  ;;  %8930 = vmatprep.subr.bf16.mxu0 %v9780_v21 }
0x114e   :  { %8931 = vmatpush3.bf16.msra.mxu0 %v9460_v56 }
0x114f   :  { %8932 = vmatprep.subr.bf16.mxu0 %v9780_v21 }
0x1152   :  { %8933 = vmatpush3.bf16.msra.mxu0 %v9461_v5 }
0x1153   :  { %8934 = vmatprep.subr.bf16.mxu0 %v9780_v21 }
0x1156   :  { %8935 = vmatpush3.bf16.msra.mxu0 %v9462_v57 }
0x1157   :  { %8960 = vmatprep.subr.bf16.mxu0 %v9780_v21 }
0x1179   :  { %v4436_v54 = vpop.f32.mrb[120].mxu0 }
0x117a   :  { %v9290_v58 = vpack.i.bf16 %v10921_v32, %v4436_v54  ;;  %v8888_v52 = vpop.f32.mrb[121].mxu0 }
0x117b   :  { %v4439_v55 = vpop.f32.mrb[122].mxu0 }
0x117c   :  { %9291 = vrot.lane.b32.xlu1 %v9290_v58, %s9787_s7  ;;  %v8889_v59 = vpop.f32.mrb[123].mxu0 }
0x117d   :  { %v4496_v2 = vpop.f32.mrb[140].mxu1 }
0x117e   :  { %v9295_v3 = vpack.i.bf16 %v10925_v42, %v4496_v2  ;;  %v8894_v63 = vpop.f32.mrb[141].mxu1 }
0x117f   :  { %v4499_v4 = vpop.f32.mrb[142].mxu1 }
0x1180   :  { %v8895_v32 = vpop.f32.mrb[143].mxu1  ;;  %9296 = vrot.lane.b32.xlu0 %v9295_v3, %s9786_s6 }
0x1181   :  { %v4556_v7 = vpop.f32.mrb[124].mxu0  ;;  %v8055_v32 = vld [vmem:[%s11906_s3 + $0xc] ss:$0 sm:$0xff] }
0x1182   :  { %v9300_v36 = vpack.i.bf16 %v10923_v33, %v4556_v7  ;;  %v8900_v60 = vpop.f32.mrb[125].mxu0 }
0x1183   :  { %v4559_v45 = vpop.f32.mrb[126].mxu0 }
0x1184   :  { %9301 = vrot.lane.b32.xlu1 %v9300_v36, %s9785_s5  ;;  %v8901_v42 = vpop.f32.mrb[127].mxu0 }
0x1185   :  { %v4616_v62 = vpop.f32.mrb[144].mxu1 }
0x1186   :  { %v9305_v6 = vpack.i.bf16 %v10927_v48, %v4616_v62  ;;  %v8906_v9 = vpop.f32.mrb[145].mxu1 }
0x1187   :  { %v4619_v10 = vpop.f32.mrb[146].mxu1  ;;  %v9463_v9 = vld [vmem:[%s11905_s2 + $0x28] ss:$76 sps:$4 sm:$0xff]  }
0x1188   :  { %v8907_v33 = vpop.f32.mrb[147].mxu1  ;;  %9306 = vrot.lane.b32.xlu0 %v9305_v6, %s9782_s24  ;;  %8941 = vmatpush3.bf16.msra.mxu1 %v9463_v9  ;;  %v9479_v9 = vld [vmem:[%s11905_s2 + $0x30] ss:$76 sps:$4 sm:$0xff]  }
0x1189   :  { %v4676_v11 = vpop.f32.mrb[128].mxu0  ;;  %8942 = vmatprep.subr.bf16.mxu1 %v9780_v21 }
0x118a   :  { %v9310_v61 = vpack.i.bf16 %v10929_v28, %v4676_v11  ;;  %v8912_v12 = vpop.f32.mrb[129].mxu0 }
0x118b   :  { %v4679_v38 = vpop.f32.mrb[130].mxu0 }
0x118c   :  { %9311 = vrot.lane.b32.xlu1 %v9310_v61, %s9784_s1  ;;  %v8913_v51 = vpop.f32.mrb[131].mxu0 }
0x118d   :  { %v4736_v14 = vpop.f32.mrb[148].mxu1 }
0x118e   :  { %4767 = vrot.lane.b32.xlu0 %v4736_v14, %s9783_s25  ;;  %v8918_v48 = vpop.f32.mrb[149].mxu1  ;;  %v9464_v14 = vld [vmem:[%s11905_s2 + $0xc0] ss:$76 sps:$4 sm:$0xff]  }
0x118f   :  { %v4739_v15 = vpop.f32.mrb[150].mxu1  ;;  %8943 = vmatpush3.bf16.msra.mxu1 %v9464_v14  ;;  %v9465_v48 = vld [vmem:[%s11905_s2 + $0x158] ss:$76 sps:$4 sm:$0xff]  }
0x1190   :  { %v8919_v16 = vpop.f32.mrb[151].mxu1  ;;  %3829 = vrot.lane.b32.xlu1 %v10931_v29, %s9783_s25  ;;  %8944 = vmatprep.subr.bf16.mxu1 %v9780_v21  ;;  %v9466_v15 = vld [vmem:[%s11905_s2 + $0x1f0] ss:$76 sps:$4 sm:$0xff]  }
0x1191   :  { %v9467_v16 = vld [vmem:[%s11905_s2 + $0x288] ss:$76 sps:$4 sm:$0xff]  }
0x1193   :  { %8945 = vmatpush3.bf16.msra.mxu1 %v9465_v48 }
0x1194   :  { %8946 = vmatprep.subr.bf16.mxu1 %v9780_v21 }
0x1197   :  { %8947 = vmatpush3.bf16.msra.mxu1 %v9466_v15 }
0x1198   :  { %8948 = vmatprep.subr.bf16.mxu1 %v9780_v21 }
0x119b   :  { %8949 = vmatpush3.bf16.msra.mxu1 %v9467_v16 }
0x119c   :  { %8950 = vmatprep.subr.bf16.mxu1 %v9780_v21 }
0x11bd   :  { %v9287_v19 = vpop.permute.xlu0 %9286 }
0x11be   :  { %v9289_v30 = vunpack.i.h.bf16 %v9287_v19  ;;  %v9288_v8 = vunpack.i.l.bf16 %v9287_v19  ;;  %v9468_v19 = vld [vmem:[%s11905_s2 + $0x320] ss:$76 sps:$4 sm:$0xff]  }
0x11bf   :  { %8951 = vmatpush3.bf16.msra.mxu1 %v9468_v19  ;;  %v9486_v19 = vld [vmem:[%s11905_s2 + $0xd0] ss:$76 sps:$4 sm:$0xff]  }
0x11c0   :  { %v3832_v23 = vsel %vm624_vm5, %v10917_v18, %v9289_v30  ;;  %v4770_v34 = vsel %vm624_vm5, %v11044_v41, %v9288_v8  ;;  %8952 = vmatprep.subr.bf16.mxu1 %v9780_v21  ;;  %v9471_v30 = vld [vmem:[%s11905_s2 + $0x2c] ss:$76 sps:$4 sm:$0xff]   ;;  %v9472_v8 = vld [vmem:[%s11905_s2 + $0xc4] ss:$76 sps:$4 sm:$0xff]  }
0x11ee   :  { %v9292_v46 = vpop.permute.xlu1 %9291 }
0x11ef   :  { %v9294_v13 = vunpack.i.h.bf16 %v9292_v46  ;;  %v9293_v17 = vunpack.i.l.bf16 %v9292_v46  ;;  %v9469_v46 = vld [vmem:[%s11905_s2 + $0x3b8] ss:$76 sps:$4 sm:$0xff]  }
0x11f0   :  { %8953 = vmatpush3.bf16.msra.mxu1 %v9469_v46  ;;  %v9489_v46 = vld [vmem:[%s11905_s2 + $0x164] ss:$76 sps:$4 sm:$0xff]  }
0x11f1   :  { %v3833_v44 = vsel %vm1545_vm10, %v3832_v23, %v9294_v13  ;;  %v4771_v47 = vsel %vm1545_vm10, %v4770_v34, %v9293_v17  ;;  %8954 = vmatprep.subr.bf16.mxu1 %v9780_v21  ;;  %v9474_v13 = vld [vmem:[%s11905_s2 + $0x1f4] ss:$76 sps:$4 sm:$0xff]   ;;  %v9475_v17 = vld [vmem:[%s11905_s2 + $0x28c] ss:$76 sps:$4 sm:$0xff]  }
0x11f2   :  { %v9297_v24 = vpop.permute.xlu0 %9296 }
0x11f3   :  { %v9299_v27 = vunpack.i.h.bf16 %v9297_v24  ;;  %v9298_v31 = vunpack.i.l.bf16 %v9297_v24  ;;  %v9470_v24 = vld [vmem:[%s11905_s2 + $0x450] ss:$76 sps:$4 sm:$0xff]  }
0x11f4   :  { %8955 = vmatpush3.bf16.msra.mxu1 %v9470_v24  ;;  %v9487_v24 = vld [vmem:[%s11905_s2 + $0x160] ss:$76 sps:$4 sm:$0xff]  }
0x11f5   :  { %v3834_v49 = vsel %vm1547_vm11, %v3833_v44, %v9299_v27  ;;  %v4772_v50 = vsel %vm1547_vm11, %v4771_v47, %v9298_v31  ;;  %v9476_v27 = vld [vmem:[%s11905_s2 + $0x324] ss:$76 sps:$4 sm:$0xff]   ;;  %v8064_v44 = vld [vmem:[%s11906_s3 + $0xd] ss:$0 sm:$0xff] }
0x11f6   :  { %v9302_v28 = vpop.permute.xlu1 %9301 }
0x11f7   :  { %v9304_v37 = vunpack.i.h.bf16 %v9302_v28  ;;  %v9303_v39 = vunpack.i.l.bf16 %v9302_v28  ;;  %v9473_v28 = vld [vmem:[%s11905_s2 + $0x15c] ss:$76 sps:$4 sm:$0xff]  }
0x11f9   :  { %v3835_v0 = vsel %vm122_vm0, %v3834_v49, %v9304_v37  ;;  %v4773_v40 = vsel %vm122_vm0, %v4772_v50, %v9303_v39 }
0x11fa   :  { %v9307_v25 = vpop.permute.xlu0 %9306 }
0x11fb   :  { %v9309_v29 = vunpack.i.h.bf16 %v9307_v25  ;;  %v9308_v43 = vunpack.i.l.bf16 %v9307_v25 }
0x11fd   :  { %v4774_v41 = vsel %vm1550_vm12, %v4773_v40, %v9308_v43  ;;  %v3836_v58 = vsel %vm1550_vm12, %v3835_v0, %v9309_v29 }
0x11fe   :  { %v9312_v53 = vpop.permute.xlu1 %9311 }
0x11ff   :  { %v9314_v22 = vunpack.i.h.bf16 %v9312_v53  ;;  %v9313_v18 = vunpack.i.l.bf16 %v9312_v53  ;;  %v8065_v53 = vld [vmem:[%s11906_s3 + $0xe] ss:$0 sm:$0xff] }
0x1200   :  { %v4768_v54 = vpop.permute.xlu0 %4767 }
0x1201   :  { %v4775_v52 = vsel %vm1552_vm14, %v4774_v41, %v9313_v18  ;;  %v3837_v55 = vsel %vm1552_vm14, %v3836_v58, %v9314_v22  ;;  %v9478_v41 = vld [vmem:[%s11905_s2 + $0x454] ss:$76 sps:$4 sm:$0xff]   ;;  %v8066_v58 = vld [vmem:[%s11906_s3 + $0xf] ss:$0 sm:$0xff] }
0x1202   :  { %v4776_v56 = vsel %vm1554_vm13, %v4775_v52, %v4768_v54  ;;  %v3830_v59 = vpop.permute.xlu1 %3829  ;;  %v9477_v54 = vld [vmem:[%s11905_s2 + $0x3bc] ss:$76 sps:$4 sm:$0xff]  }
0x1203   :  { %v4778_v2 = vrot.slane %v4776_v56, 3  ;;  %v3838_v3 = vsel %vm1554_vm13, %v3837_v55, %v3830_v59 }
0x1205   :  { %v4780_v63 = vsel %vm182_vm3, %v3838_v3, %v4778_v2 }
0x1206   :  { %v4797_v4 = vpack.c.bf16 %v4778_v2, %v4780_v63 }
0x1208   :  { %8937 = vmatmul.mubr.bf16.vlgmr.msra.gmra.mrb[132].mxu0 %v4797_v4 }
0x1209   :  { %8976 = vmatprep.mubr.msk.bf16.mxu0 %vm9781_vm1, %v9780_v21  ;;  %8961 = vmatpush3.bf16.msra.mxu0 %v9471_v30  ;;  %v9490_v30 = vld [vmem:[%s11905_s2 + $0x168] ss:$76 sps:$4 sm:$0xff]  }
0x120a   :  { %8962 = vmatprep.subr.bf16.mxu0 %v9780_v21 }
0x120d   :  { %8963 = vmatpush3.bf16.msra.mxu0 %v9472_v8  ;;  %v9493_v8 = vld [vmem:[%s11905_s2 + $0x1fc] ss:$76 sps:$4 sm:$0xff]  }
0x120e   :  { %8964 = vmatprep.subr.bf16.mxu0 %v9780_v21 }
0x1211   :  { %8965 = vmatpush3.bf16.msra.mxu0 %v9473_v28  ;;  %v9491_v28 = vld [vmem:[%s11905_s2 + $0x1f8] ss:$76 sps:$4 sm:$0xff]  }
0x1212   :  { %8966 = vmatprep.subr.bf16.mxu0 %v9780_v21 }
0x1215   :  { %8967 = vmatpush3.bf16.msra.mxu0 %v9474_v13  ;;  %v9494_v13 = vld [vmem:[%s11905_s2 + $0x200] ss:$76 sps:$4 sm:$0xff]  }
0x1216   :  { %8968 = vmatprep.subr.bf16.mxu0 %v9780_v21 }
0x1219   :  { %8969 = vmatpush3.bf16.msra.mxu0 %v9475_v17  ;;  %v9497_v17 = vld [vmem:[%s11905_s2 + $0x294] ss:$76 sps:$4 sm:$0xff]  }
0x121a   :  { %8970 = vmatprep.subr.bf16.mxu0 %v9780_v21 }
0x121d   :  { %8971 = vmatpush3.bf16.msra.mxu0 %v9476_v27  ;;  %v9495_v27 = vld [vmem:[%s11905_s2 + $0x290] ss:$76 sps:$4 sm:$0xff]  }
0x121e   :  { %8972 = vmatprep.subr.bf16.mxu0 %v9780_v21 }
0x1221   :  { %8973 = vmatpush3.bf16.msra.mxu0 %v9477_v54 }
0x1222   :  { %8974 = vmatprep.subr.bf16.mxu0 %v9780_v21 }
0x1225   :  { %8975 = vmatpush3.bf16.msra.mxu0 %v9478_v41  ;;  %v8084_v41 = vld [vmem:[%s11906_s3 + $0x11] ss:$0 sm:$0xff] }
0x1226   :  { %8980 = vmatprep.subr.bf16.mxu0 %v9780_v21 }
0x12db   :  { %v4885_v5 = vpop.f32.mrb[132].mxu0 }
0x12dc   :  { %v4886_v7 = vadd.f32 %v8055_v32, %v4885_v5  ;;  %v8938_v36 = vpop.f32.mrb[133].mxu0 }
0x12dd   :  { %v4888_v60 = vpop.f32.mrb[134].mxu0 }
0x12de   :  { %v4892_v45 = vadd.f32 %v4886_v7, %v10627_v26  ;;  %v4889_v42 = vadd.f32 %v8055_v32, %v4888_v60  ;;  %v8939_v57 = vpop.f32.mrb[135].mxu0  ;;  %v8075_v32 = vld [vmem:[%s11906_s3 + $0x10] ss:$0 sm:$0xff] }
0x12e0   :  { %v4893_v62 = vadd.f32 %v4889_v42, %v10629_v35  ;;  %4896 = vadd.xlane.f32.xlu1 %v4892_v45 }
0x12e2   :  { %v4898_v6 = vsel %vm1048_vm6, %v4893_v62, 0.0 }
0x12e3   :  { %4899 = vadd.xlane.f32.xlu0 %v4898_v6 }
0x136d   :  { %v4897_v10 = vpop.xlane.xlu1 %4896 }
0x136e   :  { %v4901_v33 = vmul.f32 0.0078125, %v4897_v10  ;;  %v9481_v10 = vld [vmem:[%s11905_s2 + $0x34] ss:$76 sps:$4 sm:$0xff]  }
0x136f   :  { %5357 = vmatprep.subr.bf16.mxu1 %v9481_v10 }
0x1370   :  { %v4903_v11 = vsub.f32 %v4892_v45, %v4901_v33  ;;  %v4900_v61 = vpop.xlane.xlu0 %4899  ;;  %v9482_v33 = vld [vmem:[%s11905_s2 + $0x38] ss:$76 sps:$4 sm:$0xff]  }
0x1371   :  { %v4902_v26 = vmul.f32 0.0078125, %v4900_v61  ;;  %v9483_v61 = vld [vmem:[%s11905_s2 + $0xc8] ss:$76 sps:$4 sm:$0xff]  }
0x1372   :  { %v4905_v12 = vmul.f32 %v4903_v11, %v4903_v11 }
0x1373   :  { %v4904_v38 = vsub.f32 %v4893_v62, %v4902_v26 }
0x1374   :  { %4907 = vadd.xlane.f32.xlu0 %v4905_v12 }
0x1375   :  { %v4906_v35 = vmul.f32 %v4904_v38, %v4904_v38 }
0x1377   :  { %v4909_v51 = vsel %vm1048_vm6, %v4906_v35, 0.0 }
0x1378   :  { %4910 = vadd.xlane.f32.xlu0 %v4909_v51 }
0x1401   :  { %v4908_v31 = vpop.xlane.xlu0 %4907 }
0x1402   :  { %v4912_v25 = vmul.f32 0.0078125, %v4908_v31  ;;  %v9498_v31 = vld [vmem:[%s11905_s2 + $0x298] ss:$76 sps:$4 sm:$0xff]  }
0x1404   :  { %v4914_v37 = vadd.f32 1e-05, %v4912_v25  ;;  %v9501_v25 = vld [vmem:[%s11905_s2 + $0x32c] ss:$76 sps:$4 sm:$0xff]  }
0x1405   :  { %v4911_v39 = vpop.xlane.xlu0 %4910 }
0x1406   :  { %9677 = vrsqrt.f32 %v4914_v37  ;;  %v4913_v23 = vmul.f32 0.0078125, %v4911_v39  ;;  %v9499_v37 = vld [vmem:[%s11905_s2 + $0x328] ss:$76 sps:$4 sm:$0xff]   ;;  %v9502_v39 = vld [vmem:[%s11905_s2 + $0x330] ss:$76 sps:$4 sm:$0xff]  }
0x1408   :  { %v4915_v34 = vadd.f32 1e-05, %v4913_v23  ;;  %v9505_v23 = vld [vmem:[%s11905_s2 + $0x3c4] ss:$76 sps:$4 sm:$0xff]  }
0x140a   :  { %9679 = vrsqrt.f32 %v4915_v34  ;;  %v9503_v34 = vld [vmem:[%s11905_s2 + $0x3c0] ss:$76 sps:$4 sm:$0xff]  }
0x1410   :  { %v9678_v29 = vpop.eup %9677 }
0x1411   :  { %v4918_v43 = vmul.f32 %v9678_v29, %v4903_v11  ;;  %v9485_v11 = vld [vmem:[%s11905_s2 + $0xcc] ss:$76 sps:$4 sm:$0xff]   ;;  %v9506_v29 = vld [vmem:[%s11905_s2 + $0x3c8] ss:$76 sps:$4 sm:$0xff]  }
0x1413   :  { %v4924_v50 = vmul.f32 %v8064_v44, %v4918_v43  ;;  %v9509_v43 = vld [vmem:[%s11905_s2 + $0x45c] ss:$76 sps:$4 sm:$0xff]  }
0x1414   :  { %v9680_v47 = vpop.eup %9679 }
0x1415   :  { %v4919_v49 = vmul.f32 %v9680_v47, %v4904_v38  ;;  %v4930_v40 = vadd.f32 %v8065_v53, %v4924_v50  ;;  %v9510_v47 = vld [vmem:[%s11905_s2 + $0x460] ss:$76 sps:$4 sm:$0xff]  }
0x1417   :  { %v4925_v0 = vmul.f32 %v8064_v44, %v4919_v49  ;;  %v9507_v44 = vld [vmem:[%s11905_s2 + $0x458] ss:$76 sps:$4 sm:$0xff]  }
0x1419   :  { %v4931_v22 = vadd.f32 %v8065_v53, %v4925_v0 }
0x141b   :  { %v4948_v18 = vpack.c.bf16 %v4931_v22, %v4930_v40 }
0x141d   :  { %8957 = vmatmul.mubr.bf16.vlgmr.msra.gmra.mrb[152].mxu1 %v4948_v18 }
0x141e   :  { %5389 = vmatprep.mubr.bf16.mxu1 %v9779_v1  ;;  %5358 = vmatpush1.bf16.msra.mxu1 %v9479_v9 }
0x141f   :  { %5359 = vmatprep.subr.bf16.mxu1 %v9485_v11 }
0x1422   :  { %5360 = vmatpush1.bf16.msra.mxu1 %v9483_v61 }
0x1423   :  { %5361 = vmatprep.subr.bf16.mxu1 %v9489_v46 }
0x1426   :  { %5362 = vmatpush1.bf16.msra.mxu1 %v9487_v24 }
0x1427   :  { %5363 = vmatprep.subr.bf16.mxu1 %v9493_v8 }
0x142a   :  { %5364 = vmatpush1.bf16.msra.mxu1 %v9491_v28 }
0x142b   :  { %5365 = vmatprep.subr.bf16.mxu1 %v9497_v17 }
0x142e   :  { %5366 = vmatpush1.bf16.msra.mxu1 %v9495_v27 }
0x142f   :  { %5367 = vmatprep.subr.bf16.mxu1 %v9501_v25 }
0x1432   :  { %5368 = vmatpush1.bf16.msra.mxu1 %v9499_v37 }
0x1433   :  { %5369 = vmatprep.subr.bf16.mxu1 %v9505_v23 }
0x1436   :  { %5370 = vmatpush1.bf16.msra.mxu1 %v9503_v34 }
0x1437   :  { %5371 = vmatprep.subr.bf16.mxu1 %v9509_v43 }
0x143a   :  { %5372 = vmatpush1.bf16.msra.mxu1 %v9507_v44 }
0x143b   :  { %9000 = vmatprep.subr.bf16.mxu1 %v9780_v21 }
0x14f0   :  { %v5036_v52 = vpop.f32.mrb[152].mxu1 }
0x14f1   :  { %v5037_v1 = vadd.f32 %v8066_v58, %v5036_v52  ;;  %v8958_v55 = vpop.f32.mrb[153].mxu1 }
0x14f2   :  { %v5039_v56 = vpop.f32.mrb[154].mxu1  ;;  %v8085_v55 = vld [vmem:[%s11906_s3 + $0x12] ss:$0 sm:$0xff] }
0x14f3   :  { %v5040_v59 = vadd.f32 %v8066_v58, %v5039_v56  ;;  %v8959_v2 = vpop.f32.mrb[155].mxu1  ;;  %v5043_v3 = vmax.f32 %v5037_v1, 0.0 }
0x14f5   :  { %v5044_v63 = vmax.f32 %v5040_v59, 0.0 }
0x14f7   :  { %v5061_v4 = vpack.c.bf16 %v5044_v63, %v5043_v3 }
0x14f9   :  { %8977 = vmatmul.mubr.bf16.vlgmr.msra.gmra.mrb[136].mxu0 %v5061_v4  ;;  %v8110_v4 = vld [vmem:[%s11906_s3 + $0x13] ss:$0 sm:$0xff] }
0x14fa   :  { %8996 = vmatprep.mubr.msk.bf16.mxu0 %vm9781_vm1, %v9780_v21  ;;  %8981 = vmatpush3.bf16.msra.mxu0 %v9482_v33 }
0x14fb   :  { %8982 = vmatprep.subr.bf16.mxu0 %v9780_v21 }
0x14fe   :  { %8983 = vmatpush3.bf16.msra.mxu0 %v9486_v19 }
0x14ff   :  { %8984 = vmatprep.subr.bf16.mxu0 %v9780_v21 }
0x1502   :  { %8985 = vmatpush3.bf16.msra.mxu0 %v9490_v30 }
0x1503   :  { %8986 = vmatprep.subr.bf16.mxu0 %v9780_v21 }
0x1506   :  { %8987 = vmatpush3.bf16.msra.mxu0 %v9494_v13 }
0x1507   :  { %8988 = vmatprep.subr.bf16.mxu0 %v9780_v21 }
0x150a   :  { %8989 = vmatpush3.bf16.msra.mxu0 %v9498_v31 }
0x150b   :  { %8990 = vmatprep.subr.bf16.mxu0 %v9780_v21 }
0x150e   :  { %8991 = vmatpush3.bf16.msra.mxu0 %v9502_v39 }
0x150f   :  { %8992 = vmatprep.subr.bf16.mxu0 %v9780_v21 }
0x1512   :  { %8993 = vmatpush3.bf16.msra.mxu0 %v9506_v29 }
0x1513   :  { %8994 = vmatprep.subr.bf16.mxu0 %v9780_v21 }
0x1516   :  { %8995 = vmatpush3.bf16.msra.mxu0 %v9510_v47 }
0x1517   :  { %9024 = vmatprep.subr.bf16.mxu0 %v9780_v21 }
0x15cc   :  { %v5149_v5 = vpop.f32.mrb[136].mxu0 }
0x15cd   :  { %v5150_v7 = vadd.f32 %v8075_v32, %v5149_v5  ;;  %v8978_v36 = vpop.f32.mrb[137].mxu0  ;;  %v8112_v5 = vld [vmem:[%s11906_s3 + $0x15] ss:$0 sm:$0xff] }
0x15ce   :  { %v5152_v60 = vpop.f32.mrb[138].mxu0  ;;  %v8111_v36 = vld [vmem:[%s11906_s3 + $0x14] ss:$0 sm:$0xff] }
0x15cf   :  { %v5156_v45 = vadd.f32 %v5150_v7, %v4930_v40  ;;  %v5153_v42 = vadd.f32 %v8075_v32, %v5152_v60  ;;  %v8979_v57 = vpop.f32.mrb[139].mxu0 }
0x15d1   :  { %v5157_v62 = vadd.f32 %v5153_v42, %v4931_v22  ;;  %5160 = vadd.xlane.f32.xlu0 %v5156_v45 }
0x15d3   :  { %v5162_v6 = vsel %vm1048_vm6, %v5157_v62, 0.0 }
0x15d4   :  { %5163 = vadd.xlane.f32.xlu1 %v5162_v6 }
0x165e   :  { %v5161_v26 = vpop.xlane.xlu0 %5160 }
0x165f   :  { %v5165_v12 = vmul.f32 0.0078125, %v5161_v26 }
0x1661   :  { %v11207_v38 = vsub.f32 %v5156_v45, %v5165_v12  ;;  %v5164_v35 = vpop.xlane.xlu1 %5163 }
0x1662   :  { %v5166_v51 = vmul.f32 0.0078125, %v5164_v35 }
0x1663   :  { %v5169_v14 = vmul.f32 %v11207_v38, %v11207_v38 }
0x1664   :  { %v11211_v48 = vsub.f32 %v5157_v62, %v5166_v51 }
0x1665   :  { %5171 = vadd.xlane.f32.xlu1 %v5169_v14 }
0x1666   :  { %v5170_v15 = vmul.f32 %v11211_v48, %v11211_v48 }
0x1668   :  { %v5173_v16 = vsel %vm1048_vm6, %v5170_v15, 0.0 }
0x1669   :  { %5174 = vadd.xlane.f32.xlu0 %v5173_v16 }
0x16f2   :  { %v5172_v49 = vpop.xlane.xlu1 %5171 }
0x16f3   :  { %v5176_v50 = vmul.f32 0.0078125, %v5172_v49 }
0x16f5   :  { %v5178_v53 = vadd.f32 1e-05, %v5176_v50 }
0x16f6   :  { %v5175_v0 = vpop.xlane.xlu0 %5174 }
0x16f7   :  { %9681 = vrsqrt.f32 %v5178_v53  ;;  %v5177_v40 = vmul.f32 0.0078125, %v5175_v0 }
0x16f9   :  { %v5179_v22 = vadd.f32 1e-05, %v5177_v40 }
0x16fb   :  { %9683 = vrsqrt.f32 %v5179_v22 }
0x1701   :  { %v9682_v18 = vpop.eup %9681 }
0x1702   :  { %v5182_v54 = vmul.f32 %v9682_v18, %v11207_v38 }
0x1704   :  { %v5188_v1 = vmul.f32 %v8084_v41, %v5182_v54 }
0x1705   :  { %v9684_v58 = vpop.eup %9683 }
0x1706   :  { %v5183_v52 = vmul.f32 %v9684_v58, %v11211_v48  ;;  %v11289_v59 = vadd.f32 %v8085_v55, %v5188_v1 }
0x1708   :  { %v5189_v56 = vmul.f32 %v8084_v41, %v5183_v52 }
0x170a   :  { %v11291_v2 = vadd.f32 %v8085_v55, %v5189_v56 }
0x170c   :  { %v5228_v3 = vpack.c.bf16 %v11291_v2, %v11289_v59 }
0x170e   :  { %5390 = vmatmul.mubr.bf16.vlgmr.msra.gmra.mrb[156].mxu1 %v5228_v3  ;;  %8997 = vmatmul.mubr.bf16.vlgmr.msra.gmra.mrb[140].mxu0 %v5228_v3 }
0x170f   :  { %9002 = vmatprep.mubr.msk.bf16.mxu1 %vm9781_vm1, %v9780_v21  ;;  %9026 = vmatprep.mubr.msk.bf16.mxu0 %vm9781_vm1, %v9780_v21 }
0x17e1   :  { %v5391_v63 = vpop.f32.mrb[156].mxu1  ;;  %v5434_v32 = vpop.f32.mrb[140].mxu0 }
0x17e2   :  { %v5393_v7 = vpop.f32.mrb[157].mxu1  ;;  %v8998_v60 = vpop.f32.mrb[141].mxu0  ;;  %v5446_v57 = vadd.f32 %v8110_v4, %v5391_v63  ;;  %v5460_v62 = vadd.f32 %v8112_v5, %v5434_v32 }
0x17e3   :  { %v5395_v45 = vpop.f32.mrb[158].mxu1  ;;  %v5437_v42 = vpop.f32.mrb[142].mxu0  ;;  %v5453_v11 = vadd.f32 %v8111_v36, %v5393_v7 }
0x17e4   :  { %v5447_v6 = vadd.f32 %v8110_v4, %v5395_v45  ;;  %v5461_v9 = vadd.f32 %v8112_v5, %v5437_v42  ;;  %v5397_v10 = vpop.f32.mrb[159].mxu1  ;;  %v8999_v33 = vpop.f32.mrb[143].mxu0 }
0x17e5   :  { %v5454_v61 = vadd.f32 %v8111_v36, %v5397_v10 }
0x17e6   :  { %v11308_v26 = vpack.c.bf16 %v5447_v6, %v5446_v57  ;;  %v11310_v12 = vpack.c.bf16 %v5461_v9, %v5460_v62 }
0x17e7   :  { %v11312_v38 = vpack.c.bf16 %v5454_v61, %v5453_v11 }
0x17e8   :  { %5513 = vrot.lane.b32.xlu0 %v11308_v26, %s9783_s25  ;;  %v5887_v23 = vand.u32 %v11310_v12, %v10117_v20 }
0x17e9   :  { %5516 = vrot.lane.b32.xlu1 %v11312_v38, %s9783_s25  ;;  %v5469_v35 = vsel %vm624_vm5, %v11312_v38, 0 }
0x17ea   :  { %9001 = vmatpush3.bf16.xpose.msra.mxu1 %v5469_v35 }
0x17eb   :  { %9006 = vmatprep.subr.bf16.mxu1 %v9780_v21 }
0x17ec   :  { %5618 = vrot.lane.b32.xlu0 %v11312_v38, %s9782_s24 }
0x17ed   :  { %5567 = vrot.lane.b32.xlu1 %v11312_v38, %s9784_s1 }
0x17f0   :  { %5616 = vrot.lane.b32.xlu0 %v11308_v26, %s9782_s24 }
0x17f1   :  { %5565 = vrot.lane.b32.xlu1 %v11308_v26, %s9784_s1  ;;  %9003 = vmatmul.mubr.msk.bf16.vlgmr.msra.gmra.mrb[160].mxu1 %vm624_vm5, %v11308_v26 }
0x17f2   :  { %9008 = vmatprep.mubr.msk.bf16.mxu1 %vm9781_vm1, %v9780_v21 }
0x17f4   :  { %5667 = vrot.lane.b32.xlu0 %v11308_v26, %s9785_s5 }
0x17f5   :  { %5669 = vrot.lane.b32.xlu1 %v11312_v38, %s9785_s5 }
0x17f8   :  { %5718 = vrot.lane.b32.xlu0 %v11308_v26, %s9786_s6 }
0x17f9   :  { %5720 = vrot.lane.b32.xlu1 %v11312_v38, %s9786_s6 }
0x17fc   :  { %5769 = vrot.lane.b32.xlu0 %v11308_v26, %s9787_s7 }
0x17fd   :  { %5771 = vrot.lane.b32.xlu1 %v11312_v38, %s9787_s7 }
0x1800   :  { %5942 = vrot.lane.b32.xlu0 %v11310_v12, %s9783_s25 }
0x1801   :  { %5822 = vrot.lane.b32.xlu1 %v11312_v38, %s9788_s8 }
0x1805   :  { %5820 = vrot.lane.b32.xlu1 %v11308_v26, %s9788_s8 }
0x1809   :  { %6002 = vrot.lane.b32.xlu1 %v11310_v12, %s9784_s1 }
0x185a   :  { %v5514_v51 = vpop.permute.xlu0 %5513 }
0x185b   :  { %v5517_v14 = vpop.permute.xlu1 %5516 }
0x185c   :  { %v5522_v48 = vsel %vm624_vm5, %v5517_v14, 0 }
0x185d   :  { %9007 = vmatpush3.bf16.xpose.msra.mxu1 %v5522_v48 }
0x185e   :  { %9012 = vmatprep.subr.bf16.mxu1 %v9780_v21  ;;  %v5619_v15 = vpop.permute.xlu0 %5618 }
0x185f   :  { %v5568_v16 = vpop.permute.xlu1 %5567  ;;  %v5624_v17 = vsel %vm624_vm5, %v5619_v15, 0 }
0x1860   :  { %v5573_v46 = vsel %vm624_vm5, %v5568_v16, 0 }
0x1862   :  { %v5617_v24 = vpop.permute.xlu0 %5616 }
0x1863   :  { %v5566_v19 = vpop.permute.xlu1 %5565 }
0x1864   :  { %9009 = vmatmul.mubr.msk.bf16.vlgmr.msra.gmra.mrb[164].mxu1 %vm624_vm5, %v5514_v51 }
0x1865   :  { %9013 = vmatpush3.bf16.xpose.msra.mxu1 %v5573_v46  ;;  %9014 = vmatprep.mubr.msk.bf16.mxu1 %vm9781_vm1, %v9780_v21 }
0x1866   :  { %9018 = vmatprep.subr.bf16.mxu1 %v9780_v21  ;;  %v5668_v28 = vpop.permute.xlu0 %5667 }
0x1867   :  { %v5670_v30 = vpop.permute.xlu1 %5669 }
0x1868   :  { %v5675_v8 = vsel %vm624_vm5, %v5670_v30, 0 }
0x1869   :  { %9025 = vmatpush3.bf16.xpose.msra.mxu0 %v5675_v8 }
0x186a   :  { %9036 = vmatprep.subr.bf16.mxu0 %v9780_v21  ;;  %v5719_v25 = vpop.permute.xlu0 %5718 }
0x186b   :  { %v5721_v13 = vpop.permute.xlu1 %5720 }
0x186c   :  { %9015 = vmatmul.mubr.msk.bf16.vlgmr.msra.gmra.mrb[168].mxu1 %vm624_vm5, %v5566_v19  ;;  %v5726_v37 = vsel %vm624_vm5, %v5721_v13, 0 }
0x186d   :  { %9019 = vmatpush3.bf16.xpose.msra.mxu1 %v5624_v17  ;;  %9020 = vmatprep.mubr.msk.bf16.mxu1 %vm9781_vm1, %v9780_v21 }
0x186e   :  { %9030 = vmatprep.subr.bf16.mxu1 %v9780_v21  ;;  %v5770_v39 = vpop.permute.xlu0 %5769 }
0x186f   :  { %v5772_v27 = vpop.permute.xlu1 %5771 }
0x1870   :  { %v5777_v31 = vsel %vm624_vm5, %v5772_v27, 0  ;;  %9027 = vmatmul.mubr.msk.bf16.vlgmr.msra.gmra.mrb[144].mxu0 %vm624_vm5, %v5668_v28 }
0x1871   :  { %9037 = vmatpush3.bf16.xpose.msra.mxu0 %v5777_v31  ;;  %9038 = vmatprep.mubr.msk.bf16.mxu0 %vm9781_vm1, %v9780_v21 }
0x1872   :  { %9048 = vmatprep.subr.bf16.mxu0 %v9780_v21  ;;  %v5943_v43 = vpop.permute.xlu0 %5942 }
0x1873   :  { %v5823_v34 = vpop.permute.xlu1 %5822  ;;  %v5948_v44 = vand.u32 %v5943_v43, %v10117_v20 }
0x1874   :  { %9021 = vmatmul.mubr.msk.bf16.vlgmr.msra.gmra.mrb[172].mxu1 %vm624_vm5, %v5617_v24  ;;  %v5828_v29 = vsel %vm624_vm5, %v5823_v34, 0 }
0x1875   :  { %9031 = vmatpush3.bf16.xpose.msra.mxu1 %v5726_v37  ;;  %9032 = vmatprep.mubr.msk.bf16.mxu1 %vm9781_vm1, %v9780_v21 }
0x1876   :  { %9042 = vmatprep.subr.bf16.mxu1 %v9780_v21 }
0x1877   :  { %v5821_v47 = vpop.permute.xlu1 %5820 }
0x1878   :  { %9039 = vmatmul.mubr.msk.bf16.vlgmr.msra.gmra.mrb[148].mxu0 %vm624_vm5, %v5770_v39 }
0x1879   :  { %9049 = vmatpush3.bf16.msra.mxu0 %v5887_v23  ;;  %9050 = vmatprep.mubr.msk.bf16.mxu0 %vm9781_vm1, %v9780_v21 }
0x187a   :  { %9060 = vmatprep.subr.bf16.mxu0 %v9780_v21 }
0x187c   :  { %9033 = vmatmul.mubr.msk.bf16.vlgmr.msra.gmra.mrb[176].mxu1 %vm624_vm5, %v5719_v25 }
0x187d   :  { %9043 = vmatpush3.bf16.xpose.msra.mxu1 %v5828_v29  ;;  %9044 = vmatprep.mubr.msk.bf16.mxu1 %vm9781_vm1, %v9780_v21  ;;  %v6003_v29 = vpop.permute.xlu1 %6002 }
0x187e   :  { %9054 = vmatprep.subr.bf16.mxu1 %v9780_v21 }
0x1884   :  { %9045 = vmatmul.mubr.msk.bf16.vlgmr.msra.gmra.mrb[180].mxu1 %vm624_vm5, %v5821_v47 }
0x1885   :  { %9055 = vmatpush3.bf16.msra.mxu1 %v5948_v44  ;;  %9056 = vmatprep.mubr.msk.bf16.mxu1 %vm9781_vm1, %v9780_v21 }
0x1886   :  { %9066 = vmatprep.subr.bf16.mxu1 %v9780_v21 }
0x18c4   :  { %v5505_v49 = vpop.f32.mrb[160].mxu1 }
0x18c5   :  { %v5511_v50 = vmul.f32 0.25, %v5505_v49  ;;  %v9004_v53 = vpop.f32.mrb[161].mxu1 }
0x18c6   :  { %v5508_v0 = vpop.f32.mrb[162].mxu1 }
0x18c7   :  { %v9005_v40 = vpop.f32.mrb[163].mxu1  ;;  %v5871_v22 = vsel %vm1031_vm8, %v5511_v50, -inf }
0x18c8   :  { %5872 = vmax.xlane.f32.xlu0 %v5871_v22 }
0x1937   :  { %v5558_v18 = vpop.f32.mrb[164].mxu1 }
0x1938   :  { %v5564_v54 = vmul.f32 0.25, %v5558_v18  ;;  %v9010_v41 = vpop.f32.mrb[165].mxu1 }
0x1939   :  { %v5561_v58 = vpop.f32.mrb[166].mxu1 }
0x193a   :  { %v9011_v52 = vpop.f32.mrb[167].mxu1  ;;  %v5929_v1 = vsel %vm1031_vm8, %v5564_v54, -inf }
0x193b   :  { %5930 = vmax.xlane.f32.xlu1 %v5929_v1 }
0x193f   :  { %v5609_v55 = vpop.f32.mrb[168].mxu1 }
0x1940   :  { %v5615_v56 = vmul.f32 0.25, %v5609_v55  ;;  %v9016_v3 = vpop.f32.mrb[169].mxu1 }
0x1941   :  { %v5612_v63 = vpop.f32.mrb[170].mxu1 }
0x1942   :  { %v9017_v4 = vpop.f32.mrb[171].mxu1  ;;  %v5990_v32 = vsel %vm1031_vm8, %v5615_v56, -inf }
0x1943   :  { %5991 = vmax.xlane.f32.xlu0 %v5990_v32  ;;  %v5711_v5 = vpop.f32.mrb[144].mxu0 }
0x1944   :  { %v5717_v7 = vmul.f32 0.25, %v5711_v5  ;;  %v9028_v36 = vpop.f32.mrb[145].mxu0 }
0x1945   :  { %v5714_v60 = vpop.f32.mrb[146].mxu0 }
0x1946   :  { %v9029_v45 = vpop.f32.mrb[147].mxu0  ;;  %v6110_v42 = vsel %vm1031_vm8, %v5717_v7, -inf }
0x1947   :  { %v5660_v57 = vpop.f32.mrb[172].mxu1  ;;  %6111 = vmax.xlane.f32.xlu1 %v6110_v42 }
0x1948   :  { %v11397_v62 = vmul.f32 0.25, %v5660_v57  ;;  %v9022_v6 = vpop.f32.mrb[173].mxu1 }
0x1949   :  { %v5663_v9 = vpop.f32.mrb[174].mxu1 }
0x194a   :  { %v9023_v10 = vpop.f32.mrb[175].mxu1  ;;  %v6050_v33 = vsel %vm1031_vm8, %v11397_v62, -inf }
0x194b   :  { %6051 = vmax.xlane.f32.xlu0 %v6050_v33  ;;  %v5813_v11 = vpop.f32.mrb[148].mxu0 }
0x194c   :  { %v11401_v61 = vmul.f32 0.25, %v5813_v11  ;;  %v9040_v35 = vpop.f32.mrb[149].mxu0 }
0x194d   :  { %v5816_v51 = vpop.f32.mrb[150].mxu0 }
0x194e   :  { %v9041_v14 = vpop.f32.mrb[151].mxu0  ;;  %v6230_v48 = vsel %vm1031_vm8, %v11401_v61, -inf }
0x194f   :  { %v5762_v15 = vpop.f32.mrb[176].mxu1  ;;  %6231 = vmax.xlane.f32.xlu1 %v6230_v48 }
0x1950   :  { %v5768_v16 = vmul.f32 0.25, %v5762_v15  ;;  %v9034_v19 = vpop.f32.mrb[177].mxu1  ;;  %v6008_v15 = vand.u32 %v6003_v29, %v10117_v20 }
0x1951   :  { %v5765_v46 = vpop.f32.mrb[178].mxu1  ;;  %v6392_v19 = vshrl.u32 %v11312_v38, 16 }
0x1952   :  { %v9035_v24 = vpop.f32.mrb[179].mxu1  ;;  %v6170_v30 = vsel %vm1031_vm8, %v5768_v16, -inf  ;;  %v6395_v46 = vshll.u32 %v11312_v38, 16 }
0x1953   :  { %6171 = vmax.xlane.f32.xlu0 %v6170_v30  ;;  %v6394_v24 = vrot.slane %v6392_v19, 2 }
0x1954   :  { %v6397_v30 = vrot.slane %v6395_v46, 3 }
0x1955   :  { %v5873_v25 = vpop.xlane.xlu0 %5872 }
0x1956   :  { %v5874_v37 = vsub.f32 %v5511_v50, %v5873_v25 }
0x1957   :  { %v5864_v8 = vpop.f32.mrb[180].mxu1 }
0x1958   :  { %v5870_v28 = vmul.f32 0.25, %v5864_v8  ;;  %v9046_v13 = vpop.f32.mrb[181].mxu1  ;;  %v5875_v39 = vmul.f32 1.442695, %v5874_v37  ;;  %v11457_v8 = vor.u32 %v6397_v30, %v6394_v24  ;;  %v6815_v30 = vshrl.u32 %v11310_v12, 16 }
0x1959   :  { %v5867_v17 = vpop.f32.mrb[182].mxu1  ;;  %v6388_v13 = vshll.u32 %v11308_v26, 16 }
0x195a   :  { %v9047_v27 = vpop.f32.mrb[183].mxu1  ;;  %v6290_v31 = vsel %vm1031_vm8, %v5870_v28, -inf  ;;  %9685 = vpow2.f32 %v5875_v39 }
0x195b   :  { %6291 = vmax.xlane.f32.xlu0 %v6290_v31  ;;  %v6390_v17 = vrot.slane %v6388_v13, 3  ;;  %v6817_v13 = vrot.slane %v6815_v30, 2 }
0x1960   :  { %6122 = vrot.lane.b32.xlu1 %v11310_v12, %s9785_s5 }
0x1964   :  { %v9686_v23 = vpop.eup %9685 }
0x1965   :  { %v5877_v34 = vsel %vm1031_vm8, %v9686_v23, 0.0 }
0x1971   :  { %6062 = vrot.lane.b32.xlu0 %v11310_v12, %s9782_s24 }
0x1984   :  { %5878 = vadd.xlane.f32.xlu1 %v5877_v34 }
0x19c8   :  { %v5931_v43 = vpop.xlane.xlu1 %5930 }
0x19c9   :  { %v5932_v44 = vsub.f32 %v5564_v54, %v5931_v43 }
0x19cb   :  { %v5933_v47 = vmul.f32 1.442695, %v5932_v44 }
0x19cd   :  { %9687 = vpow2.f32 %v5933_v47 }
0x19d0   :  { %v5992_v49 = vpop.xlane.xlu0 %5991 }
0x19d1   :  { %v5993_v53 = vsub.f32 %v5615_v56, %v5992_v49 }
0x19d3   :  { %v5994_v50 = vmul.f32 1.442695, %v5993_v53 }
0x19d4   :  { %v6112_v0 = vpop.xlane.xlu1 %6111 }
0x19d5   :  { %v6113_v40 = vsub.f32 %v5717_v7, %v6112_v0 }
0x19d7   :  { %v11412_v22 = vpop.eup %9687  ;;  %v6114_v18 = vmul.f32 1.442695, %v6113_v40 }
0x19d8   :  { %v5935_v41 = vsel %vm1031_vm8, %v11412_v22, 0.0  ;;  %v6052_v55 = vpop.xlane.xlu0 %6051 }
0x19d9   :  { %9689 = vpow2.f32 %v6114_v18  ;;  %5936 = vadd.xlane.f32.xlu0 %v5935_v41  ;;  %v6053_v56 = vsub.f32 %v11397_v62, %v6052_v55 }
0x19da   :  { %9691 = vpow2.f32 %v5994_v50 }
0x19db   :  { %v6054_v63 = vmul.f32 1.442695, %v6053_v56 }
0x19dc   :  { %v6232_v5 = vpop.xlane.xlu1 %6231 }
0x19dd   :  { %9693 = vpow2.f32 %v6054_v63  ;;  %v6233_v7 = vsub.f32 %v11401_v61, %v6232_v5 }
0x19df   :  { %v6234_v45 = vmul.f32 1.442695, %v6233_v7 }
0x19e0   :  { %v6172_v3 = vpop.xlane.xlu0 %6171  ;;  %v11432_v57 = vpop.permute.xlu1 %6122 }
0x19e1   :  { %v6173_v4 = vsub.f32 %v5768_v16, %v6172_v3  ;;  %v6128_v53 = vand.u32 %v11432_v57, %v10117_v20 }
0x19e3   :  { %v11416_v58 = vpop.eup %9689  ;;  %v6174_v32 = vmul.f32 1.442695, %v6173_v4 }
0x19e4   :  { %v6116_v54 = vsel %vm1031_vm8, %v11416_v58, 0.0  ;;  %v11420_v52 = vpop.eup %9691 }
0x19e5   :  { %6117 = vadd.xlane.f32.xlu1 %v6116_v54  ;;  %v5996_v1 = vsel %vm1031_vm8, %v11420_v52, 0.0  ;;  %9695 = vpow2.f32 %v6174_v32 }
0x19e6   :  { %9697 = vpow2.f32 %v6234_v45 }
0x19e7   :  { %v11430_v60 = vpop.eup %9693 }
0x19e8   :  { %v6292_v36 = vpop.xlane.xlu0 %6291  ;;  %v6056_v62 = vsel %vm1031_vm8, %v11430_v60, 0.0 }
0x19e9   :  { %5997 = vadd.xlane.f32.xlu1 %v5996_v1  ;;  %v6293_v42 = vsub.f32 %v5870_v28, %v6292_v36  ;;  %v6385_v28 = vshrl.u32 %v11308_v26, 16 }
0x19eb   :  { %v6294_v9 = vmul.f32 1.442695, %v6293_v42  ;;  %v6387_v38 = vrot.slane %v6385_v28, 2 }
0x19ec   :  { %v6063_v26 = vpop.permute.xlu0 %6062 }
0x19ed   :  { %v11469_v27 = vor.u32 %v6390_v17, %v6387_v38  ;;  %v6068_v34 = vand.u32 %v6063_v26, %v10117_v20 }
0x19ef   :  { %6182 = vrot.lane.b32.xlu0 %v11310_v12, %s9786_s6  ;;  %v11436_v6 = vpop.eup %9695 }
0x19f0   :  { %v6176_v33 = vsel %vm1031_vm8, %v11436_v6, 0.0  ;;  %v11440_v11 = vpop.eup %9697 }
0x19f1   :  { %v6236_v51 = vsel %vm1031_vm8, %v11440_v11, 0.0 }
0x19fa   :  { %6242 = vrot.lane.b32.xlu1 %v11310_v12, %s9787_s7 }
0x1a0e   :  { %6057 = vadd.xlane.f32.xlu0 %v6056_v62 }
0x1a11   :  { %v5879_v10 = vpop.xlane.xlu1 %5878 }
0x1a12   :  { %9699 = vrcp.f32 %v5879_v10  ;;  %6177 = vadd.xlane.f32.xlu0 %v6176_v33 }
0x1a13   :  { %9701 = vpow2.f32 %v6294_v9  ;;  %v6403_v9 = vsel %vm624_vm5, %v11457_v8, 0 }
0x1a1c   :  { %v9700_v61 = vpop.eup %9699 }
0x1a1d   :  { %v5881_v35 = vmul.f32 %v9700_v61, %v9686_v23  ;;  %v11444_v14 = vpop.eup %9701 }
0x1a1e   :  { %6237 = vadd.xlane.f32.xlu1 %v6236_v51  ;;  %v6296_v16 = vsel %vm1031_vm8, %v11444_v14, 0.0 }
0x1a1f   :  { %v5882_v48 = vpack.c.bf16 %v5881_v35, %v5881_v35 }
0x1a21   :  { %9051 = vmatmul.mubr.msk.bf16.vlgmr.msra.gmra.mrb[152].mxu0 %vm1044_vm9, %v5882_v48 }
0x1a22   :  { %9061 = vmatpush3.bf16.msra.mxu0 %v6008_v15  ;;  %6297 = vadd.xlane.f32.xlu1 %v6296_v16 }
0x1a23   :  { %9062 = vmatprep.mubr.msk.bf16.mxu0 %vm9781_vm1, %v9780_v21  ;;  %9072 = vmatprep.subr.bf16.mxu0 %v9780_v21 }
0x1a28   :  { %6302 = vrot.lane.b32.xlu0 %v11310_v12, %s9788_s8 }
0x1a2c   :  { %6499 = vrot.lane.b32.xlu0 %v11457_v8, %s9784_s1 }
0x1a30   :  { %6550 = vrot.lane.b32.xlu0 %v11457_v8, %s9782_s24 }
0x1a33   :  { %6448 = vrot.lane.b32.xlu1 %v11457_v8, %s9783_s25 }
0x1a34   :  { %6601 = vrot.lane.b32.xlu0 %v11457_v8, %s9785_s5 }
0x1a37   :  { %6446 = vrot.lane.b32.xlu1 %v11469_v27, %s9783_s25 }
0x1a38   :  { %6652 = vrot.lane.b32.xlu0 %v11457_v8, %s9786_s6 }
0x1a3b   :  { %6497 = vrot.lane.b32.xlu1 %v11469_v27, %s9784_s1 }
0x1a3c   :  { %6703 = vrot.lane.b32.xlu0 %v11457_v8, %s9787_s7 }
0x1a3f   :  { %6548 = vrot.lane.b32.xlu1 %v11469_v27, %s9782_s24 }
0x1a40   :  { %6754 = vrot.lane.b32.xlu0 %v11457_v8, %s9788_s8  ;;  %v6818_v8 = vshll.u32 %v11310_v12, 16 }
0x1a42   :  { %v6820_v38 = vrot.slane %v6818_v8, 3 }
0x1a43   :  { %6599 = vrot.lane.b32.xlu1 %v11469_v27, %s9785_s5 }
0x1a44   :  { %6752 = vrot.lane.b32.xlu0 %v11469_v27, %s9788_s8  ;;  %v11563_v12 = vor.u32 %v6820_v38, %v6817_v13 }
0x1a47   :  { %6650 = vrot.lane.b32.xlu1 %v11469_v27, %s9786_s6 }
0x1a4b   :  { %6701 = vrot.lane.b32.xlu1 %v11469_v27, %s9787_s7 }
0x1a66   :  { %v5937_v31 = vpop.xlane.xlu0 %5936 }
0x1a67   :  { %9703 = vrcp.f32 %v5937_v31 }
0x1a6a   :  { %v6183_v18 = vpop.permute.xlu0 %6182 }
0x1a6b   :  { %v6188_v56 = vand.u32 %v6183_v18, %v10117_v20 }
0x1a71   :  { %v9704_v25 = vpop.eup %9703 }
0x1a72   :  { %v5939_v37 = vmul.f32 %v9704_v25, %v11412_v22  ;;  %v6118_v39 = vpop.xlane.xlu1 %6117 }
0x1a74   :  { %v5940_v23 = vpack.c.bf16 %v5939_v37, %v5939_v37  ;;  %v6826_v37 = vand.u32 %v11563_v12, %v10117_v20 }
0x1a76   :  { %9057 = vmatmul.mubr.msk.bf16.vlgmr.msra.gmra.mrb[184].mxu1 %vm1044_vm9, %v5940_v23  ;;  %v5998_v29 = vpop.xlane.xlu1 %5997 }
0x1a77   :  { %9067 = vmatpush3.bf16.msra.mxu1 %v6068_v34  ;;  %9705 = vrcp.f32 %v5998_v29  ;;  %9068 = vmatprep.mubr.msk.bf16.mxu1 %vm9781_vm1, %v9780_v21 }
0x1a78   :  { %9078 = vmatprep.subr.bf16.mxu1 %v9780_v21  ;;  %9707 = vrcp.f32 %v6118_v39 }
0x1a7a   :  { %v6243_v40 = vpop.permute.xlu1 %6242 }
0x1a7b   :  { %v6248_v50 = vand.u32 %v6243_v40, %v10117_v20 }
0x1a81   :  { %v9706_v43 = vpop.eup %9705 }
0x1a82   :  { %v6000_v44 = vmul.f32 %v9706_v43, %v11420_v52  ;;  %v9708_v49 = vpop.eup %9707 }
0x1a83   :  { %v6120_v0 = vmul.f32 %v9708_v49, %v11416_v58 }
0x1a84   :  { %v6001_v47 = vpack.c.bf16 %v6000_v44, %v6000_v44 }
0x1a85   :  { %v6121_v22 = vpack.c.bf16 %v6120_v0, %v6120_v0 }
0x1a86   :  { %9063 = vmatmul.mubr.msk.bf16.vlgmr.msra.gmra.mrb[156].mxu0 %vm1044_vm9, %v6001_v47 }
0x1a87   :  { %9073 = vmatpush3.bf16.msra.mxu0 %v6128_v53  ;;  %9074 = vmatprep.mubr.msk.bf16.mxu0 %vm9781_vm1, %v9780_v21 }
0x1a88   :  { %9084 = vmatprep.subr.bf16.mxu0 %v9780_v21 }
0x1a8e   :  { %9075 = vmatmul.mubr.msk.bf16.vlgmr.msra.gmra.mrb[160].mxu0 %vm1044_vm9, %v6121_v22 }
0x1a8f   :  { %9085 = vmatpush3.bf16.msra.mxu0 %v6248_v50  ;;  %9086 = vmatprep.mubr.msk.bf16.mxu0 %vm9781_vm1, %v9780_v21 }
0x1a90   :  { %9096 = vmatprep.subr.bf16.mxu0 %v9780_v21 }
0x1a9b   :  { %v6058_v41 = vpop.xlane.xlu0 %6057 }
0x1a9c   :  { %9709 = vrcp.f32 %v6058_v41 }
0x1a9f   :  { %v6178_v54 = vpop.xlane.xlu0 %6177 }
0x1aa0   :  { %9711 = vrcp.f32 %v6178_v54 }
0x1aa3   :  { %v6303_v4 = vpop.permute.xlu0 %6302 }
0x1aa4   :  { %v6308_v7 = vand.u32 %v6303_v4, %v10117_v20 }
0x1aa6   :  { %v9710_v58 = vpop.eup %9709 }
0x1aa7   :  { %v6060_v52 = vmul.f32 %v9710_v58, %v11430_v60  ;;  %v6500_v60 = vpop.permute.xlu0 %6499 }
0x1aa9   :  { %v6061_v1 = vpack.c.bf16 %v6060_v52, %v6060_v52 }
0x1aaa   :  { %v9712_v55 = vpop.eup %9711 }
0x1aab   :  { %9069 = vmatmul.mubr.msk.bf16.vlgmr.msra.gmra.mrb[188].mxu1 %vm1044_vm9, %v6061_v1  ;;  %v6238_v3 = vpop.xlane.xlu1 %6237  ;;  %v6180_v63 = vmul.f32 %v9712_v55, %v11436_v6  ;;  %v6551_v10 = vpop.permute.xlu0 %6550 }
0x1aac   :  { %9079 = vmatpush3.bf16.msra.mxu1 %v6188_v56  ;;  %9713 = vrcp.f32 %v6238_v3  ;;  %9080 = vmatprep.mubr.msk.bf16.mxu1 %vm9781_vm1, %v9780_v21  ;;  %v6556_v48 = vsel %vm624_vm5, %v6551_v10, 0 }
0x1aad   :  { %9090 = vmatprep.subr.bf16.mxu1 %v9780_v21  ;;  %v6181_v5 = vpack.c.bf16 %v6180_v63, %v6180_v63 }
0x1aaf   :  { %v6298_v32 = vpop.xlane.xlu1 %6297  ;;  %v6602_v35 = vpop.permute.xlu0 %6601 }
0x1ab0   :  { %9715 = vrcp.f32 %v6298_v32  ;;  %v6607_v19 = vsel %vm624_vm5, %v6602_v35, 0 }
0x1ab3   :  { %9081 = vmatmul.mubr.msk.bf16.vlgmr.msra.gmra.mrb[192].mxu1 %vm1044_vm9, %v6181_v5  ;;  %v6449_v45 = vpop.permute.xlu1 %6448  ;;  %v6653_v15 = vpop.permute.xlu0 %6652 }
0x1ab4   :  { %9091 = vmatpush3.bf16.msra.mxu1 %v6308_v7  ;;  %9092 = vmatprep.mubr.msk.bf16.mxu1 %vm9781_vm1, %v9780_v21  ;;  %v6658_v28 = vsel %vm624_vm5, %v6653_v15, 0 }
0x1ab5   :  { %9102 = vmatprep.subr.bf16.mxu1 %v9780_v21 }
0x1ab6   :  { %v9714_v36 = vpop.eup %9713 }
0x1ab7   :  { %v6240_v42 = vmul.f32 %v9714_v36, %v11440_v11  ;;  %v6447_v33 = vpop.permute.xlu1 %6446  ;;  %v6454_v11 = vsel %vm624_vm5, %v6449_v45, 0  ;;  %v6704_v46 = vpop.permute.xlu0 %6703 }
0x1ab8   :  { %v6709_v17 = vsel %vm624_vm5, %v6704_v46, 0 }
0x1ab9   :  { %v6241_v57 = vpack.c.bf16 %v6240_v42, %v6240_v42 }
0x1aba   :  { %v9716_v62 = vpop.eup %9715 }
0x1abb   :  { %v6300_v6 = vmul.f32 %v9716_v62, %v11444_v14  ;;  %9087 = vmatmul.mubr.msk.bf16.vlgmr.msra.gmra.mrb[164].mxu0 %vm1044_vm9, %v6241_v57  ;;  %v6498_v51 = vpop.permute.xlu1 %6497  ;;  %v6505_v14 = vsel %vm624_vm5, %v6500_v60, 0 }
0x1abc   :  { %9097 = vmatpush3.bf16.xpose.msra.mxu0 %v6403_v9  ;;  %9098 = vmatprep.mubr.msk.bf16.mxu0 %vm9781_vm1, %v9780_v21 }
0x1abd   :  { %v6301_v61 = vpack.c.bf16 %v6300_v6, %v6300_v6  ;;  %9108 = vmatprep.subr.bf16.mxu0 %v9780_v21 }
0x1abf   :  { %9093 = vmatmul.mubr.msk.bf16.vlgmr.msra.gmra.mrb[196].mxu1 %vm1044_vm9, %v6301_v61  ;;  %v6549_v16 = vpop.permute.xlu1 %6548 }
0x1ac0   :  { %9103 = vmatpush3.bf16.xpose.msra.mxu1 %v6454_v11  ;;  %9104 = vmatprep.mubr.msk.bf16.mxu1 %vm9781_vm1, %v9780_v21 }
0x1ac1   :  { %9114 = vmatprep.subr.bf16.mxu1 %v9780_v21 }
0x1ac3   :  { %9099 = vmatmul.mubr.msk.bf16.vlgmr.msra.gmra.mrb[168].mxu0 %vm624_vm5, %v11469_v27  ;;  %v6600_v24 = vpop.permute.xlu1 %6599  ;;  %v6755_v27 = vpop.permute.xlu0 %6754 }
0x1ac4   :  { %9109 = vmatpush3.bf16.xpose.msra.mxu0 %v6505_v14  ;;  %9110 = vmatprep.mubr.msk.bf16.mxu0 %vm9781_vm1, %v9780_v21  ;;  %v6760_v31 = vsel %vm624_vm5, %v6755_v27, 0 }
0x1ac5   :  { %9120 = vmatprep.subr.bf16.mxu0 %v9780_v21 }
0x1ac7   :  { %9105 = vmatmul.mubr.msk.bf16.vlgmr.msra.gmra.mrb[200].mxu1 %vm624_vm5, %v6447_v33  ;;  %v6651_v26 = vpop.permute.xlu1 %6650  ;;  %v6753_v39 = vpop.permute.xlu0 %6752 }
0x1ac8   :  { %9115 = vmatpush3.bf16.xpose.msra.mxu1 %v6556_v48  ;;  %9116 = vmatprep.mubr.msk.bf16.mxu1 %vm9781_vm1, %v9780_v21 }
0x1ac9   :  { %9126 = vmatprep.subr.bf16.mxu1 %v9780_v21 }
0x1acb   :  { %9111 = vmatmul.mubr.msk.bf16.vlgmr.msra.gmra.mrb[172].mxu0 %vm624_vm5, %v6498_v51  ;;  %v6702_v25 = vpop.permute.xlu1 %6701 }
0x1acc   :  { %9121 = vmatpush3.bf16.xpose.msra.mxu0 %v6607_v19  ;;  %9122 = vmatprep.mubr.msk.bf16.mxu0 %vm9781_vm1, %v9780_v21 }
0x1acd   :  { %9132 = vmatprep.subr.bf16.mxu0 %v9780_v21 }
0x1acf   :  { %9117 = vmatmul.mubr.msk.bf16.vlgmr.msra.gmra.mrb[204].mxu1 %vm624_vm5, %v6549_v16 }
0x1ad0   :  { %9127 = vmatpush3.bf16.xpose.msra.mxu1 %v6658_v28  ;;  %9128 = vmatprep.mubr.msk.bf16.mxu1 %vm9781_vm1, %v9780_v21 }
0x1ad1   :  { %9138 = vmatprep.subr.bf16.mxu1 %v9780_v21 }
0x1ad3   :  { %9123 = vmatmul.mubr.msk.bf16.vlgmr.msra.gmra.mrb[176].mxu0 %vm624_vm5, %v6600_v24 }
0x1ad4   :  { %9133 = vmatpush3.bf16.xpose.msra.mxu0 %v6709_v17  ;;  %9134 = vmatprep.mubr.msk.bf16.mxu0 %vm9781_vm1, %v9780_v21 }
0x1ad5   :  { %9144 = vmatprep.subr.bf16.mxu0 %v9780_v21 }
0x1ad7   :  { %9129 = vmatmul.mubr.msk.bf16.vlgmr.msra.gmra.mrb[208].mxu1 %vm624_vm5, %v6651_v26 }
0x1ad8   :  { %9139 = vmatpush3.bf16.xpose.msra.mxu1 %v6760_v31  ;;  %9140 = vmatprep.mubr.msk.bf16.mxu1 %vm9781_vm1, %v9780_v21 }
0x1ad9   :  { %9150 = vmatprep.subr.bf16.mxu1 %v9780_v21 }
0x1adb   :  { %9135 = vmatmul.mubr.msk.bf16.vlgmr.msra.gmra.mrb[180].mxu0 %vm624_vm5, %v6702_v25 }
0x1adc   :  { %9145 = vmatpush3.bf16.msra.mxu0 %v6826_v37  ;;  %9146 = vmatprep.mubr.msk.bf16.mxu0 %vm9781_vm1, %v9780_v21 }
0x1add   :  { %9156 = vmatprep.subr.bf16.mxu0 %v9780_v21 }
0x1adf   :  { %9141 = vmatmul.mubr.msk.bf16.vlgmr.msra.gmra.mrb[212].mxu1 %vm624_vm5, %v6753_v39 }
0x1ae0   :  { %9152 = vmatprep.mubr.msk.bf16.mxu1 %vm9781_vm1, %v9780_v21 }
0x1af4   :  { %v11579_v23 = vpop.f32.mrb[152].mxu0 }
0x1af5   :  { %v9052_v34 = vpop.f32.mrb[153].mxu0 }
0x1af6   :  { %v5926_v29 = vpop.f32.mrb[154].mxu0 }
0x1af7   :  { %v9053_v43 = vpop.f32.mrb[155].mxu0 }
0x1b49   :  { %v11581_v44 = vpop.f32.mrb[184].mxu1 }
0x1b4a   :  { %v9058_v47 = vpop.f32.mrb[185].mxu1 }
0x1b4b   :  { %v5987_v49 = vpop.f32.mrb[186].mxu1 }
0x1b4c   :  { %v9059_v53 = vpop.f32.mrb[187].mxu1 }
0x1b59   :  { %v11583_v0 = vpop.f32.mrb[156].mxu0 }
0x1b5a   :  { %v9064_v40 = vpop.f32.mrb[157].mxu0 }
0x1b5b   :  { %v6047_v22 = vpop.f32.mrb[158].mxu0 }
0x1b5c   :  { %v9065_v50 = vpop.f32.mrb[159].mxu0 }
0x1b61   :  { %v11585_v18 = vpop.f32.mrb[160].mxu0 }
0x1b62   :  { %v9076_v41 = vpop.f32.mrb[161].mxu0 }
0x1b63   :  { %v6167_v54 = vpop.f32.mrb[162].mxu0 }
0x1b64   :  { %v9077_v58 = vpop.f32.mrb[163].mxu0 }
0x1b7e   :  { %v11587_v52 = vpop.f32.mrb[188].mxu1 }
0x1b7f   :  { %v9070_v1 = vpop.f32.mrb[189].mxu1 }
0x1b80   :  { %v6107_v55 = vpop.f32.mrb[190].mxu1 }
0x1b81   :  { %v9071_v56 = vpop.f32.mrb[191].mxu1 }
0x1b86   :  { %v11589_v3 = vpop.f32.mrb[192].mxu1 }
0x1b87   :  { %v9082_v63 = vpop.f32.mrb[193].mxu1 }
0x1b88   :  { %v6227_v4 = vpop.f32.mrb[194].mxu1 }
0x1b89   :  { %v9083_v32 = vpop.f32.mrb[195].mxu1 }
0x1b8e   :  { %v11591_v5 = vpop.f32.mrb[164].mxu0 }
0x1b8f   :  { %v9088_v7 = vpop.f32.mrb[165].mxu0 }
0x1b90   :  { %v6287_v36 = vpop.f32.mrb[166].mxu0 }
0x1b91   :  { %v9089_v60 = vpop.f32.mrb[167].mxu0 }
0x1b92   :  { %v11593_v45 = vpop.f32.mrb[196].mxu1 }
0x1b93   :  { %v9094_v42 = vpop.f32.mrb[197].mxu1 }
0x1b94   :  { %v6347_v57 = vpop.f32.mrb[198].mxu1 }
0x1b95   :  { %v9095_v62 = vpop.f32.mrb[199].mxu1 }
0x1b96   :  { %v6439_v6 = vpop.f32.mrb[168].mxu0 }
0x1b97   :  { %v6445_v9 = vmul.f32 0.25, %v6439_v6  ;;  %v9100_v10 = vpop.f32.mrb[169].mxu0 }
0x1b98   :  { %v6442_v33 = vpop.f32.mrb[170].mxu0 }
0x1b99   :  { %v9101_v61 = vpop.f32.mrb[171].mxu0  ;;  %v6803_v11 = vsel %vm1031_vm8, %v6445_v9, -inf }
0x1b9a   :  { %v6490_v35 = vpop.f32.mrb[200].mxu1  ;;  %6804 = vmax.xlane.f32.xlu1 %v6803_v11 }
0x1b9b   :  { %v6496_v51 = vmul.f32 0.25, %v6490_v35  ;;  %v9106_v14 = vpop.f32.mrb[201].mxu1 }
0x1b9c   :  { %v6493_v48 = vpop.f32.mrb[202].mxu1 }
0x1b9d   :  { %v9107_v15 = vpop.f32.mrb[203].mxu1  ;;  %v6868_v16 = vsel %vm1031_vm8, %v6496_v51, -inf }
0x1b9e   :  { %6869 = vmax.xlane.f32.xlu0 %v6868_v16  ;;  %v6541_v19 = vpop.f32.mrb[172].mxu0 }
0x1b9f   :  { %v11597_v46 = vmul.f32 0.25, %v6541_v19  ;;  %v9112_v24 = vpop.f32.mrb[173].mxu0 }
0x1ba0   :  { %v6544_v30 = vpop.f32.mrb[174].mxu0 }
0x1ba1   :  { %v9113_v8 = vpop.f32.mrb[175].mxu0  ;;  %v6928_v28 = vsel %vm1031_vm8, %v11597_v46, -inf }
0x1ba2   :  { %v6592_v13 = vpop.f32.mrb[204].mxu1  ;;  %6929 = vmax.xlane.f32.xlu0 %v6928_v28 }
0x1ba3   :  { %v11601_v38 = vmul.f32 0.25, %v6592_v13  ;;  %v9118_v17 = vpop.f32.mrb[205].mxu1 }
0x1ba4   :  { %v6595_v27 = vpop.f32.mrb[206].mxu1 }
0x1ba5   :  { %v9119_v26 = vpop.f32.mrb[207].mxu1  ;;  %v6988_v31 = vsel %vm1031_vm8, %v11601_v38, -inf }
0x1ba6   :  { %6989 = vmax.xlane.f32.xlu1 %v6988_v31  ;;  %v6643_v25 = vpop.f32.mrb[176].mxu0 }
0x1ba7   :  { %v6649_v37 = vmul.f32 0.25, %v6643_v25  ;;  %v9124_v39 = vpop.f32.mrb[177].mxu0 }
0x1ba8   :  { %v6646_v34 = vpop.f32.mrb[178].mxu0 }
0x1ba9   :  { %v9125_v29 = vpop.f32.mrb[179].mxu0  ;;  %v7048_v43 = vsel %vm1031_vm8, %v6649_v37, -inf }
0x1baa   :  { %v6694_v47 = vpop.f32.mrb[208].mxu1  ;;  %7049 = vmax.xlane.f32.xlu0 %v7048_v43 }
0x1bab   :  { %v6700_v49 = vmul.f32 0.25, %v6694_v47  ;;  %v9130_v53 = vpop.f32.mrb[209].mxu1 }
0x1bac   :  { %v6697_v40 = vpop.f32.mrb[210].mxu1 }
0x1bad   :  { %v9131_v22 = vpop.f32.mrb[211].mxu1  ;;  %v7108_v50 = vsel %vm1031_vm8, %v6700_v49, -inf }
0x1bae   :  { %7109 = vmax.xlane.f32.xlu1 %v7108_v50  ;;  %v6745_v41 = vpop.f32.mrb[180].mxu0 }
0x1baf   :  { %v6751_v54 = vmul.f32 0.25, %v6745_v41  ;;  %v9136_v58 = vpop.f32.mrb[181].mxu0 }
0x1bb0   :  { %v6748_v1 = vpop.f32.mrb[182].mxu0 }
0x1bb1   :  { %v9137_v55 = vpop.f32.mrb[183].mxu0  ;;  %v7168_v56 = vsel %vm1031_vm8, %v6751_v54, -inf }
0x1bb2   :  { %v6796_v63 = vpop.f32.mrb[212].mxu1  ;;  %7169 = vmax.xlane.f32.xlu0 %v7168_v56 }
0x1bb3   :  { %v9142_v4 = vpop.f32.mrb[213].mxu1  ;;  %v6802_v36 = vmul.f32 0.25, %v6796_v63 }
0x1bb4   :  { %v6799_v32 = vpop.f32.mrb[214].mxu1 }
0x1bb5   :  { %v9143_v7 = vpop.f32.mrb[215].mxu1  ;;  %v7228_v60 = vsel %vm1031_vm8, %v6802_v36, -inf }
0x1bbf   :  { %6880 = vrot.lane.b32.xlu1 %v11563_v12, %s9783_s25 }
0x1be3   :  { %7229 = vmax.xlane.f32.xlu1 %v7228_v60 }
0x1bf4   :  { %7000 = vrot.lane.b32.xlu1 %v11563_v12, %s9782_s24 }
0x1bf8   :  { %7060 = vrot.lane.b32.xlu1 %v11563_v12, %s9785_s5 }
0x1c27   :  { %v6805_v42 = vpop.xlane.xlu1 %6804 }
0x1c28   :  { %v6806_v57 = vsub.f32 %v6445_v9, %v6805_v42 }
0x1c2a   :  { %v6807_v62 = vmul.f32 1.442695, %v6806_v57 }
0x1c2b   :  { %v6870_v6 = vpop.xlane.xlu0 %6869 }
0x1c2c   :  { %9717 = vpow2.f32 %v6807_v62  ;;  %v6871_v10 = vsub.f32 %v6496_v51, %v6870_v6 }
0x1c2e   :  { %v6872_v33 = vmul.f32 1.442695, %v6871_v10 }
0x1c2f   :  { %v6930_v51 = vpop.xlane.xlu0 %6929 }
0x1c30   :  { %9719 = vpow2.f32 %v6872_v33  ;;  %v6931_v19 = vsub.f32 %v11597_v46, %v6930_v51 }
0x1c32   :  { %v6932_v8 = vmul.f32 1.442695, %v6931_v19 }
0x1c33   :  { %v6990_v11 = vpop.xlane.xlu1 %6989 }
0x1c34   :  { %v6991_v30 = vsub.f32 %v11601_v38, %v6990_v11  ;;  %9721 = vpow2.f32 %v6932_v8 }
0x1c36   :  { %v11615_v61 = vpop.eup %9717  ;;  %v6992_v17 = vmul.f32 1.442695, %v6991_v30 }
0x1c37   :  { %v6809_v35 = vsel %vm1031_vm8, %v11615_v61, 0.0  ;;  %v7050_v24 = vpop.xlane.xlu0 %7049 }
0x1c38   :  { %6810 = vadd.xlane.f32.xlu0 %v6809_v35  ;;  %v7051_v28 = vsub.f32 %v6649_v37, %v7050_v24  ;;  %9723 = vpow2.f32 %v6992_v17 }
0x1c3a   :  { %v11619_v14 = vpop.eup %9719  ;;  %v7052_v26 = vmul.f32 1.442695, %v7051_v28 }
0x1c3b   :  { %v7110_v48 = vpop.xlane.xlu1 %7109  ;;  %v6874_v15 = vsel %vm1031_vm8, %v11619_v14, 0.0 }
0x1c3c   :  { %6875 = vadd.xlane.f32.xlu1 %v6874_v15  ;;  %v7111_v27 = vsub.f32 %v6700_v49, %v7110_v48  ;;  %9725 = vpow2.f32 %v7052_v26 }
0x1c3e   :  { %v7112_v25 = vmul.f32 1.442695, %v7111_v27  ;;  %v9722_v34 = vpop.eup %9721 }
0x1c3f   :  { %v6881_v9 = vpop.permute.xlu1 %6880  ;;  %v7170_v13 = vpop.xlane.xlu0 %7169  ;;  %v6934_v46 = vsel %vm1031_vm8, %v9722_v34, 0.0 }
0x1c40   :  { %v6886_v16 = vand.u32 %v6881_v9, %v10117_v20  ;;  %v7171_v31 = vsub.f32 %v6751_v54, %v7170_v13  ;;  %9727 = vpow2.f32 %v7112_v25 }
0x1c42   :  { %9151 = vmatpush3.bf16.msra.mxu1 %v6886_v16  ;;  %v7172_v39 = vmul.f32 1.442695, %v7171_v31  ;;  %v11631_v29 = vpop.eup %9723 }
0x1c43   :  { %9162 = vmatprep.subr.bf16.mxu1 %v9780_v21  ;;  %v6994_v47 = vsel %vm1031_vm8, %v11631_v29, 0.0 }
0x1c44   :  { %9729 = vpow2.f32 %v7172_v39 }
0x1c46   :  { %v11634_v38 = vpop.eup %9725 }
0x1c47   :  { %v7054_v49 = vsel %vm1031_vm8, %v11634_v38, 0.0 }
0x1c4a   :  { %v11636_v37 = vpop.eup %9727 }
0x1c4b   :  { %v7114_v50 = vsel %vm1031_vm8, %v11636_v37, 0.0 }
0x1c4d   :  { %7120 = vrot.lane.b32.xlu1 %v11563_v12, %s9786_s6 }
0x1c4e   :  { %6940 = vrot.lane.b32.xlu0 %v11563_v12, %s9784_s1  ;;  %v11642_v53 = vpop.eup %9729 }
0x1c4f   :  { %v7174_v41 = vsel %vm1031_vm8, %v11642_v53, 0.0 }
0x1c6d   :  { %6935 = vadd.xlane.f32.xlu0 %v6934_v46 }
0x1c70   :  { %v7230_v43 = vpop.xlane.xlu1 %7229 }
0x1c71   :  { %v7231_v40 = vsub.f32 %v6802_v36, %v7230_v43  ;;  %6995 = vadd.xlane.f32.xlu1 %v6994_v47  ;;  %7055 = vadd.xlane.f32.xlu0 %v7054_v49  ;;  %v9511_v47 = vld [vmem:[%s11905_s2 + $0x3c] ss:$76 sps:$4 sm:$0xff]   ;;  %v9512_v49 = vld [vmem:[%s11905_s2 + $0xd4] ss:$76 sps:$4 sm:$0xff]  }
0x1c73   :  { %v7232_v22 = vmul.f32 1.442695, %v7231_v40 }
0x1c74   :  { %v7001_v1 = vpop.permute.xlu1 %7000 }
0x1c75   :  { %9731 = vpow2.f32 %v7232_v22  ;;  %7115 = vadd.xlane.f32.xlu1 %v7114_v50  ;;  %7175 = vadd.xlane.f32.xlu0 %v7174_v41  ;;  %v7006_v62 = vand.u32 %v7001_v1, %v10117_v20 }
0x1c78   :  { %v7061_v55 = vpop.permute.xlu1 %7060 }
0x1c79   :  { %v7066_v16 = vand.u32 %v7061_v55, %v10117_v20 }
0x1c7f   :  { %v11648_v54 = vpop.eup %9731 }
0x1c80   :  { %v7234_v58 = vsel %vm1031_vm8, %v11648_v54, 0.0 }
0x1c81   :  { %7235 = vadd.xlane.f32.xlu0 %v7234_v58 }
0x1c86   :  { %7240 = vrot.lane.b32.xlu1 %v11563_v12, %s9788_s8 }
0x1c97   :  { %7180 = vrot.lane.b32.xlu0 %v11563_v12, %s9787_s7 }
0x1cc5   :  { %v6811_v56 = vpop.xlane.xlu0 %6810 }
0x1cc6   :  { %9733 = vrcp.f32 %v6811_v56  ;;  %v9513_v56 = vld [vmem:[%s11905_s2 + $0x16c] ss:$76 sps:$4 sm:$0xff]  }
0x1cc9   :  { %v6876_v63 = vpop.xlane.xlu1 %6875  ;;  %v6941_v7 = vpop.permute.xlu0 %6940 }
0x1cca   :  { %9735 = vrcp.f32 %v6876_v63  ;;  %v6946_v42 = vand.u32 %v6941_v7, %v10117_v20  ;;  %v9514_v63 = vld [vmem:[%s11905_s2 + $0x204] ss:$76 sps:$4 sm:$0xff]  }
0x1ccd   :  { %v7121_v6 = vpop.permute.xlu1 %7120 }
0x1cce   :  { %v7126_v28 = vand.u32 %v7121_v6, %v10117_v20 }
0x1cd0   :  { %v9734_v4 = vpop.eup %9733 }
0x1cd1   :  { %v6813_v32 = vmul.f32 %v9734_v4, %v11615_v61 }
0x1cd3   :  { %v6814_v36 = vpack.c.bf16 %v6813_v32, %v6813_v32 }
0x1cd4   :  { %v9736_v60 = vpop.eup %9735 }
0x1cd5   :  { %v6878_v57 = vmul.f32 %v9736_v60, %v11619_v14  ;;  %9147 = vmatmul.mubr.msk.bf16.vlgmr.msra.gmra.mrb[184].mxu0 %vm1044_vm9, %v6814_v36  ;;  %v9516_v60 = vld [vmem:[%s11905_s2 + $0x334] ss:$76 sps:$4 sm:$0xff]  }
0x1cd6   :  { %9157 = vmatpush3.bf16.msra.mxu0 %v6946_v42  ;;  %9158 = vmatprep.mubr.msk.bf16.mxu0 %vm9781_vm1, %v9780_v21 }
0x1cd7   :  { %v6879_v12 = vpack.c.bf16 %v6878_v57, %v6878_v57  ;;  %9168 = vmatprep.subr.bf16.mxu0 %v9780_v21 }
0x1cd9   :  { %9153 = vmatmul.mubr.msk.bf16.vlgmr.msra.gmra.mrb[216].mxu1 %vm1044_vm9, %v6879_v12 }
0x1cda   :  { %9163 = vmatpush3.bf16.msra.mxu1 %v7006_v62  ;;  %9164 = vmatprep.mubr.msk.bf16.mxu1 %vm9781_vm1, %v9780_v21 }
0x1cdb   :  { %9174 = vmatprep.subr.bf16.mxu1 %v9780_v21 }
0x1cfa   :  { %v6936_v10 = vpop.xlane.xlu0 %6935 }
0x1cfb   :  { %9737 = vrcp.f32 %v6936_v10  ;;  %v9517_v10 = vld [vmem:[%s11905_s2 + $0x3cc] ss:$76 sps:$4 sm:$0xff]  }
0x1cfe   :  { %v6996_v33 = vpop.xlane.xlu1 %6995  ;;  %v7056_v61 = vpop.xlane.xlu0 %7055 }
0x1cff   :  { %9739 = vrcp.f32 %v6996_v33 }
0x1d00   :  { %9741 = vrcp.f32 %v7056_v61 }
0x1d02   :  { %v7116_v11 = vpop.xlane.xlu1 %7115  ;;  %v7176_v35 = vpop.xlane.xlu0 %7175 }
0x1d03   :  { %9743 = vrcp.f32 %v7116_v11 }
0x1d04   :  { %9745 = vrcp.f32 %v7176_v35 }
0x1d05   :  { %v9738_v14 = vpop.eup %9737 }
0x1d06   :  { %v6938_v48 = vmul.f32 %v9738_v14, %v9722_v34  ;;  %v7241_v31 = vpop.permute.xlu1 %7240  ;;  %v9518_v14 = vld [vmem:[%s11905_s2 + $0x464] ss:$76 sps:$4 sm:$0xff]  }
0x1d07   :  { %v7246_v46 = vand.u32 %v7241_v31, %v10117_v20 }
0x1d08   :  { %v6939_v15 = vpack.c.bf16 %v6938_v48, %v6938_v48 }
0x1d09   :  { %v9740_v9 = vpop.eup %9739 }
0x1d0a   :  { %v9742_v51 = vpop.eup %9741  ;;  %v6998_v19 = vmul.f32 %v9740_v9, %v11631_v29  ;;  %9159 = vmatmul.mubr.msk.bf16.vlgmr.msra.gmra.mrb[188].mxu0 %vm1044_vm9, %v6939_v15 }
0x1d0b   :  { %9169 = vmatpush3.bf16.msra.mxu0 %v7066_v16  ;;  %9170 = vmatprep.mubr.msk.bf16.mxu0 %vm9781_vm1, %v9780_v21  ;;  %v7058_v24 = vmul.f32 %v9742_v51, %v11634_v38 }
0x1d0c   :  { %v6999_v30 = vpack.c.bf16 %v6998_v19, %v6998_v19  ;;  %9180 = vmatprep.subr.bf16.mxu0 %v9780_v21 }
0x1d0d   :  { %v9744_v8 = vpop.eup %9743  ;;  %v7059_v27 = vpack.c.bf16 %v7058_v24, %v7058_v24 }
0x1d0e   :  { %9165 = vmatmul.mubr.msk.bf16.vlgmr.msra.gmra.mrb[220].mxu1 %vm1044_vm9, %v6999_v30  ;;  %v7236_v13 = vpop.xlane.xlu0 %7235  ;;  %v7118_v17 = vmul.f32 %v9744_v8, %v11636_v37  ;;  %v9746_v26 = vpop.eup %9745 }
0x1d0f   :  { %9175 = vmatpush3.bf16.msra.mxu1 %v7126_v28  ;;  %9747 = vrcp.f32 %v7236_v13  ;;  %9176 = vmatprep.mubr.msk.bf16.mxu1 %vm9781_vm1, %v9780_v21  ;;  %v7178_v34 = vmul.f32 %v9746_v26, %v11642_v53 }
0x1d10   :  { %9186 = vmatprep.subr.bf16.mxu1 %v9780_v21  ;;  %v7119_v29 = vpack.c.bf16 %v7118_v17, %v7118_v17 }
0x1d11   :  { %v7179_v38 = vpack.c.bf16 %v7178_v34, %v7178_v34 }
0x1d12   :  { %9171 = vmatmul.mubr.msk.bf16.vlgmr.msra.gmra.mrb[192].mxu0 %vm1044_vm9, %v7059_v27  ;;  %v7181_v25 = vpop.permute.xlu0 %7180 }
0x1d13   :  { %v7186_v39 = vand.u32 %v7181_v25, %v10117_v20  ;;  %9182 = vmatprep.mubr.msk.bf16.mxu0 %vm9781_vm1, %v9780_v21 }
0x1d15   :  { %9181 = vmatpush3.bf16.msra.mxu0 %v7186_v39 }
0x1d16   :  { %9177 = vmatmul.mubr.msk.bf16.vlgmr.msra.gmra.mrb[224].mxu1 %vm1044_vm9, %v7119_v29  ;;  %9192 = vmatprep.subr.bf16.mxu0 %v9780_v21 }
0x1d17   :  { %9187 = vmatpush3.bf16.msra.mxu1 %v7246_v46  ;;  %9188 = vmatprep.mubr.msk.bf16.mxu1 %vm9781_vm1, %v9780_v21 }
0x1d18   :  { %9212 = vmatprep.subr.bf16.mxu1 %v9780_v21 }
0x1d19   :  { %v9748_v37 = vpop.eup %9747 }
0x1d1a   :  { %v7238_v43 = vmul.f32 %v9748_v37, %v11648_v54  ;;  %9183 = vmatmul.mubr.msk.bf16.vlgmr.msra.gmra.mrb[196].mxu0 %vm1044_vm9, %v7179_v38 }
0x1d1b   :  { %9208 = vmatprep.mubr.msk.bf16.mxu0 %vm9781_vm1, %v9780_v21  ;;  %9193 = vmatpush3.bf16.msra.mxu0 %v9511_v47 }
0x1d1c   :  { %v7239_v20 = vpack.c.bf16 %v7238_v43, %v7238_v43  ;;  %9194 = vmatprep.subr.bf16.mxu0 %v9780_v21 }
0x1d1e   :  { %9189 = vmatmul.mubr.msk.bf16.vlgmr.msra.gmra.mrb[228].mxu1 %vm1044_vm9, %v7239_v20 }
0x1d1f   :  { %9228 = vmatprep.mubr.msk.bf16.mxu1 %vm9781_vm1, %v9780_v21  ;;  %9195 = vmatpush3.bf16.msra.mxu0 %v9512_v49 }
0x1d20   :  { %9196 = vmatprep.subr.bf16.mxu0 %v9780_v21 }
0x1d23   :  { %9197 = vmatpush3.bf16.msra.mxu0 %v9513_v56 }
0x1d24   :  { %9198 = vmatprep.subr.bf16.mxu0 %v9780_v21 }
0x1d27   :  { %9199 = vmatpush3.bf16.msra.mxu0 %v9514_v63 }
0x1d28   :  { %9200 = vmatprep.subr.bf16.mxu0 %v9780_v21 }
0x1da8   :  { %v11706_v53 = vpop.f32.mrb[184].mxu0 }
0x1da9   :  { %v9148_v40 = vpop.f32.mrb[185].mxu0 }
0x1daa   :  { %v6865_v22 = vpop.f32.mrb[186].mxu0 }
0x1dab   :  { %v9149_v50 = vpop.f32.mrb[187].mxu0 }
0x1dac   :  { %v6922_v41 = vpop.f32.mrb[216].mxu1 }
0x1dad   :  { %v9315_v54 = vpack.i.bf16 %v11581_v44, %v6922_v41  ;;  %v9154_v58 = vpop.f32.mrb[217].mxu1  ;;  %v9515_v44 = vld [vmem:[%s11905_s2 + $0x29c] ss:$76 sps:$4 sm:$0xff]  }
0x1dae   :  { %v6925_v1 = vpop.f32.mrb[218].mxu1  ;;  %9201 = vmatpush3.bf16.msra.mxu0 %v9515_v44 }
0x1daf   :  { %v9155_v55 = vpop.f32.mrb[219].mxu1  ;;  %9316 = vrot.lane.b32.xlu0 %v9315_v54, %s9788_s8  ;;  %9202 = vmatprep.subr.bf16.mxu0 %v9780_v21 }
0x1db2   :  { %9203 = vmatpush3.bf16.msra.mxu0 %v9516_v60 }
0x1db3   :  { %9204 = vmatprep.subr.bf16.mxu0 %v9780_v21 }
0x1db6   :  { %9205 = vmatpush3.bf16.msra.mxu0 %v9517_v10 }
0x1db7   :  { %9206 = vmatprep.subr.bf16.mxu0 %v9780_v21 }
0x1dba   :  { %9207 = vmatpush3.bf16.msra.mxu0 %v9518_v14 }
0x1dbb   :  { %9232 = vmatprep.subr.bf16.mxu0 %v9780_v21 }
0x1ddd   :  { %v6982_v4 = vpop.f32.mrb[188].mxu0 }
0x1dde   :  { %v9320_v32 = vpack.i.bf16 %v11583_v0, %v6982_v4  ;;  %v9160_v7 = vpop.f32.mrb[189].mxu0 }
0x1ddf   :  { %v6985_v36 = vpop.f32.mrb[190].mxu0 }
0x1de0   :  { %9321 = vrot.lane.b32.xlu1 %v9320_v32, %s9787_s7  ;;  %v9161_v42 = vpop.f32.mrb[191].mxu0 }
0x1de1   :  { %v7042_v57 = vpop.f32.mrb[220].mxu1 }
0x1de2   :  { %v9325_v12 = vpack.i.bf16 %v11587_v52, %v7042_v57  ;;  %v9166_v62 = vpop.f32.mrb[221].mxu1 }
0x1de3   :  { %v7045_v6 = vpop.f32.mrb[222].mxu1  ;;  %v8145_v62 = vld [vmem:[%s11906_s3 + $0x16] ss:$0 sm:$0xff] }
0x1de4   :  { %v9167_v0 = vpop.f32.mrb[223].mxu1  ;;  %9326 = vrot.lane.b32.xlu0 %v9325_v12, %s9786_s6 }
0x1de5   :  { %v7102_v33 = vpop.f32.mrb[192].mxu0 }
0x1de6   :  { %v9330_v61 = vpack.i.bf16 %v11585_v18, %v7102_v33  ;;  %v9172_v11 = vpop.f32.mrb[193].mxu0 }
0x1de7   :  { %v7105_v35 = vpop.f32.mrb[194].mxu0 }
0x1de8   :  { %9331 = vrot.lane.b32.xlu1 %v9330_v61, %s9785_s5  ;;  %v9173_v52 = vpop.f32.mrb[195].mxu0 }
0x1de9   :  { %v7162_v48 = vpop.f32.mrb[224].mxu1 }
0x1dea   :  { %v9335_v15 = vpack.i.bf16 %v11589_v3, %v7162_v48  ;;  %v9178_v9 = vpop.f32.mrb[225].mxu1  ;;  %v9519_v48 = vld [vmem:[%s11905_s2 + $0x40] ss:$76 sps:$4 sm:$0xff]  }
0x1deb   :  { %v7165_v16 = vpop.f32.mrb[226].mxu1  ;;  %9213 = vmatpush3.bf16.msra.mxu1 %v9519_v48  ;;  %v9535_v48 = vld [vmem:[%s11905_s2 + $0x48] ss:$76 sps:$4 sm:$0xff]  }
0x1dec   :  { %v9179_v18 = vpop.f32.mrb[227].mxu1  ;;  %9336 = vrot.lane.b32.xlu0 %v9335_v15, %s9782_s24  ;;  %9214 = vmatprep.subr.bf16.mxu1 %v9780_v21 }
0x1ded   :  { %v7222_v51 = vpop.f32.mrb[196].mxu0 }
0x1dee   :  { %v9340_v19 = vpack.i.bf16 %v11591_v5, %v7222_v51  ;;  %v9184_v24 = vpop.f32.mrb[197].mxu0 }
0x1def   :  { %v7225_v30 = vpop.f32.mrb[198].mxu0 }
0x1df0   :  { %9341 = vrot.lane.b32.xlu1 %v9340_v19, %s9784_s1  ;;  %v9185_v8 = vpop.f32.mrb[199].mxu0  ;;  %v9520_v30 = vld [vmem:[%s11905_s2 + $0xd8] ss:$76 sps:$4 sm:$0xff]  }
0x1df1   :  { %v7282_v28 = vpop.f32.mrb[228].mxu1  ;;  %9215 = vmatpush3.bf16.msra.mxu1 %v9520_v30  ;;  %v9521_v8 = vld [vmem:[%s11905_s2 + $0x170] ss:$76 sps:$4 sm:$0xff]  }
0x1df2   :  { %7313 = vrot.lane.b32.xlu0 %v7282_v28, %s9783_s25  ;;  %v9190_v3 = vpop.f32.mrb[229].mxu1  ;;  %9216 = vmatprep.subr.bf16.mxu1 %v9780_v21  ;;  %v9522_v28 = vld [vmem:[%s11905_s2 + $0x208] ss:$76 sps:$4 sm:$0xff]  }
0x1df3   :  { %v7285_v13 = vpop.f32.mrb[230].mxu1  ;;  %v9523_v3 = vld [vmem:[%s11905_s2 + $0x2a0] ss:$76 sps:$4 sm:$0xff]  }
0x1df4   :  { %v9191_v17 = vpop.f32.mrb[231].mxu1  ;;  %6375 = vrot.lane.b32.xlu1 %v11593_v45, %s9783_s25  ;;  %v9524_v13 = vld [vmem:[%s11905_s2 + $0x338] ss:$76 sps:$4 sm:$0xff]  }
0x1df5   :  { %9217 = vmatpush3.bf16.msra.mxu1 %v9521_v8  ;;  %v9525_v17 = vld [vmem:[%s11905_s2 + $0x3d0] ss:$76 sps:$4 sm:$0xff]   ;;  %v9790_v8 = vmov 1966171168  }
0x1df6   :  { %9218 = vmatprep.subr.bf16.mxu1 %v9780_v21 }
0x1df9   :  { %9219 = vmatpush3.bf16.msra.mxu1 %v9522_v28  ;;  %v7728_v28 = vunpack.c.l.s4 %v9790_v8 }
0x1dfa   :  { %9220 = vmatprep.subr.bf16.mxu1 %v9780_v21 }
0x1dfd   :  { %9221 = vmatpush3.bf16.msra.mxu1 %v9523_v3  ;;  %v7730_v3 = vlaneseq }
0x1dfe   :  { %9222 = vmatprep.subr.bf16.mxu1 %v9780_v21 }
0x1e01   :  { %9223 = vmatpush3.bf16.msra.mxu1 %v9524_v13  ;;  %v7729_v13 = vunpack.c.0.s8 %v7728_v28 }
0x1e02   :  { %9224 = vmatprep.subr.bf16.mxu1 %v9780_v21 }
0x1e05   :  { %9225 = vmatpush3.bf16.msra.mxu1 %v9525_v17  ;;  %v7731_v17 = vshrl.u32 %v7730_v3, 7 }
0x1e06   :  { %9226 = vmatprep.subr.bf16.mxu1 %v9780_v21 }
0x1e21   :  { %v9317_v27 = vpop.permute.xlu0 %9316 }
0x1e22   :  { %v9319_v25 = vunpack.i.h.bf16 %v9317_v27  ;;  %v9318_v39 = vunpack.i.l.bf16 %v9317_v27  ;;  %v9526_v27 = vld [vmem:[%s11905_s2 + $0x468] ss:$76 sps:$4 sm:$0xff]  }
0x1e23   :  { %9227 = vmatpush3.bf16.msra.mxu1 %v9526_v27 }
0x1e24   :  { %v6378_v47 = vsel %vm624_vm5, %v11579_v23, %v9319_v25  ;;  %v7316_v49 = vsel %vm624_vm5, %v11706_v53, %v9318_v39  ;;  %9252 = vmatprep.subr.bf16.mxu1 %v9780_v21  ;;  %v9529_v25 = vld [vmem:[%s11905_s2 + $0x174] ss:$76 sps:$4 sm:$0xff]   ;;  %v9530_v39 = vld [vmem:[%s11905_s2 + $0x20c] ss:$76 sps:$4 sm:$0xff]  }
0x1e52   :  { %v9322_v26 = vpop.permute.xlu1 %9321 }
0x1e53   :  { %v9324_v34 = vunpack.i.h.bf16 %v9322_v26  ;;  %v9323_v29 = vunpack.i.l.bf16 %v9322_v26  ;;  %v9527_v26 = vld [vmem:[%s11905_s2 + $0x44] ss:$76 sps:$4 sm:$0xff]  }
0x1e55   :  { %v6379_v22 = vsel %vm1545_vm10, %v6378_v47, %v9324_v34  ;;  %v7317_v50 = vsel %vm1545_vm10, %v7316_v49, %v9323_v29  ;;  %v9532_v34 = vld [vmem:[%s11905_s2 + $0x33c] ss:$76 sps:$4 sm:$0xff]  }
0x1e56   :  { %v9327_v31 = vpop.permute.xlu0 %9326 }
0x1e57   :  { %v9329_v46 = vunpack.i.h.bf16 %v9327_v31  ;;  %v9328_v38 = vunpack.i.l.bf16 %v9327_v31  ;;  %v9528_v31 = vld [vmem:[%s11905_s2 + $0xdc] ss:$76 sps:$4 sm:$0xff]  }
0x1e59   :  { %v6380_v41 = vsel %vm1547_vm11, %v6379_v22, %v9329_v46  ;;  %v7318_v54 = vsel %vm1547_vm11, %v7317_v50, %v9328_v38 }
0x1e5a   :  { %v9332_v5 = vpop.permute.xlu1 %9331 }
0x1e5b   :  { %v9334_v43 = vunpack.i.h.bf16 %v9332_v5  ;;  %v9333_v20 = vunpack.i.l.bf16 %v9332_v5  ;;  %v9531_v5 = vld [vmem:[%s11905_s2 + $0x2a4] ss:$76 sps:$4 sm:$0xff]  }
0x1e5d   :  { %v6381_v1 = vsel %vm122_vm0, %v6380_v41, %v9334_v43  ;;  %v7319_v55 = vsel %vm122_vm0, %v7318_v54, %v9333_v20  ;;  %v8155_v41 = vld [vmem:[%s11906_s3 + $0x18] ss:$0 sm:$0xff] }
0x1e5e   :  { %v9337_v37 = vpop.permute.xlu0 %9336 }
0x1e5f   :  { %v9339_v45 = vunpack.i.h.bf16 %v9337_v37  ;;  %v9338_v40 = vunpack.i.l.bf16 %v9337_v37 }
0x1e61   :  { %v7320_v53 = vsel %vm1550_vm12, %v7319_v55, %v9338_v40  ;;  %v6382_v44 = vsel %vm1550_vm12, %v6381_v1, %v9339_v45  ;;  %v8154_v45 = vld [vmem:[%s11906_s3 + $0x17] ss:$0 sm:$0xff] }
0x1e62   :  { %v9342_v58 = vpop.permute.xlu1 %9341 }
0x1e63   :  { %v9344_v56 = vunpack.i.h.bf16 %v9342_v58  ;;  %v9343_v23 = vunpack.i.l.bf16 %v9342_v58 }
0x1e64   :  { %v7314_v63 = vpop.permute.xlu0 %7313 }
0x1e65   :  { %v7321_v4 = vsel %vm1552_vm14, %v7320_v53, %v9343_v23  ;;  %v6383_v32 = vsel %vm1552_vm14, %v6382_v44, %v9344_v56  ;;  %v9533_v56 = vld [vmem:[%s11905_s2 + $0x3d4] ss:$76 sps:$4 sm:$0xff]   ;;  %v9534_v23 = vld [vmem:[%s11905_s2 + $0x46c] ss:$76 sps:$4 sm:$0xff]  }
0x1e66   :  { %v7322_v7 = vsel %vm1554_vm13, %v7321_v4, %v7314_v63  ;;  %v6376_v36 = vpop.permute.xlu1 %6375  ;;  %v8156_v63 = vld [vmem:[%s11906_s3 + $0x19] ss:$0 sm:$0xff] }
0x1e67   :  { %v7324_v60 = vrot.slane %v7322_v7, 3  ;;  %v6384_v42 = vsel %vm1554_vm13, %v6383_v32, %v6376_v36 }
0x1e69   :  { %v7326_v57 = vsel %vm182_vm3, %v6384_v42, %v7324_v60 }
0x1e6a   :  { %v7343_v12 = vpack.c.bf16 %v7324_v60, %v7326_v57 }
0x1e6c   :  { %9209 = vmatmul.mubr.bf16.vlgmr.msra.gmra.mrb[200].mxu0 %v7343_v12  ;;  %v8165_v12 = vld [vmem:[%s11906_s3 + $0x1a] ss:$0 sm:$0xff] }
0x1e6d   :  { %9248 = vmatprep.mubr.msk.bf16.mxu0 %vm9781_vm1, %v9780_v21  ;;  %9233 = vmatpush3.bf16.msra.mxu0 %v9527_v26  ;;  %v8174_v26 = vld [vmem:[%s11906_s3 + $0x1b] ss:$0 sm:$0xff] }
0x1e6e   :  { %9234 = vmatprep.subr.bf16.mxu0 %v9780_v21 }
0x1e71   :  { %9235 = vmatpush3.bf16.msra.mxu0 %v9528_v31 }
0x1e72   :  { %9236 = vmatprep.subr.bf16.mxu0 %v9780_v21 }
0x1e75   :  { %9237 = vmatpush3.bf16.msra.mxu0 %v9529_v25 }
0x1e76   :  { %9238 = vmatprep.subr.bf16.mxu0 %v9780_v21 }
0x1e79   :  { %9239 = vmatpush3.bf16.msra.mxu0 %v9530_v39  ;;  %v7732_v39 = vsub.s32 %v7729_v13, %v7731_v17 }
0x1e7a   :  { %9240 = vmatprep.subr.bf16.mxu0 %v9780_v21 }
0x1e7d   :  { %9241 = vmatpush3.bf16.msra.mxu0 %v9531_v5 }
0x1e7e   :  { %9242 = vmatprep.subr.bf16.mxu0 %v9780_v21 }
0x1e81   :  { %9243 = vmatpush3.bf16.msra.mxu0 %v9532_v34 }
0x1e82   :  { %9244 = vmatprep.subr.bf16.mxu0 %v9780_v21 }
0x1e85   :  { %9245 = vmatpush3.bf16.msra.mxu0 %v9533_v56 }
0x1e86   :  { %9246 = vmatprep.subr.bf16.mxu0 %v9780_v21 }
0x1e89   :  { %9247 = vmatpush3.bf16.msra.mxu0 %v9534_v23 }
0x1f3f   :  { %v7431_v6 = vpop.f32.mrb[200].mxu0 }
0x1f40   :  { %v7432_v0 = vadd.f32 %v8145_v62, %v7431_v6  ;;  %v9210_v10 = vpop.f32.mrb[201].mxu0 }
0x1f41   :  { %v7434_v33 = vpop.f32.mrb[202].mxu0 }
0x1f42   :  { %v7438_v61 = vadd.f32 %v7432_v0, %v11289_v59  ;;  %v7435_v11 = vadd.f32 %v8145_v62, %v7434_v33  ;;  %v9211_v35 = vpop.f32.mrb[203].mxu0 }
0x1f44   :  { %v7439_v52 = vadd.f32 %v7435_v11, %v11291_v2  ;;  %7442 = vadd.xlane.f32.xlu1 %v7438_v61 }
0x1f46   :  { %v7444_v14 = vsel %vm1048_vm6, %v7439_v52, 0.0 }
0x1f47   :  { %7445 = vadd.xlane.f32.xlu0 %v7444_v14 }
0x1fd1   :  { %v7443_v15 = vpop.xlane.xlu1 %7442 }
0x1fd2   :  { %v7447_v9 = vmul.f32 0.0078125, %v7443_v15  ;;  %v9536_v15 = vld [vmem:[%s11905_s2 + $0xe0] ss:$76 sps:$4 sm:$0xff]  }
0x1fd4   :  { %v7449_v16 = vsub.f32 %v7438_v61, %v7447_v9  ;;  %v7446_v18 = vpop.xlane.xlu0 %7445  ;;  %v9537_v9 = vld [vmem:[%s11905_s2 + $0x178] ss:$76 sps:$4 sm:$0xff]  }
0x1fd5   :  { %v7448_v59 = vmul.f32 0.0078125, %v7446_v18  ;;  %v9539_v18 = vld [vmem:[%s11905_s2 + $0x2a8] ss:$76 sps:$4 sm:$0xff]  }
0x1fd6   :  { %v7451_v51 = vmul.f32 %v7449_v16, %v7449_v16 }
0x1fd7   :  { %v7450_v19 = vsub.f32 %v7439_v52, %v7448_v59  ;;  %v9540_v59 = vld [vmem:[%s11905_s2 + $0x340] ss:$76 sps:$4 sm:$0xff]  }
0x1fd8   :  { %7453 = vadd.xlane.f32.xlu0 %v7451_v51  ;;  %v9541_v51 = vld [vmem:[%s11905_s2 + $0x3d8] ss:$76 sps:$4 sm:$0xff]  }
0x1fd9   :  { %v7452_v2 = vmul.f32 %v7450_v19, %v7450_v19 }
0x1fdb   :  { %v7455_v24 = vsel %vm1048_vm6, %v7452_v2, 0.0 }
0x1fdc   :  { %7456 = vadd.xlane.f32.xlu0 %v7455_v24 }
0x2065   :  { %v7454_v29 = vpop.xlane.xlu0 %7453 }
0x2066   :  { %v7458_v46 = vmul.f32 0.0078125, %v7454_v29 }
0x2068   :  { %v7460_v38 = vadd.f32 1e-05, %v7458_v46 }
0x2069   :  { %v7457_v37 = vpop.xlane.xlu0 %7456 }
0x206a   :  { %9749 = vrsqrt.f32 %v7460_v38  ;;  %v7459_v43 = vmul.f32 0.0078125, %v7457_v37 }
0x206c   :  { %v7461_v20 = vadd.f32 1e-05, %v7459_v43 }
0x206e   :  { %9751 = vrsqrt.f32 %v7461_v20 }
0x2074   :  { %v9750_v47 = vpop.eup %9749 }
0x2075   :  { %v7464_v49 = vmul.f32 %v9750_v47, %v7449_v16  ;;  %v9538_v16 = vld [vmem:[%s11905_s2 + $0x210] ss:$76 sps:$4 sm:$0xff]  }
0x2077   :  { %v7470_v50 = vmul.f32 %v8154_v45, %v7464_v49 }
0x2078   :  { %v9752_v40 = vpop.eup %9751 }
0x2079   :  { %v7465_v22 = vmul.f32 %v9752_v40, %v7450_v19  ;;  %v7476_v58 = vadd.f32 %v8155_v41, %v7470_v50  ;;  %v9542_v19 = vld [vmem:[%s11905_s2 + $0x470] ss:$76 sps:$4 sm:$0xff]  }
0x207b   :  { %v7471_v54 = vmul.f32 %v8154_v45, %v7465_v22 }
0x207d   :  { %v7477_v1 = vadd.f32 %v8155_v41, %v7471_v54  ;;  %v8176_v41 = vld [vmem:[%s11906_s3 + $0x1d] ss:$0 sm:$0xff] }
0x207f   :  { %v7494_v55 = vpack.c.bf16 %v7477_v1, %v7476_v58 }
0x2081   :  { %9229 = vmatmul.mubr.bf16.vlgmr.msra.gmra.mrb[232].mxu1 %v7494_v55 }
0x2082   :  { %9268 = vmatprep.mubr.msk.bf16.mxu1 %vm9781_vm1, %v9780_v21  ;;  %9253 = vmatpush3.bf16.msra.mxu1 %v9535_v48 }
0x2083   :  { %9254 = vmatprep.subr.bf16.mxu1 %v9780_v21 }
0x2086   :  { %9255 = vmatpush3.bf16.msra.mxu1 %v9536_v15 }
0x2087   :  { %9256 = vmatprep.subr.bf16.mxu1 %v9780_v21 }
0x208a   :  { %9257 = vmatpush3.bf16.msra.mxu1 %v9537_v9 }
0x208b   :  { %9258 = vmatprep.subr.bf16.mxu1 %v9780_v21 }
0x208e   :  { %9259 = vmatpush3.bf16.msra.mxu1 %v9538_v16 }
0x208f   :  { %9260 = vmatprep.subr.bf16.mxu1 %v9780_v21 }
0x2092   :  { %9261 = vmatpush3.bf16.msra.mxu1 %v9539_v18 }
0x2093   :  { %9262 = vmatprep.subr.bf16.mxu1 %v9780_v21 }
0x2096   :  { %9263 = vmatpush3.bf16.msra.mxu1 %v9540_v59 }
0x2097   :  { %9264 = vmatprep.subr.bf16.mxu1 %v9780_v21 }
0x209a   :  { %9265 = vmatpush3.bf16.msra.mxu1 %v9541_v51 }
0x209b   :  { %9266 = vmatprep.subr.bf16.mxu1 %v9780_v21  ;;  %v8175_v21 = vld [vmem:[%s11906_s3 + $0x1c] ss:$0 sm:$0xff] }
0x209e   :  { %9267 = vmatpush3.bf16.msra.mxu1 %v9542_v19 }
0x2154   :  { %v7582_v53 = vpop.f32.mrb[232].mxu1 }
0x2155   :  { %v7583_v44 = vadd.f32 %v8156_v63, %v7582_v53  ;;  %v9230_v4 = vpop.f32.mrb[233].mxu1 }
0x2156   :  { %v7585_v32 = vpop.f32.mrb[234].mxu1 }
0x2157   :  { %v7586_v7 = vadd.f32 %v8156_v63, %v7585_v32  ;;  %v9231_v36 = vpop.f32.mrb[235].mxu1  ;;  %v7589_v60 = vmax.f32 %v7583_v44, 0.0 }
0x2159   :  { %v7590_v42 = vmax.f32 %v7586_v7, 0.0 }
0x215b   :  { %v7607_v57 = vpack.c.bf16 %v7590_v42, %v7589_v60 }
0x215d   :  { %9249 = vmatmul.mubr.bf16.vlgmr.msra.gmra.mrb[204].mxu0 %v7607_v57 }
0x2230   :  { %v7695_v62 = vpop.f32.mrb[204].mxu0 }
0x2231   :  { %v7696_v6 = vadd.f32 %v8165_v12, %v7695_v62  ;;  %v9250_v0 = vpop.f32.mrb[205].mxu0 }
0x2232   :  { %v7698_v10 = vpop.f32.mrb[206].mxu0 }
0x2233   :  { %v7701_v33 = vadd.f32 %v7696_v6, %v7476_v58  ;;  %v9251_v61 = vpop.f32.mrb[207].mxu0 }
0x2235   :  { %7704 = vadd.xlane.f32.xlu1 %v7701_v33 }
0x22c2   :  { %v7705_v11 = vpop.xlane.xlu1 %7704 }
0x22c3   :  { %v7706_v35 = vmul.f32 0.0078125, %v7705_v11 }
0x22c5   :  { %v7707_v52 = vsub.f32 %v7701_v33, %v7706_v35 }
0x22c7   :  { %v7708_v14 = vmul.f32 %v7707_v52, %v7707_v52 }
0x22c9   :  { %7709 = vadd.xlane.f32.xlu0 %v7708_v14 }
0x2356   :  { %v7710_v2 = vpop.xlane.xlu0 %7709 }
0x2357   :  { %v7711_v24 = vmul.f32 0.0078125, %v7710_v2 }
0x2359   :  { %v7712_v30 = vadd.f32 1e-05, %v7711_v24 }
0x235b   :  { %9753 = vrsqrt.f32 %v7712_v30 }
0x2365   :  { %v9754_v27 = vpop.eup %9753 }
0x2366   :  { %v7714_v31 = vmul.f32 %v9754_v27, %v7707_v52 }
0x2368   :  { %v7719_v25 = vmul.f32 %v8174_v26, %v7714_v31 }
0x236a   :  { %v7724_v5 = vadd.f32 %v8175_v21, %v7719_v25 }
0x236c   :  { %v7726_v34 = vcombine.high %v7724_v5, %v7724_v5  ;;  %v7733_v29 = vrot.slane %v7724_v5, %v7732_v39 }
0x236e   :  { %v7740_v46 = vrot.slane %v7726_v34, %v7732_v39  ;;  %v7748_v37 = vrot.slane %v7733_v29, %v7732_v39 }
0x2370   :  { %v7741_v38 = vcombine.high %v7740_v46, %v7740_v46  ;;  %v7774_v20 = vpack.c.bf16 %v7748_v37, %v7748_v37 }
0x2372   :  { %v7755_v43 = vrot.slane %v7741_v38, %v7732_v39  ;;  %v7783_v45 = vunpack.c.l.b16 %v7774_v20 }
0x2374   :  { %v7775_v47 = vpack.c.bf16 %v7755_v43, %v7755_v43 }
0x2376   :  { %v7784_v49 = vunpack.c.l.b16 %v7775_v47 }
0x2378   :  { %v7785_v40 = vrot.slane %v7784_v49, 7 }
0x237a   :  { %v7787_v22 = vsel %vm7786_vm15, %v7785_v40, %v7783_v45 }
0x237b   :  { %v7788_v50 = vpack.c.b16 %v7787_v22, %v7787_v22 }
0x237d   :  { %9269 = vmatmul.mubr.bf16.vlgmr.msra.gmra.mrb[236].mxu1 %v7788_v50 }
0x2450   :  { %v7872_v54 = vpop.f32.mrb[236].mxu1 }
0x2451   :  { %v7873_v58 = vadd.f32 %v8176_v41, %v7872_v54  ;;  %v9270_v1 = vpop.f32.mrb[237].mxu1 }
0x2452   :  { %v7875_v55 = vpop.f32.mrb[238].mxu1 }
0x2453   :  { %7878 = vst [vmem:[#allocation2] sm:$0x3] %v7873_v58  ;;  %v9271_v56 = vpop.f32.mrb[239].mxu1 }
0x2454   :  { %9766 = shalt.err (!%p9763_p4)
}
0x2455   :  { %s9767_s3 = scalar_lea.hbm %s11907_s4, 32 }
0x2456   :  { %p9768_p5 = scmp.ne.s32.totalorder %s11907_s4, %s9767_s3  ;;  %p9771_p6 = scmp.lt.u32.totalorder %s9767_s3, %s11907_s4 }
0x2458   :  { %p9773_p7 = pnand %p9771_p6, %p9768_p5 }
0x245a   :  { %9776 = shalt.err (!%p9773_p7)
}
0x245b   :  { %7888 = dma.vmem_to_hbm [thread:$0]  %s7886_s0, 32, %s11907_s4, [#allocation3]  }
0x245c   :  { %9777 = dma.done.wait [#allocation3], 32  }
0x245d   :  { %9778 = vsyncadd [#allocation3], 4294967264 }
0x245e   :  { %7892 = vsyncpa [#allocation3], 1 }

</bundles_post_ra>
